<compile_context>
chip_gen: v7x
topology: tpu7x:2x2x1
jax: 0.10.0
libtpu: 0.0.40
codegen_flags: <defaults>
</compile_context>

<pallas_src>
import jax
import jax.numpy as jnp
import numpy as np
from jax import lax
from jax.experimental import pallas as pl
from jax.experimental.pallas import tpu as pltpu

# ---- static geometry (dictated by the module) ----
N = 2                 # batch
H_IN = 48             # input spatial (input is (N, 1, 48, 48) NCHW)
K = 5                 # conv kernel size
C1, C2 = 3, 7         # conv out channels
H1 = H_IN - K + 1     # 44 after conv1 (valid)
P1 = H1 // 2          # 22 after pool1
H2 = P1 - K + 1       # 18 after conv2 (valid)
P2 = H2 // 2          # 9  after pool2
F_IN = C2 * P2 * P2   # 567
F_HID, F_OUT = 84, 3
BN_EPS = 1e-5

# slab row/lane sizes (batch on sublanes, channel*width on lanes)
R0 = N * H_IN         # 96  input / conv1 rows (uncompacted: 48 rows per batch)
HB2 = 24              # per-batch row block after pool1 (22 valid, padded to 24
                      #   so conv2's sublane rolls stay tile-aligned)
RP1 = N * HB2         # 48  pool1 / conv2 rows
L1 = C1 * H1          # 132 conv1 lanes
L1P = C1 * P1         # 66  pool1 lanes
L2 = C2 * H2          # 126 conv2 lanes
L2P = C2 * P2         # 63  pool2 lanes

HP = lax.Precision.HIGHEST      # fp32 contract precision (real weights / stats)
DP = lax.Precision.DEFAULT      # single bf16 pass (0/1 selectors: exact selector,
                                # activation rounded once)


def _dot_w(a, b):
    return jnp.dot(a, b, precision=HP, preferred_element_type=jnp.float32)


def _dot_s(a, b):
    return jnp.dot(a, b, precision=DP, preferred_element_type=jnp.float32)


# --------------------------- the kernel ---------------------------
def calvis2_kernel(x_ref, mask_ref, w1c_ref, b1l_ref, g_ref, bt_ref,
                   chsel_ref, chselT_ref, pc1_ref, pr1_ref,
                   w2c_ref, b2l_ref, pc2_ref, pr2_ref,
                   fw1_ref, fb1_ref, fw2_ref, fb2_ref, out_ref):
    x = x_ref[...]                                               # (96, 48)

    # ---- conv1 (1->3, 5x5 valid): ky via sublane rolls (XLU), (kx, oc) via ONE
    #      banded-weight matmul.  Rows stay b*48+i; i>=44 is garbage -> masked.
    xcat = jnp.concatenate(
        [x] + [pltpu.roll(x, R0 - ky, axis=0) for ky in range(1, K)], axis=1)  # (96, 240)
    acc1 = _dot_w(xcat, w1c_ref[...])                            # (96, 132)
    relu1 = jnp.maximum(acc1 + b1l_ref[...], 0.0) * mask_ref[...]  # zero 4 pad rows/batch

    # ---- BatchNorm2d(3), training-mode batch stats (biased variance) ----
    cnt = float(N * H1 * H1)                                     # per-channel count
    colsum = jnp.sum(relu1, axis=0, keepdims=True)               # (1, 132)
    colsq = jnp.sum(relu1 * relu1, axis=0, keepdims=True)        # (1, 132)
    mean = _dot_w(colsum, chsel_ref[...]) / cnt                  # (1, 3)
    var = _dot_w(colsq, chsel_ref[...]) / cnt - mean * mean      # single-pass variance
    scale3 = g_ref[...] * lax.rsqrt(var + BN_EPS)                # (1, 3)
    shift3 = bt_ref[...] - mean * scale3                         # (1, 3)
    scale_l = _dot_w(scale3, chselT_ref[...])                    # (1, 132)
    shift_l = _dot_w(shift3, chselT_ref[...])                    # (1, 132)
    bn1 = relu1 * scale_l + shift_l                              # (96, 132)

    # ---- maxpool 2x2 #1: width then height via 0/1 selector matmuls (DEFAULT).
    #      The height selector also folds the 48->24 per-batch row compaction.
    m1 = jnp.maximum(_dot_s(bn1, pc1_ref[0]), _dot_s(bn1, pc1_ref[1]))   # (96, 66)
    p1 = jnp.maximum(_dot_s(pr1_ref[0], m1), _dot_s(pr1_ref[1], m1))     # (48, 66)

    # ---- conv2 (3->7, 5x5 valid) + ReLU: same roll + one-matmul scheme ----
    p1cat = jnp.concatenate(
        [p1] + [pltpu.roll(p1, RP1 - ky, axis=0) for ky in range(1, K)], axis=1)  # (48, 330)
    relu2 = jnp.maximum(_dot_w(p1cat, w2c_ref[...]) + b2l_ref[...], 0.0)  # (48, 126)

    # ---- maxpool 2x2 #2 (row selector emits rows ordered h*2 + b) ----
    m2 = jnp.maximum(_dot_s(relu2, pc2_ref[0]), _dot_s(relu2, pc2_ref[1]))  # (48, 63)
    p2 = jnp.maximum(_dot_s(pr2_ref[0], m2), _dot_s(pr2_ref[1], m2))        # (18, 63)

    # ---- flatten to (2, 567): lane order h*63 + c*9 + w (fw1 pre-permuted).
    #      Pure vreg shuffles (lane concat of row pairs), no scratch, no MXU.
    flat = jnp.concatenate([p2[2 * h:2 * h + 2, :] for h in range(P2)], axis=1)  # (2, 567)

    # ---- fc1 (567->84) + ReLU, fc2 (84->3): one matmul each ----
    hid = jnp.maximum(_dot_w(flat, fw1_ref[...]) + fb1_ref[...], 0.0)   # (2, 84)
    out_ref[...] = _dot_w(hid, fw2_ref[...]) + fb2_ref[...]             # (2, 3)


# ------------------ host-side packing (runs once at trace time) ------------------
def _conv_weight_cat(w, h_in, h_out):
    # (Cout,Cin,K,K) -> (K*Cin*h_in, Cout*h_out) banded weight:
    # row ky*Cin*h_in + ic*h_in + q, col oc*h_out + j holds w[oc,ic,ky,q-j]
    # when 0 <= q-j < K, else 0.  Matches the lane-concat of rolled activations.
    co, ci = w.shape[0], w.shape[1]
    q = np.arange(h_in)[:, None]
    j = np.arange(h_out)[None, :]
    d = q - j
    mask = jnp.asarray(((d >= 0) & (d < K)).astype(np.float32))
    dc = np.clip(d, 0, K - 1)
    g = w[:, :, :, dc] * mask                                    # (co, ci, K, h_in, h_out)
    return jnp.transpose(g, (2, 1, 3, 0, 4)).reshape(K * ci * h_in, co * h_out)


def _pool_col_sel(nch, h):
    # (2, nch*h, nch*(h//2)): [par, c*h + 2m + par, c*(h//2) + m] = 1
    ho = h // 2
    sels = np.zeros((2, nch * h, nch * ho), np.float32)
    for par in (0, 1):
        for c in range(nch):
            for m in range(ho):
                sels[par, c * h + 2 * m + par, c * ho + m] = 1.0
    return sels


def _pool1_row_sel():
    # (2, N*24, N*48): [par, b*24 + k, b*48 + 2k + par] = 1 for k < 22
    sels = np.zeros((2, N * HB2, N * H_IN), np.float32)
    for par in (0, 1):
        for b in range(N):
            for k in range(P1):
                sels[par, b * HB2 + k, b * H_IN + 2 * k + par] = 1.0
    return sels


def _pool2_row_sel():
    # (2, 9*N, N*24): output rows ordered h*2 + b (so flatten = row-pair concat)
    sels = np.zeros((2, P2 * N, N * HB2), np.float32)
    for par in (0, 1):
        for b in range(N):
            for h in range(P2):
                sels[par, h * N + b, b * HB2 + 2 * h + par] = 1.0
    return sels


def _channel_sel(nch, h):
    # (nch*h, nch): [c*h + j, c] = 1
    sel = np.zeros((nch * h, nch), np.float32)
    for c in range(nch):
        sel[c * h:(c + 1) * h, c] = 1.0
    return sel


# --------------------------- wrapper ---------------------------
def _calvis2_forward(x, p):
    # x: (N, 1, 48, 48) float32, NCHW (same convention as the PyTorch module).
    f32 = jnp.float32

    x2d = x[:, 0, :, :].reshape(R0, H_IN).astype(f32)            # (96, 48)
    rowmask = jnp.asarray(((np.arange(R0) % H_IN) < H1)
                          .astype(np.float32)[:, None])          # (96, 1)
    w1c = _conv_weight_cat(p["w1"].astype(f32), H_IN, H1)        # (240, 132)
    b1l = jnp.repeat(p["b1"].astype(f32), H1)[None, :]           # (1, 132)
    gamma = p["gamma"].astype(f32)[None, :]                      # (1, 3)
    beta = p["beta"].astype(f32)[None, :]                        # (1, 3)
    chsel = jnp.asarray(_channel_sel(C1, H1))                    # (132, 3)
    chselT = chsel.T                                             # (3, 132)
    pc1 = jnp.asarray(_pool_col_sel(C1, H1))                     # (2, 132, 66)
    pr1 = jnp.asarray(_pool1_row_sel())                          # (2, 48, 96)
    w2c = _conv_weight_cat(p["w2"].astype(f32), P1, H2)          # (330, 126)
    b2l = jnp.repeat(p["b2"].astype(f32), H2)[None, :]           # (1, 126)
    pc2 = jnp.asarray(_pool_col_sel(C2, H2))                     # (2, 126, 63)
    pr2 = jnp.asarray(_pool2_row_sel())                          # (2, 18, 48)
    # fc1 weight permuted so the in-kernel flat layout [h*63 + c*9 + w] matches
    # the PyTorch flatten order [c*81 + h*9 + w].
    fw1p = jnp.transpose(p["fw1"].astype(f32).reshape(F_HID, C2, P2, P2),
                         (2, 1, 3, 0)).reshape(F_IN, F_HID)      # (567, 84)
    fb1 = p["fb1"].astype(f32)[None, :]                          # (1, 84)
    fw2t = p["fw2"].astype(f32).T                                # (84, 3)
    fb2 = p["fb2"].astype(f32)[None, :]                          # (1, 3)

    vmem = pl.BlockSpec(memory_space=pltpu.MemorySpace.VMEM)
    return pl.pallas_call(
        calvis2_kernel,
        out_shape=jax.ShapeDtypeStruct((N, F_OUT), f32),
        in_specs=[vmem] * 18,
        out_specs=vmem,
    )(x2d, rowmask, w1c, b1l, gamma, beta, chsel, chselT, pc1, pr1,
      w2c, b2l, pc2, pr2, fw1p, fb1, fw2t, fb2)


# jitted: selector/weight packing is traced once and cached; the whole forward
# is a single dispatch instead of eager per-call host packing.
calvis2_forward = jax.jit(_calvis2_forward)


# --------------------------- reference & test ---------------------------
def init_params(key):
    ks = jax.random.split(key, 10)
    return {
        "w1":    0.20 * jax.random.normal(ks[0], (C1, 1, K, K), jnp.float32),
        "b1":    0.10 * jax.random.normal(ks[1], (C1,), jnp.float32),
        "gamma": 1.0 + 0.10 * jax.random.normal(ks[2], (C1,), jnp.float32),
        "beta":  0.10 * jax.random.normal(ks[3], (C1,), jnp.float32),
        "w2":    0.08 * jax.random.normal(ks[4], (C2, C1, K, K), jnp.float32),
        "b2":    0.10 * jax.random.normal(ks[5], (C2,), jnp.float32),
        "fw1":   0.05 * jax.random.normal(ks[6], (F_HID, F_IN), jnp.float32),
        "fb1":   0.10 * jax.random.normal(ks[7], (F_HID,), jnp.float32),
        "fw2":   0.10 * jax.random.normal(ks[8], (F_OUT, F_HID), jnp.float32),
        "fb2":   0.10 * jax.random.normal(ks[9], (F_OUT,), jnp.float32),
    }


def reference_forward(x, p):
    dn = ("NCHW", "OIHW", "NCHW")
    y = lax.conv_general_dilated(x, p["w1"], (1, 1), "VALID",
                                 dimension_numbers=dn, precision=HP)
    y = jnp.maximum(y + p["b1"][None, :, None, None], 0.0)
    mean = jnp.mean(y, axis=(0, 2, 3), keepdims=True)
    var = jnp.mean((y - mean) ** 2, axis=(0, 2, 3), keepdims=True)
    y = ((y - mean) / jnp.sqrt(var + BN_EPS)
         * p["gamma"][None, :, None, None] + p["beta"][None, :, None, None])
    y = lax.reduce_window(y, -jnp.inf, lax.max, (1, 1, 2, 2), (1, 1, 2, 2), "VALID")
    y = lax.conv_general_dilated(y, p["w2"], (1, 1), "VALID",
                                 dimension_numbers=dn, precision=HP)
    y = jnp.maximum(y + p["b2"][None, :, None, None], 0.0)
    y = lax.reduce_window(y, -jnp.inf, lax.max, (1, 1, 2, 2), (1, 1, 2, 2), "VALID")
    y = y.reshape(y.shape[0], -1)
    y = jnp.maximum(jnp.dot(y, p["fw1"].T, precision=HP) + p["fb1"], 0.0)
    return jnp.dot(y, p["fw2"].T, precision=HP) + p["fb2"]


if __name__ == "__main__":
    key = jax.random.PRNGKey(0)
    kx, kp = jax.random.split(key)
    x = jax.random.normal(kx, (N, 1, H_IN, H_IN), jnp.float32)
    params = init_params(kp)

    out = jax.block_until_ready(calvis2_forward(x, params))
    assert out.shape == (N, F_OUT) and out.dtype == jnp.float32

    ref = jax.block_until_ready(reference_forward(x, params))
    err = float(jnp.max(jnp.abs(out - ref)))
    scale = float(jnp.max(jnp.abs(ref))) + 1e-6
    assert err <= 1e-2 + 1e-2 * scale, f"mismatch: max abs err {err} (ref scale {scale})"
    print("KERNEL_OK")
</pallas_src>

<mosaic_0001>
module attributes {stable_mosaic.version = 11 : i64} {
  func.func @calvis2_kernel(%arg0: memref<96x48xf32, #tpu.memory_space<vmem>>, %arg1: memref<96x1xf32, #tpu.memory_space<vmem>>, %arg2: memref<240x132xf32, #tpu.memory_space<vmem>>, %arg3: memref<1x132xf32, #tpu.memory_space<vmem>>, %arg4: memref<1x3xf32, #tpu.memory_space<vmem>>, %arg5: memref<1x3xf32, #tpu.memory_space<vmem>>, %arg6: memref<132x3xf32, #tpu.memory_space<vmem>>, %arg7: memref<3x132xf32, #tpu.memory_space<vmem>>, %arg8: memref<2x132x66xf32, #tpu.memory_space<vmem>>, %arg9: memref<2x48x96xf32, #tpu.memory_space<vmem>>, %arg10: memref<330x126xf32, #tpu.memory_space<vmem>>, %arg11: memref<1x126xf32, #tpu.memory_space<vmem>>, %arg12: memref<2x126x63xf32, #tpu.memory_space<vmem>>, %arg13: memref<2x18x48xf32, #tpu.memory_space<vmem>>, %arg14: memref<567x84xf32, #tpu.memory_space<vmem>>, %arg15: memref<1x84xf32, #tpu.memory_space<vmem>>, %arg16: memref<84x3xf32, #tpu.memory_space<vmem>>, %arg17: memref<1x3xf32, #tpu.memory_space<vmem>>, %arg18: memref<2x3xf32, #tpu.memory_space<vmem>>) attributes {dimension_semantics = [], scalar_prefetch = 0 : i64, scratch_operands = 0 : i64, tpu.core_type = #tpu.core_type<tc>} {
    %c0 = arith.constant 0 : index
    %c0_0 = arith.constant 0 : index
    %0 = vector.load %arg0[%c0, %c0_0] : memref<96x48xf32, #tpu.memory_space<vmem>>, vector<96x48xf32>
    %c95_i32 = arith.constant 95 : i32
    %1 = tpu.dynamic_rotate %0 by %c95_i32 dim 0 : vector<96x48xf32>, i32 -> vector<96x48xf32>
    %c94_i32 = arith.constant 94 : i32
    %2 = tpu.dynamic_rotate %0 by %c94_i32 dim 0 : vector<96x48xf32>, i32 -> vector<96x48xf32>
    %c93_i32 = arith.constant 93 : i32
    %3 = tpu.dynamic_rotate %0 by %c93_i32 dim 0 : vector<96x48xf32>, i32 -> vector<96x48xf32>
    %c92_i32 = arith.constant 92 : i32
    %4 = tpu.dynamic_rotate %0 by %c92_i32 dim 0 : vector<96x48xf32>, i32 -> vector<96x48xf32>
    %5 = tpu.concatenate %0, %1, %2, %3, %4 in 1 : vector<96x48xf32>, vector<96x48xf32>, vector<96x48xf32>, vector<96x48xf32>, vector<96x48xf32> -> vector<96x240xf32>
    %c0_1 = arith.constant 0 : index
    %c0_2 = arith.constant 0 : index
    %6 = vector.load %arg2[%c0_1, %c0_2] : memref<240x132xf32, #tpu.memory_space<vmem>>, vector<240x132xf32>
    %cst = arith.constant dense<0.000000e+00> : vector<96x132xf32>
    %7 = tpu.matmul %5, %6, %cst {dimension_numbers = #tpu.dot_dimension_numbers<[1], [0], [0], [1], [0, 0, 1, 1], [], []>, precision = #tpu.contract_precision<fp32>} : vector<96x240xf32>, vector<240x132xf32>, vector<96x132xf32> -> vector<96x132xf32>
    %c0_3 = arith.constant 0 : index
    %c0_4 = arith.constant 0 : index
    %8 = vector.load %arg3[%c0_3, %c0_4] : memref<1x132xf32, #tpu.memory_space<vmem>>, vector<1x132xf32>
    %9 = vector.broadcast %8 : vector<1x132xf32> to vector<96x132xf32>
    %10 = arith.addf %7, %9 : vector<96x132xf32>
    %cst_5 = arith.constant 0.000000e+00 : f32
    %11 = vector.broadcast %cst_5 : f32 to vector<96x132xf32>
    %12 = arith.maximumf %10, %11 : vector<96x132xf32>
    %c0_6 = arith.constant 0 : index
    %c0_7 = arith.constant 0 : index
    %13 = vector.load %arg1[%c0_6, %c0_7] : memref<96x1xf32, #tpu.memory_space<vmem>>, vector<96x1xf32>
    %14 = vector.broadcast %13 : vector<96x1xf32> to vector<96x132xf32>
    %15 = arith.mulf %12, %14 : vector<96x132xf32>
    %cst_8 = arith.constant dense<0.000000e+00> : vector<132xf32>
    %16 = vector.multi_reduction <add>, %15, %cst_8 [0] : vector<96x132xf32> to vector<132xf32>
    %17 = vector.shape_cast %16 : vector<132xf32> to vector<1x132xf32>
    %18 = arith.mulf %15, %15 : vector<96x132xf32>
    %cst_9 = arith.constant dense<0.000000e+00> : vector<132xf32>
    %19 = vector.multi_reduction <add>, %18, %cst_9 [0] : vector<96x132xf32> to vector<132xf32>
    %20 = vector.shape_cast %19 : vector<132xf32> to vector<1x132xf32>
    %c0_10 = arith.constant 0 : index
    %c0_11 = arith.constant 0 : index
    %21 = vector.load %arg6[%c0_10, %c0_11] : memref<132x3xf32, #tpu.memory_space<vmem>>, vector<132x3xf32>
    %cst_12 = arith.constant dense<0.000000e+00> : vector<1x3xf32>
    %22 = tpu.matmul %17, %21, %cst_12 {dimension_numbers = #tpu.dot_dimension_numbers<[1], [0], [0], [1], [0, 0, 1, 1], [], []>, precision = #tpu.contract_precision<fp32>} : vector<1x132xf32>, vector<132x3xf32>, vector<1x3xf32> -> vector<1x3xf32>
    %cst_13 = arith.constant 3.872000e+03 : f32
    %23 = vector.broadcast %cst_13 : f32 to vector<1x3xf32>
    %24 = arith.divf %22, %23 : vector<1x3xf32>
    %c0_14 = arith.constant 0 : index
    %c0_15 = arith.constant 0 : index
    %25 = vector.load %arg6[%c0_14, %c0_15] : memref<132x3xf32, #tpu.memory_space<vmem>>, vector<132x3xf32>
    %cst_16 = arith.constant dense<0.000000e+00> : vector<1x3xf32>
    %26 = tpu.matmul %20, %25, %cst_16 {dimension_numbers = #tpu.dot_dimension_numbers<[1], [0], [0], [1], [0, 0, 1, 1], [], []>, precision = #tpu.contract_precision<fp32>} : vector<1x132xf32>, vector<132x3xf32>, vector<1x3xf32> -> vector<1x3xf32>
    %cst_17 = arith.constant 3.872000e+03 : f32
    %27 = vector.broadcast %cst_17 : f32 to vector<1x3xf32>
    %28 = arith.divf %26, %27 : vector<1x3xf32>
    %29 = arith.mulf %24, %24 : vector<1x3xf32>
    %30 = arith.subf %28, %29 : vector<1x3xf32>
    %c0_18 = arith.constant 0 : index
    %c0_19 = arith.constant 0 : index
    %31 = vector.load %arg4[%c0_18, %c0_19] : memref<1x3xf32, #tpu.memory_space<vmem>>, vector<1x3xf32>
    %cst_20 = arith.constant 9.99999974E-6 : f32
    %32 = vector.broadcast %cst_20 : f32 to vector<1x3xf32>
    %33 = arith.addf %30, %32 : vector<1x3xf32>
    %34 = math.rsqrt %33 : vector<1x3xf32>
    %35 = arith.mulf %31, %34 : vector<1x3xf32>
    %c0_21 = arith.constant 0 : index
    %c0_22 = arith.constant 0 : index
    %36 = vector.load %arg5[%c0_21, %c0_22] : memref<1x3xf32, #tpu.memory_space<vmem>>, vector<1x3xf32>
    %37 = arith.mulf %24, %35 : vector<1x3xf32>
    %38 = arith.subf %36, %37 : vector<1x3xf32>
    %c0_23 = arith.constant 0 : index
    %c0_24 = arith.constant 0 : index
    %39 = vector.load %arg7[%c0_23, %c0_24] : memref<3x132xf32, #tpu.memory_space<vmem>>, vector<3x132xf32>
    %cst_25 = arith.constant dense<0.000000e+00> : vector<1x132xf32>
    %40 = tpu.matmul %35, %39, %cst_25 {dimension_numbers = #tpu.dot_dimension_numbers<[1], [0], [0], [1], [0, 0, 1, 1], [], []>, precision = #tpu.contract_precision<fp32>} : vector<1x3xf32>, vector<3x132xf32>, vector<1x132xf32> -> vector<1x132xf32>
    %c0_26 = arith.constant 0 : index
    %c0_27 = arith.constant 0 : index
    %41 = vector.load %arg7[%c0_26, %c0_27] : memref<3x132xf32, #tpu.memory_space<vmem>>, vector<3x132xf32>
    %cst_28 = arith.constant dense<0.000000e+00> : vector<1x132xf32>
    %42 = tpu.matmul %38, %41, %cst_28 {dimension_numbers = #tpu.dot_dimension_numbers<[1], [0], [0], [1], [0, 0, 1, 1], [], []>, precision = #tpu.contract_precision<fp32>} : vector<1x3xf32>, vector<3x132xf32>, vector<1x132xf32> -> vector<1x132xf32>
    %43 = vector.broadcast %40 : vector<1x132xf32> to vector<96x132xf32>
    %44 = arith.mulf %15, %43 : vector<96x132xf32>
    %45 = vector.broadcast %42 : vector<1x132xf32> to vector<96x132xf32>
    %46 = arith.addf %44, %45 : vector<96x132xf32>
    %c0_29 = arith.constant 0 : index
    %c0_30 = arith.constant 0 : index
    %c0_31 = arith.constant 0 : index
    %47 = vector.load %arg8[%c0_29, %c0_30, %c0_31] : memref<2x132x66xf32, #tpu.memory_space<vmem>>, vector<1x132x66xf32>
    %48 = vector.shape_cast %47 : vector<1x132x66xf32> to vector<132x66xf32>
    %cst_32 = arith.constant dense<0.000000e+00> : vector<96x66xf32>
    %49 = tpu.matmul %46, %48, %cst_32 {dimension_numbers = #tpu.dot_dimension_numbers<[1], [0], [0], [1], [0, 0, 1, 1], [], []>} : vector<96x132xf32>, vector<132x66xf32>, vector<96x66xf32> -> vector<96x66xf32>
    %c1 = arith.constant 1 : index
    %c0_33 = arith.constant 0 : index
    %c0_34 = arith.constant 0 : index
    %50 = vector.load %arg8[%c1, %c0_33, %c0_34] : memref<2x132x66xf32, #tpu.memory_space<vmem>>, vector<1x132x66xf32>
    %51 = vector.shape_cast %50 : vector<1x132x66xf32> to vector<132x66xf32>
    %cst_35 = arith.constant dense<0.000000e+00> : vector<96x66xf32>
    %52 = tpu.matmul %46, %51, %cst_35 {dimension_numbers = #tpu.dot_dimension_numbers<[1], [0], [0], [1], [0, 0, 1, 1], [], []>} : vector<96x132xf32>, vector<132x66xf32>, vector<96x66xf32> -> vector<96x66xf32>
    %53 = arith.maximumf %49, %52 : vector<96x66xf32>
    %c0_36 = arith.constant 0 : index
    %c0_37 = arith.constant 0 : index
    %c0_38 = arith.constant 0 : index
    %54 = vector.load %arg9[%c0_36, %c0_37, %c0_38] : memref<2x48x96xf32, #tpu.memory_space<vmem>>, vector<1x48x96xf32>
    %55 = vector.shape_cast %54 : vector<1x48x96xf32> to vector<48x96xf32>
    %cst_39 = arith.constant dense<0.000000e+00> : vector<48x66xf32>
    %56 = tpu.matmul %55, %53, %cst_39 {dimension_numbers = #tpu.dot_dimension_numbers<[1], [0], [0], [1], [0, 0, 1, 1], [], []>} : vector<48x96xf32>, vector<96x66xf32>, vector<48x66xf32> -> vector<48x66xf32>
    %c1_40 = arith.constant 1 : index
    %c0_41 = arith.constant 0 : index
    %c0_42 = arith.constant 0 : index
    %57 = vector.load %arg9[%c1_40, %c0_41, %c0_42] : memref<2x48x96xf32, #tpu.memory_space<vmem>>, vector<1x48x96xf32>
    %58 = vector.shape_cast %57 : vector<1x48x96xf32> to vector<48x96xf32>
    %cst_43 = arith.constant dense<0.000000e+00> : vector<48x66xf32>
    %59 = tpu.matmul %58, %53, %cst_43 {dimension_numbers = #tpu.dot_dimension_numbers<[1], [0], [0], [1], [0, 0, 1, 1], [], []>} : vector<48x96xf32>, vector<96x66xf32>, vector<48x66xf32> -> vector<48x66xf32>
    %60 = arith.maximumf %56, %59 : vector<48x66xf32>
    %c47_i32 = arith.constant 47 : i32
    %61 = tpu.dynamic_rotate %60 by %c47_i32 dim 0 : vector<48x66xf32>, i32 -> vector<48x66xf32>
    %c46_i32 = arith.constant 46 : i32
    %62 = tpu.dynamic_rotate %60 by %c46_i32 dim 0 : vector<48x66xf32>, i32 -> vector<48x66xf32>
    %c45_i32 = arith.constant 45 : i32
    %63 = tpu.dynamic_rotate %60 by %c45_i32 dim 0 : vector<48x66xf32>, i32 -> vector<48x66xf32>
    %c44_i32 = arith.constant 44 : i32
    %64 = tpu.dynamic_rotate %60 by %c44_i32 dim 0 : vector<48x66xf32>, i32 -> vector<48x66xf32>
    %65 = tpu.concatenate %60, %61, %62, %63, %64 in 1 : vector<48x66xf32>, vector<48x66xf32>, vector<48x66xf32>, vector<48x66xf32>, vector<48x66xf32> -> vector<48x330xf32>
    %c0_44 = arith.constant 0 : index
    %c0_45 = arith.constant 0 : index
    %66 = vector.load %arg10[%c0_44, %c0_45] : memref<330x126xf32, #tpu.memory_space<vmem>>, vector<330x126xf32>
    %cst_46 = arith.constant dense<0.000000e+00> : vector<48x126xf32>
    %67 = tpu.matmul %65, %66, %cst_46 {dimension_numbers = #tpu.dot_dimension_numbers<[1], [0], [0], [1], [0, 0, 1, 1], [], []>, precision = #tpu.contract_precision<fp32>} : vector<48x330xf32>, vector<330x126xf32>, vector<48x126xf32> -> vector<48x126xf32>
    %c0_47 = arith.constant 0 : index
    %c0_48 = arith.constant 0 : index
    %68 = vector.load %arg11[%c0_47, %c0_48] : memref<1x126xf32, #tpu.memory_space<vmem>>, vector<1x126xf32>
    %69 = vector.broadcast %68 : vector<1x126xf32> to vector<48x126xf32>
    %70 = arith.addf %67, %69 : vector<48x126xf32>
    %cst_49 = arith.constant 0.000000e+00 : f32
    %71 = vector.broadcast %cst_49 : f32 to vector<48x126xf32>
    %72 = arith.maximumf %70, %71 : vector<48x126xf32>
    %c0_50 = arith.constant 0 : index
    %c0_51 = arith.constant 0 : index
    %c0_52 = arith.constant 0 : index
    %73 = vector.load %arg12[%c0_50, %c0_51, %c0_52] : memref<2x126x63xf32, #tpu.memory_space<vmem>>, vector<1x126x63xf32>
    %74 = vector.shape_cast %73 : vector<1x126x63xf32> to vector<126x63xf32>
    %cst_53 = arith.constant dense<0.000000e+00> : vector<48x63xf32>
    %75 = tpu.matmul %72, %74, %cst_53 {dimension_numbers = #tpu.dot_dimension_numbers<[1], [0], [0], [1], [0, 0, 1, 1], [], []>} : vector<48x126xf32>, vector<126x63xf32>, vector<48x63xf32> -> vector<48x63xf32>
    %c1_54 = arith.constant 1 : index
    %c0_55 = arith.constant 0 : index
    %c0_56 = arith.constant 0 : index
    %76 = vector.load %arg12[%c1_54, %c0_55, %c0_56] : memref<2x126x63xf32, #tpu.memory_space<vmem>>, vector<1x126x63xf32>
    %77 = vector.shape_cast %76 : vector<1x126x63xf32> to vector<126x63xf32>
    %cst_57 = arith.constant dense<0.000000e+00> : vector<48x63xf32>
    %78 = tpu.matmul %72, %77, %cst_57 {dimension_numbers = #tpu.dot_dimension_numbers<[1], [0], [0], [1], [0, 0, 1, 1], [], []>} : vector<48x126xf32>, vector<126x63xf32>, vector<48x63xf32> -> vector<48x63xf32>
    %79 = arith.maximumf %75, %78 : vector<48x63xf32>
    %c0_58 = arith.constant 0 : index
    %c0_59 = arith.constant 0 : index
    %c0_60 = arith.constant 0 : index
    %80 = vector.load %arg13[%c0_58, %c0_59, %c0_60] : memref<2x18x48xf32, #tpu.memory_space<vmem>>, vector<1x18x48xf32>
    %81 = vector.shape_cast %80 : vector<1x18x48xf32> to vector<18x48xf32>
    %cst_61 = arith.constant dense<0.000000e+00> : vector<18x63xf32>
    %82 = tpu.matmul %81, %79, %cst_61 {dimension_numbers = #tpu.dot_dimension_numbers<[1], [0], [0], [1], [0, 0, 1, 1], [], []>} : vector<18x48xf32>, vector<48x63xf32>, vector<18x63xf32> -> vector<18x63xf32>
    %c1_62 = arith.constant 1 : index
    %c0_63 = arith.constant 0 : index
    %c0_64 = arith.constant 0 : index
    %83 = vector.load %arg13[%c1_62, %c0_63, %c0_64] : memref<2x18x48xf32, #tpu.memory_space<vmem>>, vector<1x18x48xf32>
    %84 = vector.shape_cast %83 : vector<1x18x48xf32> to vector<18x48xf32>
    %cst_65 = arith.constant dense<0.000000e+00> : vector<18x63xf32>
    %85 = tpu.matmul %84, %79, %cst_65 {dimension_numbers = #tpu.dot_dimension_numbers<[1], [0], [0], [1], [0, 0, 1, 1], [], []>} : vector<18x48xf32>, vector<48x63xf32>, vector<18x63xf32> -> vector<18x63xf32>
    %86 = arith.maximumf %82, %85 : vector<18x63xf32>
    %87 = vector.extract_strided_slice %86 {offsets = [0, 0], sizes = [2, 63], strides = [1, 1]} : vector<18x63xf32> to vector<2x63xf32>
    %88 = vector.extract_strided_slice %86 {offsets = [2, 0], sizes = [2, 63], strides = [1, 1]} : vector<18x63xf32> to vector<2x63xf32>
    %89 = vector.extract_strided_slice %86 {offsets = [4, 0], sizes = [2, 63], strides = [1, 1]} : vector<18x63xf32> to vector<2x63xf32>
    %90 = vector.extract_strided_slice %86 {offsets = [6, 0], sizes = [2, 63], strides = [1, 1]} : vector<18x63xf32> to vector<2x63xf32>
    %91 = vector.extract_strided_slice %86 {offsets = [8, 0], sizes = [2, 63], strides = [1, 1]} : vector<18x63xf32> to vector<2x63xf32>
    %92 = vector.extract_strided_slice %86 {offsets = [10, 0], sizes = [2, 63], strides = [1, 1]} : vector<18x63xf32> to vector<2x63xf32>
    %93 = vector.extract_strided_slice %86 {offsets = [12, 0], sizes = [2, 63], strides = [1, 1]} : vector<18x63xf32> to vector<2x63xf32>
    %94 = vector.extract_strided_slice %86 {offsets = [14, 0], sizes = [2, 63], strides = [1, 1]} : vector<18x63xf32> to vector<2x63xf32>
    %95 = vector.extract_strided_slice %86 {offsets = [16, 0], sizes = [2, 63], strides = [1, 1]} : vector<18x63xf32> to vector<2x63xf32>
    %96 = tpu.concatenate %87, %88, %89, %90, %91, %92, %93, %94, %95 in 1 : vector<2x63xf32>, vector<2x63xf32>, vector<2x63xf32>, vector<2x63xf32>, vector<2x63xf32>, vector<2x63xf32>, vector<2x63xf32>, vector<2x63xf32>, vector<2x63xf32> -> vector<2x567xf32>
    %c0_66 = arith.constant 0 : index
    %c0_67 = arith.constant 0 : index
    %97 = vector.load %arg14[%c0_66, %c0_67] : memref<567x84xf32, #tpu.memory_space<vmem>>, vector<567x84xf32>
    %cst_68 = arith.constant dense<0.000000e+00> : vector<2x84xf32>
    %98 = tpu.matmul %96, %97, %cst_68 {dimension_numbers = #tpu.dot_dimension_numbers<[1], [0], [0], [1], [0, 0, 1, 1], [], []>, precision = #tpu.contract_precision<fp32>} : vector<2x567xf32>, vector<567x84xf32>, vector<2x84xf32> -> vector<2x84xf32>
    %c0_69 = arith.constant 0 : index
    %c0_70 = arith.constant 0 : index
    %99 = vector.load %arg15[%c0_69, %c0_70] : memref<1x84xf32, #tpu.memory_space<vmem>>, vector<1x84xf32>
    %100 = vector.broadcast %99 : vector<1x84xf32> to vector<2x84xf32>
    %101 = arith.addf %98, %100 : vector<2x84xf32>
    %cst_71 = arith.constant 0.000000e+00 : f32
    %102 = vector.broadcast %cst_71 : f32 to vector<2x84xf32>
    %103 = arith.maximumf %101, %102 : vector<2x84xf32>
    %c0_72 = arith.constant 0 : index
    %c0_73 = arith.constant 0 : index
    %104 = vector.load %arg16[%c0_72, %c0_73] : memref<84x3xf32, #tpu.memory_space<vmem>>, vector<84x3xf32>
    %cst_74 = arith.constant dense<0.000000e+00> : vector<2x3xf32>
    %105 = tpu.matmul %103, %104, %cst_74 {dimension_numbers = #tpu.dot_dimension_numbers<[1], [0], [0], [1], [0, 0, 1, 1], [], []>, precision = #tpu.contract_precision<fp32>} : vector<2x84xf32>, vector<84x3xf32>, vector<2x3xf32> -> vector<2x3xf32>
    %c0_75 = arith.constant 0 : index
    %c0_76 = arith.constant 0 : index
    %106 = vector.load %arg17[%c0_75, %c0_76] : memref<1x3xf32, #tpu.memory_space<vmem>>, vector<1x3xf32>
    %107 = vector.broadcast %106 : vector<1x3xf32> to vector<2x3xf32>
    %108 = arith.addf %105, %107 : vector<2x3xf32>
    %c0_77 = arith.constant 0 : index
    %c0_78 = arith.constant 0 : index
    %109 = vector.load %arg18[%c0_77, %c0_78] : memref<2x3xf32, #tpu.memory_space<vmem>>, vector<2x3xf32>
    tpu.vector_store %arg18[%c0_77, %c0_78], %108 {strides = array<i32>} : memref<2x3xf32, #tpu.memory_space<vmem>>, vector<2x3xf32>,
    return
  }
}

</mosaic_0001>

<bundles_post_ra>
// kernel: _calvis2_forward.1
= control target key start
LH: loop header
LB: loop body
LE: loop exit
PB: predicated region body
PF: predicated region fallthrough
CT: control target
= control target key end

     0   :  { %s21541_s0 = inlined_call_operand.vmem [shape: f32[96,48], index: 0, kind: input, shape index: {}]   ;;  %s21542_s1 = inlined_call_operand.vmem [shape: f32[96,1], index: 1, kind: input, shape index: {}]   ;;  %s21543_s2 = inlined_call_operand.vmem [shape: f32[240,132], index: 2, kind: input, shape index: {}]   ;;  %s21544_s3 = inlined_call_operand.vmem [shape: f32[1,132], index: 3, kind: input, shape index: {}]   ;;  %s21545_s4 = inlined_call_operand.vmem [shape: f32[1,3], index: 4, kind: input, shape index: {}]   ;;  %s21546_s5 = inlined_call_operand.vmem [shape: f32[1,3], index: 5, kind: input, shape index: {}]   ;;  %s21547_s6 = inlined_call_operand.vmem [shape: f32[132,3], index: 6, kind: input, shape index: {}]   ;;  %s21548_s7 = inlined_call_operand.vmem [shape: f32[3,132], index: 7, kind: input, shape index: {}]   ;;  %s21549_s8 = inlined_call_operand.vmem [shape: f32[2,132,66], index: 8, kind: input, shape index: {}]   ;;  %s21550_s9 = inlined_call_operand.vmem [shape: f32[2,48,96], index: 9, kind: input, shape index: {}]   ;;  %s21551_s10 = inlined_call_operand.vmem [shape: f32[330,126], index: 10, kind: input, shape index: {}]   ;;  %s21552_s11 = inlined_call_operand.vmem [shape: f32[1,126], index: 11, kind: input, shape index: {}]   ;;  %s21553_s12 = inlined_call_operand.vmem [shape: f32[2,126,63], index: 12, kind: input, shape index: {}]   ;;  %s21554_s13 = inlined_call_operand.vmem [shape: f32[2,18,48], index: 13, kind: input, shape index: {}]   ;;  %s21555_s14 = inlined_call_operand.vmem [shape: f32[567,84], index: 14, kind: input, shape index: {}]   ;;  %s21556_s15 = inlined_call_operand.vmem [shape: f32[1,84], index: 15, kind: input, shape index: {}]   ;;  %s21557_s16 = inlined_call_operand.vmem [shape: f32[84,3], index: 16, kind: input, shape index: {}]   ;;  %s21558_s17 = inlined_call_operand.vmem [shape: f32[1,3], index: 17, kind: input, shape index: {}]   ;;  %s21559_s18 = inlined_call_operand.hbm [shape: f32[2,3], index: 18, kind: output, shape index: {}]  }
   0x1   :  { %22195 = sst [smem:[#allocation123_spill]] %s21541_s0 }
   0x2   :  { %22196 = sst [smem:[#allocation124_spill]] %s21542_s1 }
   0x3   :  { %22197 = sst [smem:[#allocation125_spill]] %s21543_s2 }
   0x4   :  { %s22198_s29 = sld [smem:[#allocation123_spill]]  ;;  %v84_v2 = vlaneseq  ;;  %s14982_s23 = smov 64  }
   0x5   :  { %s14983_s24 = smov 96   ;;  %s14984_s30 = smov 16  }
   0x6   :  { %v15112_v8 = vshrl.u32 %v84_v2, 7  ;;  %s14985_s0 = smov 48   ;;  %s22200_s19 = sld [smem:[#allocation125_spill]] }
   0x8   :  { %22199 = vst [vmem:[#allocation5_spill] sm:$0xff] %v15112_v8  ;;  %vm161_vm0 = vcmp.lt.s32.totalorder %v15112_v8, 4  ;;  %vm111_vm1 = vcmp.lt.s32.totalorder %v15112_v8, 6  ;;  %vm136_vm2 = vcmp.lt.s32.totalorder %v15112_v8, 5  ;;  %vm86_vm3 = vcmp.lt.s32.totalorder %v15112_v8, 7 }
   0xa   :  { %v15102_v0 = vld [vmem:[%s22198_s29] sm:$0xff]  ;;  %v61_v1 = vld [vmem:[%s22198_s29 + $0x8] sm:$0xff]  ;;  %v62_v3 = vld [vmem:[%s22198_s29 + $0x10] sm:$0xff] }
   0xb   :  { %v21564_v4 = vrot.slane %v15102_v0, 4  ;;  %v150_v5 = vrot.slane %v61_v1, 4  ;;  %v21566_v6 = vrot.slane %v15102_v0, 2  ;;  %v100_v7 = vrot.slane %v61_v1, 2  ;;  %v63_v15 = vld [vmem:[%s22198_s29 + $0x18] sm:$0xff]  ;;  %v64_v19 = vld [vmem:[%s22198_s29 + $0x20] sm:$0xff] }
   0xc   :  { %v21565_v9 = vrot.slane %v15102_v0, 3  ;;  %v125_v10 = vrot.slane %v61_v1, 3  ;;  %v21563_v11 = vrot.slane %v15102_v0, 1  ;;  %v73_v12 = vrot.slane %v61_v1, 1  ;;  %v65_v30 = vld [vmem:[%s22198_s29 + $0x28] sm:$0xff]  ;;  %v66_v35 = vld [vmem:[%s22198_s29 + $0x30] sm:$0xff] }
   0xd   :  { %v101_v13 = vrot.slane %v62_v3, 2  ;;  %v126_v14 = vrot.slane %v62_v3, 3  ;;  %v172_v16 = vsel %vm161_vm0, %v21564_v4, %v150_v5  ;;  %v122_v17 = vsel %vm111_vm1, %v21566_v6, %v100_v7  ;;  %v67_v48 = vld [vmem:[%s22198_s29 + $0x38] sm:$0xff]  ;;  %v68_v53 = vld [vmem:[%s22198_s29 + $0x40] sm:$0xff] }
   0xe   :  { %v151_v18 = vrot.slane %v62_v3, 4  ;;  %330 = vrot.lane.b32.xlu1 %v172_v16, %s14982_s23  ;;  %234 = vrot.lane.b32.xlu0 %v122_v17, %s14983_s24  ;;  %v147_v20 = vsel %vm136_vm2, %v21565_v9, %v125_v10  ;;  %v74_v21 = vrot.slane %v62_v3, 1  ;;  %v97_v22 = vsel %vm86_vm3, %v21563_v11, %v73_v12  ;;  %v15223_v3 = vld [vmem:[%s22198_s29 + $0x48] sm:$0xff]  ;;  %v428_v11 = vld [vmem:[%s22200_s19 + $0x50] sm:$0xff] }
   0xf   :  { %v102_v23 = vrot.slane %v63_v15, 2  ;;  %v127_v24 = vrot.slane %v63_v15, 3  ;;  %v152_v25 = vrot.slane %v63_v15, 4  ;;  %v121_v26 = vsel %vm111_vm1, %v100_v7, %v101_v13  ;;  %v433_v4 = vld [vmem:[%s22200_s19 + $0x78] sm:$0xff] }
  0x10   :  { %v146_v27 = vsel %vm136_vm2, %v125_v10, %v126_v14  ;;  %v75_v28 = vrot.slane %v63_v15, 1  ;;  %v103_v29 = vrot.slane %v64_v19, 2  ;;  %v171_v31 = vsel %vm161_vm0, %v150_v5, %v151_v18 }
  0x11   :  { %v96_v32 = vsel %vm86_vm3, %v73_v12, %v74_v21  ;;  %v128_v33 = vrot.slane %v64_v19, 3  ;;  %v153_v34 = vrot.slane %v64_v19, 4  ;;  %v120_v36 = vsel %vm111_vm1, %v101_v13, %v102_v23  ;;  %v15236_v13 = vld [vmem:[%s22198_s29 + $0x50] sm:$0xff] }
  0x12   :  { %282 = vrot.lane.b32.xlu0 %v147_v20, %s14984_s30  ;;  %186 = vrot.lane.b32.xlu1 %v97_v22, %s14985_s0  ;;  %v145_v37 = vsel %vm136_vm2, %v126_v14, %v127_v24  ;;  %v15166_v38 = vsel %vm161_vm0, %v151_v18, %v152_v25  ;;  %v76_v39 = vrot.slane %v64_v19, 1  ;;  %v104_v40 = vrot.slane %v65_v30, 2  ;;  %v419_v14 = vld [vmem:[%s22200_s19 + $0x8] sm:$0xff] }
  0x13   :  { %v129_v41 = vrot.slane %v65_v30, 3  ;;  %v154_v42 = vrot.slane %v65_v30, 4  ;;  %v77_v43 = vrot.slane %v65_v30, 1  ;;  %v15170_v44 = vsel %vm86_vm3, %v74_v21, %v75_v28 }
  0x14   :  { %v15174_v45 = vsel %vm111_vm1, %v102_v23, %v103_v29  ;;  %v105_v46 = vrot.slane %v66_v35, 2  ;;  %v130_v47 = vrot.slane %v66_v35, 3  ;;  %v15181_v49 = vsel %vm136_vm2, %v127_v24, %v128_v33  ;;  %v421_v23 = vld [vmem:[%s22200_s19 + $0x18] sm:$0xff] }
  0x15   :  { %v15185_v50 = vsel %vm161_vm0, %v152_v25, %v153_v34  ;;  %v15189_v51 = vsel %vm86_vm3, %v75_v28, %v76_v39  ;;  %v155_v52 = vrot.slane %v66_v35, 4  ;;  %v15198_v54 = vsel %vm111_vm1, %v103_v29, %v104_v40  ;;  %v418_v28 = vld [vmem:[%s22200_s19] sm:$0xff]  ;;  %v420_v29 = vld [vmem:[%s22200_s19 + $0x10] sm:$0xff] }
  0x16   :  { %236 = vrot.lane.b32.xlu0 %v121_v26, %s14983_s24  ;;  %284 = vrot.lane.b32.xlu1 %v146_v27, %s14984_s30  ;;  %v15202_v55 = vsel %vm136_vm2, %v128_v33, %v129_v41  ;;  %v15206_v56 = vsel %vm161_vm0, %v153_v34, %v154_v42  ;;  %v78_v57 = vrot.slane %v66_v35, 1  ;;  %v15210_v58 = vsel %vm86_vm3, %v76_v39, %v77_v43  ;;  %v423_v34 = vld [vmem:[%s22200_s19 + $0x28] sm:$0xff]  ;;  %v425_v35 = vld [vmem:[%s22200_s19 + $0x38] sm:$0xff] }
  0x17   :  { %v106_v59 = vrot.slane %v67_v48, 2  ;;  %v131_v60 = vrot.slane %v67_v48, 3  ;;  %v156_v61 = vrot.slane %v67_v48, 4  ;;  %v15214_v62 = vsel %vm111_vm1, %v104_v40, %v105_v46 }
  0x18   :  { %v15218_v63 = vsel %vm136_vm2, %v129_v41, %v130_v47  ;;  %v79_v1 = vrot.slane %v67_v48, 1  ;;  %v107_v2 = vrot.slane %v68_v53, 2  ;;  %v15227_v5 = vsel %vm161_vm0, %v154_v42, %v155_v52 }
  0x19   :  { %v15231_v7 = vsel %vm86_vm3, %v77_v43, %v78_v57  ;;  %v132_v10 = vrot.slane %v68_v53, 3  ;;  %v157_v12 = vrot.slane %v68_v53, 4  ;;  %v15245_v15 = vsel %vm111_vm1, %v105_v46, %v106_v59 }
  0x1a   :  { %332 = vrot.lane.b32.xlu0 %v171_v31, %s14982_s23  ;;  %188 = vrot.lane.b32.xlu1 %v96_v32, %s14985_s0  ;;  %v15249_v16 = vsel %vm136_vm2, %v130_v47, %v131_v60  ;;  %v15253_v17 = vsel %vm161_vm0, %v155_v52, %v156_v61  ;;  %v80_v18 = vrot.slane %v68_v53, 1  ;;  %v108_v19 = vrot.slane %v15223_v3, 2  ;;  %v422_v47 = vld [vmem:[%s22200_s19 + $0x20] sm:$0xff] }
  0x1b   :  { %v133_v20 = vrot.slane %v15223_v3, 3  ;;  %v158_v21 = vrot.slane %v15223_v3, 4  ;;  %v81_v22 = vrot.slane %v15223_v3, 1  ;;  %v15264_v24 = vsel %vm86_vm3, %v78_v57, %v79_v1  ;;  %v427_v3 = vld [vmem:[%s22200_s19 + $0x48] sm:$0xff] }
  0x1c   :  { %v15268_v25 = vsel %vm111_vm1, %v106_v59, %v107_v2  ;;  %v21570_v26 = vrot.slane %v15236_v13, 2  ;;  %v527_v27 = vand.u32 4294901760, %v419_v14  ;;  %v15279_v30 = vsel %vm136_vm2, %v131_v60, %v132_v10  ;;  %v424_v59 = vld [vmem:[%s22200_s19 + $0x30] sm:$0xff] }
  0x1d   :  { %v15283_v31 = vsel %vm161_vm0, %v156_v61, %v157_v12  ;;  %v15287_v32 = vsel %vm86_vm3, %v79_v1, %v80_v18  ;;  %v21569_v33 = vrot.slane %v15236_v13, 3  ;;  %v15300_v39 = vsel %vm111_vm1, %v107_v2, %v108_v19 }
  0x1e   :  { %238 = vrot.lane.b32.xlu0 %v120_v36, %s14983_s24  ;;  %286 = vrot.lane.b32.xlu1 %v145_v37, %s14984_s30  ;;  %v15304_v40 = vsel %vm136_vm2, %v132_v10, %v133_v20  ;;  %v15308_v41 = vsel %vm161_vm0, %v157_v12, %v158_v21  ;;  %v531_v42 = vand.u32 4294901760, %v421_v23  ;;  %v15312_v43 = vsel %vm86_vm3, %v80_v18, %v81_v22  ;;  %v429_v10 = vld [vmem:[%s22200_s19 + $0x58] sm:$0xff]  ;;  %v426_v12 = vld [vmem:[%s22200_s19 + $0x40] sm:$0xff] }
  0x1f   :  { %v15318_v36 = vsel %vm111_vm1, %v108_v19, %v21570_v26  ;;  %v529_v37 = vand.u32 4294901760, %v418_v28  ;;  %v533_v46 = vand.u32 4294901760, %v420_v29  ;;  %v21568_v52 = vrot.slane %v15236_v13, 4 }
  0x20   :  { %22201 = vst [vmem:[#allocation6_spill] sm:$0xff] %v15318_v36  ;;  %v15323_v48 = vpack.c.bf16 %v531_v42, %v527_v27  ;;  %v535_v53 = vand.u32 4294901760, %v423_v34  ;;  %v539_v57 = vand.u32 4294901760, %v425_v35  ;;  %v21567_v2 = vrot.slane %v15236_v13, 1 }
  0x21   :  { %v15329_v60 = vpack.c.bf16 %v533_v46, %v529_v37  ;;  %v15331_v61 = vsub.f32 %v418_v28, %v529_v37  ;;  %v15333_v1 = vsub.f32 %v420_v29, %v533_v46  ;;  %v15353_v18 = vsel %vm136_vm2, %v133_v20, %v21569_v33 }
  0x22   :  { %22202 = vst [vmem:[#allocation7_spill] sm:$0xff] %v15323_v48  ;;  %334 = vrot.lane.b32.xlu0 %v15166_v38, %s14982_s23  ;;  %190 = vrot.lane.b32.xlu1 %v15170_v44, %s14985_s0  ;;  %22204 = vst [vmem:[#allocation9_spill] sm:$0xff] %v15353_v18  ;;  %v15355_v19 = vpack.c.bf16 %v539_v57, %v535_v53  ;;  %v15357_v28 = vsub.f32 %v423_v34, %v535_v53  ;;  %v537_v29 = vand.u32 4294901760, %v422_v47  ;;  %v15375_v34 = vld [vmem:[%s22198_s29 + $0x58] sm:$0xff] }
  0x23   :  { %22203 = vst [vmem:[#allocation8_spill] sm:$0xff] %v15329_v60  ;;  %13009 = vmatprep.subr.bf16.mxu0 %v15323_v48  ;;  %v15360_v37 = vsub.f32 %v419_v14, %v527_v27  ;;  %v15362_v46 = vsub.f32 %v421_v23, %v531_v42  ;;  %v15364_v38 = vsub.f32 %v425_v35, %v539_v57  ;;  %v541_v44 = vand.u32 4294901760, %v424_v59  ;;  %v431_v35 = vld [vmem:[%s22200_s19 + $0x68] sm:$0xff] }
  0x24   :  { %22205 = vst [vmem:[#allocation10_spill] sm:$0xff] %v15355_v19  ;;  %13011 = vmatpush1.bf16.msra.mxu0 %v15329_v60  ;;  %v15370_v20 = vsub.f32 %v422_v47, %v537_v29  ;;  %v543_v14 = vand.u32 4294901760, %v427_v3  ;;  %v547_v27 = vand.u32 4294901760, %v429_v10  ;;  %v545_v23 = vand.u32 4294901760, %v426_v12 }
  0x25   :  { %22206 = vst [vmem:[#allocation11_spill] sm:$0xff] %v15360_v37  ;;  %22207 = vst [vmem:[#allocation12_spill] sm:$0xff] %v15362_v46  ;;  %v15384_v42 = vsel %vm161_vm0, %v158_v21, %v21568_v52  ;;  %v15390_v47 = vsel %vm86_vm3, %v81_v22, %v21567_v2  ;;  %13013 = vmatprep.subr.bf16.mxu0 %v15355_v19  ;;  %v15393_v53 = vpack.c.bf16 %v541_v44, %v537_v29  ;;  %v430_v21 = vld [vmem:[%s22200_s19 + $0x60] sm:$0xff] }
  0x26   :  { %22208 = vst [vmem:[#allocation13_spill] sm:$0xff] %v15384_v42  ;;  %22209 = vst [vmem:[#allocation14_spill] sm:$0xff] %v15390_v47  ;;  %v15395_v57 = vsub.f32 %v424_v59, %v541_v44 }
  0x27   :  { %22210 = vst [vmem:[#allocation15_spill] sm:$0xff] %v15393_v53 }
  0x28   :  { %23 = vsyncpa [#allocation3], 0  ;;  %240 = vrot.lane.b32.xlu0 %v15174_v45, %s14983_s24  ;;  %288 = vrot.lane.b32.xlu1 %v15181_v49, %s14984_s30  ;;  %v15407_v22 = vpack.c.bf16 %v547_v27, %v543_v14  ;;  %v15409_v29 = vsub.f32 %v427_v3, %v543_v14  ;;  %v15411_v59 = vsub.f32 %v429_v10, %v547_v27  ;;  %v549_v44 = vand.u32 4294901760, %v428_v11  ;;  %v432_v9 = vld [vmem:[%s22200_s19 + $0x70] sm:$0xff]  ;;  %v435_v49 = vld [vmem:[%s22200_s19 + $0x88] sm:$0xff]  ;;  %s22634_s1 = sld [smem:[#allocation124_spill]] }
  0x29   :  { %v110_v6 = vrot.slane %v15375_v34, 2  ;;  %v15418_v52 = vsub.f32 %v426_v12, %v545_v23  ;;  %v551_v45 = vand.u32 4294901760, %v431_v35  ;;  %13015 = vmatpush1.bf16.msra.mxu0 %v15393_v53  ;;  %v555_v14 = vand.u32 4294901760, %v433_v4  ;;  %v437_v19 = vld [vmem:[%s22200_s19 + $0x98] sm:$0xff]  ;;  %v438_v48 = vld [vmem:[%s22200_s19 + $0xa0] sm:$0xff]  ;;  %s14990_s2 = smov 66  }
  0x2a   :  { %22211 = vst [vmem:[#allocation16_spill] sm:$0xff] %v15407_v22  ;;  %v15424_v3 = vpack.c.bf16 %v549_v44, %v545_v23  ;;  %v15426_v10 = vsub.f32 %v428_v11, %v549_v44  ;;  %v553_v27 = vand.u32 4294901760, %v430_v21  ;;  %13017 = vmatprep.subr.bf16.mxu0 %v15407_v22  ;;  %v557_v26 = vand.u32 4294901760, %v432_v9  ;;  %v434_v11 = vld [vmem:[%s22200_s19 + $0x80] sm:$0xff]  ;;  %v436_v23 = vld [vmem:[%s22200_s19 + $0x90] sm:$0xff]  ;;  %v439_v22 = vld [vmem:[%s22200_s19 + $0xa8] sm:$0xff] }
  0x2b   :  { %v15431_v2 = vsub.f32 %v431_v35, %v551_v45  ;;  %v15446_v35 = vpack.c.bf16 %v555_v14, %v551_v45  ;;  %v15448_v44 = vsub.f32 %v433_v4, %v555_v14  ;;  %v559_v33 = vand.u32 4294901760, %v435_v49  ;;  %v441_v53 = vld [vmem:[%s22200_s19 + $0xb8] sm:$0xff]  ;;  %s14991_s25 = smov 70   ;;  %s14992_s26 = smov 8  }
  0x2c   :  { %22212 = vst [vmem:[#allocation17_spill] sm:$0xff] %v15424_v3  ;;  %336 = vrot.lane.b32.xlu0 %v15185_v50, %s14982_s23  ;;  %192 = vrot.lane.b32.xlu1 %v15189_v51, %s14985_s0  ;;  %v15450_v12 = vsub.f32 %v430_v21, %v553_v27  ;;  %v22214_v50 = vrot.slane %v15236_v13, 2  ;;  %v22216_v4 = vrot.slane %v15375_v34, 3  ;;  %v22217_v21 = vrot.slane %v15236_v13, 3  ;;  %s14999_s22 = smov 57  }
  0x2d   :  { %22213 = vst [vmem:[#allocation18_spill] sm:$0xff] %v15446_v35  ;;  %v15472_v14 = vpack.c.bf16 %v557_v26, %v553_v27  ;;  %v15474_v60 = vsub.f32 %v432_v9, %v557_v26  ;;  %13019 = vmatpush1.bf16.msra.mxu0 %v15424_v3  ;;  %v561_v47 = vand.u32 4294901760, %v434_v11  ;;  %v565_v42 = vand.u32 4294901760, %v436_v23 }
  0x2e   :  { %v15462_v51 = vsel %vm111_vm1, %v22214_v50, %v110_v6  ;;  %v15470_v45 = vsel %vm136_vm2, %v22217_v21, %v22216_v4  ;;  %v563_v50 = vand.u32 4294901760, %v437_v19  ;;  %v22221_v18 = vrot.slane %v15375_v34, 4  ;;  %13021 = vmatprep.subr.bf16.mxu0 %v15446_v35 }
  0x2f   :  { %22215 = vst [vmem:[#allocation19_spill] sm:$0xff] %v15462_v51  ;;  %22218 = vst [vmem:[#allocation20_spill] sm:$0xff] %v15470_v45  ;;  %v15480_v51 = vsub.f32 %v435_v49, %v559_v33  ;;  %v22222_v4 = vrot.slane %v15236_v13, 4  ;;  %v22224_v9 = vrot.slane %v15375_v34, 1  ;;  %v22225_v26 = vrot.slane %v15236_v13, 1  ;;  %v440_v45 = vld [vmem:[%s22200_s19 + $0xb0] sm:$0xff] }
  0x30   :  { %22219 = vst [vmem:[#allocation21_spill] sm:$0xff] %v15472_v14  ;;  %v567_v49 = vand.u32 4294901760, %v439_v22  ;;  %v571_v3 = vand.u32 4294901760, %v441_v53  ;;  %v445_v13 = vld [vmem:[%s22200_s19 + $0xd8] sm:$0xff]  ;;  %242 = vrot.lane.b32.xlu0 %v15198_v54, %s14983_s24  ;;  %290 = vrot.lane.b32.xlu1 %v15202_v55, %s14984_s30  ;;  %v15520_v35 = vsub.f32 %v437_v19, %v563_v50  ;;  %v444_v54 = vld [vmem:[%s22200_s19 + $0xd0] sm:$0xff]  ;;  %v15528_v55 = vpack.c.bf16 %v565_v42, %v561_v47 }
  0x31   :  { %22220 = vst [vmem:[#allocation22_spill] sm:$0xff] %v15480_v51  ;;  %v15488_v27 = vsel %vm161_vm0, %v22222_v4, %v22221_v18  ;;  %v15496_v21 = vsel %vm86_vm3, %v22225_v26, %v22224_v9  ;;  %v443_v18 = vld [vmem:[%s22200_s19 + $0xc8] sm:$0xff]  ;;  %v22227_v4 = vrot.slane %v15102_v0, 2  ;;  %v15518_v26 = vpack.c.bf16 %v563_v50, %v559_v33  ;;  %v449_v19 = vld [vmem:[%s22200_s19 + $0xf8] sm:$0xff]  ;;  %13023 = vmatpush1.bf16.msra.mxu0 %v15472_v14 }
  0x32   :  { %22223 = vst [vmem:[#allocation23_spill] sm:$0xff] %v15488_v27  ;;  %22226 = vst [vmem:[#allocation24_spill] sm:$0xff] %v15496_v21  ;;  %v569_v21 = vand.u32 4294901760, %v438_v48  ;;  %v442_v27 = vld [vmem:[%s22200_s19 + $0xc0] sm:$0xff]  ;;  %v15530_v36 = vsub.f32 %v434_v11, %v561_v47  ;;  %v15532_v51 = vsub.f32 %v436_v23, %v565_v42  ;;  %v15539_v33 = vld [vmem:[%s22200_s19 + $0xe8] sm:$0xff]  ;;  %v15545_v50 = vsub.f32 %v441_v53, %v571_v3 }
  0x33   :  { %v15516_v9 = vsel %vm111_vm1, %v110_v6, %v22227_v4  ;;  %22229 = vst [vmem:[#allocation26_spill] sm:$0xff] %v15518_v26  ;;  %22230 = vst [vmem:[#allocation27_spill] sm:$0xff] %v15528_v55  ;;  %v15534_v6 = vsub.f32 %v439_v22, %v567_v49  ;;  %v573_v4 = vand.u32 4294901760, %v440_v45  ;;  %v575_v42 = vand.u32 4294901760, %v443_v18  ;;  %13025 = vmatprep.subr.bf16.mxu0 %v15518_v26  ;;  %v448_v26 = vld [vmem:[%s22200_s19 + $0xf0] sm:$0xff]  ;;  %v451_v14 = vld [vmem:[%s22200_s19 + $0x108] sm:$0xff] }
  0x34   :  { %22228 = vst [vmem:[#allocation25_spill] sm:$0xff] %v15516_v9  ;;  %22231 = vst [vmem:[#allocation28_spill] sm:$0xff] %v15532_v51  ;;  %v15547_v47 = vsub.f32 %v438_v48, %v569_v21  ;;  %v15550_v22 = vpack.c.bf16 %v571_v3, %v567_v49  ;;  %v579_v11 = vand.u32 4294901760, %v445_v13  ;;  %v577_v23 = vand.u32 4294901760, %v442_v27  ;;  %338 = vrot.lane.b32.xlu0 %v15206_v56, %s14982_s23  ;;  %v453_v51 = vld [vmem:[%s22200_s19 + $0x118] sm:$0xff] }
  0x35   :  { %22232 = vst [vmem:[#allocation29_spill] sm:$0xff] %v15534_v6  ;;  %22233 = vst [vmem:[#allocation30_spill] sm:$0xff] %v15545_v50  ;;  %v581_v9 = vand.u32 4294901760, %v444_v54  ;;  %v446_v6 = vld [vmem:[%s22200_s19 + $0xe0] sm:$0xff]  ;;  %194 = vrot.lane.b32.xlu1 %v15210_v58, %s14985_s0  ;;  %v15559_v48 = vsub.f32 %v440_v45, %v573_v4  ;;  %v15561_v53 = vsub.f32 %v443_v18, %v575_v42  ;;  %v583_v3 = vand.u32 4294901760, %v15539_v33 }
  0x36   :  { %22234 = vst [vmem:[#allocation31_spill] sm:$0xff] %v15547_v47  ;;  %22235 = vst [vmem:[#allocation32_spill] sm:$0xff] %v15550_v22  ;;  %v587_v49 = vand.u32 4294901760, %v449_v19  ;;  %v22238_v56 = vrot.slane %v15102_v0, 3  ;;  %v22239_v47 = vrot.slane %v15375_v34, 3  ;;  %v22241_v45 = vrot.slane %v15102_v0, 4  ;;  %13027 = vmatpush1.bf16.msra.mxu0 %v15528_v55 }
  0x37   :  { %22236 = vst [vmem:[#allocation33_spill] sm:$0xff] %v15559_v48  ;;  %22237 = vst [vmem:[#allocation34_spill] sm:$0xff] %v15561_v53  ;;  %v22242_v18 = vrot.slane %v15375_v34, 4  ;;  %v15586_v48 = vsub.f32 %v445_v13, %v579_v11  ;;  %v15588_v50 = vsub.f32 %v442_v27, %v577_v23  ;;  %v15602_v13 = vsub.f32 %v444_v54, %v581_v9 }
  0x38   :  { %v15576_v58 = vsel %vm136_vm2, %v22239_v47, %v22238_v56  ;;  %v450_v47 = vld [vmem:[%s22200_s19 + $0x100] sm:$0xff]  ;;  %v452_v56 = vld [vmem:[%s22200_s19 + $0x110] sm:$0xff]  ;;  %v15605_v27 = vsub.f32 %v15539_v33, %v583_v3  ;;  %13029 = vmatprep.subr.bf16.mxu0 %v15550_v22  ;;  %v15624_v33 = vpack.c.bf16 %v579_v11, %v575_v42  ;;  %244 = vrot.lane.b32.xlu0 %v15214_v62, %s14983_s24  ;;  %v591_v55 = vand.u32 4294901760, %v451_v14 }
  0x39   :  { %22240 = vst [vmem:[#allocation35_spill] sm:$0xff] %v15576_v58  ;;  %v15584_v53 = vsel %vm161_vm0, %v22242_v18, %v22241_v45  ;;  %22244 = vst [vmem:[#allocation37_spill] sm:$0xff] %v15586_v48  ;;  %v15600_v45 = vpack.c.bf16 %v573_v4, %v569_v21  ;;  %v15607_v18 = vsub.f32 %v449_v19, %v587_v49  ;;  %v457_v58 = vld [vmem:[%s22200_s19 + $0x138] sm:$0xff]  ;;  %v22251_v21 = vrot.slane %v15375_v34, 1  ;;  %v454_v42 = vld [vmem:[%s22200_s19 + $0x120] sm:$0xff] }
  0x3a   :  { %22243 = vst [vmem:[#allocation36_spill] sm:$0xff] %v15584_v53  ;;  %22245 = vst [vmem:[#allocation38_spill] sm:$0xff] %v15588_v50  ;;  %v455_v53 = vld [vmem:[%s22200_s19 + $0x128] sm:$0xff]  ;;  %v22250_v50 = vrot.slane %v15102_v0, 1  ;;  %v585_v19 = vand.u32 4294901760, %v446_v6  ;;  %v589_v4 = vand.u32 4294901760, %v448_v26  ;;  %292 = vrot.lane.b32.xlu1 %v15218_v63, %s14984_s30 }
  0x3b   :  { %22246 = vst [vmem:[#allocation39_spill] sm:$0xff] %v15600_v45  ;;  %22247 = vst [vmem:[#allocation40_spill] sm:$0xff] %v15602_v13  ;;  %v595_v0 = vand.u32 4294901760, %v453_v51  ;;  %v597_v34 = vand.u32 4294901760, %v452_v56  ;;  %v603_v8 = vand.u32 4294901760, %v457_v58  ;;  %v456_v62 = vld [vmem:[%s22200_s19 + $0x130] sm:$0xff]  ;;  %13031 = vmatpush1.bf16.msra.mxu0 %v15600_v45 }
  0x3c   :  { %22248 = vst [vmem:[#allocation41_spill] sm:$0xff] %v15605_v27  ;;  %22249 = vst [vmem:[#allocation42_spill] sm:$0xff] %v15607_v18  ;;  %v15621_v54 = vsel %vm86_vm3, %v22251_v21, %v22250_v50  ;;  %v593_v18 = vand.u32 4294901760, %v450_v47  ;;  %v15630_v27 = vsub.f32 %v446_v6, %v585_v19  ;;  %v15632_v50 = vsub.f32 %v448_v26, %v589_v4  ;;  %v459_v63 = vld [vmem:[%s22200_s19 + $0x148] sm:$0xff]  ;;  %v460_v45 = vld [vmem:[%s22200_s19 + $0x150] sm:$0xff] }
  0x3d   :  { %22252 = vst [vmem:[#allocation43_spill] sm:$0xff] %v15621_v54  ;;  %22253 = vst [vmem:[#allocation44_spill] sm:$0xff] %v15624_v33  ;;  %v599_v21 = vand.u32 4294901760, %v455_v53  ;;  %v15644_v6 = vpack.c.bf16 %v581_v9, %v577_v23  ;;  %v15646_v26 = vsub.f32 %v451_v14, %v591_v55  ;;  %v15648_v11 = vsub.f32 %v453_v51, %v595_v0  ;;  %v461_v54 = vld [vmem:[%s22200_s19 + $0x158] sm:$0xff] }
  0x3e   :  { %22254 = vst [vmem:[#allocation45_spill] sm:$0xff] %v15630_v27  ;;  %22255 = vst [vmem:[#allocation46_spill] sm:$0xff] %v15632_v50  ;;  %v15650_v22 = vsub.f32 %v450_v47, %v593_v18  ;;  %v458_v50 = vld [vmem:[%s22200_s19 + $0x140] sm:$0xff]  ;;  %13033 = vmatprep.subr.bf16.mxu0 %v15624_v33  ;;  %v15662_v14 = vpack.c.bf16 %v587_v49, %v583_v3  ;;  %v15664_v51 = vsub.f32 %v452_v56, %v597_v34  ;;  %v463_v47 = vld [vmem:[%s22200_s19 + $0x168] sm:$0xff]  ;;  %vm392_vm4 = vcmask 130048  }
  0x3f   :  { %22256 = vst [vmem:[#allocation47_spill] sm:$0xff] %v15644_v6  ;;  %22257 = vst [vmem:[#allocation48_spill] sm:$0xff] %v15646_v26  ;;  %v15666_v9 = vsub.f32 %v455_v53, %v599_v21  ;;  %v15668_v23 = vsub.f32 %v457_v58, %v603_v8  ;;  %340 = vrot.lane.b32.xlu0 %v15227_v5, %s14982_s23  ;;  %196 = vrot.lane.b32.xlu1 %v15231_v7, %s14985_s0  ;;  %v601_v49 = vand.u32 4294901760, %v454_v42  ;;  %vm366_vm5 = vcmask 392192  }
  0x40   :  { %22258 = vst [vmem:[#allocation49_spill] sm:$0xff] %v15648_v11  ;;  %22259 = vst [vmem:[#allocation50_spill] sm:$0xff] %v15650_v22  ;;  %v465_v22 = vld [vmem:[%s22200_s19 + $0x178] sm:$0xff]  ;;  %v15680_v3 = vpack.c.bf16 %v589_v4, %v585_v19  ;;  %v15682_v53 = vpack.c.bf16 %v595_v0, %v591_v55  ;;  %v605_v58 = vand.u32 4294901760, %v456_v62  ;;  %v607_v56 = vand.u32 4294901760, %v459_v63  ;;  %13035 = vmatpush1.bf16.msra.mxu0 %v15644_v6  ;;  %v464_v55 = vld [vmem:[%s22200_s19 + $0x170] sm:$0xff] }
  0x41   :  { %22260 = vst [vmem:[#allocation51_spill] sm:$0xff] %v15662_v14  ;;  %22261 = vst [vmem:[#allocation52_spill] sm:$0xff] %v15664_v51  ;;  %v611_v33 = vand.u32 4294901760, %v461_v54  ;;  %v462_v51 = vld [vmem:[%s22200_s19 + $0x160] sm:$0xff]  ;;  %v15688_v5 = vsub.f32 %v454_v42, %v601_v49  ;;  %v615_v7 = vand.u32 4294901760, %v463_v47  ;;  %v619_v19 = vand.u32 4294901760, %v465_v22  ;;  %13037 = vmatprep.subr.bf16.mxu0 %v15662_v14 }
  0x42   :  { %22262 = vst [vmem:[#allocation53_spill] sm:$0xff] %v15666_v9  ;;  %22263 = vst [vmem:[#allocation54_spill] sm:$0xff] %v15668_v23  ;;  %v609_v23 = vand.u32 4294901760, %v458_v50  ;;  %v613_v9 = vand.u32 4294901760, %v460_v45  ;;  %v15690_v11 = vsub.f32 %v456_v62, %v605_v58  ;;  %v15696_v4 = vpack.c.bf16 %v597_v34, %v593_v18  ;;  %v467_v42 = vld [vmem:[%s22200_s19 + $0x188] sm:$0xff] }
  0x43   :  { %22264 = vst [vmem:[#allocation55_spill] sm:$0xff] %v15680_v3  ;;  %22265 = vst [vmem:[#allocation56_spill] sm:$0xff] %v15682_v53  ;;  %v15698_v0 = vsub.f32 %v459_v63, %v607_v56  ;;  %v15700_v26 = vsub.f32 %v461_v54, %v611_v33  ;;  %246 = vrot.lane.b32.xlu0 %v15245_v15, %s14983_s24  ;;  %294 = vrot.lane.b32.xlu1 %v15249_v16, %s14984_s30  ;;  %v617_v54 = vand.u32 4294901760, %v462_v51  ;;  %v466_v63 = vld [vmem:[%s22200_s19 + $0x180] sm:$0xff]  ;;  %vm405_vm6 = vcmask 523264  }
  0x44   :  { %22266 = vst [vmem:[#allocation57_spill] sm:$0xff] %v15688_v5  ;;  %22267 = vst [vmem:[#allocation58_spill] sm:$0xff] %v15690_v11  ;;  %v15702_v27 = vsub.f32 %v458_v50, %v609_v23  ;;  %v15711_v62 = vpack.c.bf16 %v603_v8, %v599_v21  ;;  %v15713_v18 = vsub.f32 %v460_v45, %v613_v9  ;;  %v469_v50 = vld [vmem:[%s22200_s19 + $0x198] sm:$0xff]  ;;  %v621_v8 = vand.u32 4294901760, %v464_v55  ;;  %v468_v45 = vld [vmem:[%s22200_s19 + $0x190] sm:$0xff] }
  0x45   :  { %22268 = vst [vmem:[#allocation59_spill] sm:$0xff] %v15696_v4  ;;  %22269 = vst [vmem:[#allocation60_spill] sm:$0xff] %v15698_v0  ;;  %v15715_v34 = vsub.f32 %v463_v47, %v615_v7  ;;  %v15723_v14 = vpack.c.bf16 %v605_v58, %v601_v49  ;;  %v15725_v15 = vpack.c.bf16 %v611_v33, %v607_v56  ;;  %v471_v21 = vld [vmem:[%s22200_s19 + $0x1a8] sm:$0xff]  ;;  %v473_v47 = vld [vmem:[%s22200_s19 + $0x1b8] sm:$0xff]  ;;  %13039 = vmatpush1.bf16.msra.mxu0 %v15680_v3  ;;  %vm379_vm7 = vcmask 785408  }
  0x46   :  { %22270 = vst [vmem:[#allocation61_spill] sm:$0xff] %v15700_v26  ;;  %22271 = vst [vmem:[#allocation62_spill] sm:$0xff] %v15702_v27  ;;  %v15727_v16 = vsub.f32 %v465_v22, %v619_v19  ;;  %v15739_v49 = vpack.c.bf16 %v613_v9, %v609_v23  ;;  %v15741_v33 = vpack.c.bf16 %v619_v19, %v615_v7  ;;  %v623_v58 = vand.u32 4294901760, %v467_v42  ;;  %v470_v56 = vld [vmem:[%s22200_s19 + $0x1a0] sm:$0xff]  ;;  %v472_v19 = vld [vmem:[%s22200_s19 + $0x1b0] sm:$0xff] }
  0x47   :  { %22272 = vst [vmem:[#allocation63_spill] sm:$0xff] %v15711_v62  ;;  %22273 = vst [vmem:[#allocation64_spill] sm:$0xff] %v15713_v18  ;;  %v15743_v22 = vsub.f32 %v462_v51, %v617_v54  ;;  %13041 = vmatprep.subr.bf16.mxu0 %v15682_v53  ;;  %v15749_v6 = vpack.c.bf16 %v621_v8, %v617_v54  ;;  %v625_v18 = vand.u32 4294901760, %v466_v63  ;;  %342 = vrot.lane.b32.xlu0 %v15253_v17, %s14982_s23  ;;  %v474_v53 = vld [vmem:[%s22200_s19 + $0x1c0] sm:$0xff]  ;;  %v476_v3 = vld [vmem:[%s22200_s19 + $0x1d0] sm:$0xff]  ;;  %vm490_vm8 = vcmask 916480  }
  0x48   :  { %22274 = vst [vmem:[#allocation65_spill] sm:$0xff] %v15715_v34  ;;  %22275 = vst [vmem:[#allocation66_spill] sm:$0xff] %v15723_v14  ;;  %v627_v34 = vand.u32 4294901760, %v469_v50  ;;  %198 = vrot.lane.b32.xlu1 %v15264_v24, %s14985_s0  ;;  %v15757_v51 = vsub.f32 %v467_v42, %v623_v58  ;;  %v629_v9 = vand.u32 4294901760, %v468_v45  ;;  %v631_v23 = vand.u32 4294901760, %v471_v21  ;;  %v477_v42 = vld [vmem:[%s22200_s19 + $0x1d8] sm:$0xff] }
  0x49   :  { %22276 = vst [vmem:[#allocation67_spill] sm:$0xff] %v15725_v15  ;;  %22277 = vst [vmem:[#allocation68_spill] sm:$0xff] %v15727_v16  ;;  %v15751_v16 = vsub.f32 %v464_v55, %v621_v8  ;;  %v635_v7 = vand.u32 4294901760, %v473_v47  ;;  %v475_v55 = vld [vmem:[%s22200_s19 + $0x1c8] sm:$0xff]  ;;  %v15769_v17 = vsub.f32 %v466_v63, %v625_v18  ;;  %v633_v24 = vand.u32 4294901760, %v470_v56  ;;  %13043 = vmatpush1.bf16.msra.mxu0 %v15696_v4  ;;  %s14998_s19 = smov 124  }
  0x4a   :  { %22278 = vst [vmem:[#allocation69_spill] sm:$0xff] %v15739_v49  ;;  %22279 = vst [vmem:[#allocation70_spill] sm:$0xff] %v15741_v33  ;;  %v15765_v54 = vpack.c.bf16 %v627_v34, %v623_v58  ;;  %v15767_v8 = vsub.f32 %v469_v50, %v627_v34  ;;  %v15781_v58 = vpack.c.bf16 %v629_v9, %v625_v18  ;;  %13045 = vmatprep.subr.bf16.mxu0 %v15711_v62  ;;  %vm2698_vm9 = vcmask 1043456  }
  0x4b   :  { %22280 = vst [vmem:[#allocation71_spill] sm:$0xff] %v15743_v22  ;;  %22281 = vst [vmem:[#allocation72_spill] sm:$0xff] %v15749_v6  ;;  %v15783_v34 = vsub.f32 %v468_v45, %v629_v9  ;;  %v15785_v50 = vpack.c.bf16 %v635_v7, %v631_v23  ;;  %v15787_v63 = vsub.f32 %v471_v21, %v631_v23  ;;  %248 = vrot.lane.b32.xlu0 %v15268_v25, %s14983_s24  ;;  %vm2578_vm10 = vcmask 31744  }
  0x4c   :  { %22282 = vst [vmem:[#allocation73_spill] sm:$0xff] %v15751_v16  ;;  %22283 = vst [vmem:[#allocation74_spill] sm:$0xff] %v15757_v51  ;;  %v15792_v51 = vsub.f32 %v470_v56, %v633_v24  ;;  %v639_v16 = vand.u32 4294901760, %v475_v55  ;;  %296 = vrot.lane.b32.xlu1 %v15279_v30, %s14984_s30  ;;  %v643_v18 = vand.u32 4294901760, %v477_v42  ;;  %v641_v45 = vand.u32 4294901760, %v474_v53 }
  0x4d   :  { %22284 = vst [vmem:[#allocation75_spill] sm:$0xff] %v15765_v54  ;;  %22285 = vst [vmem:[#allocation76_spill] sm:$0xff] %v15767_v8  ;;  %v637_v8 = vand.u32 4294901760, %v472_v19  ;;  %v645_v9 = vand.u32 4294901760, %v476_v3  ;;  %v21638_v21 = vand.u32 4294901760, %v15360_v37  ;;  %v21636_v56 = vand.u32 4294901760, %v15362_v46  ;;  %13047 = vmatpush1.bf16.msra.mxu0 %v15723_v14 }
  0x4e   :  { %22286 = vst [vmem:[#allocation77_spill] sm:$0xff] %v15769_v17  ;;  %22287 = vst [vmem:[#allocation78_spill] sm:$0xff] %v15781_v58  ;;  %v15790_v17 = vsub.f32 %v473_v47, %v635_v7  ;;  %v15803_v47 = vsub.f32 %v475_v55, %v639_v16  ;;  %v15807_v7 = vpack.c.bf16 %v643_v18, %v639_v16  ;;  %13049 = vmatprep.subr.bf16.mxu0 %v15725_v15  ;;  %vm4058_vm11 = vcmask 1042432  }
  0x4f   :  { %22288 = vst [vmem:[#allocation79_spill] sm:$0xff] %v15783_v34  ;;  %22289 = vst [vmem:[#allocation80_spill] sm:$0xff] %v15785_v50  ;;  %v15799_v23 = vpack.c.bf16 %v637_v8, %v633_v24  ;;  %v15801_v62 = vsub.f32 %v472_v19, %v637_v8  ;;  %v15809_v25 = vsub.f32 %v477_v42, %v643_v18  ;;  %v21637_v16 = vand.u32 4294901760, %v15331_v61 }
  0x50   :  { %22290 = vst [vmem:[#allocation81_spill] sm:$0xff] %v15787_v63  ;;  %22291 = vst [vmem:[#allocation82_spill] sm:$0xff] %v15790_v17  ;;  %v15811_v30 = vpack.c.bf16 %v645_v9, %v641_v45  ;;  %v15813_v4 = vsub.f32 %v474_v53, %v641_v45  ;;  %v15816_v24 = vsub.f32 %v476_v3, %v645_v9  ;;  %344 = vrot.lane.b32.xlu0 %v15283_v31, %s14982_s23  ;;  %vm4054_vm12 = vcmask 23552  }
  0x51   :  { %22292 = vst [vmem:[#allocation83_spill] sm:$0xff] %v15792_v51  ;;  %22293 = vst [vmem:[#allocation84_spill] sm:$0xff] %v15799_v23  ;;  %v847_v19 = vsub.f32 %v15360_v37, %v21638_v21  ;;  %v859_v55 = vsub.f32 %v15362_v46, %v21636_v56  ;;  %200 = vrot.lane.b32.xlu1 %v15287_v32, %s14985_s0  ;;  %v21639_v53 = vand.u32 4294901760, %v15333_v1  ;;  %v21643_v3 = vand.u32 4294901760, %v15357_v28 }
  0x52   :  { %22294 = vst [vmem:[#allocation85_spill] sm:$0xff] %v15801_v62  ;;  %22295 = vst [vmem:[#allocation86_spill] sm:$0xff] %v15803_v47  ;;  %v21642_v8 = vand.u32 4294901760, %v15364_v38  ;;  %v21644_v42 = vand.u32 4294901760, %v15370_v20  ;;  %v853_v9 = vsub.f32 %v15331_v61, %v21637_v16  ;;  %v21649_v56 = vand.u32 4294901760, %v15395_v57  ;;  %13051 = vmatpush1.bf16.msra.mxu0 %v15739_v49 }
  0x53   :  { %22296 = vst [vmem:[#allocation87_spill] sm:$0xff] %v15807_v7  ;;  %22297 = vst [vmem:[#allocation88_spill] sm:$0xff] %v15809_v25  ;;  %v848_v18 = vand.u32 4294901760, %v847_v19  ;;  %v860_v45 = vand.u32 4294901760, %v859_v55  ;;  %v865_v31 = vsub.f32 %v15333_v1, %v21639_v53  ;;  %v871_v32 = vsub.f32 %v15357_v28, %v21643_v3  ;;  %13053 = vmatprep.subr.bf16.mxu0 %v15741_v33 }
  0x54   :  { %22298 = vst [vmem:[#allocation89_spill] sm:$0xff] %v15811_v30  ;;  %22299 = vst [vmem:[#allocation90_spill] sm:$0xff] %v15813_v4  ;;  %v883_v19 = vsub.f32 %v15364_v38, %v21642_v8  ;;  %v877_v55 = vsub.f32 %v15370_v20, %v21644_v42  ;;  %v854_v21 = vand.u32 4294901760, %v853_v9  ;;  %v889_v53 = vsub.f32 %v15395_v57, %v21649_v56 }
  0x55   :  { %22300 = vst [vmem:[#allocation91_spill] sm:$0xff] %v15816_v24  ;;  %v15851_v16 = vpack.c.bf16 %v860_v45, %v848_v18  ;;  %v21655_v49 = vand.u32 4294901760, %v15409_v29  ;;  %250 = vrot.lane.b32.xlu0 %v15300_v39, %s14983_s24  ;;  %298 = vrot.lane.b32.xlu1 %v15304_v40, %s14984_s30  ;;  %v866_v8 = vand.u32 4294901760, %v865_v31  ;;  %v872_v3 = vand.u32 4294901760, %v871_v32 }
  0x56   :  { %v884_v42 = vand.u32 4294901760, %v883_v19  ;;  %v878_v15 = vand.u32 4294901760, %v877_v55  ;;  %v890_v33 = vand.u32 4294901760, %v889_v53  ;;  %v21651_v45 = vand.u32 4294901760, %v15411_v59  ;;  %13055 = vmatpush1.bf16.msra.mxu0 %v15749_v6 }
  0x57   :  { %v895_v18 = vsub.f32 %v15409_v29, %v21655_v49  ;;  %v21650_v9 = vand.u32 4294901760, %v15418_v52  ;;  %v15867_v56 = vpack.c.bf16 %v866_v8, %v854_v21  ;;  %v21652_v40 = vand.u32 4294901760, %v15426_v10  ;;  %13057 = vmatprep.subr.bf16.mxu0 %v15765_v54  ;;  %v22307_v49 = vld [vmem:[#allocation9_spill] sm:$0xff]  ;;  %v22309_v54 = vld [vmem:[#allocation28_spill] sm:$0xff] }
  0x58   :  { %v15869_v39 = vpack.c.bf16 %v884_v42, %v872_v3  ;;  %v21653_v31 = vand.u32 4294901760, %v15431_v2  ;;  %v15874_v53 = vpack.c.bf16 %v890_v33, %v878_v15  ;;  %v907_v19 = vsub.f32 %v15411_v59, %v21651_v45 }
  0x59   :  { %22301 = vst [vmem:[#allocation92_spill] sm:$0xff] %v15867_v56  ;;  %v896_v32 = vand.u32 4294901760, %v895_v18  ;;  %v901_v21 = vsub.f32 %v15418_v52, %v21650_v9  ;;  %346 = vrot.lane.b32.xlu0 %v15308_v41, %s14982_s23  ;;  %202 = vrot.lane.b32.xlu1 %v15312_v43, %s14985_s0  ;;  %v913_v15 = vsub.f32 %v15426_v10, %v21652_v40  ;;  %v21654_v3 = vand.u32 4294901760, %v15448_v44  ;;  %v22304_v41 = vld [vmem:[#allocation22_spill] sm:$0xff] }
  0x5a   :  { %22302 = vst [vmem:[#allocation93_spill] sm:$0xff] %v15869_v39  ;;  %22303 = vst [vmem:[#allocation94_spill] sm:$0xff] %v15874_v53  ;;  %v919_v33 = vsub.f32 %v15431_v2, %v21653_v31  ;;  %v21656_v8 = vand.u32 4294901760, %v15450_v12  ;;  %v908_v42 = vand.u32 4294901760, %v907_v19  ;;  %v21661_v18 = vand.u32 4294901760, %v15474_v60  ;;  %13059 = vmatpush1.bf16.msra.mxu0 %v15781_v58 }
  0x5b   :  { %v902_v55 = vand.u32 4294901760, %v901_v21  ;;  %v21662_v9 = vand.u32 4294901760, %v22304_v41  ;;  %v914_v43 = vand.u32 4294901760, %v913_v15  ;;  %v931_v40 = vsub.f32 %v15448_v44, %v21654_v3  ;;  %13061 = vmatprep.subr.bf16.mxu0 %v15785_v50  ;;  %v22306_v3 = vld [vmem:[#allocation6_spill] sm:$0xff] }
  0x5c   :  { %v920_v45 = vand.u32 4294901760, %v919_v33  ;;  %v925_v31 = vsub.f32 %v15450_v12, %v21656_v8  ;;  %v15904_v19 = vpack.c.bf16 %v908_v42, %v896_v32  ;;  %v937_v21 = vsub.f32 %v15474_v60, %v21661_v18 }
  0x5d   :  { %v943_v15 = vsub.f32 %v22304_v41, %v21662_v9  ;;  %v21667_v33 = vand.u32 4294901760, %v15520_v35  ;;  %252 = vrot.lane.b32.xlu0 %v22306_v3, %s14983_s24  ;;  %300 = vrot.lane.b32.xlu1 %v22307_v49, %s14984_s30  ;;  %v15917_v8 = vpack.c.bf16 %v914_v43, %v902_v55  ;;  %v932_v32 = vand.u32 4294901760, %v931_v40  ;;  %v22311_v40 = vld [vmem:[#allocation29_spill] sm:$0xff]  ;;  %v22312_v55 = vld [vmem:[#allocation30_spill] sm:$0xff] }
  0x5e   :  { %22305 = vst [vmem:[#allocation22_spill] sm:$0xff] %v15904_v19  ;;  %v926_v42 = vand.u32 4294901760, %v925_v31  ;;  %v21670_v50 = vand.u32 4294901760, %v15530_v36  ;;  %v938_v58 = vand.u32 4294901760, %v937_v21  ;;  %v21675_v6 = vand.u32 4294901760, %v22309_v54  ;;  %13063 = vmatpush1.bf16.msra.mxu0 %v15799_v23  ;;  %v22314_v23 = vld [vmem:[#allocation31_spill] sm:$0xff] }
  0x5f   :  { %22308 = vst [vmem:[#allocation6_spill] sm:$0xff] %v15917_v8  ;;  %v944_v18 = vand.u32 4294901760, %v943_v15  ;;  %v955_v9 = vsub.f32 %v15520_v35, %v21667_v33  ;;  %v15925_v3 = vpack.c.bf16 %v932_v32, %v920_v45  ;;  %13065 = vmatprep.subr.bf16.mxu0 %v15807_v7  ;;  %v22315_v32 = vld [vmem:[#allocation13_spill] sm:$0xff]  ;;  %v22317_v43 = vand.u32 4294901760, %v22311_v40 }
  0x60   :  { %v949_v49 = vsub.f32 %v15530_v36, %v21670_v50  ;;  %v15933_v21 = vpack.c.bf16 %v938_v58, %v926_v42  ;;  %v961_v33 = vsub.f32 %v22309_v54, %v21675_v6  ;;  %v22316_v50 = vld [vmem:[#allocation14_spill] sm:$0xff]  ;;  %v22318_v58 = vand.u32 4294901760, %v22312_v55  ;;  %v22319_v42 = vld [vmem:[#allocation33_spill] sm:$0xff] }
  0x61   :  { %22310 = vst [vmem:[#allocation9_spill] sm:$0xff] %v15925_v3  ;;  %v956_v15 = vand.u32 4294901760, %v955_v9  ;;  %348 = vrot.lane.b32.xlu0 %v22315_v32, %s14982_s23  ;;  %204 = vrot.lane.b32.xlu1 %v22316_v50, %s14985_s0  ;;  %v967_v7 = vsub.f32 %v22311_v40, %v22317_v43  ;;  %v21676_v14 = vand.u32 4294901760, %v22319_v42  ;;  %v22322_v3 = vld [vmem:[#allocation34_spill] sm:$0xff]  ;;  %vm5788_vm13 = vcmask 539648  }
  0x62   :  { %22313 = vst [vmem:[#allocation28_spill] sm:$0xff] %v15933_v21  ;;  %v950_v31 = vand.u32 4294901760, %v949_v49  ;;  %v979_v9 = vsub.f32 %v22312_v55, %v22318_v58  ;;  %v962_v45 = vand.u32 4294901760, %v961_v33  ;;  %v22321_v21 = vand.u32 4294901760, %v22314_v23  ;;  %13067 = vmatpush1.bf16.msra.mxu0 %v15811_v30  ;;  %v22329_v30 = vld [vmem:[#allocation41_spill] sm:$0xff] }
  0x63   :  { %v15950_v6 = vpack.c.bf16 %v956_v15, %v944_v18  ;;  %v21677_v50 = vand.u32 4294901760, %v22322_v3  ;;  %v968_v49 = vand.u32 4294901760, %v967_v7  ;;  %v985_v43 = vsub.f32 %v22319_v42, %v21676_v14  ;;  %13069 = vmatprep.subr.bf16.mxu0 %v15851_v16  ;;  %v22324_v15 = vld [vmem:[#allocation38_spill] sm:$0xff]  ;;  %v22325_v7 = vld [vmem:[#allocation19_spill] sm:$0xff] }
  0x64   :  { %v973_v32 = vsub.f32 %v22314_v23, %v22321_v21  ;;  %v980_v8 = vand.u32 4294901760, %v979_v9  ;;  %v15962_v18 = vpack.c.bf16 %v962_v45, %v950_v31  ;;  %v22326_v9 = vld [vmem:[#allocation20_spill] sm:$0xff]  ;;  %v22328_v16 = vand.u32 4294901760, %v15586_v48 }
  0x65   :  { %22320 = vst [vmem:[#allocation13_spill] sm:$0xff] %v15950_v6  ;;  %v991_v21 = vsub.f32 %v22322_v3, %v21677_v50  ;;  %v21680_v6 = vand.u32 4294901760, %v22324_v15  ;;  %254 = vrot.lane.b32.xlu0 %v22325_v7, %s14983_s24  ;;  %302 = vrot.lane.b32.xlu1 %v22326_v9, %s14984_s30  ;;  %v986_v58 = vand.u32 4294901760, %v985_v43  ;;  %v21681_v45 = vand.u32 4294901760, %v15602_v13  ;;  %v22330_v7 = vld [vmem:[#allocation42_spill] sm:$0xff]  ;;  %v22332_v43 = vld [vmem:[#allocation45_spill] sm:$0xff] }
  0x66   :  { %22323 = vst [vmem:[#allocation14_spill] sm:$0xff] %v15962_v18  ;;  %v974_v33 = vand.u32 4294901760, %v973_v32  ;;  %v15972_v14 = vpack.c.bf16 %v980_v8, %v968_v49  ;;  %v1003_v31 = vsub.f32 %v15586_v48, %v22328_v16  ;;  %v21682_v18 = vand.u32 4294901760, %v22329_v30 }
  0x67   :  { %v992_v32 = vand.u32 4294901760, %v991_v21  ;;  %v997_v50 = vsub.f32 %v22324_v15, %v21680_v6  ;;  %v21684_v19 = vand.u32 4294901760, %v22330_v7  ;;  %v1009_v49 = vsub.f32 %v15602_v13, %v21681_v45  ;;  %v22382_v15 = vld [vmem:[#allocation92_spill] sm:$0xff] }
  0x68   :  { %22327 = vst [vmem:[#allocation19_spill] sm:$0xff] %v15972_v14  ;;  %v15983_v53 = vpack.c.bf16 %v986_v58, %v974_v33  ;;  %v1004_v8 = vand.u32 4294901760, %v1003_v31  ;;  %v21688_v9 = vand.u32 4294901760, %v22332_v43  ;;  %v1015_v21 = vsub.f32 %v22329_v30, %v21682_v18  ;;  %v22333_v14 = vld [vmem:[#allocation46_spill] sm:$0xff]  ;;  %v22334_v58 = vld [vmem:[#allocation23_spill] sm:$0xff]  ;;  %v22335_v33 = vld [vmem:[#allocation24_spill] sm:$0xff] }
  0x69   :  { %v998_v16 = vand.u32 4294901760, %v997_v50  ;;  %v1027_v6 = vsub.f32 %v22330_v7, %v21684_v19  ;;  %v21689_v39 = vand.u32 4294901760, %v22333_v14  ;;  %350 = vrot.lane.b32.xlu0 %v22334_v58, %s14982_s23  ;;  %206 = vrot.lane.b32.xlu1 %v22335_v33, %s14985_s0  ;;  %v1010_v45 = vand.u32 4294901760, %v1009_v49  ;;  %v22337_v18 = vld [vmem:[#allocation48_spill] sm:$0xff]  ;;  %v22338_v7 = vld [vmem:[#allocation49_spill] sm:$0xff] }
  0x6a   :  { %22331 = vst [vmem:[#allocation20_spill] sm:$0xff] %v15983_v53  ;;  %v16000_v31 = vpack.c.bf16 %v1004_v8, %v992_v32  ;;  %v1021_v50 = vsub.f32 %v22332_v43, %v21688_v9  ;;  %v21691_v53 = vand.u32 4294901760, %v22337_v18  ;;  %v1016_v56 = vand.u32 4294901760, %v1015_v21  ;;  %v22340_v8 = vld [vmem:[#allocation50_spill] sm:$0xff]  ;;  %v22342_v21 = vld [vmem:[#allocation52_spill] sm:$0xff] }
  0x6b   :  { %v1028_v30 = vand.u32 4294901760, %v1027_v6  ;;  %v1033_v19 = vsub.f32 %v22333_v14, %v21689_v39  ;;  %v21692_v58 = vand.u32 4294901760, %v22338_v7  ;;  %v16010_v13 = vpack.c.bf16 %v1010_v45, %v998_v16  ;;  %v22343_v14 = vld [vmem:[#allocation25_spill] sm:$0xff]  ;;  %v22344_v45 = vld [vmem:[#allocation35_spill] sm:$0xff] }
  0x6c   :  { %22336 = vst [vmem:[#allocation23_spill] sm:$0xff] %v16000_v31  ;;  %v1022_v33 = vand.u32 4294901760, %v1021_v50  ;;  %v1039_v32 = vsub.f32 %v22337_v18, %v21691_v53  ;;  %v21694_v49 = vand.u32 4294901760, %v22340_v8  ;;  %v21695_v39 = vand.u32 4294901760, %v22342_v21 }
  0x6d   :  { %22339 = vst [vmem:[#allocation24_spill] sm:$0xff] %v16010_v13  ;;  %v16016_v9 = vpack.c.bf16 %v1028_v30, %v1016_v56  ;;  %v1034_v31 = vand.u32 4294901760, %v1033_v19  ;;  %v1051_v6 = vsub.f32 %v22338_v7, %v21692_v58  ;;  %256 = vrot.lane.b32.xlu0 %v22343_v14, %s14983_s24  ;;  %304 = vrot.lane.b32.xlu1 %v22344_v45, %s14984_s30  ;;  %v22345_v56 = vld [vmem:[#allocation53_spill] sm:$0xff]  ;;  %v22346_v19 = vld [vmem:[#allocation54_spill] sm:$0xff]  ;;  %v21699_v14 = vand.u32 4294901760, %v15688_v5  ;;  %s14995_s30 = smov 61  }
  0x6e   :  { %v1040_v16 = vand.u32 4294901760, %v1039_v32  ;;  %v1045_v50 = vsub.f32 %v22340_v8, %v21694_v49  ;;  %v21696_v30 = vand.u32 4294901760, %v22345_v56  ;;  %v21698_v53 = vand.u32 4294901760, %v22346_v19 }
  0x6f   :  { %22341 = vst [vmem:[#allocation95_spill] sm:$0xff] %v16016_v9  ;;  %v16031_v9 = vpack.c.bf16 %v1034_v31, %v1022_v33  ;;  %v1052_v58 = vand.u32 4294901760, %v1051_v6  ;;  %v1057_v13 = vsub.f32 %v22342_v21, %v21695_v39  ;;  %v21700_v49 = vand.u32 4294901760, %v15690_v11 }
  0x70   :  { %v1046_v7 = vand.u32 4294901760, %v1045_v50  ;;  %v1063_v32 = vsub.f32 %v22345_v56, %v21696_v30  ;;  %v1075_v45 = vsub.f32 %v22346_v19, %v21698_v53  ;;  %v1069_v6 = vsub.f32 %v15688_v5, %v21699_v14  ;;  %v22349_v50 = vld [vmem:[#allocation36_spill] sm:$0xff]  ;;  %v22350_v30 = vld [vmem:[#allocation43_spill] sm:$0xff]  ;;  %v22383_v19 = vld [vmem:[#allocation93_spill] sm:$0xff] }
  0x71   :  { %22347 = vst [vmem:[#allocation25_spill] sm:$0xff] %v16031_v9  ;;  %v16044_v31 = vpack.c.bf16 %v1052_v58, %v1040_v16  ;;  %v1058_v33 = vand.u32 4294901760, %v1057_v13  ;;  %v21703_v39 = vand.u32 4294901760, %v15698_v0  ;;  %352 = vrot.lane.b32.xlu0 %v22349_v50, %s14982_s23  ;;  %208 = vrot.lane.b32.xlu1 %v22350_v30, %s14985_s0  ;;  %v1081_v58 = vsub.f32 %v15690_v11, %v21700_v49  ;;  %s14996_s0 = smov 126  }
  0x72   :  { %v1064_v9 = vand.u32 4294901760, %v1063_v32  ;;  %v1076_v56 = vand.u32 4294901760, %v1075_v45  ;;  %v21706_v13 = vand.u32 4294901760, %v15700_v26  ;;  %v1070_v53 = vand.u32 4294901760, %v1069_v6  ;;  %v22353_v45 = vld [vmem:[#allocation64_spill] sm:$0xff] }
  0x73   :  { %22348 = vst [vmem:[#allocation35_spill] sm:$0xff] %v16044_v31  ;;  %v16058_v16 = vpack.c.bf16 %v1058_v33, %v1046_v7  ;;  %v1087_v14 = vsub.f32 %v15698_v0, %v21703_v39  ;;  %v21707_v50 = vand.u32 4294901760, %v15702_v27  ;;  %v1082_v30 = vand.u32 4294901760, %v1081_v58  ;;  %v22354_v33 = vld [vmem:[#allocation65_spill] sm:$0xff] }
  0x74   :  { %v16064_v31 = vpack.c.bf16 %v1076_v56, %v1064_v9  ;;  %v1099_v32 = vsub.f32 %v15700_v26, %v21706_v13  ;;  %v21710_v49 = vand.u32 4294901760, %v22353_v45  ;;  %v21712_v6 = vand.u32 4294901760, %v22354_v33 }
  0x75   :  { %22351 = vst [vmem:[#allocation36_spill] sm:$0xff] %v16058_v16  ;;  %v1088_v11 = vand.u32 4294901760, %v1087_v14  ;;  %v1093_v7 = vsub.f32 %v15702_v27, %v21707_v50  ;;  %v22355_v16 = vld [vmem:[#allocation68_spill] sm:$0xff]  ;;  %v16075_v0 = vpack.c.bf16 %v1082_v30, %v1070_v53  ;;  %v21718_v58 = vand.u32 4294901760, %v15743_v22 }
  0x76   :  { %22352 = vst [vmem:[#allocation43_spill] sm:$0xff] %v16064_v31  ;;  %v21716_v39 = vand.u32 4294901760, %v22355_v16  ;;  %v1100_v9 = vand.u32 4294901760, %v1099_v32  ;;  %v1105_v56 = vsub.f32 %v22353_v45, %v21710_v49  ;;  %v1111_v14 = vsub.f32 %v22354_v33, %v21712_v6  ;;  %v22357_v31 = vld [vmem:[#allocation73_spill] sm:$0xff]  ;;  %v22359_v49 = vld [vmem:[#allocation74_spill] sm:$0xff]  ;;  %v22360_v33 = vld [vmem:[#allocation76_spill] sm:$0xff] }
  0x77   :  { %22356 = vst [vmem:[#allocation96_spill] sm:$0xff] %v16075_v0  ;;  %v1094_v13 = vand.u32 4294901760, %v1093_v7  ;;  %v21719_v27 = vand.u32 4294901760, %v22357_v31  ;;  %v1117_v32 = vsub.f32 %v15743_v22, %v21718_v58  ;;  %v21720_v0 = vand.u32 4294901760, %v22359_v49 }
  0x78   :  { %v1123_v50 = vsub.f32 %v22355_v16, %v21716_v39  ;;  %v16088_v53 = vpack.c.bf16 %v1100_v9, %v1088_v11  ;;  %v1106_v30 = vand.u32 4294901760, %v1105_v56  ;;  %v1112_v7 = vand.u32 4294901760, %v1111_v14  ;;  %v22362_v9 = vld [vmem:[#allocation77_spill] sm:$0xff] }
  0x79   :  { %v1129_v6 = vsub.f32 %v22357_v31, %v21719_v27  ;;  %v21721_v26 = vand.u32 4294901760, %v22360_v33  ;;  %v1118_v16 = vand.u32 4294901760, %v1117_v32  ;;  %v1135_v11 = vsub.f32 %v22359_v49, %v21720_v0 }
  0x7a   :  { %22358 = vst [vmem:[#allocation97_spill] sm:$0xff] %v16088_v53  ;;  %v1124_v45 = vand.u32 4294901760, %v1123_v50  ;;  %v16098_v39 = vpack.c.bf16 %v1106_v30, %v1094_v13  ;;  %v21722_v56 = vand.u32 4294901760, %v22362_v9  ;;  %v21723_v14 = vand.u32 4294901760, %v15783_v34 }
  0x7b   :  { %v1130_v53 = vand.u32 4294901760, %v1129_v6  ;;  %v1147_v50 = vsub.f32 %v22360_v33, %v21721_v26  ;;  %v1136_v27 = vand.u32 4294901760, %v1135_v11  ;;  %v21724_v30 = vand.u32 4294901760, %v15787_v63  ;;  %v22398_v33 = vld [vmem:[#allocation28_spill] sm:$0xff] }
  0x7c   :  { %22361 = vst [vmem:[#allocation98_spill] sm:$0xff] %v16098_v39  ;;  %v16104_v58 = vpack.c.bf16 %v1124_v45, %v1112_v7  ;;  %v1141_v13 = vsub.f32 %v22362_v9, %v21722_v56  ;;  %v21725_v32 = vand.u32 4294901760, %v15790_v17  ;;  %v1153_v6 = vsub.f32 %v15783_v34, %v21723_v14 }
  0x7d   :  { %v16115_v0 = vpack.c.bf16 %v1130_v53, %v1118_v16  ;;  %v1148_v45 = vand.u32 4294901760, %v1147_v50  ;;  %v21728_v7 = vand.u32 4294901760, %v15792_v51  ;;  %v1159_v11 = vsub.f32 %v15787_v63, %v21724_v30 }
  0x7e   :  { %22363 = vst [vmem:[#allocation99_spill] sm:$0xff] %v16104_v58  ;;  %v1142_v26 = vand.u32 4294901760, %v1141_v13  ;;  %v1171_v56 = vsub.f32 %v15790_v17, %v21725_v32  ;;  %v21729_v58 = vand.u32 4294901760, %v15801_v62  ;;  %v1154_v53 = vand.u32 4294901760, %v1153_v6  ;;  %v22423_v63 = vld [vmem:[#allocation96_spill] sm:$0xff] }
  0x7f   :  { %22364 = vst [vmem:[#allocation100_spill] sm:$0xff] %v16115_v0  ;;  %v16128_v16 = vpack.c.bf16 %v1148_v45, %v1136_v27  ;;  %v1165_v50 = vsub.f32 %v15792_v51, %v21728_v7  ;;  %v21732_v14 = vand.u32 4294901760, %v15803_v47  ;;  %v1160_v13 = vand.u32 4294901760, %v1159_v11  ;;  %v22415_v51 = vld [vmem:[#allocation25_spill] sm:$0xff] }
  0x80   :  { %v1172_v0 = vand.u32 4294901760, %v1171_v56  ;;  %v1177_v30 = vsub.f32 %v15801_v62, %v21729_v58  ;;  %v21730_v39 = vand.u32 4294901760, %v15809_v25  ;;  %v16138_v32 = vpack.c.bf16 %v1154_v53, %v1142_v26 }
  0x81   :  { %v1166_v17 = vand.u32 4294901760, %v1165_v50  ;;  %v1183_v27 = vsub.f32 %v15803_v47, %v21732_v14  ;;  %v21731_v45 = vand.u32 4294901760, %v15813_v4  ;;  %v21733_v11 = vand.u32 4294901760, %v15816_v24  ;;  %v235_v50 = vpop.permute.xlu0 %234  ;;  %v14947_v14 = vld [vmem:[%s22198_s29 + $0x8] sm:$0xff]  ;;  %v22407_v47 = vld [vmem:[#allocation20_spill] sm:$0xff] }
  0x82   :  { %v16144_v6 = vpack.c.bf16 %v1172_v0, %v1160_v13  ;;  %v1178_v7 = vand.u32 4294901760, %v1177_v30  ;;  %v1195_v56 = vsub.f32 %v15809_v25, %v21730_v39  ;;  %vm5801_vm14 = vcmask 572416  }
  0x83   :  { %v1184_v58 = vand.u32 4294901760, %v1183_v27  ;;  %v1189_v26 = vsub.f32 %v15813_v4, %v21731_v45  ;;  %v1201_v13 = vsub.f32 %v15816_v24, %v21733_v11  ;;  %v331_v27 = vpop.permute.xlu1 %330  ;;  %vm5883_vm15 = vcmask 1041408  }
  0x84   :  { %v16157_v0 = vpack.c.bf16 %v1178_v7, %v1166_v17  ;;  %v1196_v30 = vand.u32 4294901760, %v1195_v56 }
  0x85   :  { %v1190_v39 = vand.u32 4294901760, %v1189_v26  ;;  %v1202_v7 = vand.u32 4294901760, %v1201_v13  ;;  %v283_v26 = vpop.permute.xlu0 %282 }
  0x86   :  { %v16170_v17 = vpack.c.bf16 %v1196_v30, %v1184_v58  ;;  %v393_v11 = vsel %vm392_vm4, %v235_v50, %v283_v26  ;;  %v22365_v30 = vld [vmem:[#allocation40_spill] sm:$0xff] }
  0x87   :  { %v16182_v58 = vpack.c.bf16 %v1202_v7, %v1190_v39  ;;  %v187_v45 = vpop.permute.xlu1 %186  ;;  %v14946_v39 = vld [vmem:[%s22198_s29] sm:$0xff]  ;;  %v406_v56 = vsel %vm405_vm6, %v393_v11, %v331_v27 }
  0x88   :  { %v367_v7 = vsel %vm366_vm5, %v14946_v39, %v187_v45  ;;  %v492_v13 = vsel %vm490_vm8, %v406_v56, 0  ;;  %v22429_v22 = vld [vmem:[#allocation100_spill] sm:$0xff] }
  0x89   :  { %v380_v53 = vsel %vm379_vm7, %v367_v7, %v235_v50  ;;  %v16202_v42 = vand.u32 4294901760, %v492_v13  ;;  %v237_v40 = vpop.permute.xlu0 %236 }
  0x8a   :  { %v16198_v3 = vand.u32 4294901760, %v380_v53 }
  0x8b   :  { %22369 = vst [vmem:[#allocation101_spill] sm:$0xff] %v16202_v42  ;;  %v285_v55 = vpop.permute.xlu1 %284  ;;  %v16210_v11 = vsub.f32 %v492_v13, %v16202_v42 }
  0x8c   :  { %22366 = vst [vmem:[#allocation40_spill] sm:$0xff] %v16198_v3  ;;  %v16205_v45 = vsub.f32 %v380_v53, %v16198_v3  ;;  %v394_v7 = vsel %vm392_vm4, %v237_v40, %v285_v55 }
  0x8d   :  { %22372 = vst [vmem:[#allocation103_spill] sm:$0xff] %v16210_v11  ;;  %v333_v26 = vpop.permute.xlu0 %332  ;;  %v21746_v23 = vand.u32 4294901760, %v16210_v11 }
  0x8e   :  { %22370 = vst [vmem:[#allocation102_spill] sm:$0xff] %v16205_v45  ;;  %v21743_v50 = vand.u32 4294901760, %v16205_v45  ;;  %v407_v53 = vsel %vm405_vm6, %v394_v7, %v333_v26 }
  0x8f   :  { %v189_v48 = vpop.permute.xlu1 %188  ;;  %v495_v55 = vsel %vm490_vm8, %v407_v53, 0  ;;  %v654_v26 = vsub.f32 %v16210_v11, %v21746_v23  ;;  %v22385_v23 = vld [vmem:[#allocation64_spill] sm:$0xff] }
  0x90   :  { %v368_v13 = vsel %vm366_vm5, %v14947_v14, %v189_v48  ;;  %v660_v43 = vsub.f32 %v16205_v45, %v21743_v50  ;;  %v16232_v7 = vand.u32 4294901760, %v495_v55 }
  0x91   :  { %v381_v18 = vsel %vm379_vm7, %v368_v13, %v237_v40  ;;  %v239_v39 = vpop.permute.xlu0 %238  ;;  %v655_v45 = vand.u32 4294901760, %v654_v26  ;;  %v22388_v13 = vld [vmem:[#allocation94_spill] sm:$0xff] }
  0x92   :  { %22374 = vst [vmem:[#allocation104_spill] sm:$0xff] %v16232_v7  ;;  %v16234_v27 = vand.u32 4294901760, %v381_v18  ;;  %v16239_v56 = vsub.f32 %v495_v55, %v16232_v7  ;;  %v661_v40 = vand.u32 4294901760, %v660_v43  ;;  %v14948_v43 = vld [vmem:[%s22198_s29 + $0x10] sm:$0xff] }
  0x93   :  { %v287_v50 = vpop.permute.xlu1 %286  ;;  %656 = vmatprep.mubr.f32.mxu0 %v655_v45 }
  0x94   :  { %22375 = vst [vmem:[#allocation105_spill] sm:$0xff] %v16234_v27  ;;  %22377 = vst [vmem:[#allocation106_spill] sm:$0xff] %v16239_v56  ;;  %v16242_v53 = vsub.f32 %v381_v18, %v16234_v27  ;;  %662 = vmatmul.mubr.f32.vlgmr.msra.gmra.mrb[0].mxu0 %v661_v40  ;;  %v21755_v11 = vand.u32 4294901760, %v16239_v56  ;;  %v395_v26 = vsel %vm392_vm4, %v239_v39, %v287_v50 }
  0x95   :  { %v335_v55 = vpop.permute.xlu0 %334  ;;  %13071 = vmatpush1.bf16.msra.mxu0 %v22382_v15 }
  0x96   :  { %22378 = vst [vmem:[#allocation107_spill] sm:$0xff] %v16242_v53  ;;  %v21758_v8 = vand.u32 4294901760, %v16242_v53  ;;  %v408_v18 = vsel %vm405_vm6, %v395_v26, %v335_v55  ;;  %v670_v40 = vsub.f32 %v16239_v56, %v21755_v11  ;;  %13073 = vmatprep.subr.bf16.mxu0 %v22383_v19  ;;  %v22384_v55 = vld [vmem:[#allocation62_spill] sm:$0xff] }
  0x97   :  { %v191_v21 = vpop.permute.xlu1 %190  ;;  %v498_v15 = vsel %vm490_vm8, %v408_v18, 0 }
  0x98   :  { %v369_v45 = vsel %vm366_vm5, %v14948_v43, %v191_v21  ;;  %v676_v50 = vsub.f32 %v16242_v53, %v21758_v8  ;;  %v16268_v48 = vand.u32 4294901760, %v498_v15  ;;  %v671_v43 = vand.u32 4294901760, %v670_v40  ;;  %v22390_v53 = vld [vmem:[#allocation68_spill] sm:$0xff] }
  0x99   :  { %v382_v26 = vsel %vm379_vm7, %v369_v45, %v239_v39  ;;  %13075 = vmatpush1.bf16.msra.mxu0 %v22388_v13  ;;  %v22393_v45 = vld [vmem:[#allocation22_spill] sm:$0xff] }
  0x9a   :  { %22386 = vst [vmem:[#allocation92_spill] sm:$0xff] %v16268_v48  ;;  %v16270_v21 = vand.u32 4294901760, %v382_v26  ;;  %v677_v5 = vand.u32 4294901760, %v676_v50  ;;  %v241_v11 = vpop.permute.xlu0 %240  ;;  %v16276_v18 = vsub.f32 %v498_v15, %v16268_v48  ;;  %672 = vmatprep.mubr.f32.mxu0 %v671_v43  ;;  %13077 = vmatprep.subr.bf16.mxu0 %v22393_v45  ;;  %v14949_v45 = vld [vmem:[%s22198_s29 + $0x18] sm:$0xff] }
  0x9b   :  { %v289_v56 = vpop.permute.xlu1 %288 }
  0x9c   :  { %22387 = vst [vmem:[#allocation93_spill] sm:$0xff] %v16270_v21  ;;  %22391 = vst [vmem:[#allocation94_spill] sm:$0xff] %v16276_v18  ;;  %v16279_v39 = vsub.f32 %v382_v26, %v16270_v21  ;;  %678 = vmatmul.mubr.f32.gmra.mrb[2].mxu0 %v677_v5  ;;  %v21766_v50 = vand.u32 4294901760, %v16276_v18  ;;  %v396_v15 = vsel %vm392_vm4, %v241_v11, %v289_v56  ;;  %v22394_v26 = vld [vmem:[#allocation6_spill] sm:$0xff] }
  0x9d   :  { %13079 = vmatpush1.bf16.msra.mxu0 %v22394_v26  ;;  %v22395_v26 = vld [vmem:[#allocation9_spill] sm:$0xff] }
  0x9e   :  { %22392 = vst [vmem:[#allocation108_spill] sm:$0xff] %v16279_v39  ;;  %v21769_v13 = vand.u32 4294901760, %v16279_v39  ;;  %v337_v14 = vpop.permute.xlu0 %336  ;;  %v686_v19 = vsub.f32 %v16276_v18, %v21766_v50  ;;  %13081 = vmatprep.subr.bf16.mxu0 %v22395_v26 }
  0x9f   :  { %v193_v8 = vpop.permute.xlu1 %192  ;;  %v409_v5 = vsel %vm405_vm6, %v396_v15, %v337_v14 }
  0xa0   :  { %v370_v40 = vsel %vm366_vm5, %v14949_v45, %v193_v8  ;;  %v692_v56 = vsub.f32 %v16279_v39, %v21769_v13  ;;  %v501_v43 = vsel %vm490_vm8, %v409_v5, 0  ;;  %v687_v34 = vand.u32 4294901760, %v686_v19 }
  0xa1   :  { %v383_v14 = vsel %vm379_vm7, %v370_v40, %v241_v11  ;;  %v16306_v15 = vand.u32 4294901760, %v501_v43  ;;  %13083 = vmatpush1.bf16.msra.mxu0 %v22398_v33  ;;  %v22402_v40 = vld [vmem:[#allocation13_spill] sm:$0xff] }
  0xa2   :  { %v16308_v9 = vand.u32 4294901760, %v383_v14  ;;  %v693_v8 = vand.u32 4294901760, %v692_v56  ;;  %v243_v45 = vpop.permute.xlu0 %242  ;;  %688 = vmatprep.mubr.f32.mxu0 %v687_v34  ;;  %13085 = vmatprep.subr.bf16.mxu0 %v22402_v40 }
  0xa3   :  { %22396 = vst [vmem:[#allocation22_spill] sm:$0xff] %v16306_v15  ;;  %v291_v49 = vpop.permute.xlu1 %290  ;;  %v16316_v5 = vsub.f32 %v501_v43, %v16306_v15  ;;  %v22403_v43 = vld [vmem:[#allocation14_spill] sm:$0xff] }
  0xa4   :  { %22397 = vst [vmem:[#allocation6_spill] sm:$0xff] %v16308_v9  ;;  %v16319_v11 = vsub.f32 %v383_v14, %v16308_v9  ;;  %694 = vmatmul.mubr.f32.gmra.mrb[4].mxu0 %v693_v8  ;;  %v397_v13 = vsel %vm392_vm4, %v243_v45, %v291_v49  ;;  %v14950_v8 = vld [vmem:[%s22198_s29 + $0x20] sm:$0xff] }
  0xa5   :  { %22400 = vst [vmem:[#allocation9_spill] sm:$0xff] %v16316_v5  ;;  %v21778_v19 = vand.u32 4294901760, %v16316_v5  ;;  %13087 = vmatpush1.bf16.msra.mxu0 %v22403_v43  ;;  %v22404_v43 = vld [vmem:[#allocation19_spill] sm:$0xff] }
  0xa6   :  { %22401 = vst [vmem:[#allocation28_spill] sm:$0xff] %v16319_v11  ;;  %v21779_v33 = vand.u32 4294901760, %v16319_v11  ;;  %v339_v26 = vpop.permute.xlu0 %338  ;;  %13089 = vmatprep.subr.bf16.mxu0 %v22404_v43 }
  0xa7   :  { %v195_v18 = vpop.permute.xlu1 %194  ;;  %v410_v34 = vsel %vm405_vm6, %v397_v13, %v339_v26  ;;  %v702_v56 = vsub.f32 %v16316_v5, %v21778_v19 }
  0xa8   :  { %v371_v40 = vsel %vm366_vm5, %v14950_v8, %v195_v18  ;;  %v708_v49 = vsub.f32 %v16319_v11, %v21779_v33  ;;  %v504_v14 = vsel %vm490_vm8, %v410_v34, 0  ;;  %v22410_v34 = vld [vmem:[#allocation23_spill] sm:$0xff]  ;;  %v22411_v11 = vld [vmem:[#allocation24_spill] sm:$0xff] }
  0xa9   :  { %v384_v13 = vsel %vm379_vm7, %v371_v40, %v243_v45  ;;  %v16344_v26 = vand.u32 4294901760, %v504_v14  ;;  %v703_v4 = vand.u32 4294901760, %v702_v56  ;;  %13091 = vmatpush1.bf16.msra.mxu0 %v22407_v47 }
  0xaa   :  { %v16346_v39 = vand.u32 4294901760, %v384_v13  ;;  %v709_v18 = vand.u32 4294901760, %v708_v49  ;;  %v245_v8 = vpop.permute.xlu0 %244  ;;  %13093 = vmatprep.subr.bf16.mxu0 %v22410_v34 }
  0xab   :  { %22405 = vst [vmem:[#allocation13_spill] sm:$0xff] %v16344_v26  ;;  %v16350_v19 = vsub.f32 %v504_v14, %v16344_v26  ;;  %704 = vmatprep.mubr.f32.mxu0 %v703_v4  ;;  %v14951_v14 = vld [vmem:[%s22198_s29 + $0x28] sm:$0xff] }
  0xac   :  { %22406 = vst [vmem:[#allocation14_spill] sm:$0xff] %v16346_v39  ;;  %v293_v24 = vpop.permute.xlu1 %292  ;;  %v16353_v33 = vsub.f32 %v384_v13, %v16346_v39  ;;  %710 = vmatmul.mubr.f32.gmra.mrb[6].mxu0 %v709_v18  ;;  %v22412_v18 = vld [vmem:[#allocation95_spill] sm:$0xff] }
  0xad   :  { %22408 = vst [vmem:[#allocation19_spill] sm:$0xff] %v16350_v19  ;;  %v21788_v45 = vand.u32 4294901760, %v16350_v19  ;;  %v398_v56 = vsel %vm392_vm4, %v245_v8, %v293_v24  ;;  %13095 = vmatpush1.bf16.msra.mxu0 %v22411_v11 }
  0xae   :  { %22409 = vst [vmem:[#allocation20_spill] sm:$0xff] %v16353_v33  ;;  %v21789_v40 = vand.u32 4294901760, %v16353_v33  ;;  %13097 = vmatprep.subr.bf16.mxu0 %v22412_v18 }
  0xaf   :  { %v718_v13 = vsub.f32 %v16350_v19, %v21788_v45 }
  0xb0   :  { %v724_v24 = vsub.f32 %v16353_v33, %v21789_v40  ;;  %v22419_v33 = vld [vmem:[#allocation36_spill] sm:$0xff] }
  0xb1   :  { %v341_v49 = vpop.permute.xlu0 %340  ;;  %v197_v43 = vpop.permute.xlu1 %196  ;;  %v719_v5 = vand.u32 4294901760, %v718_v13  ;;  %13099 = vmatpush1.bf16.msra.mxu0 %v22415_v51 }
  0xb2   :  { %v411_v47 = vsel %vm405_vm6, %v398_v56, %v341_v49  ;;  %v372_v4 = vsel %vm366_vm5, %v14951_v14, %v197_v43  ;;  %v725_v43 = vand.u32 4294901760, %v724_v24 }
  0xb3   :  { %v507_v11 = vsel %vm490_vm8, %v411_v47, 0  ;;  %v385_v34 = vsel %vm379_vm7, %v372_v4, %v245_v8  ;;  %720 = vmatprep.mubr.f32.mxu0 %v719_v5  ;;  %v22418_v47 = vld [vmem:[#allocation35_spill] sm:$0xff] }
  0xb4   :  { %v16374_v56 = vand.u32 4294901760, %v507_v11  ;;  %v16376_v49 = vand.u32 4294901760, %v385_v34  ;;  %13101 = vmatprep.subr.bf16.mxu0 %v22418_v47  ;;  %726 = vmatmul.mubr.f32.gmra.mrb[8].mxu0 %v725_v43  ;;  %v22420_v43 = vld [vmem:[#allocation43_spill] sm:$0xff] }
  0xb5   :  { %v247_v14 = vpop.permute.xlu0 %246  ;;  %v295_v25 = vpop.permute.xlu1 %294  ;;  %13103 = vmatpush1.bf16.msra.mxu0 %v22419_v33 }
  0xb6   :  { %22413 = vst [vmem:[#allocation23_spill] sm:$0xff] %v16374_v56  ;;  %22414 = vst [vmem:[#allocation24_spill] sm:$0xff] %v16376_v49  ;;  %v16380_v45 = vsub.f32 %v507_v11, %v16374_v56  ;;  %v16383_v40 = vsub.f32 %v385_v34, %v16376_v49  ;;  %v399_v13 = vsel %vm392_vm4, %v247_v14, %v295_v25  ;;  %v14952_v11 = vld [vmem:[%s22198_s29 + $0x30] sm:$0xff]  ;;  %13105 = vmatprep.subr.bf16.mxu0 %v22420_v43 }
  0xb8   :  { %22416 = vst [vmem:[#allocation95_spill] sm:$0xff] %v16380_v45  ;;  %22417 = vst [vmem:[#allocation25_spill] sm:$0xff] %v16383_v40  ;;  %v21798_v8 = vand.u32 4294901760, %v16380_v45  ;;  %v21799_v4 = vand.u32 4294901760, %v16383_v40 }
  0xb9   :  { %v343_v24 = vpop.permute.xlu0 %342  ;;  %13107 = vmatpush1.bf16.msra.mxu0 %v22423_v63 }
  0xba   :  { %v199_v18 = vpop.permute.xlu1 %198  ;;  %v412_v51 = vsel %vm405_vm6, %v399_v13, %v343_v24  ;;  %v734_v34 = vsub.f32 %v16380_v45, %v21798_v8  ;;  %v740_v25 = vsub.f32 %v16383_v40, %v21799_v4  ;;  %v22425_v40 = vld [vmem:[#allocation98_spill] sm:$0xff] }
  0xbb   :  { %v373_v5 = vsel %vm366_vm5, %v14952_v11, %v199_v18  ;;  %v510_v33 = vsel %vm490_vm8, %v412_v51, 0  ;;  %v22424_v51 = vld [vmem:[#allocation97_spill] sm:$0xff] }
  0xbc   :  { %v386_v47 = vsel %vm379_vm7, %v373_v5, %v247_v14  ;;  %v16404_v13 = vand.u32 4294901760, %v510_v33  ;;  %v735_v19 = vand.u32 4294901760, %v734_v34  ;;  %v741_v18 = vand.u32 4294901760, %v740_v25  ;;  %13109 = vmatprep.subr.bf16.mxu0 %v22424_v51 }
  0xbd   :  { %v16406_v24 = vand.u32 4294901760, %v386_v47  ;;  %v249_v11 = vpop.permute.xlu0 %248  ;;  %13111 = vmatpush1.bf16.msra.mxu0 %v22425_v40 }
  0xbe   :  { %22421 = vst [vmem:[#allocation35_spill] sm:$0xff] %v16404_v13  ;;  %v297_v62 = vpop.permute.xlu1 %296  ;;  %v16410_v8 = vsub.f32 %v510_v33, %v16404_v13  ;;  %736 = vmatprep.mubr.f32.mxu0 %v735_v19  ;;  %v14953_v33 = vld [vmem:[%s22198_s29 + $0x38] sm:$0xff] }
  0xbf   :  { %22422 = vst [vmem:[#allocation36_spill] sm:$0xff] %v16406_v24  ;;  %v16413_v4 = vsub.f32 %v386_v47, %v16406_v24  ;;  %742 = vmatmul.mubr.f32.gmra.mrb[10].mxu0 %v741_v18  ;;  %v400_v34 = vsel %vm392_vm4, %v249_v11, %v297_v62  ;;  %v22426_v18 = vld [vmem:[#allocation99_spill] sm:$0xff] }
  0xc0   :  { %v21806_v14 = vand.u32 4294901760, %v16410_v8  ;;  %13113 = vmatprep.subr.bf16.mxu0 %v22426_v18  ;;  %v14954_v18 = vld [vmem:[%s22198_s29 + $0x40] sm:$0xff] }
  0xc1   :  { %v21807_v5 = vand.u32 4294901760, %v16413_v4  ;;  %13115 = vmatpush1.bf16.msra.mxu0 %v22429_v22 }
  0xc2   :  { %v345_v25 = vpop.permute.xlu0 %344  ;;  %v750_v47 = vsub.f32 %v16410_v8, %v21806_v14  ;;  %13117 = vmatprep.subr.bf16.mxu0 %v16128_v16 }
  0xc3   :  { %v201_v43 = vpop.permute.xlu1 %200  ;;  %v413_v63 = vsel %vm405_vm6, %v400_v34, %v345_v25  ;;  %v756_v62 = vsub.f32 %v16413_v4, %v21807_v5 }
  0xc4   :  { %v374_v19 = vsel %vm366_vm5, %v14953_v33, %v201_v43  ;;  %v513_v40 = vsel %vm490_vm8, %v413_v63, 0  ;;  %v751_v45 = vand.u32 4294901760, %v750_v47 }
  0xc5   :  { %v387_v51 = vsel %vm379_vm7, %v374_v19, %v249_v11  ;;  %v16434_v34 = vand.u32 4294901760, %v513_v40  ;;  %v757_v43 = vand.u32 4294901760, %v756_v62  ;;  %13119 = vmatpush1.bf16.msra.mxu0 %v16138_v32 }
  0xc6   :  { %v16436_v25 = vand.u32 4294901760, %v387_v51  ;;  %752 = vmatprep.mubr.f32.mxu0 %v751_v45  ;;  %13121 = vmatprep.subr.bf16.mxu0 %v16144_v6 }
  0xc7   :  { %22427 = vst [vmem:[#allocation43_spill] sm:$0xff] %v16434_v34  ;;  %v251_v33 = vpop.permute.xlu0 %250  ;;  %v299_v50 = vpop.permute.xlu1 %298  ;;  %v16440_v14 = vsub.f32 %v513_v40, %v16434_v34  ;;  %758 = vmatmul.mubr.f32.gmra.mrb[12].mxu0 %v757_v43 }
  0xc8   :  { %22428 = vst [vmem:[#allocation96_spill] sm:$0xff] %v16436_v25  ;;  %v16443_v5 = vsub.f32 %v387_v51, %v16436_v25  ;;  %v401_v19 = vsel %vm392_vm4, %v251_v33, %v299_v50 }
  0xc9   :  { %22430 = vst [vmem:[#allocation97_spill] sm:$0xff] %v16440_v14  ;;  %v21808_v11 = vand.u32 4294901760, %v16440_v14  ;;  %13123 = vmatpush1.bf16.msra.mxu0 %v16157_v0 }
  0xca   :  { %22431 = vst [vmem:[#allocation98_spill] sm:$0xff] %v16443_v5  ;;  %v21809_v63 = vand.u32 4294901760, %v16443_v5  ;;  %13125 = vmatprep.subr.bf16.mxu0 %v16170_v17 }
  0xcb   :  { %v347_v47 = vpop.permute.xlu0 %346  ;;  %v203_v62 = vpop.permute.xlu1 %202  ;;  %v766_v16 = vsub.f32 %v16440_v14, %v21808_v11 }
  0xcc   :  { %v414_v22 = vsel %vm405_vm6, %v401_v19, %v347_v47  ;;  %v375_v45 = vsel %vm366_vm5, %v14954_v18, %v203_v62  ;;  %v772_v50 = vsub.f32 %v16443_v5, %v21809_v63 }
  0xcd   :  { %v516_v32 = vsel %vm490_vm8, %v414_v22, 0  ;;  %v388_v40 = vsel %vm379_vm7, %v375_v45, %v251_v33  ;;  %v767_v19 = vand.u32 4294901760, %v766_v16  ;;  %13127 = vmatpush1.bf16.msra.mxu0 %v16182_v58 }
  0xce   :  { %v16464_v51 = vand.u32 4294901760, %v516_v32  ;;  %v16466_v43 = vand.u32 4294901760, %v388_v40  ;;  %v773_v47 = vand.u32 4294901760, %v772_v50  ;;  %v14955_v50 = vld [vmem:[%s22198_s29 + $0x48] sm:$0xff] }
  0xcf   :  { %v253_v62 = vpop.permute.xlu0 %252  ;;  %v301_v18 = vpop.permute.xlu1 %300  ;;  %768 = vmatprep.mubr.f32.mxu0 %v767_v19  ;;  %v22436_v19 = vpack.c.bf16 %v15362_v46, %v15360_v37 }
  0xd0   :  { %22432 = vst [vmem:[#allocation99_spill] sm:$0xff] %v16464_v51  ;;  %22433 = vst [vmem:[#allocation100_spill] sm:$0xff] %v16466_v43  ;;  %v16470_v11 = vsub.f32 %v516_v32, %v16464_v51  ;;  %v16473_v63 = vsub.f32 %v388_v40, %v16466_v43  ;;  %774 = vmatmul.mubr.f32.gmra.mrb[14].mxu0 %v773_v47  ;;  %v402_v22 = vsel %vm392_vm4, %v253_v62, %v301_v18 }
  0xd1   :  { %13129 = vmatprep.subr.bf16.mxu0 %v22436_v19 }
  0xd2   :  { %22434 = vst [vmem:[#allocation109_spill] sm:$0xff] %v16470_v11  ;;  %22435 = vst [vmem:[#allocation110_spill] sm:$0xff] %v16473_v63  ;;  %v21810_v6 = vand.u32 4294901760, %v16470_v11  ;;  %v21813_v33 = vand.u32 4294901760, %v16473_v63 }
  0xd3   :  { %v349_v45 = vpop.permute.xlu0 %348  ;;  %v205_v16 = vpop.permute.xlu1 %204 }
  0xd4   :  { %v415_v0 = vsel %vm405_vm6, %v402_v22, %v349_v45  ;;  %v376_v32 = vsel %vm366_vm5, %v14955_v50, %v205_v16  ;;  %v782_v17 = vsub.f32 %v16470_v11, %v21810_v6  ;;  %v788_v40 = vsub.f32 %v16473_v63, %v21813_v33 }
  0xd5   :  { %v519_v58 = vsel %vm490_vm8, %v415_v0, 0  ;;  %v389_v47 = vsel %vm379_vm7, %v376_v32, %v253_v62 }
  0xd6   :  { %v16496_v18 = vand.u32 4294901760, %v519_v58  ;;  %v16498_v22 = vand.u32 4294901760, %v389_v47  ;;  %v783_v45 = vand.u32 4294901760, %v782_v17  ;;  %v789_v16 = vand.u32 4294901760, %v788_v40  ;;  %v14956_v40 = vld [vmem:[%s22198_s29 + $0x50] sm:$0xff] }
  0xd7   :  { %v255_v50 = vpop.permute.xlu0 %254  ;;  %v303_v6 = vpop.permute.xlu1 %302 }
  0xd8   :  { %22437 = vst [vmem:[#allocation111_spill] sm:$0xff] %v16496_v18  ;;  %22438 = vst [vmem:[#allocation112_spill] sm:$0xff] %v16498_v22  ;;  %v16501_v11 = vsub.f32 %v519_v58, %v16496_v18  ;;  %v16504_v33 = vsub.f32 %v389_v47, %v16498_v22  ;;  %784 = vmatprep.mubr.f32.mxu0 %v783_v45  ;;  %v403_v32 = vsel %vm392_vm4, %v255_v50, %v303_v6 }
  0xd9   :  { %790 = vmatmul.mubr.f32.gmra.mrb[16].mxu0 %v789_v16 }
  0xda   :  { %22439 = vst [vmem:[#allocation113_spill] sm:$0xff] %v16501_v11  ;;  %22440 = vst [vmem:[#allocation114_spill] sm:$0xff] %v16504_v33  ;;  %v21820_v0 = vand.u32 4294901760, %v16501_v11  ;;  %v21821_v62 = vand.u32 4294901760, %v16504_v33 }
  0xdb   :  { %v351_v19 = vpop.permute.xlu0 %350  ;;  %v207_v46 = vpop.permute.xlu1 %206 }
  0xdc   :  { %v416_v17 = vsel %vm405_vm6, %v403_v32, %v351_v19  ;;  %v377_v58 = vsel %vm366_vm5, %v14956_v40, %v207_v46  ;;  %v798_v47 = vsub.f32 %v16501_v11, %v21820_v0  ;;  %v804_v45 = vsub.f32 %v16504_v33, %v21821_v62 }
  0xdd   :  { %v522_v6 = vsel %vm490_vm8, %v416_v17, 0  ;;  %v390_v16 = vsel %vm379_vm7, %v377_v58, %v255_v50 }
  0xde   :  { %v16522_v37 = vand.u32 4294901760, %v522_v6  ;;  %v16524_v32 = vand.u32 4294901760, %v390_v16  ;;  %v799_v19 = vand.u32 4294901760, %v798_v47  ;;  %v805_v63 = vand.u32 4294901760, %v804_v45  ;;  %v14957_v45 = vld [vmem:[%s22198_s29 + $0x58] sm:$0xff] }
  0xdf   :  { %v257_v5 = vpop.permute.xlu0 %256  ;;  %v305_v46 = vpop.permute.xlu1 %304 }
  0xe0   :  { %22441 = vst [vmem:[#allocation115_spill] sm:$0xff] %v16522_v37  ;;  %22442 = vst [vmem:[#allocation116_spill] sm:$0xff] %v16524_v32  ;;  %v16527_v40 = vsub.f32 %v522_v6, %v16522_v37  ;;  %v16530_v0 = vsub.f32 %v390_v16, %v16524_v32  ;;  %800 = vmatprep.mubr.f32.mxu0 %v799_v19  ;;  %v404_v58 = vsel %vm392_vm4, %v257_v5, %v305_v46 }
  0xe1   :  { %806 = vmatmul.mubr.f32.gmra.mrb[18].mxu0 %v805_v63 }
  0xe2   :  { %22443 = vst [vmem:[#allocation117_spill] sm:$0xff] %v16527_v40  ;;  %22444 = vst [vmem:[#allocation118_spill] sm:$0xff] %v16530_v0  ;;  %v21831_v17 = vand.u32 4294901760, %v16527_v40  ;;  %v21828_v50 = vand.u32 4294901760, %v16530_v0 }
  0xe3   :  { %v353_v62 = vpop.permute.xlu0 %352  ;;  %v209_v33 = vpop.permute.xlu1 %208 }
  0xe4   :  { %v417_v47 = vsel %vm405_vm6, %v404_v58, %v353_v62  ;;  %v378_v6 = vsel %vm366_vm5, %v14957_v45, %v209_v33  ;;  %v814_v63 = vsub.f32 %v16527_v40, %v21831_v17  ;;  %v820_v16 = vsub.f32 %v16530_v0, %v21828_v50 }
  0xe5   :  { %v525_v19 = vsel %vm490_vm8, %v417_v47, 0  ;;  %v391_v46 = vsel %vm379_vm7, %v378_v6, %v257_v5  ;;  %vm7829_vm6 = vcmask 1031168   ;;  %vm8289_vm8 = vcmask 515072  }
  0xe6   :  { %v16548_v11 = vand.u32 4294901760, %v525_v19  ;;  %v16550_v62 = vand.u32 4294901760, %v391_v46  ;;  %v815_v58 = vand.u32 4294901760, %v814_v63  ;;  %v821_v14 = vand.u32 4294901760, %v820_v16 }
  0xe8   :  { %22445 = vst [vmem:[#allocation119_spill] sm:$0xff] %v16548_v11  ;;  %22446 = vst [vmem:[#allocation120_spill] sm:$0xff] %v16550_v62  ;;  %v16553_v33 = vsub.f32 %v525_v19, %v16548_v11  ;;  %v16556_v45 = vsub.f32 %v391_v46, %v16550_v62  ;;  %816 = vmatprep.mubr.f32.mxu0 %v815_v58  ;;  %v22450_v19 = vpack.c.bf16 %v15364_v38, %v15357_v28 }
  0xe9   :  { %822 = vmatmul.mubr.f32.gmra.mrb[20].mxu0 %v821_v14  ;;  %v22449_v14 = vpack.c.bf16 %v15333_v1, %v15331_v61  ;;  %v22451_v46 = vpack.c.bf16 %v15395_v57, %v15370_v20  ;;  %v22452_v58 = vpack.c.bf16 %v15411_v59, %v15409_v29 }
  0xea   :  { %22447 = vst [vmem:[#allocation121_spill] sm:$0xff] %v16553_v33  ;;  %22448 = vst [vmem:[#allocation122_spill] sm:$0xff] %v16556_v45  ;;  %v21830_v50 = vand.u32 4294901760, %v16553_v33  ;;  %v21829_v47 = vand.u32 4294901760, %v16556_v45 }
  0xec   :  { %v830_v5 = vsub.f32 %v16553_v33, %v21830_v50  ;;  %v836_v6 = vsub.f32 %v16556_v45, %v21829_v47  ;;  %v22465_v47 = vld [vmem:[#allocation34_spill] sm:$0xff] }
  0xee   :  { %v831_v63 = vand.u32 4294901760, %v830_v5  ;;  %v837_v16 = vand.u32 4294901760, %v836_v6  ;;  %v22453_v5 = vpack.c.bf16 %v15426_v10, %v15418_v52  ;;  %v22454_v6 = vpack.c.bf16 %v15448_v44, %v15431_v2 }
  0xf0   :  { %832 = vmatprep.mubr.f32.mxu0 %v831_v63  ;;  %v22455_v63 = vpack.c.bf16 %v15474_v60, %v15450_v12 }
  0xf1   :  { %838 = vmatmul.mubr.f32.gmra.mrb[22].mxu0 %v837_v16  ;;  %v22456_v16 = vpack.c.bf16 %v15520_v35, %v22304_v41 }
  0xf2   :  { %1209 = vmatprep.mubr.f32.mxu0 %v16202_v42  ;;  %v22503_v42 = vld [vmem:[#allocation81_spill] sm:$0xff] }
  0xf5   :  { %1211 = vmatmul.mubr.f32.vlgmr.msra.gmra.mrb[0].mxu0 %v16198_v3 }
  0xf6   :  { %13131 = vmatpush1.bf16.msra.mxu0 %v22449_v14  ;;  %1217 = vmatprep.mubr.f32.mxu0 %v16232_v7  ;;  %v22457_v14 = vpack.c.bf16 %v22309_v54, %v15530_v36  ;;  %v22499_v7 = vld [vmem:[#allocation79_spill] sm:$0xff] }
  0xf7   :  { %13133 = vmatprep.subr.bf16.mxu0 %v22450_v19  ;;  %v22458_v19 = vld [vmem:[#allocation30_spill] sm:$0xff] }
  0xf9   :  { %1219 = vmatmul.mubr.f32.gmra.mrb[2].mxu0 %v16234_v27 }
  0xfa   :  { %13135 = vmatpush1.bf16.msra.mxu0 %v22451_v46  ;;  %1225 = vmatprep.mubr.f32.mxu0 %v16268_v48  ;;  %v22459_v46 = vld [vmem:[#allocation29_spill] sm:$0xff] }
  0xfb   :  { %13137 = vmatprep.subr.bf16.mxu0 %v22452_v58  ;;  %v22460_v58 = vpack.c.bf16 %v22458_v19, %v22459_v46 }
  0xfd   :  { %1227 = vmatmul.mubr.f32.gmra.mrb[4].mxu0 %v16270_v21 }
  0xfe   :  { %13139 = vmatpush1.bf16.msra.mxu0 %v22453_v5  ;;  %1233 = vmatprep.mubr.f32.mxu0 %v16306_v15  ;;  %v22461_v5 = vld [vmem:[#allocation33_spill] sm:$0xff] }
  0xff   :  { %13141 = vmatprep.subr.bf16.mxu0 %v22454_v6  ;;  %v22462_v6 = vld [vmem:[#allocation31_spill] sm:$0xff] }
 0x101   :  { %1235 = vmatmul.mubr.f32.gmra.mrb[6].mxu0 %v16308_v9 }
 0x102   :  { %13143 = vmatpush1.bf16.msra.mxu0 %v22455_v63  ;;  %1241 = vmatprep.mubr.f32.mxu0 %v16344_v26  ;;  %v22463_v63 = vpack.c.bf16 %v22461_v5, %v22462_v6 }
 0x103   :  { %13145 = vmatprep.subr.bf16.mxu0 %v22456_v16  ;;  %v22464_v16 = vld [vmem:[#allocation37_spill] sm:$0xff] }
 0x104   :  { %v22466_v50 = vpack.c.bf16 %v22464_v16, %v22465_v47 }
 0x105   :  { %1243 = vmatmul.mubr.f32.gmra.mrb[8].mxu0 %v16346_v39 }
 0x106   :  { %13147 = vmatpush1.bf16.msra.mxu0 %v22457_v14  ;;  %1249 = vmatprep.mubr.f32.mxu0 %v16374_v56  ;;  %v22467_v14 = vld [vmem:[#allocation38_spill] sm:$0xff] }
 0x107   :  { %13149 = vmatprep.subr.bf16.mxu0 %v22460_v58  ;;  %v22468_v17 = vpack.c.bf16 %v22365_v30, %v22467_v14  ;;  %v22469_v58 = vld [vmem:[#allocation42_spill] sm:$0xff] }
 0x109   :  { %1251 = vmatmul.mubr.f32.gmra.mrb[10].mxu0 %v16376_v49  ;;  %v22470_v49 = vld [vmem:[#allocation41_spill] sm:$0xff] }
 0x10a   :  { %13151 = vmatpush1.bf16.msra.mxu0 %v22463_v63  ;;  %1257 = vmatprep.mubr.f32.mxu0 %v16404_v13  ;;  %v22471_v56 = vpack.c.bf16 %v22469_v58, %v22470_v49  ;;  %v22472_v63 = vld [vmem:[#allocation46_spill] sm:$0xff]  ;;  %v22473_v13 = vld [vmem:[#allocation45_spill] sm:$0xff] }
 0x10b   :  { %13153 = vmatprep.subr.bf16.mxu0 %v22466_v50  ;;  %v22474_v39 = vpack.c.bf16 %v22472_v63, %v22473_v13  ;;  %v22475_v50 = vld [vmem:[#allocation49_spill] sm:$0xff] }
 0x10d   :  { %1259 = vmatmul.mubr.f32.gmra.mrb[12].mxu0 %v16406_v24  ;;  %v22476_v24 = vld [vmem:[#allocation48_spill] sm:$0xff] }
 0x10e   :  { %13155 = vmatpush1.bf16.msra.mxu0 %v22468_v17  ;;  %1265 = vmatprep.mubr.f32.mxu0 %v16434_v34  ;;  %v22477_v26 = vpack.c.bf16 %v22475_v50, %v22476_v24  ;;  %v22478_v17 = vld [vmem:[#allocation52_spill] sm:$0xff]  ;;  %v22479_v34 = vld [vmem:[#allocation50_spill] sm:$0xff] }
 0x10f   :  { %13157 = vmatprep.subr.bf16.mxu0 %v22471_v56  ;;  %v22480_v9 = vpack.c.bf16 %v22478_v17, %v22479_v34  ;;  %v22481_v56 = vld [vmem:[#allocation54_spill] sm:$0xff] }
 0x111   :  { %1267 = vmatmul.mubr.f32.gmra.mrb[14].mxu0 %v16436_v25  ;;  %v22482_v25 = vld [vmem:[#allocation53_spill] sm:$0xff] }
 0x112   :  { %13159 = vmatpush1.bf16.msra.mxu0 %v22474_v39  ;;  %1273 = vmatprep.mubr.f32.mxu0 %v16464_v51  ;;  %v22483_v15 = vpack.c.bf16 %v22481_v56, %v22482_v25  ;;  %v22484_v39 = vld [vmem:[#allocation58_spill] sm:$0xff]  ;;  %v22485_v51 = vld [vmem:[#allocation57_spill] sm:$0xff]  ;;  %v22548_v56 = vld [vmem:[#allocation63_spill] sm:$0xff] }
 0x113   :  { %13161 = vmatprep.subr.bf16.mxu0 %v22477_v26  ;;  %v22486_v21 = vpack.c.bf16 %v22484_v39, %v22485_v51  ;;  %v22487_v26 = vld [vmem:[#allocation61_spill] sm:$0xff]  ;;  %v22544_v39 = vld [vmem:[#allocation56_spill] sm:$0xff]  ;;  %v22545_v51 = vld [vmem:[#allocation110_spill] sm:$0xff] }
 0x114   :  { %v22549_v25 = vld [vmem:[#allocation114_spill] sm:$0xff] }
 0x115   :  { %1275 = vmatmul.mubr.f32.gmra.mrb[16].mxu0 %v16466_v43  ;;  %v22488_v43 = vld [vmem:[#allocation60_spill] sm:$0xff] }
 0x116   :  { %13163 = vmatpush1.bf16.msra.mxu0 %v22480_v9  ;;  %1281 = vmatprep.mubr.f32.mxu0 %v16496_v18  ;;  %v22489_v48 = vpack.c.bf16 %v22487_v26, %v22488_v43  ;;  %v22490_v9 = vpack.c.bf16 %v22385_v23, %v22384_v55  ;;  %v22495_v18 = vld [vmem:[#allocation103_spill] sm:$0xff]  ;;  %v22512_v55 = vld [vmem:[#allocation90_spill] sm:$0xff] }
 0x117   :  { %13165 = vmatprep.subr.bf16.mxu0 %v22483_v15  ;;  %v22491_v15 = vld [vmem:[#allocation65_spill] sm:$0xff]  ;;  %v22511_v23 = vld [vmem:[#allocation91_spill] sm:$0xff]  ;;  %v22541_v43 = vld [vmem:[#allocation98_spill] sm:$0xff] }
 0x118   :  { %v22540_v26 = vld [vmem:[#allocation51_spill] sm:$0xff] }
 0x119   :  { %1283 = vmatmul.mubr.f32.gmra.mrb[18].mxu0 %v16498_v22  ;;  %v22492_v22 = vpack.c.bf16 %v22390_v53, %v22491_v15 }
 0x11a   :  { %13167 = vmatpush1.bf16.msra.mxu0 %v22486_v21  ;;  %1289 = vmatprep.mubr.f32.mxu0 %v16522_v37  ;;  %v22493_v21 = vld [vmem:[#allocation71_spill] sm:$0xff] }
 0x11b   :  { %13169 = vmatprep.subr.bf16.mxu0 %v22489_v48  ;;  %v22494_v37 = vpack.c.bf16 %v22357_v31, %v22493_v21  ;;  %v22496_v48 = vld [vmem:[#allocation76_spill] sm:$0xff] }
 0x11c   :  { %v22508_v31 = vld [vmem:[#allocation88_spill] sm:$0xff] }
 0x11d   :  { %1291 = vmatmul.mubr.f32.gmra.mrb[20].mxu0 %v16524_v32  ;;  %v22497_v32 = vld [vmem:[#allocation74_spill] sm:$0xff] }
 0x11e   :  { %13171 = vmatpush1.bf16.msra.mxu0 %v22490_v9  ;;  %1297 = vmatprep.mubr.f32.mxu0 %v16548_v11  ;;  %v22498_v27 = vpack.c.bf16 %v22496_v48, %v22497_v32  ;;  %v22500_v9 = vld [vmem:[#allocation77_spill] sm:$0xff]  ;;  %v22502_v11 = vld [vmem:[#allocation82_spill] sm:$0xff]  ;;  %v22513_v48 = vpack.c.bf16 %v22511_v23, %v22512_v55  ;;  %v22523_v23 = vld [vmem:[#allocation108_spill] sm:$0xff] }
 0x11f   :  { %13173 = vmatprep.subr.bf16.mxu0 %v22492_v22  ;;  %v22501_v3 = vpack.c.bf16 %v22499_v7, %v22500_v9  ;;  %v22504_v53 = vpack.c.bf16 %v22502_v11, %v22503_v42  ;;  %v22505_v22 = vld [vmem:[#allocation85_spill] sm:$0xff]  ;;  %v22515_v7 = vld [vmem:[#allocation102_spill] sm:$0xff]  ;;  %v22517_v11 = vld [vmem:[#allocation8_spill] sm:$0xff] }
 0x120   :  { %v22526_v55 = vld [vmem:[#allocation18_spill] sm:$0xff]  ;;  %v22531_v42 = vld [vmem:[#allocation20_spill] sm:$0xff]  ;;  %v22535_v32 = vld [vmem:[#allocation25_spill] sm:$0xff] }
 0x121   :  { %1299 = vmatmul.mubr.f32.gmra.mrb[22].mxu0 %v16550_v62  ;;  %v22506_v62 = vld [vmem:[#allocation83_spill] sm:$0xff]  ;;  %v22534_v9 = vld [vmem:[#allocation32_spill] sm:$0xff] }
 0x122   :  { %13175 = vmatpush1.bf16.msra.mxu0 %v22494_v37  ;;  %1491 = vmatprep.mubr.f32.mxu0 %v22495_v18  ;;  %v22507_v15 = vpack.c.bf16 %v22505_v22, %v22506_v62  ;;  %v22509_v37 = vld [vmem:[#allocation86_spill] sm:$0xff]  ;;  %v22519_v22 = vld [vmem:[#allocation107_spill] sm:$0xff] }
 0x123   :  { %13177 = vmatprep.subr.bf16.mxu0 %v22498_v27  ;;  %v22510_v21 = vpack.c.bf16 %v22508_v31, %v22509_v37  ;;  %v22514_v27 = vld [vmem:[#allocation7_spill] sm:$0xff]  ;;  %v22527_v37 = vld [vmem:[#allocation28_spill] sm:$0xff]  ;;  %v22530_v62 = vld [vmem:[#allocation26_spill] sm:$0xff] }
 0x124   :  { %v22521_v31 = vld [vmem:[#allocation15_spill] sm:$0xff] }
 0x126   :  { %13179 = vmatpush1.bf16.msra.mxu0 %v22501_v3  ;;  %v22516_v3 = vld [vmem:[#allocation106_spill] sm:$0xff] }
 0x127   :  { %13181 = vmatprep.subr.bf16.mxu0 %v22504_v53  ;;  %v22518_v53 = vld [vmem:[#allocation10_spill] sm:$0xff] }
 0x12a   :  { %13183 = vmatpush1.bf16.msra.mxu0 %v22507_v15  ;;  %v22520_v15 = vld [vmem:[#allocation94_spill] sm:$0xff] }
 0x12b   :  { %13185 = vmatprep.subr.bf16.mxu0 %v22510_v21  ;;  %v22522_v21 = vld [vmem:[#allocation16_spill] sm:$0xff] }
 0x12e   :  { %13187 = vmatpush1.bf16.msra.mxu0 %v22513_v48  ;;  %v22524_v48 = vld [vmem:[#allocation9_spill] sm:$0xff] }
 0x12f   :  { %13189 = vmatprep.subr.bf16.mxu0 %v22514_v27  ;;  %v22525_v27 = vld [vmem:[#allocation17_spill] sm:$0xff] }
 0x131   :  { %1494 = vmatmul.mubr.f32.vlgmr.msra.gmra.mrb[0].mxu0 %v22515_v7 }
 0x132   :  { %1501 = vmatprep.mubr.f32.mxu0 %v22516_v3  ;;  %13191 = vmatpush1.bf16.msra.mxu0 %v22517_v11  ;;  %v22528_v11 = vld [vmem:[#allocation19_spill] sm:$0xff] }
 0x133   :  { %13193 = vmatprep.subr.bf16.mxu0 %v22518_v53  ;;  %v22529_v53 = vld [vmem:[#allocation21_spill] sm:$0xff] }
 0x135   :  { %1504 = vmatmul.mubr.f32.gmra.mrb[2].mxu0 %v22519_v22 }
 0x136   :  { %1511 = vmatprep.mubr.f32.mxu0 %v22520_v15  ;;  %13195 = vmatpush1.bf16.msra.mxu0 %v22521_v31  ;;  %v22532_v31 = vld [vmem:[#allocation95_spill] sm:$0xff] }
 0x137   :  { %13197 = vmatprep.subr.bf16.mxu0 %v22522_v21  ;;  %v22533_v21 = vld [vmem:[#allocation27_spill] sm:$0xff] }
 0x139   :  { %1514 = vmatmul.mubr.f32.gmra.mrb[4].mxu0 %v22523_v23 }
 0x13a   :  { %1521 = vmatprep.mubr.f32.mxu0 %v22524_v48  ;;  %13199 = vmatpush1.bf16.msra.mxu0 %v22525_v27  ;;  %v22537_v27 = vld [vmem:[#allocation44_spill] sm:$0xff] }
 0x13b   :  { %13201 = vmatprep.subr.bf16.mxu0 %v22526_v55  ;;  %v22536_v55 = vld [vmem:[#allocation39_spill] sm:$0xff] }
 0x13d   :  { %1524 = vmatmul.mubr.f32.gmra.mrb[6].mxu0 %v22527_v37 }
 0x13e   :  { %1531 = vmatprep.mubr.f32.mxu0 %v22528_v11  ;;  %13203 = vmatpush1.bf16.msra.mxu0 %v22529_v53  ;;  %v22538_v53 = vld [vmem:[#allocation97_spill] sm:$0xff] }
 0x13f   :  { %13205 = vmatprep.subr.bf16.mxu0 %v22530_v62  ;;  %v22539_v62 = vld [vmem:[#allocation47_spill] sm:$0xff] }
 0x141   :  { %1534 = vmatmul.mubr.f32.gmra.mrb[8].mxu0 %v22531_v42 }
 0x142   :  { %1541 = vmatprep.mubr.f32.mxu0 %v22532_v31  ;;  %13207 = vmatpush1.bf16.msra.mxu0 %v22533_v21  ;;  %v22542_v21 = vld [vmem:[#allocation109_spill] sm:$0xff] }
 0x143   :  { %13209 = vmatprep.subr.bf16.mxu0 %v22534_v9  ;;  %v22543_v9 = vld [vmem:[#allocation55_spill] sm:$0xff] }
 0x145   :  { %1544 = vmatmul.mubr.f32.gmra.mrb[10].mxu0 %v22535_v32 }
 0x146   :  { %1551 = vmatprep.mubr.f32.mxu0 %v16410_v8  ;;  %13211 = vmatpush1.bf16.msra.mxu0 %v22536_v55  ;;  %v22546_v55 = vld [vmem:[#allocation113_spill] sm:$0xff] }
 0x147   :  { %13213 = vmatprep.subr.bf16.mxu0 %v22537_v27  ;;  %v22547_v27 = vld [vmem:[#allocation59_spill] sm:$0xff] }
 0x149   :  { %1554 = vmatmul.mubr.f32.gmra.mrb[12].mxu0 %v16413_v4 }
 0x14a   :  { %1561 = vmatprep.mubr.f32.mxu0 %v22538_v53  ;;  %13215 = vmatpush1.bf16.msra.mxu0 %v22539_v62  ;;  %v22551_v62 = vld [vmem:[#allocation67_spill] sm:$0xff] }
 0x14b   :  { %13217 = vmatprep.subr.bf16.mxu0 %v22540_v26  ;;  %v22550_v26 = vld [vmem:[#allocation66_spill] sm:$0xff] }
 0x14d   :  { %1564 = vmatmul.mubr.f32.gmra.mrb[14].mxu0 %v22541_v43 }
 0x14e   :  { %1571 = vmatprep.mubr.f32.mxu0 %v22542_v21  ;;  %13219 = vmatpush1.bf16.msra.mxu0 %v22543_v9  ;;  %v22553_v9 = vld [vmem:[#allocation70_spill] sm:$0xff] }
 0x14f   :  { %13221 = vmatprep.subr.bf16.mxu0 %v22544_v39  ;;  %v22552_v39 = vld [vmem:[#allocation69_spill] sm:$0xff] }
 0x151   :  { %1574 = vmatmul.mubr.f32.gmra.mrb[16].mxu0 %v22545_v51  ;;  %v22565_v51 = vld [vmem:[#allocation89_spill] sm:$0xff] }
 0x152   :  { %1581 = vmatprep.mubr.f32.mxu0 %v22546_v55  ;;  %13223 = vmatpush1.bf16.msra.mxu0 %v22547_v27  ;;  %v22554_v27 = vld [vmem:[#allocation72_spill] sm:$0xff] }
 0x153   :  { %13225 = vmatprep.subr.bf16.mxu0 %v22548_v56  ;;  %v22555_v56 = vand.u32 4294901760, %v22495_v18  ;;  %v22566_v18 = vand.u32 4294901760, %v15331_v61  ;;  %v22573_v61 = vand.u32 4294901760, %v15395_v57  ;;  %v22580_v57 = vand.u32 4294901760, %v15431_v2 }
 0x154   :  { %v22587_v2 = vand.u32 4294901760, %v15520_v35  ;;  %v22594_v35 = vand.u32 4294901760, %v22531_v42  ;;  %v22601_v42 = vand.u32 4294901760, %v16410_v8  ;;  %v22608_v8 = vand.u32 4294901760, %v22473_v13 }
 0x155   :  { %1584 = vmatmul.mubr.f32.gmra.mrb[18].mxu0 %v22549_v25  ;;  %v22615_v13 = vand.u32 4294901760, %v22478_v17  ;;  %v22628_v17 = vld [vmem:[#allocation60_spill] sm:$0xff] }
 0x156   :  { %1591 = vmatprep.mubr.f32.mxu0 %v16527_v40  ;;  %13227 = vmatpush1.bf16.msra.mxu0 %v22550_v26  ;;  %v22556_v40 = vld [vmem:[#allocation75_spill] sm:$0xff]  ;;  %v22557_v26 = vld [vmem:[#allocation78_spill] sm:$0xff] }
 0x157   :  { %13229 = vmatprep.subr.bf16.mxu0 %v22551_v62  ;;  %v22558_v62 = vld [vmem:[#allocation80_spill] sm:$0xff] }
 0x159   :  { %1594 = vmatmul.mubr.f32.gmra.mrb[20].mxu0 %v16530_v0  ;;  %v22559_v0 = vld [vmem:[#allocation84_spill] sm:$0xff] }
 0x15a   :  { %1601 = vmatprep.mubr.f32.mxu0 %v16553_v33  ;;  %13231 = vmatpush1.bf16.msra.mxu0 %v22552_v39  ;;  %v22560_v33 = vld [vmem:[#allocation87_spill] sm:$0xff] }
 0x15b   :  { %13233 = vmatprep.subr.bf16.mxu0 %v22553_v9  ;;  %v22561_v39 = vld [vmem:[#allocation11_spill] sm:$0xff]  ;;  %v22563_v9 = vld [vmem:[#allocation12_spill] sm:$0xff] }
 0x15c   :  { %v22562_v25 = vand.u32 4294901760, %v22561_v39  ;;  %v22564_v55 = vand.u32 4294901760, %v22563_v9  ;;  %v22571_v39 = vand.u32 4294901760, %v22516_v3  ;;  %v22590_v3 = vand.u32 4294901760, %v15530_v36 }
 0x15d   :  { %1604 = vmatmul.mubr.f32.gmra.mrb[22].mxu0 %v16556_v45  ;;  %v22597_v36 = vand.u32 4294901760, %v22461_v5  ;;  %v22604_v5 = vand.u32 4294901760, %v22470_v49  ;;  %v22611_v49 = vand.u32 4294901760, %v22475_v50  ;;  %v22620_v50 = vld [vmem:[#allocation110_spill] sm:$0xff] }
 0x15e   :  { %13235 = vmatpush1.bf16.msra.mxu0 %v22554_v27  ;;  %1737 = vmatprep.mubr.f32.mxu0 %v22555_v56  ;;  %v13248_v45 = vpack.c.bf16 %v22564_v55, %v22562_v25  ;;  %v22567_v56 = vand.u32 4294901760, %v15333_v1  ;;  %v22572_v55 = vand.u32 4294901760, %v15370_v20  ;;  %v22574_v1 = vand.u32 4294901760, %v15409_v29 }
 0x15f   :  { %13237 = vmatprep.subr.bf16.mxu0 %v22556_v40  ;;  %v22579_v20 = vand.u32 4294901760, %v15426_v10  ;;  %v22581_v29 = vand.u32 4294901760, %v15448_v44  ;;  %v22586_v10 = vand.u32 4294901760, %v22304_v41  ;;  %v22588_v44 = vand.u32 4294901760, %v22527_v37 }
 0x160   :  { %v13250_v40 = vpack.c.bf16 %v22567_v56, %v22566_v18  ;;  %v13254_v25 = vpack.c.bf16 %v22573_v61, %v22572_v55  ;;  %v22593_v41 = vand.u32 4294901760, %v22458_v19  ;;  %v22595_v37 = vand.u32 4294901760, %v22532_v31 }
 0x161   :  { %v22600_v19 = vand.u32 4294901760, %v22535_v32  ;;  %v22602_v31 = vand.u32 4294901760, %v22467_v14  ;;  %v22607_v32 = vand.u32 4294901760, %v22538_v53  ;;  %v22609_v14 = vand.u32 4294901760, %v22472_v63  ;;  %v22616_v63 = vld [vmem:[#allocation53_spill] sm:$0xff] }
 0x162   :  { %13239 = vmatpush1.bf16.msra.mxu0 %v22557_v26  ;;  %v22568_v26 = vand.u32 4294901760, %v15357_v28  ;;  %v22575_v28 = vand.u32 4294901760, %v15411_v59  ;;  %v22582_v59 = vand.u32 4294901760, %v22523_v23  ;;  %v22589_v23 = vand.u32 4294901760, %v22528_v11 }
 0x163   :  { %13241 = vmatprep.subr.bf16.mxu0 %v22558_v62  ;;  %v22569_v62 = vand.u32 4294901760, %v15364_v38  ;;  %v22576_v38 = vand.u32 4294901760, %v22519_v22  ;;  %v13264_v22 = vpack.c.bf16 %v22587_v2, %v22586_v10  ;;  %v22596_v11 = vand.u32 4294901760, %v22462_v6  ;;  %v22635_v10 = vld [vmem:[#allocation117_spill] sm:$0xff] }
 0x164   :  { %v22603_v6 = vand.u32 4294901760, %v22365_v30  ;;  %v13278_v61 = vpack.c.bf16 %v22609_v14, %v22608_v8  ;;  %v22610_v30 = vand.u32 4294901760, %v22476_v24  ;;  %v22614_v53 = vand.u32 4294901760, %v22479_v34  ;;  %v22657_v14 = vld [vmem:[#allocation122_spill] sm:$0xff] }
 0x165   :  { %v13270_v18 = vpack.c.bf16 %v22597_v36, %v22596_v11  ;;  %v22636_v2 = vand.u32 4294901760, %v22635_v10  ;;  %v14986_v11 = vmov 0   ;;  %v22645_v36 = vld [vmem:[#allocation118_spill] sm:$0xff] }
 0x166   :  { %13243 = vmatpush1.bf16.msra.mxu0 %v22559_v0  ;;  %v13252_v0 = vpack.c.bf16 %v22569_v62, %v22568_v26  ;;  %v22584_v26 = vand.u32 4294901760, %v15450_v12  ;;  %v22591_v12 = vand.u32 4294901760, %v22309_v54  ;;  %v22598_v54 = vand.u32 4294901760, %v22465_v47  ;;  %14941 = vset.pattern.permute.xlu0 %v14986_v11 }
 0x167   :  { %13245 = vmatprep.subr.bf16.mxu0 %v22560_v33  ;;  %v22570_v33 = vand.u32 4294901760, %v22515_v7  ;;  %v22577_v7 = vand.u32 4294901760, %v22520_v15  ;;  %v22605_v47 = vand.u32 4294901760, %v22469_v58  ;;  %v22612_v58 = vand.u32 4294901760, %v22541_v43  ;;  %v22622_v43 = vld [vmem:[#allocation113_spill] sm:$0xff]  ;;  %14942 = vset.pattern.permute.xlu1 %v14986_v11 }
 0x168   :  { %v13266_v15 = vpack.c.bf16 %v22591_v12, %v22590_v3  ;;  %v22689_v11 = vld [vmem:[#allocation93_spill] sm:$0xff] }
 0x169   :  { %v13276_v55 = vpack.c.bf16 %v22605_v47, %v22604_v5  ;;  %v2467_v5 = vld [vmem:[%s22634_s1 + $0x10] sm:$0xff] }
 0x16a   :  { %13247 = vmatpush1.bf16.msra.mxu0 %v22565_v51  ;;  %v22653_v47 = vld [vmem:[#allocation74_spill] sm:$0xff] }
 0x16b   :  { %13249 = vmatprep.subr.bf16.mxu0 %v13248_v45  ;;  %v13256_v45 = vpack.c.bf16 %v22575_v28, %v22574_v1  ;;  %v13282_v1 = vpack.c.bf16 %v22615_v13, %v22614_v53  ;;  %v22617_v28 = vand.u32 4294901760, %v22616_v63  ;;  %v22664_v63 = vld [vmem:[#allocation81_spill] sm:$0xff] }
 0x16d   :  { %1741 = vmatmul.mubr.f32.vlgmr.msra.gmra.mrb[0].mxu0 %v22570_v33  ;;  %v22583_v33 = vand.u32 4294901760, %v22524_v48 }
 0x16e   :  { %1749 = vmatprep.mubr.f32.mxu0 %v22571_v39  ;;  %13251 = vmatpush1.bf16.msra.mxu0 %v13250_v40  ;;  %v22578_v40 = vand.u32 4294901760, %v15418_v52  ;;  %v22585_v52 = vand.u32 4294901760, %v15474_v60  ;;  %v22592_v60 = vand.u32 4294901760, %v22459_v46  ;;  %v22599_v46 = vand.u32 4294901760, %v22464_v16 }
 0x16f   :  { %13253 = vmatprep.subr.bf16.mxu0 %v13252_v0  ;;  %v13260_v0 = vpack.c.bf16 %v22581_v29, %v22580_v57  ;;  %v13274_v39 = vpack.c.bf16 %v22603_v6, %v22602_v31  ;;  %v22606_v16 = vand.u32 4294901760, %v16413_v4  ;;  %v22613_v4 = vand.u32 4294901760, %v22542_v21  ;;  %v22624_v21 = vld [vmem:[#allocation57_spill] sm:$0xff] }
 0x170   :  { %v13258_v62 = vpack.c.bf16 %v22579_v20, %v22578_v40  ;;  %v13262_v9 = vpack.c.bf16 %v22585_v52, %v22584_v26  ;;  %v13268_v48 = vpack.c.bf16 %v22593_v41, %v22592_v60  ;;  %v13272_v56 = vpack.c.bf16 %v22599_v46, %v22598_v54  ;;  %v22632_v26 = vld [vmem:[#allocation114_spill] sm:$0xff]  ;;  %v22641_v60 = vld [vmem:[#allocation65_spill] sm:$0xff]  ;;  %v2468_v54 = vld [vmem:[%s22634_s1 + $0x18] sm:$0xff] }
 0x171   :  { %1753 = vmatmul.mubr.f32.gmra.mrb[2].mxu0 %v22576_v38  ;;  %v22623_v40 = vand.u32 4294901760, %v22622_v43  ;;  %v22625_v20 = vand.u32 4294901760, %v22624_v21  ;;  %v22629_v29 = vand.u32 4294901760, %v22628_v17  ;;  %v22633_v52 = vand.u32 4294901760, %v22632_v26  ;;  %v22647_v46 = vld [vmem:[#allocation121_spill] sm:$0xff]  ;;  %v22674_v17 = vld [vmem:[#allocation88_spill] sm:$0xff] }
 0x172   :  { %1761 = vmatprep.mubr.f32.mxu0 %v22577_v7  ;;  %13255 = vmatpush1.bf16.msra.mxu0 %v13254_v25  ;;  %v13280_v25 = vpack.c.bf16 %v22611_v49, %v22610_v30  ;;  %v22621_v7 = vand.u32 4294901760, %v22620_v50  ;;  %v22642_v41 = vand.u32 4294901760, %v22641_v60  ;;  %v22651_v31 = vld [vmem:[#allocation73_spill] sm:$0xff]  ;;  %v2472_v50 = vld [vmem:[%s22634_s1 + $0x38] sm:$0xff]  ;;  %v22684_v60 = vld [vmem:[#allocation10_spill] sm:$0xff] }
 0x173   :  { %13257 = vmatprep.subr.bf16.mxu0 %v13256_v45  ;;  %v22618_v45 = vld [vmem:[#allocation54_spill] sm:$0xff]  ;;  %v22652_v6 = vand.u32 4294901760, %v22651_v31  ;;  %v22659_v49 = vld [vmem:[#allocation101_spill] sm:$0xff] }
 0x174   :  { %v22619_v24 = vand.u32 4294901760, %v22618_v45  ;;  %v2470_v30 = vld [vmem:[%s22634_s1 + $0x28] sm:$0xff] }
 0x175   :  { %1765 = vmatmul.mubr.f32.gmra.mrb[4].mxu0 %v22582_v59  ;;  %v22666_v45 = vld [vmem:[#allocation82_spill] sm:$0xff] }
 0x176   :  { %1773 = vmatprep.mubr.f32.mxu0 %v22583_v33  ;;  %13259 = vmatpush1.bf16.msra.mxu0 %v13258_v62  ;;  %v13284_v38 = vpack.c.bf16 %v22619_v24, %v22617_v28  ;;  %v22626_v62 = vld [vmem:[#allocation58_spill] sm:$0xff]  ;;  %v22665_v28 = vand.u32 4294901760, %v22664_v63  ;;  %v22667_v24 = vand.u32 4294901760, %v22666_v45  ;;  %v22715_v63 = vld [vmem:[#allocation59_spill] sm:$0xff]  ;;  %v22717_v45 = vld [vmem:[#allocation112_spill] sm:$0xff] }
 0x177   :  { %13261 = vmatprep.subr.bf16.mxu0 %v13260_v0  ;;  %v22627_v34 = vand.u32 4294901760, %v22626_v62  ;;  %v22630_v0 = vld [vmem:[#allocation61_spill] sm:$0xff]  ;;  %v2471_v62 = vld [vmem:[%s22634_s1 + $0x30] sm:$0xff] }
 0x178   :  { %v22631_v59 = vand.u32 4294901760, %v22630_v0  ;;  %v22697_v31 = vld [vmem:[#allocation14_spill] sm:$0xff] }
 0x179   :  { %1777 = vmatmul.mubr.f32.gmra.mrb[6].mxu0 %v22588_v44  ;;  %v13286_v57 = vpack.c.bf16 %v22627_v34, %v22625_v20  ;;  %v22672_v34 = vld [vmem:[#allocation86_spill] sm:$0xff] }
 0x17a   :  { %1785 = vmatprep.mubr.f32.mxu0 %v22589_v23  ;;  %13263 = vmatpush1.bf16.msra.mxu0 %v13262_v9  ;;  %v13288_v33 = vpack.c.bf16 %v22631_v59, %v22629_v29  ;;  %v2465_v9 = vld [vmem:[%s22634_s1] sm:$0xff]  ;;  %v22675_v29 = vand.u32 4294901760, %v22674_v17  ;;  %v2474_v59 = vld [vmem:[%s22634_s1 + $0x48] sm:$0xff] }
 0x17b   :  { %13265 = vmatprep.subr.bf16.mxu0 %v13264_v22  ;;  %v22637_v22 = vld [vmem:[#allocation62_spill] sm:$0xff]  ;;  %v22639_v23 = vld [vmem:[#allocation64_spill] sm:$0xff]  ;;  %2479 = vperm.xlu0 %14941, %v2465_v9  }
 0x17c   :  { %v22638_v44 = vand.u32 4294901760, %v22637_v22  ;;  %v22640_v3 = vand.u32 4294901760, %v22639_v23  ;;  %v2476_v22 = vld [vmem:[%s22634_s1 + $0x58] sm:$0xff] }
 0x17d   :  { %1789 = vmatmul.mubr.f32.gmra.mrb[8].mxu0 %v22594_v35  ;;  %v22680_v23 = vld [vmem:[#allocation7_spill] sm:$0xff]  ;;  %v22729_v17 = vld [vmem:[#allocation84_spill] sm:$0xff] }
 0x17e   :  { %1797 = vmatprep.mubr.f32.mxu0 %v22595_v37  ;;  %13267 = vmatpush1.bf16.msra.mxu0 %v13266_v15  ;;  %v13290_v12 = vpack.c.bf16 %v22640_v3, %v22638_v44  ;;  %v2466_v15 = vld [vmem:[%s22634_s1 + $0x8] sm:$0xff]  ;;  %v2475_v44 = vld [vmem:[%s22634_s1 + $0x50] sm:$0xff]  ;;  %v22681_v3 = vld [vmem:[#allocation40_spill] sm:$0xff] }
 0x17f   :  { %13269 = vmatprep.subr.bf16.mxu0 %v13268_v48  ;;  %v22643_v48 = vld [vmem:[#allocation68_spill] sm:$0xff]  ;;  %2484 = vperm.xlu1 %14942, %v2466_v15  }
 0x180   :  { %v22644_v35 = vand.u32 4294901760, %v22643_v48  ;;  %2494 = vperm.xlu0 %14941, %v2468_v54   ;;  %v22683_v15 = vld [vmem:[#allocation8_spill] sm:$0xff]  ;;  %v22692_v54 = vld [vmem:[#allocation18_spill] sm:$0xff] }
 0x181   :  { %1801 = vmatmul.mubr.f32.gmra.mrb[10].mxu0 %v22600_v19  ;;  %v22649_v19 = vld [vmem:[#allocation71_spill] sm:$0xff]  ;;  %v22686_v48 = vld [vmem:[#allocation92_spill] sm:$0xff] }
 0x182   :  { %1809 = vmatprep.mubr.f32.mxu0 %v22601_v42  ;;  %13271 = vmatpush1.bf16.msra.mxu0 %v13270_v18  ;;  %v13292_v37 = vpack.c.bf16 %v22644_v35, %v22642_v41  ;;  %v22646_v18 = vand.u32 4294901760, %v22645_v36  ;;  %v22650_v42 = vand.u32 4294901760, %v22649_v19  ;;  %v22685_v41 = vld [vmem:[#allocation105_spill] sm:$0xff]  ;;  %v22687_v35 = vld [vmem:[#allocation15_spill] sm:$0xff]  ;;  %v22690_v36 = vld [vmem:[#allocation22_spill] sm:$0xff] }
 0x183   :  { %13273 = vmatprep.subr.bf16.mxu0 %v13272_v56  ;;  %v22648_v56 = vand.u32 4294901760, %v22647_v46  ;;  %2489 = vperm.xlu1 %14942, %v2467_v5   ;;  %v22693_v46 = vld [vmem:[#allocation6_spill] sm:$0xff]  ;;  %v22695_v19 = vld [vmem:[#allocation21_spill] sm:$0xff]  ;;  %v22700_v5 = vld [vmem:[#allocation32_spill] sm:$0xff] }
 0x184   :  { %2504 = vperm.xlu0 %14941, %v2470_v30   ;;  %v22708_v30 = vld [vmem:[#allocation51_spill] sm:$0xff] }
 0x185   :  { %1813 = vmatmul.mubr.f32.gmra.mrb[12].mxu0 %v22606_v16  ;;  %v22655_v16 = vld [vmem:[#allocation76_spill] sm:$0xff] }
 0x186   :  { %1821 = vmatprep.mubr.f32.mxu0 %v22607_v32  ;;  %13275 = vmatpush1.bf16.msra.mxu0 %v13274_v39  ;;  %v13294_v39 = vpack.c.bf16 %v22652_v6, %v22650_v42  ;;  %v22656_v32 = vand.u32 4294901760, %v22655_v16  ;;  %v22696_v42 = vld [vmem:[#allocation26_spill] sm:$0xff]  ;;  %v22698_v6 = vld [vmem:[#allocation23_spill] sm:$0xff] }
 0x187   :  { %13277 = vmatprep.subr.bf16.mxu0 %v13276_v55  ;;  %v22654_v55 = vand.u32 4294901760, %v22653_v47  ;;  %v22701_v47 = vld [vmem:[#allocation24_spill] sm:$0xff]  ;;  %v22703_v16 = vld [vmem:[#allocation39_spill] sm:$0xff] }
 0x188   :  { %2514 = vperm.xlu0 %14941, %v2472_v50   ;;  %v22720_v50 = vld [vmem:[#allocation67_spill] sm:$0xff] }
 0x189   :  { %1825 = vmatmul.mubr.f32.gmra.mrb[14].mxu0 %v22612_v58  ;;  %v13296_v8 = vpack.c.bf16 %v22656_v32, %v22654_v55  ;;  %v22702_v55 = vld [vmem:[#allocation35_spill] sm:$0xff]  ;;  %v22704_v32 = vld [vmem:[#allocation44_spill] sm:$0xff] }
 0x18a   :  { %1833 = vmatprep.mubr.f32.mxu0 %v22613_v4  ;;  %13279 = vmatpush1.bf16.msra.mxu0 %v13278_v61  ;;  %v22658_v61 = vand.u32 4294901760, %v22657_v14  ;;  %v22662_v4 = vld [vmem:[#allocation79_spill] sm:$0xff] }
 0x18b   :  { %13281 = vmatprep.subr.bf16.mxu0 %v13280_v25  ;;  %v22660_v25 = vld [vmem:[#allocation77_spill] sm:$0xff]  ;;  %v22663_v53 = vand.u32 4294901760, %v22662_v4  ;;  %v22706_v14 = vld [vmem:[#allocation43_spill] sm:$0xff] }
 0x18c   :  { %v22661_v58 = vand.u32 4294901760, %v22660_v25  ;;  %2524 = vperm.xlu0 %14941, %v2474_v59   ;;  %v22709_v25 = vld [vmem:[#allocation96_spill] sm:$0xff]  ;;  %v22711_v4 = vld [vmem:[#allocation55_spill] sm:$0xff] }
 0x18d   :  { %1837 = vmatmul.mubr.f32.gmra.mrb[16].mxu0 %v22621_v7  ;;  %v22668_v7 = vld [vmem:[#allocation83_spill] sm:$0xff] }
 0x18e   :  { %1845 = vmatprep.mubr.f32.mxu0 %v22623_v40  ;;  %13283 = vmatpush1.bf16.msra.mxu0 %v13282_v1  ;;  %v13298_v13 = vpack.c.bf16 %v22663_v53, %v22661_v58  ;;  %v2469_v1 = vld [vmem:[%s22634_s1 + $0x20] sm:$0xff]  ;;  %v22669_v43 = vand.u32 4294901760, %v22668_v7  ;;  %v22710_v58 = vld [vmem:[#allocation99_spill] sm:$0xff] }
 0x18f   :  { %13285 = vmatprep.subr.bf16.mxu0 %v13284_v38  ;;  %v13300_v38 = vpack.c.bf16 %v22667_v24, %v22665_v28  ;;  %2499 = vperm.xlu1 %14942, %v2469_v1   ;;  %v22670_v40 = vld [vmem:[#allocation85_spill] sm:$0xff]  ;;  %v22712_v53 = vld [vmem:[#allocation56_spill] sm:$0xff]  ;;  %v22714_v1 = vld [vmem:[#allocation111_spill] sm:$0xff] }
 0x190   :  { %v22671_v21 = vand.u32 4294901760, %v22670_v40  ;;  %2534 = vperm.xlu0 %14941, %v2476_v22   ;;  %v22716_v28 = vld [vmem:[#allocation63_spill] sm:$0xff]  ;;  %v22721_v7 = vld [vmem:[#allocation116_spill] sm:$0xff]  ;;  %v22723_v40 = vld [vmem:[#allocation69_spill] sm:$0xff] }
 0x191   :  { %1849 = vmatmul.mubr.f32.gmra.mrb[18].mxu0 %v22633_v52  ;;  %v22678_v52 = vld [vmem:[#allocation91_spill] sm:$0xff] }
 0x192   :  { %1857 = vmatprep.mubr.f32.mxu0 %v22636_v2  ;;  %13287 = vmatpush1.bf16.msra.mxu0 %v13286_v57  ;;  %v13302_v20 = vpack.c.bf16 %v22671_v21, %v22669_v43  ;;  %v22673_v57 = vand.u32 4294901760, %v22672_v34  ;;  %v22679_v9 = vand.u32 4294901760, %v22678_v52  ;;  %v2473_v2 = vld [vmem:[%s22634_s1 + $0x40] sm:$0xff]  ;;  %v22718_v24 = vld [vmem:[#allocation115_spill] sm:$0xff]  ;;  %v22724_v21 = vld [vmem:[#allocation70_spill] sm:$0xff]  ;;  %s14989_s1 = smov 4  }
 0x193   :  { %13289 = vmatprep.subr.bf16.mxu0 %v13288_v33  ;;  %2509 = vperm.xlu1 %14942, %v2471_v62   ;;  %v22676_v33 = vld [vmem:[#allocation90_spill] sm:$0xff]  ;;  %v22722_v43 = vld [vmem:[#allocation119_spill] sm:$0xff] }
 0x194   :  { %v13304_v0 = vpack.c.bf16 %v22675_v29, %v22673_v57  ;;  %v22677_v26 = vand.u32 4294901760, %v22676_v33  ;;  %v22726_v62 = vld [vmem:[#allocation75_spill] sm:$0xff]  ;;  %v22727_v34 = vld [vmem:[#allocation78_spill] sm:$0xff]  ;;  %v22728_v57 = vld [vmem:[#allocation80_spill] sm:$0xff] }
 0x195   :  { %1861 = vmatmul.mubr.f32.gmra.mrb[20].mxu0 %v22646_v18  ;;  %v22691_v18 = vld [vmem:[#allocation17_spill] sm:$0xff]  ;;  %v22730_v29 = vld [vmem:[#allocation87_spill] sm:$0xff] }
 0x196   :  { %1869 = vmatprep.mubr.f32.mxu0 %v22648_v56  ;;  %13291 = vmatpush1.bf16.msra.mxu0 %v13290_v12  ;;  %v13306_v10 = vpack.c.bf16 %v22679_v9, %v22677_v26  ;;  %v22682_v12 = vld [vmem:[#allocation104_spill] sm:$0xff]  ;;  %v22694_v56 = vld [vmem:[#allocation13_spill] sm:$0xff]  ;;  %v17026_v26 = vld [vmem:[%s21547_s6 + $0x10] sm:$0xff] }
 0x197   :  { %13293 = vmatprep.subr.bf16.mxu0 %v13292_v37  ;;  %2519 = vperm.xlu1 %14942, %v2473_v2   ;;  %v22688_v37 = vld [vmem:[#allocation16_spill] sm:$0xff]  ;;  %v2709_v2 = vand.u32 4294901760, %v17026_v26 }
 0x198   :  { %v17031_v52 = vld [vmem:[%s21547_s6 + $0x18] sm:$0xff] }
 0x199   :  { %1873 = vmatmul.mubr.f32.gmra.mrb[22].mxu0 %v22658_v61  ;;  %v22707_v61 = vld [vmem:[#allocation47_spill] sm:$0xff]  ;;  %v2712_v22 = vand.u32 4294901760, %v17031_v52 }
 0x19a   :  { %13295 = vmatpush1.bf16.msra.mxu0 %v13294_v39  ;;  %2124 = vmatprep.mubr.f32.mxu0 %v22659_v49  ;;  %v22699_v39 = vld [vmem:[#allocation27_spill] sm:$0xff] }
 0x19b   :  { %13297 = vmatprep.subr.bf16.mxu0 %v13296_v8  ;;  %2529 = vperm.xlu1 %14942, %v2475_v44   ;;  %v22705_v8 = vld [vmem:[#allocation36_spill] sm:$0xff] }
 0x19e   :  { %13299 = vmatpush1.bf16.msra.mxu0 %v13298_v13  ;;  %v22713_v13 = vld [vmem:[#allocation100_spill] sm:$0xff] }
 0x19f   :  { %13301 = vmatprep.subr.bf16.mxu0 %v13300_v38  ;;  %v22719_v38 = vld [vmem:[#allocation66_spill] sm:$0xff] }
 0x1a2   :  { %13303 = vmatpush1.bf16.msra.mxu0 %v13302_v20  ;;  %v22725_v20 = vld [vmem:[#allocation120_spill] sm:$0xff] }
 0x1a3   :  { %13305 = vmatprep.subr.bf16.mxu0 %v13304_v0 }
 0x1a6   :  { %13307 = vmatpush1.bf16.msra.mxu0 %v13306_v10 }
 0x1a7   :  { %13309 = vmatprep.subr.bf16.mxu0 %v22680_v23 }
 0x1a9   :  { %2126 = vmatmul.mubr.f32.vlgmr.msra.gmra.mrb[0].mxu0 %v22681_v3 }
 0x1aa   :  { %2132 = vmatprep.mubr.f32.mxu0 %v22682_v12  ;;  %13311 = vmatpush1.bf16.msra.mxu0 %v22683_v15  ;;  %v17056_v15 = vld [vmem:[%s21547_s6 + $0x20] sm:$0xff] }
 0x1ab   :  { %13313 = vmatprep.subr.bf16.mxu0 %v22684_v60  ;;  %v17061_v60 = vld [vmem:[%s21547_s6 + $0x28] sm:$0xff] }
 0x1ad   :  { %2134 = vmatmul.mubr.f32.gmra.mrb[2].mxu0 %v22685_v41 }
 0x1ae   :  { %2140 = vmatprep.mubr.f32.mxu0 %v22686_v48  ;;  %13315 = vmatpush1.bf16.msra.mxu0 %v22687_v35 }
 0x1af   :  { %13317 = vmatprep.subr.bf16.mxu0 %v22688_v37 }
 0x1b1   :  { %2142 = vmatmul.mubr.f32.gmra.mrb[4].mxu0 %v22689_v11 }
 0x1b2   :  { %2148 = vmatprep.mubr.f32.mxu0 %v22690_v36  ;;  %13319 = vmatpush1.bf16.msra.mxu0 %v22691_v18 }
 0x1b3   :  { %13321 = vmatprep.subr.bf16.mxu0 %v22692_v54 }
 0x1b5   :  { %2150 = vmatmul.mubr.f32.gmra.mrb[6].mxu0 %v22693_v46 }
 0x1b6   :  { %2156 = vmatprep.mubr.f32.mxu0 %v22694_v56  ;;  %13323 = vmatpush1.bf16.msra.mxu0 %v22695_v19 }
 0x1b7   :  { %13325 = vmatprep.subr.bf16.mxu0 %v22696_v42 }
 0x1b9   :  { %2158 = vmatmul.mubr.f32.gmra.mrb[8].mxu0 %v22697_v31 }
 0x1ba   :  { %2164 = vmatprep.mubr.f32.mxu0 %v22698_v6  ;;  %13327 = vmatpush1.bf16.msra.mxu0 %v22699_v39 }
 0x1bb   :  { %13329 = vmatprep.subr.bf16.mxu0 %v22700_v5 }
 0x1bd   :  { %2166 = vmatmul.mubr.f32.gmra.mrb[10].mxu0 %v22701_v47 }
 0x1be   :  { %2172 = vmatprep.mubr.f32.mxu0 %v22702_v55  ;;  %13331 = vmatpush1.bf16.msra.mxu0 %v22703_v16 }
 0x1bf   :  { %13333 = vmatprep.subr.bf16.mxu0 %v22704_v32 }
 0x1c1   :  { %2174 = vmatmul.mubr.f32.gmra.mrb[12].mxu0 %v22705_v8 }
 0x1c2   :  { %2180 = vmatprep.mubr.f32.mxu0 %v22706_v14  ;;  %13335 = vmatpush1.bf16.msra.mxu0 %v22707_v61 }
 0x1c3   :  { %13337 = vmatprep.subr.bf16.mxu0 %v22708_v30 }
 0x1c5   :  { %2182 = vmatmul.mubr.f32.gmra.mrb[14].mxu0 %v22709_v25 }
 0x1c6   :  { %2188 = vmatprep.mubr.f32.mxu0 %v22710_v58  ;;  %13339 = vmatpush1.bf16.msra.mxu0 %v22711_v4  ;;  %v17129_v4 = vld [vmem:[%s21547_s6 + $0x48] sm:$0xff] }
 0x1c7   :  { %13341 = vmatprep.subr.bf16.mxu0 %v22712_v53 }
 0x1c9   :  { %2190 = vmatmul.mubr.f32.gmra.mrb[16].mxu0 %v22713_v13 }
 0x1ca   :  { %2196 = vmatprep.mubr.f32.mxu0 %v22714_v1  ;;  %13343 = vmatpush1.bf16.msra.mxu0 %v22715_v63  ;;  %v2730_v63 = vand.u32 4294901760, %v17129_v4 }
 0x1cb   :  { %13345 = vmatprep.subr.bf16.mxu0 %v22716_v28 }
 0x1cd   :  { %2198 = vmatmul.mubr.f32.gmra.mrb[18].mxu0 %v22717_v45 }
 0x1ce   :  { %2204 = vmatprep.mubr.f32.mxu0 %v22718_v24  ;;  %13347 = vmatpush1.bf16.msra.mxu0 %v22719_v38 }
 0x1cf   :  { %13349 = vmatprep.subr.bf16.mxu0 %v22720_v50 }
 0x1d1   :  { %2206 = vmatmul.mubr.f32.gmra.mrb[20].mxu0 %v22721_v7 }
 0x1d2   :  { %2212 = vmatprep.mubr.f32.mxu0 %v22722_v43  ;;  %13351 = vmatpush1.bf16.msra.mxu0 %v22723_v40 }
 0x1d3   :  { %13353 = vmatprep.subr.bf16.mxu0 %v22724_v21  ;;  %v17160_v21 = vld [vmem:[%s21547_s6 + $0x50] sm:$0xff] }
 0x1d5   :  { %2214 = vmatmul.mubr.f32.gmra.mrb[22].mxu0 %v22725_v20 }
 0x1d6   :  { %13355 = vmatpush1.bf16.msra.mxu0 %v22554_v27  ;;  %2345 = vmatprep.mubr.f32.mxu0 %v22659_v49  ;;  %v2679_v27 = vld [vmem:[%s21547_s6 + $0x8] sm:$0xff] }
 0x1d7   :  { %13357 = vmatprep.subr.bf16.mxu0 %v22726_v62  ;;  %v2706_v0 = vand.u32 4294901760, %v2679_v27 }
 0x1d9   :  { %v17021_v33 = vsub.f32 %v2679_v27, %v2706_v0 }
 0x1da   :  { %13359 = vmatpush1.bf16.msra.mxu0 %v22727_v34 }
 0x1db   :  { %13361 = vmatprep.subr.bf16.mxu0 %v22728_v57  ;;  %v21902_v10 = vand.u32 4294901760, %v17021_v33 }
 0x1dd   :  { %v2810_v23 = vsub.f32 %v17021_v33, %v21902_v10 }
 0x1de   :  { %13363 = vmatpush1.bf16.msra.mxu0 %v22729_v17 }
 0x1df   :  { %13365 = vmatprep.subr.bf16.mxu0 %v22730_v29  ;;  %v2733_v29 = vand.u32 4294901760, %v17160_v21 }
 0x1e2   :  { %13367 = vmatpush1.bf16.msra.mxu0 %v22565_v51  ;;  %v2678_v51 = vld [vmem:[%s21547_s6] sm:$0xff] }
 0x1e3   :  { %v2703_v49 = vand.u32 4294901760, %v2678_v51 }
 0x1e5   :  { %2347 = vmatmul.mubr.f32.vlgmr.msra.gmra.mrb[0].mxu0 %v22681_v3  ;;  %v17019_v59 = vsub.f32 %v2678_v51, %v2703_v49  ;;  %v17046_v3 = vsub.f32 %v17026_v26, %v2709_v2  ;;  %v2691_v26 = vld [vmem:[%s21547_s6 + $0x68] sm:$0xff] }
 0x1e6   :  { %2353 = vmatprep.mubr.f32.mxu0 %v22682_v12  ;;  %v17051_v12 = vsub.f32 %v17031_v52, %v2712_v22 }
 0x1e7   :  { %v21903_v9 = vand.u32 4294901760, %v17019_v59  ;;  %v21901_v35 = vand.u32 4294901760, %v17046_v3 }
 0x1e8   :  { %v21900_v37 = vand.u32 4294901760, %v17051_v12 }
 0x1e9   :  { %2355 = vmatmul.mubr.f32.gmra.mrb[2].mxu0 %v22685_v41  ;;  %v2803_v44 = vsub.f32 %v17019_v59, %v21903_v9  ;;  %v2817_v54 = vsub.f32 %v17046_v3, %v21901_v35 }
 0x1ea   :  { %2361 = vmatprep.mubr.f32.mxu0 %v22686_v48  ;;  %v2811_v48 = vand.u32 4294901760, %v2810_v23  ;;  %v17192_v23 = vsub.f32 %v17160_v21, %v2733_v29 }
 0x1eb   :  { %v2804_v41 = vand.u32 4294901760, %v2803_v44  ;;  %v2818_v39 = vand.u32 4294901760, %v2817_v54  ;;  %v17187_v44 = vpack.c.bf16 %v2712_v22, %v2709_v2  ;;  %v2742_v54 = vand.u32 4294901760, %v2691_v26 }
 0x1ec   :  { %22735 = vst [vmem:[#allocation37_spill] sm:$0xff] %v17192_v23 }
 0x1ed   :  { %2363 = vmatmul.mubr.f32.gmra.mrb[4].mxu0 %v22689_v11  ;;  %v2715_v11 = vand.u32 4294901760, %v17056_v15  ;;  %v17067_v18 = vpack.c.bf16 %v2811_v48, %v2804_v41  ;;  %v17202_v48 = vld [vmem:[%s21547_s6 + $0x60] sm:$0xff] }
 0x1ee   :  { %2369 = vmatprep.mubr.f32.mxu0 %v22690_v36  ;;  %v2718_v36 = vand.u32 4294901760, %v17061_v60  ;;  %v2739_v22 = vand.u32 4294901760, %v17202_v48 }
 0x1ef   :  { %22731 = vst [vmem:[#allocation30_spill] sm:$0xff] %v17067_v18  ;;  %v17080_v19 = vsub.f32 %v17056_v15, %v2715_v11  ;;  %v2693_v15 = vld [vmem:[%s21547_s6 + $0x78] sm:$0xff] }
 0x1f0   :  { %v17085_v42 = vsub.f32 %v17061_v60, %v2718_v36 }
 0x1f1   :  { %2371 = vmatmul.mubr.f32.gmra.mrb[6].mxu0 %v22693_v46  ;;  %v2824_v46 = vsub.f32 %v17051_v12, %v21900_v37  ;;  %v21899_v16 = vand.u32 4294901760, %v17080_v19 }
 0x1f2   :  { %2377 = vmatprep.mubr.f32.mxu0 %v22694_v56  ;;  %v21906_v56 = vmov 0.0|0.0   ;;  %v21898_v32 = vand.u32 4294901760, %v17085_v42 }
 0x1f3   :  { %13392 = vmatprep.subr.bf16.mxu1 %v21906_v56  ;;  %13368 = vmatprep.subr.bf16.mxu0 %v21906_v56  ;;  %v2825_v5 = vand.u32 4294901760, %v2824_v46  ;;  %v2831_v30 = vsub.f32 %v17080_v19, %v21899_v16  ;;  %v21893_v46 = vand.u32 4294901760, %v17192_v23 }
 0x1f4   :  { %13394 = vmatpush1.bf16.msra.mxu1 %v17067_v18 }
 0x1f5   :  { %2379 = vmatmul.mubr.f32.gmra.mrb[8].mxu0 %v22697_v31  ;;  %v17090_v31 = vld [vmem:[%s21547_s6 + $0x30] sm:$0xff]  ;;  %13395 = vmatprep.subr.bf16.mxu1 %v21906_v56  ;;  %v2832_v28 = vand.u32 4294901760, %v2831_v30  ;;  %v17217_v30 = vsub.f32 %v17202_v48, %v2739_v22 }
 0x1f6   :  { %2385 = vmatprep.mubr.f32.mxu0 %v22698_v6  ;;  %v17095_v6 = vld [vmem:[%s21547_s6 + $0x38] sm:$0xff] }
 0x1f7   :  { %22738 = vst [vmem:[#allocation42_spill] sm:$0xff] %v17217_v30  ;;  %v21889_v60 = vand.u32 4294901760, %v17217_v30 }
 0x1f9   :  { %2387 = vmatmul.mubr.f32.gmra.mrb[10].mxu0 %v22701_v47  ;;  %v2721_v47 = vand.u32 4294901760, %v17090_v31 }
 0x1fa   :  { %2393 = vmatprep.mubr.f32.mxu0 %v22702_v55  ;;  %v2724_v55 = vand.u32 4294901760, %v17095_v6 }
 0x1fc   :  { %v17113_v61 = vsub.f32 %v17095_v6, %v2724_v55 }
 0x1fd   :  { %2395 = vmatmul.mubr.f32.gmra.mrb[12].mxu0 %v22705_v8  ;;  %v17103_v8 = vpack.c.bf16 %v2825_v5, %v2818_v39 }
 0x1fe   :  { %2401 = vmatprep.mubr.f32.mxu0 %v22706_v14  ;;  %v17108_v14 = vsub.f32 %v17090_v31, %v2721_v47  ;;  %v2485_v16 = vpop.permute.xlu1 %2484 }
 0x1ff   :  { %22732 = vst [vmem:[#allocation29_spill] sm:$0xff] %v17103_v8  ;;  %13397 = vmatpush1.bf16.msra.mxu1 %v17103_v8 }
 0x200   :  { %v21897_v53 = vand.u32 4294901760, %v17108_v14  ;;  %13398 = vmatprep.subr.bf16.mxu1 %v21906_v56 }
 0x201   :  { %2403 = vmatmul.mubr.f32.gmra.mrb[14].mxu0 %v22709_v25  ;;  %v2838_v25 = vsub.f32 %v17085_v42, %v21898_v32 }
 0x202   :  { %2409 = vmatprep.mubr.f32.mxu0 %v22710_v58  ;;  %v17124_v58 = vld [vmem:[%s21547_s6 + $0x40] sm:$0xff] }
 0x205   :  { %2411 = vmatmul.mubr.f32.gmra.mrb[16].mxu0 %v22713_v13  ;;  %v21896_v13 = vand.u32 4294901760, %v17113_v61 }
 0x206   :  { %2417 = vmatprep.mubr.f32.mxu0 %v22714_v1  ;;  %v2727_v1 = vand.u32 4294901760, %v17124_v58 }
 0x207   :  { %v2852_v38 = vsub.f32 %v17113_v61, %v21896_v13 }
 0x208   :  { %v17146_v50 = vsub.f32 %v17124_v58, %v2727_v1 }
 0x209   :  { %2419 = vmatmul.mubr.f32.gmra.mrb[18].mxu0 %v22717_v45  ;;  %v2839_v45 = vand.u32 4294901760, %v2838_v25  ;;  %v2853_v34 = vand.u32 4294901760, %v2852_v38  ;;  %v17219_v25 = vsub.f32 %v2691_v26, %v2742_v54  ;;  %v2692_v38 = vld [vmem:[%s21547_s6 + $0x70] sm:$0xff] }
 0x20a   :  { %2425 = vmatprep.mubr.f32.mxu0 %v22718_v24  ;;  %v2845_v24 = vsub.f32 %v17108_v14, %v21897_v53  ;;  %v21895_v57 = vand.u32 4294901760, %v17146_v50 }
 0x20b   :  { %v17155_v40 = vpack.c.bf16 %v2839_v45, %v2832_v28  ;;  %22739 = vst [vmem:[#allocation41_spill] sm:$0xff] %v17219_v25  ;;  %v17225_v28 = vpack.c.bf16 %v2718_v36, %v2715_v11  ;;  %v2873_v45 = vsub.f32 %v17192_v23, %v21893_v46  ;;  %v21890_v11 = vand.u32 4294901760, %v17219_v25 }
 0x20c   :  { %v2846_v62 = vand.u32 4294901760, %v2845_v24  ;;  %v2745_v36 = vand.u32 4294901760, %v2692_v38 }
 0x20d   :  { %2427 = vmatmul.mubr.f32.gmra.mrb[20].mxu0 %v22721_v7  ;;  %v17151_v7 = vsub.f32 %v17129_v4, %v2730_v63  ;;  %22733 = vst [vmem:[#allocation33_spill] sm:$0xff] %v17155_v40  ;;  %13400 = vmatpush1.bf16.msra.mxu1 %v17155_v40  ;;  %v2894_v48 = vsub.f32 %v17219_v25, %v21890_v11  ;;  %v2694_v11 = vld [vmem:[%s21547_s6 + $0x80] sm:$0xf] }
 0x20e   :  { %2433 = vmatprep.mubr.f32.mxu0 %v22722_v43  ;;  %v17153_v43 = vpack.c.bf16 %v2706_v0, %v2703_v49  ;;  %13401 = vmatprep.subr.bf16.mxu1 %v21906_v56  ;;  %v17175_v27 = vpack.c.bf16 %v2853_v34, %v2846_v62  ;;  %v2859_v49 = vsub.f32 %v17146_v50, %v21895_v57  ;;  %v2748_v62 = vand.u32 4294901760, %v2693_v15 }
 0x20f   :  { %v21894_v17 = vand.u32 4294901760, %v17151_v7  ;;  %v2874_v34 = vand.u32 4294901760, %v2873_v45  ;;  %v17251_v26 = vsub.f32 %v2692_v38, %v2745_v36  ;;  %v2700_v6 = vsel %vm2698_vm9, %v2694_v11, 0 }
 0x210   :  { %13370 = vmatpush1.bf16.msra.mxu0 %v17153_v43  ;;  %22734 = vst [vmem:[#allocation31_spill] sm:$0xff] %v17175_v27  ;;  %v2860_v52 = vand.u32 4294901760, %v2859_v49  ;;  %v17261_v45 = vsub.f32 %v2693_v15, %v2748_v62  ;;  %v17278_v38 = vand.u32 4294901760, %v2700_v6  ;;  %v17284_v15 = vpack.c.bf16 %v2730_v63, %v2727_v1 }
 0x211   :  { %2435 = vmatmul.mubr.f32.gmra.mrb[22].mxu0 %v22725_v20  ;;  %v17165_v20 = vld [vmem:[%s21547_s6 + $0x58] sm:$0xff]  ;;  %13371 = vmatprep.subr.bf16.mxu0 %v21906_v56  ;;  %v2866_v0 = vsub.f32 %v17151_v7, %v21894_v17  ;;  %22740 = vst [vmem:[#allocation46_spill] sm:$0xff] %v17251_v26  ;;  %v17307_v63 = vpack.c.bf16 %v2742_v54, %v2739_v22  ;;  %v478_v17 = vld [vmem:[%s21544_s3] sm:$0x3] }
 0x212   :  { %v2736_v51 = vand.u32 4294901760, %v17165_v20  ;;  %13403 = vmatpush1.bf16.msra.mxu1 %v17175_v27  ;;  %22742 = vst [vmem:[#allocation49_spill] sm:$0xff] %v17261_v45  ;;  %v21891_v31 = vand.u32 4294901760, %v17261_v45  ;;  %v17321_v22 = vpack.c.bf16 %v2748_v62, %v2745_v36  ;;  %v17329_v54 = vpack.c.bf16 %v17051_v12, %v17046_v3 }
 0x213   :  { %v2867_v2 = vand.u32 4294901760, %v2866_v0  ;;  %13404 = vmatprep.subr.bf16.mxu1 %v21906_v56  ;;  %v2887_v0 = vsub.f32 %v17217_v30, %v21889_v60  ;;  %v21892_v60 = vand.u32 4294901760, %v17251_v26  ;;  %v17336_v36 = vpack.c.bf16 %v17085_v42, %v17080_v19 }
 0x214   :  { %v17197_v41 = vsub.f32 %v17165_v20, %v2736_v51  ;;  %13373 = vmatpush1.bf16.msra.mxu0 %v17187_v44  ;;  %v2908_v11 = vsub.f32 %v17261_v45, %v21891_v31  ;;  %v17298_v58 = vpack.c.bf16 %v2736_v51, %v2733_v29  ;;  %v21904_v20 = vmov 0.0  }
 0x215   :  { %13374 = vmatprep.subr.bf16.mxu0 %v21906_v56  ;;  %v17214_v5 = vpack.c.bf16 %v2867_v2, %v2860_v52  ;;  %v17257_v52 = vpack.c.bf16 %v2724_v55, %v2721_v47  ;;  %v2901_v55 = vsub.f32 %v17251_v26, %v21892_v60  ;;  %v17319_v51 = vpack.c.bf16 %v17021_v33, %v17019_v59  ;;  %v22747_v60 = vld [vmem:[#allocation5_spill] sm:$0xff] }
 0x216   :  { %22736 = vst [vmem:[#allocation34_spill] sm:$0xff] %v17197_v41  ;;  %v21888_v39 = vand.u32 4294901760, %v17197_v41  ;;  %v17340_v62 = vpack.c.bf16 %v17113_v61, %v17108_v14  ;;  %v486_v46 = vsub.s32 1, %v22747_v60  ;;  %v17363_v57 = vsub.s32 0, %v22747_v60 }
 0x217   :  { %22737 = vst [vmem:[#allocation38_spill] sm:$0xff] %v17214_v5  ;;  %13406 = vmatpush1.bf16.msra.mxu1 %v17214_v5 }
 0x218   :  { %v2880_v24 = vsub.f32 %v17197_v41, %v21888_v39  ;;  %13376 = vmatpush1.bf16.msra.mxu0 %v17225_v28  ;;  %13407 = vmatprep.subr.bf16.mxu1 %v21906_v56  ;;  %v2895_v39 = vand.u32 4294901760, %v2894_v48  ;;  %v17348_v48 = vpack.c.bf16 %v17197_v41, %v17192_v23  ;;  %22748 = vst [vmem:[#allocation102_spill] sm:$0xff] %v17363_v57 }
 0x219   :  { %13377 = vmatprep.subr.bf16.mxu0 %v21906_v56  ;;  %v17365_v32 = vrot.slane %v478_v17, %v486_v46  ;;  %v17368_v37 = vrot.slane %v478_v17, %v17363_v57 }
 0x21a   :  { %v2881_v49 = vand.u32 4294901760, %v2880_v24  ;;  %v2888_v24 = vand.u32 4294901760, %v2887_v0  ;;  %v17344_v0 = vpack.c.bf16 %v17151_v7, %v17146_v50 }
 0x21c   :  { %v17259_v2 = vpack.c.bf16 %v2881_v49, %v2874_v34  ;;  %13379 = vmatpush1.bf16.msra.mxu0 %v17257_v52  ;;  %v17273_v47 = vpack.c.bf16 %v2895_v39, %v2888_v24  ;;  %v2902_v34 = vand.u32 4294901760, %v2901_v55  ;;  %v17290_v39 = vsub.f32 %v2700_v6, %v17278_v38 }
 0x21d   :  { %13380 = vmatprep.subr.bf16.mxu0 %v21906_v56  ;;  %v2909_v49 = vand.u32 4294901760, %v2908_v11  ;;  %v17352_v24 = vpack.c.bf16 %v17219_v25, %v17217_v30  ;;  %v17356_v6 = vpack.c.bf16 %v17261_v45, %v17251_v26 }
 0x21e   :  { %22741 = vst [vmem:[#allocation45_spill] sm:$0xff] %v17259_v2  ;;  %13409 = vmatpush1.bf16.msra.mxu1 %v17259_v2  ;;  %22743 = vst [vmem:[#allocation48_spill] sm:$0xff] %v17273_v47  ;;  %v17305_v1 = vand.u32 4294901760, %v17290_v39 }
 0x21f   :  { %13410 = vmatprep.subr.bf16.mxu1 %v21906_v56  ;;  %v17302_v4 = vpack.c.bf16 %v2909_v49, %v2902_v34 }
 0x220   :  { %13382 = vmatpush1.bf16.msra.mxu0 %v17284_v15  ;;  %22745 = vst [vmem:[#allocation50_spill] sm:$0xff] %v17305_v1  ;;  %v2915_v21 = vsub.f32 %v17290_v39, %v17305_v1 }
 0x221   :  { %13383 = vmatprep.subr.bf16.mxu0 %v21906_v56  ;;  %22744 = vst [vmem:[#allocation52_spill] sm:$0xff] %v17302_v4 }
 0x222   :  { %13412 = vmatpush1.bf16.msra.mxu1 %v17273_v47  ;;  %v17315_v29 = vand.u32 4294901760, %v2915_v21  ;;  %v2490_v47 = vpop.permute.xlu1 %2489 }
 0x223   :  { %13413 = vmatprep.subr.bf16.mxu1 %v21906_v56 }
 0x224   :  { %13385 = vmatpush1.bf16.msra.mxu0 %v17298_v58  ;;  %22746 = vst [vmem:[#allocation103_spill] sm:$0xff] %v17315_v29 }
 0x225   :  { %13386 = vmatprep.subr.bf16.mxu0 %v21906_v56 }
 0x226   :  { %13415 = vmatpush1.bf16.msra.mxu1 %v17302_v4 }
 0x227   :  { %2911 = vmatprep.subr.mxu1 %v21904_v20 }
 0x228   :  { %13388 = vmatpush1.bf16.msra.mxu0 %v17307_v63 }
 0x229   :  { %13389 = vmatprep.subr.bf16.mxu0 %v21906_v56 }
 0x22a   :  { %2917 = vmatpush1.msra.mxu1 %v17315_v29  ;;  %v2480_v29 = vpop.permute.xlu0 %2479 }
 0x22b   :  { %13416 = vmatprep.subr.bf16.mxu1 %v21906_v56 }
 0x22c   :  { %13391 = vmatpush1.bf16.msra.mxu0 %v17321_v22 }
 0x22d   :  { %2750 = vmatprep.subr.mxu0 %v21904_v20 }
 0x22e   :  { %v2495_v8 = vpop.permute.xlu0 %2494 }
 0x230   :  { %2752 = vmatpush1.msra.mxu0 %v17278_v38 }
 0x2b8   :  { %v2348_v55 = vpop.f32.mrb[0].mxu0 }
 0x2b9   :  { %v2350_v11 = vpop.f32.mrb[1].mxu0  ;;  %v14678_v4 = vadd.f32 %v2348_v55, %v17368_v37 }
 0x2ba   :  { %v14679_v20 = vadd.f32 %v2350_v11, %v17365_v32 }
 0x2bc   :  { %v2356_v34 = vpop.f32.mrb[2].mxu0  ;;  %v2442_v27 = vmax.f32 %v14679_v20, 0.0 }
 0x2bd   :  { %v2358_v49 = vpop.f32.mrb[3].mxu0  ;;  %v14680_v56 = vadd.f32 %v2356_v34, %v17368_v37  ;;  %v2441_v34 = vmax.f32 %v14678_v4, 0.0 }
 0x2be   :  { %v14681_v10 = vadd.f32 %v2358_v49, %v17365_v32  ;;  %v17382_v26 = vmul.f32 %v2480_v29, %v2442_v27 }
 0x2bf   :  { %v2443_v49 = vmax.f32 %v14680_v56, 0.0  ;;  %v2500_v56 = vpop.permute.xlu1 %2499  ;;  %v17390_v20 = vmul.f32 %v2480_v29, %v2441_v34 }
 0x2c0   :  { %v2364_v21 = vpop.f32.mrb[4].mxu0  ;;  %v2444_v5 = vmax.f32 %v14681_v10, 0.0 }
 0x2c1   :  { %v2366_v31 = vpop.f32.mrb[5].mxu0  ;;  %v14682_v46 = vadd.f32 %v2364_v21, %v17368_v37  ;;  %22750 = vst [vmem:[#allocation107_spill] sm:$0xff] %v17390_v20 }
 0x2c2   :  { %v14683_v60 = vadd.f32 %v2366_v31, %v17365_v32  ;;  %v17379_v55 = vmul.f32 %v2485_v16, %v2444_v5 }
 0x2c3   :  { %v2445_v18 = vmax.f32 %v14682_v46, 0.0  ;;  %v2510_v30 = vpop.permute.xlu1 %2509 }
 0x2c4   :  { %v2372_v13 = vpop.f32.mrb[6].mxu0  ;;  %v2446_v40 = vmax.f32 %v14683_v60, 0.0 }
 0x2c5   :  { %v2374_v53 = vpop.f32.mrb[7].mxu0  ;;  %v14684_v11 = vadd.f32 %v2372_v13, %v17368_v37  ;;  %v17392_v5 = vmul.f32 %v2490_v47, %v2445_v18 }
 0x2c6   :  { %v14685_v17 = vadd.f32 %v2374_v53, %v17365_v32  ;;  %v17384_v53 = vmul.f32 %v2485_v16, %v2443_v49  ;;  %v17387_v13 = vmul.f32 %v2490_v47, %v2446_v40  ;;  %v2580_v16 = vsel %vm2578_vm10, %v17379_v55, 0.0  ;;  %v2505_v49 = vpop.permute.xlu0 %2504 }
 0x2c7   :  { %v2447_v4 = vmax.f32 %v14684_v11, 0.0  ;;  %22751 = vst [vmem:[#allocation94_spill] sm:$0xff] %v17392_v5 }
 0x2c8   :  { %v2380_v35 = vpop.f32.mrb[8].mxu0  ;;  %v2448_v21 = vmax.f32 %v14685_v17, 0.0  ;;  %22749 = vst [vmem:[#allocation106_spill] sm:$0xff] %v17384_v53  ;;  %v2561_v18 = vadd.f32 %v17384_v53, %v17390_v20  ;;  %v2582_v34 = vsel %vm2578_vm10, %v17387_v13, 0.0 }
 0x2c9   :  { %v2382_v9 = vpop.f32.mrb[9].mxu0  ;;  %v14686_v45 = vadd.f32 %v2380_v35, %v17368_v37 }
 0x2ca   :  { %v14687_v31 = vadd.f32 %v2382_v9, %v17365_v32  ;;  %v17397_v17 = vmul.f32 %v2495_v8, %v2448_v21 }
 0x2cc   :  { %v2388_v2 = vpop.f32.mrb[10].mxu0  ;;  %v2450_v46 = vmax.f32 %v14687_v31, 0.0  ;;  %v17407_v31 = vmul.f32 %v2495_v8, %v2447_v4 }
 0x2cd   :  { %v2390_v57 = vpop.f32.mrb[11].mxu0  ;;  %v14688_v9 = vadd.f32 %v2388_v2, %v17368_v37  ;;  %v2579_v2 = vsel %vm2578_vm10, %v17382_v26, 0.0 }
 0x2ce   :  { %v14689_v60 = vadd.f32 %v2390_v57, %v17365_v32  ;;  %v2449_v57 = vmax.f32 %v14686_v45, 0.0  ;;  %22752 = vst [vmem:[#allocation108_spill] sm:$0xff] %v17407_v31  ;;  %v17411_v25 = vmul.f32 %v2500_v56, %v2450_v46 }
 0x2cf   :  { %v2451_v21 = vmax.f32 %v14688_v9, 0.0 }
 0x2d0   :  { %v2396_v1 = vpop.f32.mrb[12].mxu0  ;;  %v2452_v47 = vmax.f32 %v14689_v60, 0.0  ;;  %v2584_v60 = vsel %vm2578_vm10, %v17397_v17, 0.0 }
 0x2d1   :  { %v2398_v10 = vpop.f32.mrb[13].mxu0  ;;  %v14690_v40 = vadd.f32 %v2396_v1, %v17368_v37  ;;  %v2562_v1 = vadd.f32 %v2561_v18, %v17392_v5 }
 0x2d2   :  { %v14691_v35 = vadd.f32 %v2398_v10, %v17365_v32  ;;  %v2581_v10 = vadd.f32 %v2580_v16, %v2579_v2  ;;  %v17418_v53 = vmul.f32 %v2505_v49, %v2452_v47  ;;  %v17422_v2 = vmul.f32 %v2505_v49, %v2451_v21  ;;  %v2520_v21 = vpop.permute.xlu1 %2519 }
 0x2d3   :  { %v2453_v20 = vmax.f32 %v14690_v40, 0.0  ;;  %v2563_v46 = vadd.f32 %v2562_v1, %v17407_v31 }
 0x2d4   :  { %v2404_v27 = vpop.f32.mrb[14].mxu0  ;;  %v2454_v41 = vmax.f32 %v14691_v35, 0.0  ;;  %v2583_v9 = vadd.f32 %v2582_v34, %v2581_v10  ;;  %v2515_v35 = vpop.permute.xlu0 %2514  ;;  %v2588_v49 = vsel %vm2578_vm10, %v17418_v53, 0.0 }
 0x2d5   :  { %v2406_v11 = vpop.f32.mrb[15].mxu0  ;;  %v14692_v45 = vadd.f32 %v2404_v27, %v17368_v37  ;;  %v17429_v34 = vmul.f32 %v2510_v30, %v2453_v20 }
 0x2d6   :  { %v14693_v29 = vadd.f32 %v2406_v11, %v17365_v32  ;;  %v17415_v11 = vmul.f32 %v2500_v56, %v2449_v57  ;;  %v2585_v5 = vadd.f32 %v2584_v60, %v2583_v9  ;;  %v2586_v56 = vsel %vm2578_vm10, %v17411_v25, 0.0 }
 0x2d7   :  { %v2455_v18 = vmax.f32 %v14692_v45, 0.0  ;;  %v17426_v57 = vmul.f32 %v2510_v30, %v2454_v41  ;;  %22754 = vst [vmem:[#allocation28_spill] sm:$0xff] %v17429_v34 }
 0x2d8   :  { %v2412_v23 = vpop.f32.mrb[16].mxu0  ;;  %22753 = vst [vmem:[#allocation9_spill] sm:$0xff] %v17415_v11  ;;  %v2456_v27 = vmax.f32 %v14693_v29, 0.0  ;;  %v2564_v47 = vadd.f32 %v2563_v46, %v17415_v11  ;;  %v2587_v41 = vadd.f32 %v2586_v56, %v2585_v5 }
 0x2d9   :  { %v14694_v8 = vadd.f32 %v2412_v23, %v17368_v37  ;;  %v2414_v4 = vpop.f32.mrb[17].mxu0  ;;  %v17438_v9 = vmul.f32 %v2515_v35, %v2455_v18  ;;  %v2590_v30 = vsel %vm2578_vm10, %v17426_v57, 0.0 }
 0x2da   :  { %v14695_v16 = vadd.f32 %v2414_v4, %v17365_v32  ;;  %v17434_v45 = vmul.f32 %v2515_v35, %v2456_v27  ;;  %v2565_v4 = vadd.f32 %v2564_v47, %v17422_v2  ;;  %v2525_v27 = vpop.permute.xlu0 %2524 }
 0x2db   :  { %v2457_v29 = vmax.f32 %v14694_v8, 0.0 }
 0x2dc   :  { %v2458_v23 = vmax.f32 %v14695_v16, 0.0  ;;  %v2420_v40 = vpop.f32.mrb[18].mxu0  ;;  %v2566_v11 = vadd.f32 %v2565_v4, %v17429_v34  ;;  %v2592_v35 = vsel %vm2578_vm10, %v17434_v45, 0.0 }
 0x2dd   :  { %v14696_v10 = vadd.f32 %v2420_v40, %v17368_v37  ;;  %v2422_v1 = vpop.f32.mrb[19].mxu0  ;;  %v2589_v40 = vadd.f32 %v2588_v49, %v2587_v41  ;;  %v17445_v31 = vmul.f32 %v2520_v21, %v2457_v29 }
 0x2de   :  { %v14697_v60 = vadd.f32 %v2422_v1, %v17365_v32  ;;  %v17442_v20 = vmul.f32 %v2520_v21, %v2458_v23 }
 0x2df   :  { %v2459_v16 = vmax.f32 %v14696_v10, 0.0  ;;  %v2591_v23 = vadd.f32 %v2590_v30, %v2589_v40  ;;  %v2567_v10 = vadd.f32 %v2566_v11, %v17438_v9 }
 0x2e0   :  { %v2460_v8 = vmax.f32 %v14697_v60, 0.0  ;;  %v2428_v46 = vpop.f32.mrb[20].mxu0  ;;  %v2530_v60 = vpop.permute.xlu1 %2529  ;;  %v2594_v29 = vsel %vm2578_vm10, %v17442_v20, 0.0 }
 0x2e1   :  { %v14698_v5 = vadd.f32 %v2428_v46, %v17368_v37  ;;  %v2430_v56 = vpop.f32.mrb[21].mxu0  ;;  %v17454_v1 = vmul.f32 %v2525_v27, %v2459_v16  ;;  %v2593_v4 = vadd.f32 %v2592_v35, %v2591_v23  ;;  %v2568_v46 = vadd.f32 %v2567_v10, %v17445_v31 }
 0x2e2   :  { %v17450_v18 = vmul.f32 %v2525_v27, %v2460_v8  ;;  %v14699_v47 = vadd.f32 %v2430_v56, %v17365_v32 }
 0x2e3   :  { %22756 = vst [vmem:[#allocation20_spill] sm:$0xff] %v17454_v1  ;;  %v2461_v49 = vmax.f32 %v14698_v5, 0.0  ;;  %v2595_v40 = vadd.f32 %v2594_v29, %v2593_v4  ;;  %v2569_v27 = vadd.f32 %v2568_v46, %v17454_v1 }
 0x2e4   :  { %22755 = vst [vmem:[#allocation19_spill] sm:$0xff] %v17450_v18  ;;  %v2462_v21 = vmax.f32 %v14699_v47, 0.0  ;;  %v2436_v41 = vpop.f32.mrb[22].mxu0  ;;  %v2596_v11 = vsel %vm2578_vm10, %v17450_v18, 0.0  ;;  %v2535_v47 = vpop.permute.xlu0 %2534 }
 0x2e5   :  { %v17459_v34 = vmul.f32 %v2530_v60, %v2461_v49  ;;  %v14700_v8 = vadd.f32 %v2436_v41, %v17368_v37  ;;  %v2438_v56 = vpop.f32.mrb[23].mxu0  ;;  %v2597_v10 = vadd.f32 %v2596_v11, %v2595_v40 }
 0x2e6   :  { %v17464_v16 = vmul.f32 %v2530_v60, %v2462_v21  ;;  %v14701_v30 = vadd.f32 %v2438_v56, %v17365_v32 }
 0x2e7   :  { %22757 = vst [vmem:[#allocation95_spill] sm:$0xff] %v17459_v34  ;;  %v2463_v5 = vmax.f32 %v14700_v8, 0.0  ;;  %v2570_v37 = vadd.f32 %v2569_v27, %v17459_v34 }
 0x2e8   :  { %22758 = vst [vmem:[#allocation25_spill] sm:$0xff] %v17464_v16  ;;  %v2598_v35 = vsel %vm2578_vm10, %v17464_v16, 0.0  ;;  %v2464_v23 = vmax.f32 %v14701_v30, 0.0 }
 0x2e9   :  { %v17471_v49 = vmul.f32 %v2535_v47, %v2463_v5  ;;  %v2599_v60 = vadd.f32 %v2598_v35, %v2597_v10 }
 0x2ea   :  { %v17473_v41 = vmul.f32 %v2535_v47, %v2464_v23 }
 0x2eb   :  { %v2571_v21 = vadd.f32 %v2570_v37, %v17471_v49 }
 0x2ec   :  { %22759 = vst [vmem:[#allocation97_spill] sm:$0xff] %v17473_v41  ;;  %v2600_v32 = vsel %vm2578_vm10, %v17473_v41, 0.0 }
 0x2ed   :  { %v2572_v29 = vrot.slane %v2571_v21, 4  ;;  %v2601_v4 = vadd.f32 %v2600_v32, %v2599_v60  ;;  %v22760_v32 = vmov 0.0|0.0  }
 0x2ef   :  { %v2573_v46 = vadd.f32 %v2572_v29, %v2571_v21  ;;  %v2602_v8 = vrot.slane %v2601_v4, 4 }
 0x2f1   :  { %v2574_v56 = vrot.slane %v2573_v46, 2  ;;  %v2603_v1 = vadd.f32 %v2602_v8, %v2601_v4  ;;  %v22761_v8 = vmov 0.0  }
 0x2f3   :  { %v2604_v30 = vrot.slane %v2603_v1, 2  ;;  %v2575_v11 = vadd.f32 %v2574_v56, %v2573_v46  ;;  %v2611_v56 = vmul.f32 %v17379_v55, %v17379_v55 }
 0x2f5   :  { %v2605_v40 = vadd.f32 %v2604_v30, %v2603_v1  ;;  %v2576_v27 = vrot.slane %v2575_v11, 1  ;;  %v2609_v30 = vmul.f32 %v17382_v26, %v17382_v26 }
 0x2f7   :  { %v2606_v5 = vrot.slane %v2605_v40, 1  ;;  %v2577_v34 = vadd.f32 %v2576_v27, %v2575_v11  ;;  %v2613_v11 = vmul.f32 %v17387_v13, %v17387_v13  ;;  %v2615_v27 = vmul.f32 %v17397_v17, %v17397_v17 }
 0x2f9   :  { %v2607_v47 = vadd.f32 %v2606_v5, %v2605_v40  ;;  %v17478_v23 = vand.u32 4294901760, %v2577_v34  ;;  %v2650_v40 = vsel %vm2578_vm10, %v2611_v56, 0.0  ;;  %v22762_v5 = vand.u32 4294901760, %v17019_v59 }
 0x2fa   :  { %v2619_v59 = vmul.f32 %v17418_v53, %v17418_v53 }
 0x2fb   :  { %v2696_v35 = vsel %vm2578_vm10, %v2607_v47, 0  ;;  %v2790_v10 = vsub.f32 %v2577_v34, %v17478_v23  ;;  %v22763_v47 = vand.u32 4294901760, %v17021_v33  ;;  %v22764_v33 = vand.u32 4294901760, %v17046_v3 }
 0x2fc   :  { %v17482_v37 = vand.u32 4294901760, %v2696_v35  ;;  %v22766_v3 = vand.u32 4294901760, %v17080_v19  ;;  %v22768_v19 = vand.u32 4294901760, %v17108_v14  ;;  %v22770_v14 = vand.u32 4294901760, %v17146_v50 }
 0x2fd   :  { %v2791_v60 = vand.u32 4294901760, %v2790_v10 }
 0x2fe   :  { %2949 = vmatprep.mubr.f32.mxu1 %v17482_v37  ;;  %v2784_v21 = vsub.f32 %v2696_v35, %v17482_v37  ;;  %v17535_v35 = vpack.c.bf16 %v22763_v47, %v22762_v5 }
 0x2ff   :  { %2951 = vmatmul.mubr.f32.vlgmr.msra.gmra.mrb[0].mxu1 %v17478_v23  ;;  %v2792_v29 = vsub.f32 %v2790_v10, %v2791_v60 }
 0x300   :  { %13418 = vmatpush1.bf16.msra.mxu1 %v17319_v51  ;;  %3056 = vmatprep.mubr.f32.mxu1 %v2784_v21  ;;  %v2785_v1 = vand.u32 4294901760, %v2784_v21 }
 0x301   :  { %13419 = vmatprep.subr.bf16.mxu1 %v22760_v32  ;;  %v2793_v46 = vand.u32 4294901760, %v2792_v29 }
 0x302   :  { %v2786_v4 = vsub.f32 %v2784_v21, %v2785_v1  ;;  %v2652_v21 = vsel %vm2578_vm10, %v2613_v11, 0.0 }
 0x304   :  { %13421 = vmatpush1.bf16.msra.mxu1 %v17329_v54  ;;  %v2787_v34 = vand.u32 4294901760, %v2786_v4  ;;  %v2654_v4 = vsel %vm2578_vm10, %v2615_v27, 0.0  ;;  %v2623_v27 = vmul.f32 %v17434_v45, %v17434_v45 }
 0x305   :  { %13422 = vmatprep.subr.bf16.mxu1 %v22760_v32 }
 0x306   :  { %2788 = vmatprep.mubr.f32.mxu0 %v2787_v34  ;;  %v22765_v34 = vand.u32 4294901760, %v17051_v12  ;;  %v22767_v12 = vand.u32 4294901760, %v17085_v42  ;;  %v22769_v42 = vand.u32 4294901760, %v17113_v61  ;;  %v22771_v61 = vand.u32 4294901760, %v17151_v7 }
 0x307   :  { %2794 = vmatmul.mubr.f32.vlgmr.msra.gmra.mrb[24].mxu0 %v2793_v46 }
 0x308   :  { %13424 = vmatpush1.bf16.msra.mxu1 %v17336_v36  ;;  %4215 = vmatprep.mubr.f32.mxu0 %v22761_v8  ;;  %v17552_v46 = vpack.c.bf16 %v22765_v34, %v22764_v33  ;;  %v17566_v5 = vpack.c.bf16 %v22767_v12, %v22766_v3 }
 0x309   :  { %13425 = vmatprep.subr.bf16.mxu1 %v22760_v32 }
 0x30c   :  { %13427 = vmatpush1.bf16.msra.mxu1 %v17340_v62 }
 0x30d   :  { %13428 = vmatprep.subr.bf16.mxu1 %v22760_v32 }
 0x310   :  { %13430 = vmatpush1.bf16.msra.mxu1 %v17344_v0 }
 0x311   :  { %13431 = vmatprep.subr.bf16.mxu1 %v22760_v32 }
 0x314   :  { %13433 = vmatpush1.bf16.msra.mxu1 %v17348_v48 }
 0x315   :  { %13434 = vmatprep.subr.bf16.mxu1 %v22760_v32 }
 0x318   :  { %13436 = vmatpush1.bf16.msra.mxu1 %v17352_v24 }
 0x319   :  { %13437 = vmatprep.subr.bf16.mxu1 %v22760_v32 }
 0x31c   :  { %13439 = vmatpush1.bf16.msra.mxu1 %v17356_v6 }
 0x31d   :  { %3020 = vmatprep.subr.mxu1 %v22761_v8 }
 0x320   :  { %3023 = vmatpush1.msra.mxu1 %v17290_v39 }
 0x321   :  { %3059 = vmatmul.mubr.f32.vlgmr.msra.gmra.mrb[0].mxu1 %v2790_v10  ;;  %13440 = vmatprep.subr.bf16.mxu1 %v22760_v32  ;;  %v2649_v10 = vsel %vm2578_vm10, %v2609_v30, 0.0  ;;  %v2621_v30 = vmul.f32 %v17426_v57, %v17426_v57 }
 0x322   :  { %13442 = vmatpush1.bf16.msra.mxu1 %v17153_v43  ;;  %3148 = vmatprep.mubr.f32.mxu1 %v2785_v1  ;;  %v2617_v1 = vmul.f32 %v17411_v25, %v17411_v25  ;;  %v2651_v29 = vadd.f32 %v2650_v40, %v2649_v10  ;;  %v2658_v40 = vsel %vm2578_vm10, %v2619_v59, 0.0  ;;  %v17580_v59 = vpack.c.bf16 %v22769_v42, %v22768_v19  ;;  %v22776_v19 = vld [vmem:[#allocation42_spill] sm:$0xff] }
 0x323   :  { %13443 = vmatprep.subr.bf16.mxu1 %v22760_v32  ;;  %v2660_v10 = vsel %vm2578_vm10, %v2621_v30, 0.0  ;;  %v22777_v42 = vand.u32 4294901760, %v22776_v19 }
 0x324   :  { %v2653_v56 = vadd.f32 %v2652_v21, %v2651_v29  ;;  %v2625_v21 = vmul.f32 %v17442_v20, %v17442_v20  ;;  %v2662_v29 = vsel %vm2578_vm10, %v2623_v27, 0.0 }
 0x326   :  { %13445 = vmatpush1.bf16.msra.mxu1 %v17187_v44  ;;  %v2655_v11 = vadd.f32 %v2654_v4, %v2653_v56  ;;  %v2627_v4 = vmul.f32 %v17450_v18, %v17450_v18  ;;  %v2664_v34 = vsel %vm2578_vm10, %v2625_v21, 0.0  ;;  %v2629_v56 = vmul.f32 %v17464_v16, %v17464_v16  ;;  %v22792_v16 = vld [vmem:[#allocation95_spill] sm:$0xff] }
 0x327   :  { %13446 = vmatprep.subr.bf16.mxu1 %v22760_v32  ;;  %v2628_v18 = vmul.f32 %v22792_v16, %v22792_v16 }
 0x328   :  { %v2666_v30 = vsel %vm2578_vm10, %v2627_v4, 0.0  ;;  %v2668_v3 = vsel %vm2578_vm10, %v2629_v56, 0.0 }
 0x32a   :  { %13448 = vmatpush1.bf16.msra.mxu1 %v17225_v28 }
 0x32b   :  { %13449 = vmatprep.subr.bf16.mxu1 %v22760_v32 }
 0x32e   :  { %13451 = vmatpush1.bf16.msra.mxu1 %v17257_v52 }
 0x32f   :  { %13452 = vmatprep.subr.bf16.mxu1 %v22760_v32 }
 0x332   :  { %13454 = vmatpush1.bf16.msra.mxu1 %v17284_v15 }
 0x333   :  { %13455 = vmatprep.subr.bf16.mxu1 %v22760_v32 }
 0x336   :  { %13457 = vmatpush1.bf16.msra.mxu1 %v17298_v58 }
 0x337   :  { %13458 = vmatprep.subr.bf16.mxu1 %v22760_v32 }
 0x33a   :  { %13460 = vmatpush1.bf16.msra.mxu1 %v17307_v63 }
 0x33b   :  { %13461 = vmatprep.subr.bf16.mxu1 %v22760_v32 }
 0x33e   :  { %13463 = vmatpush1.bf16.msra.mxu1 %v17321_v22 }
 0x33f   :  { %3112 = vmatprep.subr.mxu1 %v22761_v8 }
 0x342   :  { %3114 = vmatpush1.msra.mxu1 %v17278_v38 }
 0x343   :  { %3152 = vmatmul.mubr.f32.vlgmr.msra.gmra.mrb[0].mxu1 %v2791_v60  ;;  %13464 = vmatprep.subr.bf16.mxu1 %v22760_v32  ;;  %v2656_v60 = vsel %vm2578_vm10, %v2617_v1, 0.0 }
 0x344   :  { %13466 = vmatpush1.bf16.msra.mxu1 %v17535_v35  ;;  %3273 = vmatprep.mubr.f32.mxu1 %v17482_v37  ;;  %v2657_v47 = vadd.f32 %v2656_v60, %v2655_v11  ;;  %v2631_v11 = vmul.f32 %v17473_v41, %v17473_v41 }
 0x345   :  { %13467 = vmatprep.subr.bf16.mxu1 %v22760_v32 }
 0x346   :  { %v2659_v1 = vadd.f32 %v2658_v40, %v2657_v47  ;;  %v17594_v40 = vpack.c.bf16 %v22771_v61, %v22770_v14  ;;  %v2670_v47 = vsel %vm2578_vm10, %v2631_v11, 0.0  ;;  %v22782_v14 = vld [vmem:[#allocation49_spill] sm:$0xff] }
 0x347   :  { %v22783_v61 = vand.u32 4294901760, %v22782_v14 }
 0x348   :  { %13469 = vmatpush1.bf16.msra.mxu1 %v17552_v46  ;;  %v2661_v33 = vadd.f32 %v2660_v10, %v2659_v1  ;;  %v22772_v10 = vld [vmem:[#allocation37_spill] sm:$0xff]  ;;  %v22774_v1 = vld [vmem:[#allocation34_spill] sm:$0xff] }
 0x349   :  { %13470 = vmatprep.subr.bf16.mxu1 %v22760_v32  ;;  %v22773_v21 = vand.u32 4294901760, %v22772_v10 }
 0x34a   :  { %v2663_v60 = vadd.f32 %v2662_v29, %v2661_v33  ;;  %v22775_v29 = vand.u32 4294901760, %v22774_v1  ;;  %v22778_v33 = vld [vmem:[#allocation41_spill] sm:$0xff]  ;;  %v22786_v1 = vld [vmem:[#allocation107_spill] sm:$0xff] }
 0x34c   :  { %13472 = vmatpush1.bf16.msra.mxu1 %v17566_v5  ;;  %v2665_v27 = vadd.f32 %v2664_v34, %v2663_v60  ;;  %v17604_v4 = vpack.c.bf16 %v22775_v29, %v22773_v21  ;;  %v22779_v34 = vand.u32 4294901760, %v22778_v33  ;;  %v22785_v21 = vld [vmem:[#allocation50_spill] sm:$0xff]  ;;  %v2608_v29 = vmul.f32 %v22786_v1, %v22786_v1 }
 0x34d   :  { %13473 = vmatprep.subr.bf16.mxu1 %v22760_v32 }
 0x34e   :  { %v2667_v12 = vadd.f32 %v2666_v30, %v2665_v27  ;;  %v17612_v56 = vpack.c.bf16 %v22779_v34, %v22777_v42  ;;  %v22780_v30 = vld [vmem:[#allocation46_spill] sm:$0xff]  ;;  %v22788_v42 = vld [vmem:[#allocation108_spill] sm:$0xff] }
 0x34f   :  { %v22781_v11 = vand.u32 4294901760, %v22780_v30  ;;  %v2614_v33 = vmul.f32 %v22788_v42, %v22788_v42  ;;  %v22789_v30 = vld [vmem:[#allocation9_spill] sm:$0xff] }
 0x350   :  { %13475 = vmatpush1.bf16.msra.mxu1 %v17580_v59  ;;  %v2669_v50 = vadd.f32 %v2668_v3, %v2667_v12  ;;  %v22784_v12 = vld [vmem:[#allocation106_spill] sm:$0xff] }
 0x351   :  { %13476 = vmatprep.subr.bf16.mxu1 %v22760_v32  ;;  %v17620_v27 = vpack.c.bf16 %v22783_v61, %v22781_v11  ;;  %v2616_v11 = vmul.f32 %v22789_v30, %v22789_v30  ;;  %v2618_v61 = vmul.f32 %v17422_v2, %v17422_v2 }
 0x352   :  { %v2671_v7 = vadd.f32 %v2670_v47, %v2669_v50  ;;  %v2610_v47 = vmul.f32 %v22784_v12, %v22784_v12  ;;  %v22787_v50 = vld [vmem:[#allocation94_spill] sm:$0xff] }
 0x353   :  { %v2612_v19 = vmul.f32 %v22787_v50, %v22787_v50 }
 0x354   :  { %13478 = vmatpush1.bf16.msra.mxu1 %v17594_v40  ;;  %v2672_v60 = vrot.slane %v2671_v7, 4 }
 0x355   :  { %13479 = vmatprep.subr.bf16.mxu1 %v22760_v32 }
 0x356   :  { %v2673_v3 = vadd.f32 %v2672_v60, %v2671_v7  ;;  %v2632_v7 = vadd.f32 %v2610_v47, %v2608_v29  ;;  %v22790_v29 = vld [vmem:[#allocation28_spill] sm:$0xff] }
 0x357   :  { %v2620_v41 = vmul.f32 %v22790_v29, %v22790_v29 }
 0x358   :  { %13481 = vmatpush1.bf16.msra.mxu1 %v17604_v4  ;;  %v2674_v10 = vrot.slane %v2673_v3, 2  ;;  %v2633_v60 = vadd.f32 %v2632_v7, %v2612_v19 }
 0x359   :  { %13482 = vmatprep.subr.bf16.mxu1 %v22760_v32 }
 0x35a   :  { %v2675_v34 = vadd.f32 %v2674_v10, %v2673_v3  ;;  %v2634_v14 = vadd.f32 %v2633_v60, %v2614_v33  ;;  %v2622_v10 = vmul.f32 %v17438_v9, %v17438_v9  ;;  %v2624_v33 = vmul.f32 %v17445_v31, %v17445_v31 }
 0x35c   :  { %13484 = vmatpush1.bf16.msra.mxu1 %v17612_v56  ;;  %v2635_v47 = vadd.f32 %v2634_v14, %v2616_v11  ;;  %v22791_v11 = vld [vmem:[#allocation20_spill] sm:$0xff] }
 0x35d   :  { %13485 = vmatprep.subr.bf16.mxu1 %v22760_v32  ;;  %v2626_v14 = vmul.f32 %v22791_v11, %v22791_v11 }
 0x35e   :  { %v2636_v3 = vadd.f32 %v2635_v47, %v2618_v61 }
 0x360   :  { %13487 = vmatpush1.bf16.msra.mxu1 %v17620_v27  ;;  %v2637_v7 = vadd.f32 %v2636_v3, %v2620_v41 }
 0x361   :  { %3237 = vmatprep.subr.mxu1 %v22761_v8 }
 0x362   :  { %v2638_v60 = vadd.f32 %v2637_v7, %v2622_v10 }
 0x364   :  { %3241 = vmatpush1.msra.mxu1 %v22785_v21  ;;  %v2639_v47 = vadd.f32 %v2638_v60, %v2624_v33 }
 0x365   :  { %3275 = vmatmul.mubr.f32.vlgmr.msra.gmra.mrb[0].mxu1 %v17478_v23  ;;  %13488 = vmatprep.subr.bf16.mxu1 %v22760_v32 }
 0x366   :  { %13490 = vmatpush1.bf16.msra.mxu1 %v17153_v43  ;;  %3362 = vmatprep.mubr.f32.mxu1 %v17482_v37  ;;  %v2676_v37 = vrot.slane %v2675_v34, 1 }
 0x367   :  { %13491 = vmatprep.subr.bf16.mxu1 %v22760_v32 }
 0x368   :  { %v2677_v19 = vadd.f32 %v2676_v37, %v2675_v34  ;;  %v2640_v34 = vadd.f32 %v2639_v47, %v2626_v14  ;;  %v2630_v37 = vmul.f32 %v17471_v49, %v17471_v49 }
 0x36a   :  { %13493 = vmatpush1.bf16.msra.mxu1 %v17187_v44  ;;  %v3372_v61 = vsel %vm2578_vm10, %v2677_v19, 0  ;;  %v2641_v3 = vadd.f32 %v2640_v34, %v2628_v18 }
 0x36b   :  { %13494 = vmatprep.subr.bf16.mxu1 %v22760_v32  ;;  %v17661_v41 = vand.u32 4294901760, %v3372_v61 }
 0x36c   :  { %v2642_v19 = vadd.f32 %v2641_v3, %v2630_v37 }
 0x36d   :  { %v17668_v10 = vsub.f32 %v3372_v61, %v17661_v41 }
 0x36e   :  { %13496 = vmatpush1.bf16.msra.mxu1 %v17225_v28  ;;  %v2643_v33 = vrot.slane %v2642_v19, 4 }
 0x36f   :  { %13497 = vmatprep.subr.bf16.mxu1 %v22760_v32  ;;  %v3457_v7 = vand.u32 4294901760, %v17668_v10 }
 0x370   :  { %v2644_v60 = vadd.f32 %v2643_v33, %v2642_v19 }
 0x371   :  { %v3458_v18 = vsub.f32 %v17668_v10, %v3457_v7 }
 0x372   :  { %13499 = vmatpush1.bf16.msra.mxu1 %v17257_v52  ;;  %v2645_v61 = vrot.slane %v2644_v60, 2 }
 0x373   :  { %13500 = vmatprep.subr.bf16.mxu1 %v22760_v32  ;;  %v3459_v14 = vand.u32 4294901760, %v3458_v18 }
 0x374   :  { %v2646_v47 = vadd.f32 %v2645_v61, %v2644_v60  ;;  %v22793_v60 = vld [vmem:[#allocation30_spill] sm:$0xff]  ;;  %v22795_v61 = vld [vmem:[#allocation33_spill] sm:$0xff] }
 0x376   :  { %13502 = vmatpush1.bf16.msra.mxu1 %v17284_v15  ;;  %v2647_v34 = vrot.slane %v2646_v47, 1 }
 0x377   :  { %13503 = vmatprep.subr.bf16.mxu1 %v22760_v32 }
 0x378   :  { %v2648_v37 = vadd.f32 %v2647_v34, %v2646_v47  ;;  %v22796_v47 = vld [vmem:[#allocation31_spill] sm:$0xff]  ;;  %v22797_v34 = vld [vmem:[#allocation38_spill] sm:$0xff] }
 0x37a   :  { %13505 = vmatpush1.bf16.msra.mxu1 %v17298_v58 }
 0x37b   :  { %13506 = vmatprep.subr.bf16.mxu1 %v22760_v32 }
 0x37e   :  { %13508 = vmatpush1.bf16.msra.mxu1 %v17307_v63 }
 0x37f   :  { %13509 = vmatprep.subr.bf16.mxu1 %v22760_v32 }
 0x382   :  { %13511 = vmatpush1.bf16.msra.mxu1 %v17321_v22 }
 0x383   :  { %3328 = vmatprep.subr.mxu1 %v22761_v8 }
 0x386   :  { %3330 = vmatpush1.msra.mxu1 %v17278_v38 }
 0x387   :  { %3364 = vmatmul.mubr.f32.vlgmr.msra.gmra.mrb[0].mxu1 %v17478_v23  ;;  %13512 = vmatprep.subr.bf16.mxu1 %v22760_v32  ;;  %v17690_v23 = vand.u32 4294901760, %v2648_v37 }
 0x388   :  { %13514 = vmatpush1.bf16.msra.mxu1 %v17153_v43  ;;  %3460 = vmatprep.mubr.f32.mxu1 %v3459_v14  ;;  %v22794_v14 = vld [vmem:[#allocation29_spill] sm:$0xff] }
 0x389   :  { %13515 = vmatprep.subr.bf16.mxu1 %v22760_v32  ;;  %v17695_v3 = vsub.f32 %v2648_v37, %v17690_v23  ;;  %v22798_v37 = vld [vmem:[#allocation45_spill] sm:$0xff] }
 0x38b   :  { %v3463_v19 = vand.u32 4294901760, %v17695_v3 }
 0x38c   :  { %13517 = vmatpush1.bf16.msra.mxu1 %v17187_v44 }
 0x38d   :  { %13518 = vmatprep.subr.bf16.mxu1 %v22760_v32  ;;  %v3464_v33 = vsub.f32 %v17695_v3, %v3463_v19 }
 0x38f   :  { %v3465_v18 = vand.u32 4294901760, %v3464_v33  ;;  %v22799_v33 = vld [vmem:[#allocation48_spill] sm:$0xff] }
 0x390   :  { %13520 = vmatpush1.bf16.msra.mxu1 %v17225_v28 }
 0x391   :  { %13521 = vmatprep.subr.bf16.mxu1 %v22760_v32 }
 0x394   :  { %13523 = vmatpush1.bf16.msra.mxu1 %v17257_v52 }
 0x395   :  { %13524 = vmatprep.subr.bf16.mxu1 %v22760_v32 }
 0x398   :  { %13526 = vmatpush1.bf16.msra.mxu1 %v17284_v15 }
 0x399   :  { %13527 = vmatprep.subr.bf16.mxu1 %v22760_v32 }
 0x39c   :  { %13529 = vmatpush1.bf16.msra.mxu1 %v17298_v58 }
 0x39d   :  { %13530 = vmatprep.subr.bf16.mxu1 %v22760_v32 }
 0x3a0   :  { %13532 = vmatpush1.bf16.msra.mxu1 %v17307_v63 }
 0x3a1   :  { %13533 = vmatprep.subr.bf16.mxu1 %v22760_v32 }
 0x3a4   :  { %13535 = vmatpush1.bf16.msra.mxu1 %v17321_v22 }
 0x3a5   :  { %3422 = vmatprep.subr.mxu1 %v22761_v8 }
 0x3a8   :  { %3424 = vmatpush1.msra.mxu1 %v17278_v38 }
 0x3a9   :  { %3466 = vmatmul.mubr.f32.vlgmr.msra.gmra.mrb[2].mxu1 %v3465_v18  ;;  %13536 = vmatprep.subr.bf16.mxu1 %v22760_v32  ;;  %v22800_v18 = vld [vmem:[#allocation52_spill] sm:$0xff] }
 0x3aa   :  { %13538 = vmatpush1.bf16.msra.mxu1 %v22793_v60  ;;  %3621 = vmatprep.mubr.f32.mxu1 %v17661_v41  ;;  %v22801_v60 = vld [vmem:[#allocation103_spill] sm:$0xff] }
 0x3ab   :  { %13539 = vmatprep.subr.bf16.mxu1 %v22760_v32 }
 0x3ae   :  { %13541 = vmatpush1.bf16.msra.mxu1 %v22794_v14 }
 0x3af   :  { %13542 = vmatprep.subr.bf16.mxu1 %v22760_v32 }
 0x3b2   :  { %13544 = vmatpush1.bf16.msra.mxu1 %v22795_v61 }
 0x3b3   :  { %13545 = vmatprep.subr.bf16.mxu1 %v22760_v32 }
 0x3b6   :  { %13547 = vmatpush1.bf16.msra.mxu1 %v22796_v47 }
 0x3b7   :  { %13548 = vmatprep.subr.bf16.mxu1 %v22760_v32 }
 0x3ba   :  { %13550 = vmatpush1.bf16.msra.mxu1 %v22797_v34 }
 0x3bb   :  { %13551 = vmatprep.subr.bf16.mxu1 %v22760_v32 }
 0x3be   :  { %13553 = vmatpush1.bf16.msra.mxu1 %v22798_v37 }
 0x3bf   :  { %13554 = vmatprep.subr.bf16.mxu1 %v22760_v32 }
 0x3c2   :  { %13556 = vmatpush1.bf16.msra.mxu1 %v22799_v33 }
 0x3c3   :  { %13557 = vmatprep.subr.bf16.mxu1 %v22760_v32 }
 0x3c6   :  { %13559 = vmatpush1.bf16.msra.mxu1 %v22800_v18 }
 0x3c7   :  { %3583 = vmatprep.subr.mxu1 %v22761_v8 }
 0x3ca   :  { %3589 = vmatpush1.msra.mxu1 %v22801_v60 }
 0x3cb   :  { %3623 = vmatmul.mubr.f32.vlgmr.msra.gmra.mrb[2].mxu1 %v17690_v23  ;;  %13560 = vmatprep.subr.bf16.mxu1 %v22760_v32 }
 0x3cc   :  { %13562 = vmatpush1.bf16.msra.mxu1 %v17319_v51  ;;  %3728 = vmatprep.mubr.f32.mxu1 %v17668_v10 }
 0x3cd   :  { %13563 = vmatprep.subr.bf16.mxu1 %v22760_v32 }
 0x3d0   :  { %13565 = vmatpush1.bf16.msra.mxu1 %v17329_v54 }
 0x3d1   :  { %13566 = vmatprep.subr.bf16.mxu1 %v22760_v32 }
 0x3d4   :  { %13568 = vmatpush1.bf16.msra.mxu1 %v17336_v36 }
 0x3d5   :  { %13569 = vmatprep.subr.bf16.mxu1 %v22760_v32 }
 0x3d8   :  { %13571 = vmatpush1.bf16.msra.mxu1 %v17340_v62 }
 0x3d9   :  { %13572 = vmatprep.subr.bf16.mxu1 %v22760_v32 }
 0x3da   :  { %v17738_v14 = vpop.f32.mrb[24].mxu0 }
 0x3db   :  { %v2797_v61 = vpop.f32.mrb[25].mxu0 }
 0x3dc   :  { %13574 = vmatpush1.bf16.msra.mxu1 %v17344_v0 }
 0x3dd   :  { %13575 = vmatprep.subr.bf16.mxu1 %v22760_v32 }
 0x3e0   :  { %13577 = vmatpush1.bf16.msra.mxu1 %v17348_v48 }
 0x3e1   :  { %13578 = vmatprep.subr.bf16.mxu1 %v22760_v32 }
 0x3e4   :  { %13580 = vmatpush1.bf16.msra.mxu1 %v17352_v24 }
 0x3e5   :  { %13581 = vmatprep.subr.bf16.mxu1 %v22760_v32 }
 0x3e8   :  { %13583 = vmatpush1.bf16.msra.mxu1 %v17356_v6 }
 0x3e9   :  { %3692 = vmatprep.subr.mxu1 %v22761_v8 }
 0x3ec   :  { %3695 = vmatpush1.msra.mxu1 %v17290_v39 }
 0x3ed   :  { %3731 = vmatmul.mubr.f32.vlgmr.msra.gmra.mrb[2].mxu1 %v17695_v3  ;;  %13584 = vmatprep.subr.bf16.mxu1 %v22760_v32 }
 0x3ee   :  { %13586 = vmatpush1.bf16.msra.mxu1 %v17153_v43  ;;  %3820 = vmatprep.mubr.f32.mxu1 %v3457_v7 }
 0x3ef   :  { %13587 = vmatprep.subr.bf16.mxu1 %v22760_v32 }
 0x3f2   :  { %13589 = vmatpush1.bf16.msra.mxu1 %v17187_v44 }
 0x3f3   :  { %13590 = vmatprep.subr.bf16.mxu1 %v22760_v32 }
 0x3f6   :  { %13592 = vmatpush1.bf16.msra.mxu1 %v17225_v28 }
 0x3f7   :  { %13593 = vmatprep.subr.bf16.mxu1 %v22760_v32 }
 0x3fa   :  { %13595 = vmatpush1.bf16.msra.mxu1 %v17257_v52 }
 0x3fb   :  { %13596 = vmatprep.subr.bf16.mxu1 %v22760_v32 }
 0x3fe   :  { %13598 = vmatpush1.bf16.msra.mxu1 %v17284_v15 }
 0x3ff   :  { %13599 = vmatprep.subr.bf16.mxu1 %v22760_v32 }
 0x402   :  { %13601 = vmatpush1.bf16.msra.mxu1 %v17298_v58 }
 0x403   :  { %13602 = vmatprep.subr.bf16.mxu1 %v22760_v32 }
 0x406   :  { %13604 = vmatpush1.bf16.msra.mxu1 %v17307_v63 }
 0x407   :  { %13605 = vmatprep.subr.bf16.mxu1 %v22760_v32 }
 0x40a   :  { %13607 = vmatpush1.bf16.msra.mxu1 %v17321_v22 }
 0x40b   :  { %3784 = vmatprep.subr.mxu1 %v22761_v8 }
 0x40e   :  { %3786 = vmatpush1.msra.mxu1 %v17278_v38 }
 0x40f   :  { %3824 = vmatmul.mubr.f32.vlgmr.msra.gmra.mrb[2].mxu1 %v3463_v19  ;;  %13608 = vmatprep.subr.bf16.mxu1 %v22760_v32 }
 0x410   :  { %13610 = vmatpush1.bf16.msra.mxu1 %v17535_v35  ;;  %3945 = vmatprep.mubr.f32.mxu1 %v17661_v41 }
 0x411   :  { %13611 = vmatprep.subr.bf16.mxu1 %v22760_v32 }
 0x414   :  { %13613 = vmatpush1.bf16.msra.mxu1 %v17552_v46 }
 0x415   :  { %13614 = vmatprep.subr.bf16.mxu1 %v22760_v32 }
 0x418   :  { %13616 = vmatpush1.bf16.msra.mxu1 %v17566_v5 }
 0x419   :  { %13617 = vmatprep.subr.bf16.mxu1 %v22760_v32 }
 0x41c   :  { %13619 = vmatpush1.bf16.msra.mxu1 %v17580_v59 }
 0x41d   :  { %13620 = vmatprep.subr.bf16.mxu1 %v22760_v32 }
 0x420   :  { %13622 = vmatpush1.bf16.msra.mxu1 %v17594_v40 }
 0x421   :  { %13623 = vmatprep.subr.bf16.mxu1 %v22760_v32 }
 0x424   :  { %13625 = vmatpush1.bf16.msra.mxu1 %v17604_v4 }
 0x425   :  { %13626 = vmatprep.subr.bf16.mxu1 %v22760_v32 }
 0x428   :  { %13628 = vmatpush1.bf16.msra.mxu1 %v17612_v56  ;;  %v4044_v56 = vld [vmem:[%s21545_s4] sm:$0x1] }
 0x429   :  { %13629 = vmatprep.subr.bf16.mxu1 %v22760_v32 }
 0x42c   :  { %13631 = vmatpush1.bf16.msra.mxu1 %v17620_v27 }
 0x42d   :  { %3909 = vmatprep.subr.mxu1 %v22761_v8 }
 0x430   :  { %3913 = vmatpush1.msra.mxu1 %v22785_v21 }
 0x431   :  { %3947 = vmatmul.mubr.f32.vlgmr.msra.gmra.mrb[2].mxu1 %v17690_v23  ;;  %13632 = vmatprep.subr.bf16.mxu1 %v22760_v32 }
 0x432   :  { %13634 = vmatpush1.bf16.msra.mxu1 %v17153_v43  ;;  %4034 = vmatprep.mubr.f32.mxu1 %v17661_v41  ;;  %v4048_v41 = vld [vmem:[%s21546_s5] sm:$0x1] }
 0x433   :  { %13635 = vmatprep.subr.bf16.mxu1 %v22760_v32 }
 0x436   :  { %13637 = vmatpush1.bf16.msra.mxu1 %v17187_v44 }
 0x437   :  { %13638 = vmatprep.subr.bf16.mxu1 %v22760_v32 }
 0x43a   :  { %13640 = vmatpush1.bf16.msra.mxu1 %v17225_v28 }
 0x43b   :  { %13641 = vmatprep.subr.bf16.mxu1 %v22760_v32 }
 0x43e   :  { %13643 = vmatpush1.bf16.msra.mxu1 %v17257_v52  ;;  %v4051_v52 = vld [vmem:[%s21548_s7] sm:$0x77] }
 0x43f   :  { %13644 = vmatprep.subr.bf16.mxu1 %v22760_v32  ;;  %v4059_v39 = vsel %vm4058_vm11, %v4051_v52, 0 }
 0x442   :  { %13646 = vmatpush1.bf16.msra.mxu1 %v17284_v15  ;;  %v4053_v15 = vcombine.high %v4051_v52, %v4051_v52  ;;  %v5062_v52 = vld [vmem:[%s21549_s8 + $0x10] sm:$0xff] }
 0x443   :  { %13647 = vmatprep.subr.bf16.mxu1 %v22760_v32 }
 0x446   :  { %13649 = vmatpush1.bf16.msra.mxu1 %v17298_v58  ;;  %v17817_v58 = vand.u32 4294901760, %v4059_v39 }
 0x447   :  { %13650 = vmatprep.subr.bf16.mxu1 %v22760_v32 }
 0x44a   :  { %13652 = vmatpush1.bf16.msra.mxu1 %v17307_v63  ;;  %v4061_v63 = vsel %vm4058_vm11, %v4053_v15, 0  ;;  %vm8300_vm11 = vcmask 465920  }
 0x44b   :  { %13653 = vmatprep.subr.bf16.mxu1 %v22760_v32  ;;  %v17819_v51 = vand.u32 4294901760, %v4061_v63 }
 0x44e   :  { %13655 = vmatpush1.bf16.msra.mxu1 %v17321_v22  ;;  %v4142_v22 = vsub.f32 %v4061_v63, %v17819_v51  ;;  %v5064_v63 = vld [vmem:[%s21549_s8 + $0x20] sm:$0xff] }
 0x44f   :  { %4000 = vmatprep.subr.mxu1 %v22761_v8 }
 0x450   :  { %v17827_v36 = vand.u32 4294901760, %v4142_v22 }
 0x452   :  { %4002 = vmatpush1.msra.mxu1 %v17278_v38  ;;  %v4148_v38 = vsub.f32 %v4059_v39, %v17817_v58  ;;  %v4144_v0 = vsub.f32 %v4142_v22, %v17827_v36  ;;  %v5063_v39 = vld [vmem:[%s21549_s8 + $0x18] sm:$0xff] }
 0x453   :  { %4036 = vmatmul.mubr.f32.vlgmr.msra.gmra.mrb[2].mxu1 %v17690_v23  ;;  %4064 = vmatprep.subr.mxu1 %v17819_v51 }
 0x454   :  { %4129 = vmatprep.mubr.f32.mxu1 %v22761_v8  ;;  %v17823_v54 = vand.u32 4294901760, %v4148_v38  ;;  %4066 = vmatpush1.msra.mxu1 %v17817_v58  ;;  %v4145_v24 = vand.u32 4294901760, %v4144_v0  ;;  %v5069_v0 = vld [vmem:[%s21549_s8 + $0x48] sm:$0xff] }
 0x455   :  { %4532 = vmatprep.subr.mxu1 %v17819_v51 }
 0x456   :  { %v4150_v62 = vsub.f32 %v4148_v38, %v17823_v54  ;;  %4146 = vmatprep.subr.mxu0 %v4145_v24 }
 0x458   :  { %v4151_v48 = vand.u32 4294901760, %v4150_v62  ;;  %v5068_v62 = vld [vmem:[%s21549_s8 + $0x40] sm:$0xff] }
 0x45a   :  { %v3365_v43 = vpop.f32.mrb[0].mxu1  ;;  %4152 = vmatpush1.msra.mxu0 %v4151_v48 }
 0x45b   :  { %v14702_v44 = vadd.f32 %v3365_v43, %v17738_v14  ;;  %v3367_v28 = vpop.f32.mrb[1].mxu1  ;;  %4225 = vmatprep.subr.mxu0 %v4142_v22 }
 0x45c   :  { %v5061_v28 = vld [vmem:[%s21549_s8 + $0x8] sm:$0xff] }
 0x45d   :  { %v3370_v6 = vmul.f32 0.00025826445, %v14702_v44  ;;  %v5060_v44 = vld [vmem:[%s21549_s8] sm:$0xff] }
 0x45e   :  { %v13657_v15 = vpack.c.bf16 %v5061_v28, %v5060_v44 }
 0x45f   :  { %v4042_v46 = vmul.f32 %v3370_v6, %v3370_v6 }
 0x526   :  { %v4037_v35 = vpop.f32.mrb[2].mxu1 }
 0x527   :  { %v4041_v5 = vmul.f32 0.00025826445, %v4037_v35  ;;  %v4039_v59 = vpop.f32.mrb[3].mxu1 }
 0x529   :  { %v4043_v40 = vsub.f32 %v4041_v5, %v4042_v46  ;;  %v5072_v46 = vld [vmem:[%s21549_s8 + $0x60] sm:$0xff]  ;;  %v5073_v5 = vld [vmem:[%s21549_s8 + $0x68] sm:$0xff] }
 0x52a   :  { %v13675_v59 = vpack.c.bf16 %v5073_v5, %v5072_v46 }
 0x52b   :  { %v4045_v4 = vadd.f32 1e-05, %v4043_v40  ;;  %v5074_v40 = vld [vmem:[%s21549_s8 + $0x70] sm:$0xff] }
 0x52d   :  { %14944 = vrsqrt.f32 %v4045_v4  ;;  %v5075_v4 = vld [vmem:[%s21549_s8 + $0x78] sm:$0xff] }
 0x537   :  { %v14945_v27 = vpop.eup %14944 }
 0x538   :  { %v4047_v21 = vmul.f32 %v14945_v27, %v4044_v56  ;;  %v13678_v56 = vpack.c.bf16 %v5075_v4, %v5074_v40  ;;  %v5076_v27 = vld [vmem:[%s21549_s8 + $0x80] sm:$0xf] }
 0x53a   :  { %v4049_v10 = vmul.f32 %v4047_v21, %v3370_v6  ;;  %v4056_v7 = vsel %vm4054_vm12, %v4047_v21, 0  ;;  %v5071_v6 = vld [vmem:[%s21549_s8 + $0x58] sm:$0xff] }
 0x53b   :  { %v4130_v23 = vand.u32 4294901760, %v4056_v7 }
 0x53c   :  { %v4050_v3 = vsub.f32 %v4048_v41, %v4049_v10 }
 0x53d   :  { %v4131_v19 = vsub.f32 %v4056_v7, %v4130_v23  ;;  %4217 = vmatmul.mubr.f32.vlgmr.msra.gmra.mrb[26].mxu0 %v4130_v23 }
 0x53e   :  { %v4529_v47 = vsel %vm4054_vm12, %v4050_v3, 0  ;;  %4228 = vmatpush1.msra.mxu0 %v4148_v38  ;;  %4291 = vmatprep.mubr.f32.mxu0 %v22761_v8  ;;  %vm8302_vm12 = vcmask 982016  }
 0x53f   :  { %v4598_v34 = vand.u32 4294901760, %v4529_v47  ;;  %v4132_v37 = vand.u32 4294901760, %v4131_v19  ;;  %4301 = vmatprep.subr.mxu0 %v17819_v51 }
 0x541   :  { %v4599_v33 = vsub.f32 %v4529_v47, %v4598_v34  ;;  %v4133_v18 = vsub.f32 %v4131_v19, %v4132_v37 }
 0x543   :  { %v4134_v60 = vand.u32 4294901760, %v4133_v18  ;;  %v4600_v14 = vand.u32 4294901760, %v4599_v33  ;;  %v17934_v18 = vld [vmem:[%s21549_s8 + $0x98] sm:$0xff] }
 0x545   :  { %4135 = vmatmul.mubr.f32.vlgmr.msra.gmra.mrb[4].mxu1 %v4134_v60  ;;  %4294 = vmatmul.mubr.f32.vlgmr.msra.gmra.mrb[26].mxu0 %v4131_v19  ;;  %v4601_v61 = vsub.f32 %v4599_v33, %v4600_v14  ;;  %v22802_v19 = vld [vmem:[#allocation102_spill] sm:$0xff]  ;;  %v17939_v60 = vld [vmem:[%s21549_s8 + $0xa0] sm:$0xff] }
 0x546   :  { %4534 = vmatpush1.msra.mxu1 %v17817_v58  ;;  %4597 = vmatprep.mubr.f32.mxu1 %v22761_v8  ;;  %v13684_v44 = vpack.c.bf16 %v17939_v60, %v17934_v18  ;;  %v11274_v18 = vld [vmem:[%s21549_s8 + $0xb8] sm:$0xff]  ;;  %v11275_v60 = vld [vmem:[%s21549_s8 + $0xc0] sm:$0xff] }
 0x547   :  { %v4602_v43 = vand.u32 4294901760, %v4601_v61  ;;  %4303 = vmatpush1.msra.mxu0 %v17817_v58  ;;  %4366 = vmatprep.mubr.f32.mxu0 %v22761_v8 }
 0x548   :  { %4614 = vmatprep.subr.mxu1 %v4145_v24  ;;  %4379 = vmatprep.subr.mxu0 %v17827_v36  ;;  %v5070_v24 = vld [vmem:[%s21549_s8 + $0x50] sm:$0xff] }
 0x549   :  { %4603 = vmatmul.mubr.f32.vlgmr.msra.gmra.mrb[6].mxu1 %v4602_v43  ;;  %v13672_v35 = vpack.c.bf16 %v5071_v6, %v5070_v24 }
 0x54a   :  { %4620 = vmatpush1.msra.mxu1 %v4151_v48  ;;  %4683 = vmatprep.mubr.f32.mxu1 %v22761_v8  ;;  %v13669_v48 = vpack.c.bf16 %v5069_v0, %v5068_v62 }
 0x54b   :  { %4693 = vmatprep.subr.mxu1 %v4142_v22  ;;  %v5066_v22 = vld [vmem:[%s21549_s8 + $0x30] sm:$0xff] }
 0x54d   :  { %4370 = vmatmul.mubr.f32.vlgmr.msra.gmra.mrb[26].mxu0 %v4132_v37 }
 0x54e   :  { %4383 = vmatpush1.msra.mxu0 %v17823_v54  ;;  %4446 = vmatprep.mubr.f32.mxu0 %v22761_v8 }
 0x54f   :  { %4455 = vmatprep.subr.mxu0 %v17819_v51 }
 0x551   :  { %4685 = vmatmul.mubr.f32.vlgmr.msra.gmra.mrb[6].mxu1 %v4598_v34 }
 0x552   :  { %4696 = vmatpush1.msra.mxu1 %v4148_v38  ;;  %4759 = vmatprep.mubr.f32.mxu1 %v22761_v8 }
 0x553   :  { %4769 = vmatprep.subr.mxu1 %v17819_v51 }
 0x555   :  { %4448 = vmatmul.mubr.f32.vlgmr.msra.gmra.mrb[26].mxu0 %v4130_v23 }
 0x556   :  { %4457 = vmatpush1.msra.mxu0 %v17817_v58  ;;  %4520 = vmatprep.mubr.f32.mxu0 %v22761_v8 }
 0x559   :  { %4762 = vmatmul.mubr.f32.vlgmr.msra.gmra.mrb[6].mxu1 %v4599_v33  ;;  %v11269_v33 = vld [vmem:[%s21549_s8 + $0x90] sm:$0xff] }
 0x55a   :  { %4771 = vmatpush1.msra.mxu1 %v17817_v58  ;;  %4834 = vmatprep.mubr.f32.mxu1 %v22761_v8 }
 0x55b   :  { %4847 = vmatprep.subr.mxu1 %v17827_v36 }
 0x55d   :  { %4522 = vmatmul.mubr.f32.vlgmr.msra.gmra.mrb[26].mxu0 %v4130_v23 }
 0x561   :  { %4838 = vmatmul.mubr.f32.vlgmr.msra.gmra.mrb[6].mxu1 %v4600_v14 }
 0x562   :  { %4851 = vmatpush1.msra.mxu1 %v17823_v54  ;;  %4914 = vmatprep.mubr.f32.mxu1 %v22761_v8  ;;  %v5067_v54 = vld [vmem:[%s21549_s8 + $0x38] sm:$0xff] }
 0x563   :  { %4923 = vmatprep.subr.mxu1 %v17819_v51  ;;  %v5065_v51 = vld [vmem:[%s21549_s8 + $0x28] sm:$0xff]  ;;  %v13666_v36 = vpack.c.bf16 %v5067_v54, %v5066_v22  ;;  %v22803_v54 = vld [vmem:[#allocation19_spill] sm:$0xff] }
 0x564   :  { %v13663_v38 = vpack.c.bf16 %v5065_v51, %v5064_v63 }
 0x569   :  { %4916 = vmatmul.mubr.f32.vlgmr.msra.gmra.mrb[6].mxu1 %v4598_v34 }
 0x56a   :  { %4925 = vmatpush1.msra.mxu1 %v17817_v58  ;;  %4988 = vmatprep.mubr.f32.mxu1 %v22761_v8  ;;  %v13660_v58 = vpack.c.bf16 %v5063_v39, %v5062_v52 }
 0x56b   :  { %13656 = vmatprep.subr.bf16.mxu1 %v22760_v32 }
 0x571   :  { %4990 = vmatmul.mubr.f32.vlgmr.msra.gmra.mrb[6].mxu1 %v4598_v34  ;;  %v11268_v34 = vld [vmem:[%s21549_s8 + $0x88] sm:$0xff] }
 0x572   :  { %13658 = vmatpush1.bf16.msra.mxu1 %v13657_v15  ;;  %v13681_v43 = vpack.c.bf16 %v11269_v33, %v11268_v34  ;;  %v11273_v34 = vld [vmem:[%s21549_s8 + $0xb0] sm:$0xff] }
 0x573   :  { %13659 = vmatprep.subr.bf16.mxu1 %v22760_v32 }
 0x576   :  { %13661 = vmatpush1.bf16.msra.mxu1 %v13660_v58 }
 0x577   :  { %13662 = vmatprep.subr.bf16.mxu1 %v22760_v32 }
 0x57a   :  { %13664 = vmatpush1.bf16.msra.mxu1 %v13663_v38 }
 0x57b   :  { %13665 = vmatprep.subr.bf16.mxu1 %v22760_v32 }
 0x57e   :  { %13667 = vmatpush1.bf16.msra.mxu1 %v13666_v36  ;;  %v22804_v36 = vld [vmem:[#allocation25_spill] sm:$0xff] }
 0x57f   :  { %13668 = vmatprep.subr.bf16.mxu1 %v22760_v32 }
 0x582   :  { %13670 = vmatpush1.bf16.msra.mxu1 %v13669_v48 }
 0x583   :  { %13671 = vmatprep.subr.bf16.mxu1 %v22760_v32 }
 0x586   :  { %13673 = vmatpush1.bf16.msra.mxu1 %v13672_v35 }
 0x587   :  { %13674 = vmatprep.subr.bf16.mxu1 %v22760_v32 }
 0x58a   :  { %13676 = vmatpush1.bf16.msra.mxu1 %v13675_v59 }
 0x58b   :  { %13677 = vmatprep.subr.bf16.mxu1 %v22760_v32 }
 0x58e   :  { %13679 = vmatpush1.bf16.msra.mxu1 %v13678_v56 }
 0x58f   :  { %5148 = vmatprep.subr.mxu1 %v22761_v8 }
 0x592   :  { %11255 = vmatpush1.msk.msra.mxu1 %vm2698_vm9, %v5076_v27 }
 0x593   :  { %13680 = vmatprep.subr.bf16.mxu1 %v22760_v32 }
 0x618   :  { %v4136_v21 = vpop.f32.mrb[4].mxu1 }
 0x619   :  { %v4138_v41 = vpop.f32.mrb[5].mxu1 }
 0x630   :  { %v4523_v10 = vpop.f32.mrb[26].mxu0 }
 0x631   :  { %v14703_v7 = vadd.f32 %v4523_v10, %v4136_v21  ;;  %v4525_v23 = vpop.f32.mrb[27].mxu0 }
 0x632   :  { %v14704_v3 = vadd.f32 %v4525_v23, %v4138_v41 }
 0x633   :  { %v4999_v47 = vrot.slane %v14703_v7, %v22802_v19 }
 0x634   :  { %v5003_v37 = vrot.slane %v14704_v3, %v22802_v19 }
 0x635   :  { %v5004_v14 = vmul.f32 %v4999_v47, %v22786_v1  ;;  %v5006_v61 = vmul.f32 %v4999_v47, %v22784_v12  ;;  %v5008_v15 = vmul.f32 %v4999_v47, %v22787_v50  ;;  %v5010_v39 = vmul.f32 %v4999_v47, %v22788_v42 }
 0x636   :  { %v5005_v28 = vmul.f32 %v5003_v37, %v17382_v26  ;;  %v5007_v52 = vmul.f32 %v5003_v37, %v17379_v55  ;;  %v5009_v58 = vmul.f32 %v5003_v37, %v17387_v13  ;;  %v5011_v63 = vmul.f32 %v5003_v37, %v17397_v17 }
 0x637   :  { %v5013_v1 = vmul.f32 %v5003_v37, %v17411_v25  ;;  %v5012_v12 = vmul.f32 %v4999_v47, %v22789_v30  ;;  %v5015_v51 = vmul.f32 %v5003_v37, %v17418_v53  ;;  %v5014_v38 = vmul.f32 %v4999_v47, %v17422_v2 }
 0x638   :  { %v5017_v26 = vmul.f32 %v5003_v37, %v17426_v57  ;;  %v5016_v55 = vmul.f32 %v4999_v47, %v22790_v29  ;;  %v5019_v50 = vmul.f32 %v5003_v37, %v17434_v45  ;;  %v5018_v42 = vmul.f32 %v4999_v47, %v17438_v9  ;;  %v22805_v45 = vld [vmem:[#allocation97_spill] sm:$0xff] }
 0x639   :  { %v5021_v13 = vmul.f32 %v5003_v37, %v17442_v20  ;;  %v5020_v17 = vmul.f32 %v4999_v47, %v17445_v31  ;;  %v5023_v53 = vmul.f32 %v5003_v37, %v22803_v54  ;;  %v5022_v2 = vmul.f32 %v4999_v47, %v22791_v11 }
 0x63a   :  { %v5025_v57 = vmul.f32 %v5003_v37, %v22804_v36  ;;  %v5024_v62 = vmul.f32 %v4999_v47, %v22792_v16  ;;  %v5027_v0 = vmul.f32 %v5003_v37, %v22805_v45  ;;  %v5026_v9 = vmul.f32 %v4999_v47, %v17471_v49  ;;  %v11272_v47 = vld [vmem:[%s21549_s8 + $0xa8] sm:$0xff] }
 0x63b   :  { %v13687_v33 = vpack.c.bf16 %v11273_v34, %v11272_v47 }
 0x644   :  { %v4991_v22 = vpop.f32.mrb[6].mxu1 }
 0x645   :  { %v5031_v25 = vrot.slane %v4991_v22, %v22802_v19  ;;  %v4993_v30 = vpop.f32.mrb[7].mxu1 }
 0x646   :  { %v5035_v29 = vrot.slane %v4993_v30, %v22802_v19 }
 0x647   :  { %v17969_v20 = vadd.f32 %v5031_v25, %v5004_v14  ;;  %v17971_v31 = vadd.f32 %v5031_v25, %v5006_v61  ;;  %v17973_v48 = vadd.f32 %v5031_v25, %v5008_v15  ;;  %v17975_v24 = vadd.f32 %v5031_v25, %v5010_v39  ;;  %v11276_v61 = vld [vmem:[%s21549_s8 + $0xc8] sm:$0xff] }
 0x648   :  { %v17977_v6 = vadd.f32 %v5035_v29, %v5005_v28  ;;  %v17979_v11 = vadd.f32 %v5035_v29, %v5007_v52  ;;  %v17981_v35 = vadd.f32 %v5035_v29, %v5009_v58  ;;  %v17983_v46 = vadd.f32 %v5035_v29, %v5011_v63  ;;  %v11278_v28 = vld [vmem:[%s21549_s8 + $0xd8] sm:$0xff]  ;;  %v11279_v52 = vld [vmem:[%s21549_s8 + $0xe0] sm:$0xff]  ;;  %v11280_v39 = vld [vmem:[%s21549_s8 + $0xe8] sm:$0xff] }
 0x649   :  { %v17985_v16 = vadd.f32 %v5035_v29, %v5013_v1  ;;  %v17987_v5 = vadd.f32 %v5031_v25, %v5012_v12  ;;  %v17989_v49 = vadd.f32 %v5035_v29, %v5015_v51  ;;  %v17991_v59 = vadd.f32 %v5031_v25, %v5014_v38  ;;  %v11281_v58 = vld [vmem:[%s21549_s8 + $0xf0] sm:$0xff]  ;;  %v11282_v1 = vld [vmem:[%s21549_s8 + $0xf8] sm:$0xff]  ;;  %v11283_v12 = vld [vmem:[%s21549_s8 + $0x100] sm:$0xff] }
 0x64a   :  { %11256 = vmatprep.mubr.msk.f32.mxu1 %vm2578_vm10, %v17977_v6  ;;  %v17995_v40 = vadd.f32 %v5035_v29, %v5017_v26  ;;  %v17997_v4 = vadd.f32 %v5031_v25, %v5016_v55  ;;  %v17999_v56 = vadd.f32 %v5035_v29, %v5019_v50  ;;  %v18001_v27 = vadd.f32 %v5031_v25, %v5018_v42  ;;  %v11284_v38 = vld [vmem:[%s21549_s8 + $0x108] sm:$0xf]  ;;  %v5399_v26 = vld [vmem:[%s21550_s9] sm:$0xff]  ;;  %v11304_v55 = vld [vmem:[%s21550_s9 + $0x30] sm:$0xff] }
 0x64b   :  { %5181 = vmatmul.mubr.f32.vlgmr.msra.gmra.mrb[8].mxu1 %v17969_v20  ;;  %v18004_v21 = vadd.f32 %v5035_v29, %v5021_v13  ;;  %v18006_v41 = vadd.f32 %v5031_v25, %v5020_v17  ;;  %v18008_v10 = vadd.f32 %v5035_v29, %v5023_v53  ;;  %v18010_v7 = vadd.f32 %v5031_v25, %v5022_v2 }
 0x64c   :  { %11257 = vmatprep.mubr.msk.f32.mxu1 %vm2578_vm10, %v17979_v11  ;;  %13682 = vmatpush1.bf16.msra.mxu1 %v13681_v43  ;;  %v18014_v23 = vadd.f32 %v5035_v29, %v5025_v57  ;;  %v18016_v3 = vadd.f32 %v5031_v25, %v5024_v62  ;;  %v18018_v19 = vadd.f32 %v5035_v29, %v5027_v0  ;;  %v11277_v43 = vld [vmem:[%s21549_s8 + $0xd0] sm:$0xff]  ;;  %s15000_s8 = smov 122  }
 0x64d   :  { %13683 = vmatprep.subr.bf16.mxu1 %v22760_v32  ;;  %v18027_v37 = vadd.f32 %v5031_v25, %v5026_v9  ;;  %v13690_v14 = vpack.c.bf16 %v11275_v60, %v11274_v18  ;;  %v13696_v15 = vpack.c.bf16 %v11279_v52, %v11278_v28  ;;  %v13699_v63 = vpack.c.bf16 %v11281_v58, %v11280_v39 }
 0x64e   :  { %v13702_v51 = vpack.c.bf16 %v11283_v12, %v11282_v1  ;;  %12416 = vmatprep.mubr.msk.f32.mxu0 %vm379_vm7, %v5399_v26 }
 0x64f   :  { %5186 = vmatmul.mubr.f32.gmra.mrb[10].mxu1 %v17971_v31 }
 0x650   :  { %11258 = vmatprep.mubr.msk.f32.mxu1 %vm2578_vm10, %v17981_v35  ;;  %13685 = vmatpush1.bf16.msra.mxu1 %v13684_v44  ;;  %v13693_v44 = vpack.c.bf16 %v11277_v43, %v11276_v61 }
 0x651   :  { %13686 = vmatprep.subr.bf16.mxu1 %v22760_v32 }
 0x653   :  { %5191 = vmatmul.mubr.f32.gmra.mrb[12].mxu1 %v17973_v48 }
 0x654   :  { %11259 = vmatprep.mubr.msk.f32.mxu1 %vm2578_vm10, %v17983_v46  ;;  %13688 = vmatpush1.bf16.msra.mxu1 %v13687_v33 }
 0x655   :  { %13689 = vmatprep.subr.bf16.mxu1 %v22760_v32 }
 0x657   :  { %5196 = vmatmul.mubr.f32.gmra.mrb[14].mxu1 %v17975_v24 }
 0x658   :  { %11260 = vmatprep.mubr.msk.f32.mxu1 %vm2578_vm10, %v17985_v16  ;;  %13691 = vmatpush1.bf16.msra.mxu1 %v13690_v14 }
 0x659   :  { %13692 = vmatprep.subr.bf16.mxu1 %v22760_v32 }
 0x65b   :  { %5201 = vmatmul.mubr.f32.gmra.mrb[16].mxu1 %v17987_v5 }
 0x65c   :  { %11261 = vmatprep.mubr.msk.f32.mxu1 %vm2578_vm10, %v17989_v49  ;;  %13694 = vmatpush1.bf16.msra.mxu1 %v13693_v44 }
 0x65d   :  { %13695 = vmatprep.subr.bf16.mxu1 %v22760_v32 }
 0x65f   :  { %5206 = vmatmul.mubr.f32.gmra.mrb[18].mxu1 %v17991_v59 }
 0x660   :  { %11262 = vmatprep.mubr.msk.f32.mxu1 %vm2578_vm10, %v17995_v40  ;;  %13697 = vmatpush1.bf16.msra.mxu1 %v13696_v15 }
 0x661   :  { %13698 = vmatprep.subr.bf16.mxu1 %v22760_v32 }
 0x663   :  { %5211 = vmatmul.mubr.f32.gmra.mrb[20].mxu1 %v17997_v4 }
 0x664   :  { %11263 = vmatprep.mubr.msk.f32.mxu1 %vm2578_vm10, %v17999_v56  ;;  %13700 = vmatpush1.bf16.msra.mxu1 %v13699_v63 }
 0x665   :  { %13701 = vmatprep.subr.bf16.mxu1 %v22760_v32 }
 0x667   :  { %5216 = vmatmul.mubr.f32.gmra.mrb[22].mxu1 %v18001_v27 }
 0x668   :  { %11264 = vmatprep.mubr.msk.f32.mxu1 %vm2578_vm10, %v18004_v21  ;;  %13703 = vmatpush1.bf16.msra.mxu1 %v13702_v51 }
 0x669   :  { %5294 = vmatprep.subr.mxu1 %v22761_v8 }
 0x66b   :  { %5221 = vmatmul.mubr.f32.gmra.mrb[24].mxu1 %v18006_v41 }
 0x66c   :  { %11265 = vmatprep.mubr.msk.f32.mxu1 %vm2578_vm10, %v18008_v10  ;;  %11285 = vmatpush1.msk.msra.mxu1 %vm2698_vm9, %v11284_v38 }
 0x66f   :  { %5226 = vmatmul.mubr.f32.gmra.mrb[26].mxu1 %v18010_v7 }
 0x670   :  { %11266 = vmatprep.mubr.msk.f32.mxu1 %vm2578_vm10, %v18014_v23 }
 0x673   :  { %5231 = vmatmul.mubr.f32.gmra.mrb[28].mxu1 %v18016_v3 }
 0x674   :  { %11267 = vmatprep.mubr.msk.f32.mxu1 %vm2578_vm10, %v18018_v19 }
 0x677   :  { %5236 = vmatmul.mubr.f32.gmra.mrb[30].mxu1 %v18027_v37 }
 0x678   :  { %11286 = vmatprep.mubr.msk.f32.mxu1 %vm2578_vm10, %v17977_v6 }
 0x67b   :  { %5327 = vmatmul.mubr.f32.vlgmr.msra.gmra.mrb[32].mxu1 %v17969_v20 }
 0x67c   :  { %11287 = vmatprep.mubr.msk.f32.mxu1 %vm2578_vm10, %v17979_v11 }
 0x67f   :  { %5332 = vmatmul.mubr.f32.gmra.mrb[34].mxu1 %v17971_v31 }
 0x680   :  { %11288 = vmatprep.mubr.msk.f32.mxu1 %vm2578_vm10, %v17981_v35 }
 0x683   :  { %5337 = vmatmul.mubr.f32.gmra.mrb[36].mxu1 %v17973_v48 }
 0x684   :  { %11289 = vmatprep.mubr.msk.f32.mxu1 %vm2578_vm10, %v17983_v46 }
 0x687   :  { %5342 = vmatmul.mubr.f32.gmra.mrb[38].mxu1 %v17975_v24 }
 0x688   :  { %11290 = vmatprep.mubr.msk.f32.mxu1 %vm2578_vm10, %v17985_v16 }
 0x68b   :  { %5347 = vmatmul.mubr.f32.gmra.mrb[40].mxu1 %v17987_v5 }
 0x68c   :  { %11291 = vmatprep.mubr.msk.f32.mxu1 %vm2578_vm10, %v17989_v49 }
 0x68f   :  { %5352 = vmatmul.mubr.f32.gmra.mrb[42].mxu1 %v17991_v59 }
 0x690   :  { %11292 = vmatprep.mubr.msk.f32.mxu1 %vm2578_vm10, %v17995_v40 }
 0x693   :  { %5357 = vmatmul.mubr.f32.gmra.mrb[44].mxu1 %v17997_v4 }
 0x694   :  { %11293 = vmatprep.mubr.msk.f32.mxu1 %vm2578_vm10, %v17999_v56 }
 0x697   :  { %5362 = vmatmul.mubr.f32.gmra.mrb[46].mxu1 %v18001_v27 }
 0x698   :  { %11294 = vmatprep.mubr.msk.f32.mxu1 %vm2578_vm10, %v18004_v21 }
 0x69b   :  { %5367 = vmatmul.mubr.f32.gmra.mrb[48].mxu1 %v18006_v41 }
 0x69c   :  { %11295 = vmatprep.mubr.msk.f32.mxu1 %vm2578_vm10, %v18008_v10 }
 0x69f   :  { %5372 = vmatmul.mubr.f32.gmra.mrb[50].mxu1 %v18010_v7 }
 0x6a0   :  { %11296 = vmatprep.mubr.msk.f32.mxu1 %vm2578_vm10, %v18014_v23 }
 0x6a3   :  { %5377 = vmatmul.mubr.f32.gmra.mrb[52].mxu1 %v18016_v3 }
 0x6a4   :  { %11297 = vmatprep.mubr.msk.f32.mxu1 %vm2578_vm10, %v18018_v19 }
 0x6a7   :  { %5382 = vmatmul.mubr.f32.gmra.mrb[54].mxu1 %v18027_v37 }
 0x6a8   :  { %12449 = vmatprep.mubr.msk.f32.mxu1 %vm379_vm7, %v11304_v55 }
 0x71e   :  { %v5182_v22 = vpop.f32.mrb[8].mxu1 }
 0x71f   :  { %v5184_v50 = vpop.f32.mrb[9].mxu1 }
 0x722   :  { %v5187_v42 = vpop.f32.mrb[10].mxu1 }
 0x723   :  { %v5189_v13 = vpop.f32.mrb[11].mxu1 }
 0x726   :  { %v5192_v17 = vpop.f32.mrb[12].mxu1 }
 0x727   :  { %v5194_v25 = vpop.f32.mrb[13].mxu1 }
 0x728   :  { %v11305_v25 = vld [vmem:[%s21550_s9 + $0x38] sm:$0xff] }
 0x72a   :  { %v5197_v30 = vpop.f32.mrb[14].mxu1 }
 0x72b   :  { %v5199_v54 = vpop.f32.mrb[15].mxu1 }
 0x72c   :  { %v11306_v54 = vld [vmem:[%s21550_s9 + $0x40] sm:$0xff] }
 0x72e   :  { %v5202_v53 = vpop.f32.mrb[16].mxu1 }
 0x72f   :  { %v5204_v2 = vpop.f32.mrb[17].mxu1 }
 0x730   :  { %v11307_v2 = vld [vmem:[%s21550_s9 + $0x48] sm:$0xff] }
 0x732   :  { %v5207_v36 = vpop.f32.mrb[18].mxu1 }
 0x733   :  { %v5209_v57 = vpop.f32.mrb[19].mxu1 }
 0x734   :  { %v11308_v57 = vld [vmem:[%s21550_s9 + $0x50] sm:$0xff] }
 0x736   :  { %v5212_v29 = vpop.f32.mrb[20].mxu1 }
 0x737   :  { %v5214_v62 = vpop.f32.mrb[21].mxu1 }
 0x738   :  { %v11309_v62 = vld [vmem:[%s21550_s9 + $0x58] sm:$0xff] }
 0x73a   :  { %v5217_v45 = vpop.f32.mrb[22].mxu1 }
 0x73b   :  { %v5219_v0 = vpop.f32.mrb[23].mxu1 }
 0x73c   :  { %v5832_v0 = vld [vmem:[%s21551_s10 + $0x88] sm:$0xff] }
 0x73e   :  { %v5222_v9 = vpop.f32.mrb[24].mxu1 }
 0x73f   :  { %v5224_v20 = vpop.f32.mrb[25].mxu1 }
 0x742   :  { %v5227_v31 = vpop.f32.mrb[26].mxu1 }
 0x743   :  { %v5229_v48 = vpop.f32.mrb[27].mxu1 }
 0x744   :  { %v5816_v48 = vld [vmem:[%s21551_s10 + $0x8] sm:$0xff] }
 0x746   :  { %v18145_v24 = vpop.f32.mrb[28].mxu1 }
 0x747   :  { %v5234_v6 = vpop.f32.mrb[29].mxu1 }
 0x748   :  { %v18206_v6 = vld [vmem:[%s21551_s10 + $0x90] sm:$0xff] }
 0x74a   :  { %v18147_v11 = vpop.f32.mrb[30].mxu1 }
 0x74b   :  { %v5239_v35 = vpop.f32.mrb[31].mxu1 }
 0x74c   :  { %v5891_v35 = vand.u32 4294901760, %v5816_v48 }
 0x74e   :  { %v5328_v46 = vpop.f32.mrb[32].mxu1 }
 0x74f   :  { %v5387_v16 = vmax.f32 %v5182_v22, %v5328_v46  ;;  %v5330_v5 = vpop.f32.mrb[33].mxu1  ;;  %v5942_v46 = vand.u32 4294901760, %v18206_v6 }
 0x750   :  { %v18218_v5 = vld [vmem:[%s21551_s10 + $0x10] sm:$0xff] }
 0x752   :  { %v5333_v49 = vpop.f32.mrb[34].mxu1 }
 0x753   :  { %v5388_v59 = vmax.f32 %v5187_v42, %v5333_v49  ;;  %v5335_v40 = vpop.f32.mrb[35].mxu1  ;;  %v18223_v49 = vld [vmem:[%s21551_s10 + $0x18] sm:$0xff] }
 0x755   :  { %v13704_v4 = vpack.c.bf16 %v5388_v59, %v5387_v16 }
 0x756   :  { %v5338_v56 = vpop.f32.mrb[36].mxu1 }
 0x757   :  { %v5389_v27 = vmax.f32 %v5192_v17, %v5338_v56  ;;  %v5340_v21 = vpop.f32.mrb[37].mxu1  ;;  %13705 = vmatprep.subr.bf16.mxu0 %v13704_v4  ;;  %13729 = vmatprep.subr.bf16.mxu1 %v13704_v4  ;;  %v5400_v17 = vld [vmem:[%s21550_s9 + $0x8] sm:$0xff]  ;;  %v5894_v56 = vand.u32 4294901760, %v18218_v5 }
 0x758   :  { %13707 = vmatpush3.bf16.msra.mxu0 %v13704_v4  ;;  %13731 = vmatpush3.bf16.msra.mxu1 %v13704_v4  ;;  %v18235_v21 = vsub.f32 %v18206_v6, %v5942_v46 }
 0x75a   :  { %v5343_v41 = vpop.f32.mrb[38].mxu1 }
 0x75b   :  { %v5390_v10 = vmax.f32 %v5197_v30, %v5343_v41  ;;  %v5345_v7 = vpop.f32.mrb[39].mxu1  ;;  %v5401_v30 = vld [vmem:[%s21550_s9 + $0x10] sm:$0xff] }
 0x75d   :  { %v13708_v23 = vpack.c.bf16 %v5390_v10, %v5389_v27  ;;  %v18232_v27 = vsub.f32 %v5816_v48, %v5891_v35  ;;  %v5897_v10 = vand.u32 4294901760, %v18223_v49 }
 0x75e   :  { %v5348_v3 = vpop.f32.mrb[40].mxu1 }
 0x75f   :  { %v5391_v19 = vmax.f32 %v5202_v53, %v5348_v3  ;;  %v5350_v47 = vpop.f32.mrb[41].mxu1  ;;  %13709 = vmatprep.subr.bf16.mxu0 %v13708_v23  ;;  %13733 = vmatprep.subr.bf16.mxu1 %v13708_v23  ;;  %v5402_v53 = vld [vmem:[%s21550_s9 + $0x18] sm:$0xff] }
 0x760   :  { %13711 = vmatpush3.bf16.msra.mxu0 %v13708_v23  ;;  %13735 = vmatpush3.bf16.msra.mxu1 %v13708_v23  ;;  %v21962_v47 = vand.u32 4294901760, %v18232_v27 }
 0x762   :  { %v5353_v34 = vpop.f32.mrb[42].mxu1 }
 0x763   :  { %v5392_v37 = vmax.f32 %v5207_v36, %v5353_v34  ;;  %v5355_v33 = vpop.f32.mrb[43].mxu1  ;;  %v5403_v36 = vld [vmem:[%s21550_s9 + $0x20] sm:$0xff]  ;;  %v21961_v34 = vand.u32 4294901760, %v18235_v21 }
 0x764   :  { %v18253_v33 = vsub.f32 %v18223_v49, %v5897_v10 }
 0x765   :  { %v13712_v18 = vpack.c.bf16 %v5392_v37, %v5391_v19  ;;  %v18247_v19 = vsub.f32 %v18218_v5, %v5894_v56 }
 0x766   :  { %v5358_v60 = vpop.f32.mrb[44].mxu1 }
 0x767   :  { %v5393_v14 = vmax.f32 %v5212_v29, %v5358_v60  ;;  %v5360_v61 = vpop.f32.mrb[45].mxu1  ;;  %13713 = vmatprep.subr.bf16.mxu0 %v13712_v18  ;;  %13737 = vmatprep.subr.bf16.mxu1 %v13712_v18  ;;  %v5404_v29 = vld [vmem:[%s21550_s9 + $0x28] sm:$0xff] }
 0x768   :  { %13715 = vmatpush3.bf16.msra.mxu0 %v13712_v18  ;;  %13739 = vmatpush3.bf16.msra.mxu1 %v13712_v18  ;;  %v21958_v61 = vand.u32 4294901760, %v18247_v19 }
 0x76a   :  { %v5363_v43 = vpop.f32.mrb[46].mxu1 }
 0x76b   :  { %v5394_v44 = vmax.f32 %v5217_v45, %v5363_v43  ;;  %v5365_v28 = vpop.f32.mrb[47].mxu1  ;;  %v5831_v45 = vld [vmem:[%s21551_s10 + $0x80] sm:$0xff]  ;;  %v6085_v43 = vsub.f32 %v18232_v27, %v21962_v47 }
 0x76c   :  { %v5936_v20 = vand.u32 4294901760, %v5831_v45 }
 0x76d   :  { %v13716_v52 = vpack.c.bf16 %v5394_v44, %v5393_v14  ;;  %v6204_v44 = vsub.f32 %v18235_v21, %v21961_v34 }
 0x76e   :  { %v5368_v15 = vpop.f32.mrb[48].mxu1  ;;  %v18225_v59 = vsub.f32 %v5831_v45, %v5936_v20 }
 0x76f   :  { %v5395_v39 = vmax.f32 %v5222_v9, %v5368_v15  ;;  %v5370_v58 = vpop.f32.mrb[49].mxu1  ;;  %13717 = vmatprep.subr.bf16.mxu0 %v13716_v52  ;;  %13741 = vmatprep.subr.bf16.mxu1 %v13716_v52  ;;  %v5815_v9 = vld [vmem:[%s21551_s10] sm:$0xff] }
 0x770   :  { %13719 = vmatpush3.bf16.msra.mxu0 %v13716_v52  ;;  %13743 = vmatpush3.bf16.msra.mxu1 %v13716_v52  ;;  %v21967_v7 = vand.u32 4294901760, %v18225_v59  ;;  %v21957_v52 = vand.u32 4294901760, %v18253_v33  ;;  %v18278_v15 = vld [vmem:[%s21551_s10 + $0xa0] sm:$0xff] }
 0x772   :  { %v5373_v63 = vpop.f32.mrb[50].mxu1  ;;  %v6190_v18 = vsub.f32 %v18225_v59, %v21967_v7 }
 0x773   :  { %v5396_v1 = vmax.f32 %v5227_v31, %v5373_v63  ;;  %v5375_v12 = vpop.f32.mrb[51].mxu1  ;;  %v5939_v31 = vand.u32 4294901760, %v5832_v0 }
 0x774   :  { %v18286_v12 = vld [vmem:[%s21551_s10 + $0xa8] sm:$0xff] }
 0x775   :  { %v13720_v51 = vpack.c.bf16 %v5396_v1, %v5395_v39  ;;  %v18227_v40 = vsub.f32 %v5832_v0, %v5939_v31  ;;  %v6191_v39 = vand.u32 4294901760, %v6190_v18  ;;  %v6092_v1 = vsub.f32 %v18247_v19, %v21958_v61 }
 0x776   :  { %v5378_v38 = vpop.f32.mrb[52].mxu1 }
 0x777   :  { %v5397_v26 = vmax.f32 %v18145_v24, %v5378_v38  ;;  %v5380_v55 = vpop.f32.mrb[53].mxu1  ;;  %13721 = vmatprep.subr.bf16.mxu0 %v13720_v51  ;;  %13745 = vmatprep.subr.bf16.mxu1 %v13720_v51  ;;  %v5888_v24 = vand.u32 4294901760, %v5815_v9  ;;  %v21966_v23 = vand.u32 4294901760, %v18227_v40  ;;  %v6205_v38 = vand.u32 4294901760, %v6204_v44 }
 0x778   :  { %13723 = vmatpush3.bf16.msra.mxu0 %v13720_v51  ;;  %13747 = vmatpush3.bf16.msra.mxu1 %v13720_v51  ;;  %v6086_v51 = vand.u32 4294901760, %v6085_v43  ;;  %v6099_v55 = vsub.f32 %v18253_v33, %v21957_v52 }
 0x779   :  { %v18229_v4 = vsub.f32 %v5815_v9, %v5888_v24  ;;  %v6197_v60 = vsub.f32 %v18227_v40, %v21966_v23  ;;  %v18326_v9 = vld [vmem:[%s21551_s10 + $0x30] sm:$0xff] }
 0x77a   :  { %v5383_v22 = vpop.f32.mrb[54].mxu1 }
 0x77b   :  { %v5398_v50 = vmax.f32 %v18147_v11, %v5383_v22  ;;  %v5385_v42 = vpop.f32.mrb[55].mxu1  ;;  %v18211_v11 = vld [vmem:[%s21551_s10 + $0x98] sm:$0xff]  ;;  %v21964_v3 = vand.u32 4294901760, %v18229_v4  ;;  %v6198_v58 = vand.u32 4294901760, %v6197_v60  ;;  %v18294_v22 = vld [vmem:[%s21551_s10 + $0x20] sm:$0xff]  ;;  %v18357_v60 = vpack.c.bf16 %v5897_v10, %v5894_v56 }
 0x77c   :  { %v5945_v16 = vand.u32 4294901760, %v18211_v11  ;;  %v5900_v45 = vand.u32 4294901760, %v18294_v22 }
 0x77d   :  { %v13724_v13 = vpack.c.bf16 %v5398_v50, %v5397_v26  ;;  %v6078_v14 = vsub.f32 %v18229_v4, %v21964_v3  ;;  %v18299_v50 = vld [vmem:[%s21551_s10 + $0x28] sm:$0xff]  ;;  %v13784_v42 = vpack.c.bf16 %v6198_v58, %v6191_v39 }
 0x77e   :  { %v18238_v41 = vsub.f32 %v18211_v11, %v5945_v16  ;;  %v5903_v0 = vand.u32 4294901760, %v18299_v50  ;;  %v18331_v48 = vpack.c.bf16 %v5945_v16, %v5942_v46  ;;  %v18337_v11 = vsub.f32 %v18294_v22, %v5900_v45  ;;  %v18346_v46 = vld [vmem:[%s21551_s10 + $0x38] sm:$0xff]  ;;  %v18396_v22 = vld [vmem:[%s21551_s10 + $0xc0] sm:$0xff] }
 0x77f   :  { %13725 = vmatprep.subr.bf16.mxu0 %v13724_v13  ;;  %13749 = vmatprep.subr.bf16.mxu1 %v13724_v13  ;;  %v6079_v63 = vand.u32 4294901760, %v6078_v14  ;;  %v5906_v14 = vand.u32 4294901760, %v18326_v9  ;;  %v5909_v10 = vand.u32 4294901760, %v18346_v46 }
 0x780   :  { %13727 = vmatpush3.bf16.msra.mxu0 %v13724_v13  ;;  %13751 = vmatpush3.bf16.msra.mxu1 %v13724_v13  ;;  %v21959_v37 = vand.u32 4294901760, %v18238_v41  ;;  %v6093_v13 = vand.u32 4294901760, %v6092_v1  ;;  %v21952_v44 = vand.u32 4294901760, %v18337_v11 }
 0x781   :  { %13785 = vmatprep.subr.bf16.mxu1 %v13784_v42  ;;  %v18376_v39 = vsub.f32 %v18326_v9, %v5906_v14 }
 0x782   :  { %v6211_v28 = vsub.f32 %v18238_v41, %v21959_v37 }
 0x783   :  { %12417 = vmatmul.mubr.msk.f32.vlgmr.msra.gmra.mrb[28].mxu0 %vm379_vm7, %v5400_v17  ;;  %12450 = vmatmul.mubr.msk.f32.vlgmr.msra.gmra.mrb[56].mxu1 %vm379_vm7, %v11305_v25  ;;  %v18301_v17 = vpack.c.bf16 %v5939_v31, %v5936_v20  ;;  %v5948_v25 = vand.u32 4294901760, %v18278_v15  ;;  %22808 = vst [vmem:[#allocation72_spill] sm:$0xff] %v18376_v39 }
 0x784   :  { %12419 = vmatprep.mubr.msk.f32.mxu0 %vm379_vm7, %v5401_v30  ;;  %12452 = vmatprep.mubr.msk.f32.mxu1 %vm379_vm7, %v11306_v54  ;;  %v6212_v26 = vand.u32 4294901760, %v6211_v28  ;;  %v18307_v30 = vld [vmem:[%s21551_s10 + $0xb0] sm:$0xff]  ;;  %v13786_v54 = vpack.c.bf16 %v6086_v51, %v6079_v63  ;;  %v6106_v63 = vsub.f32 %v18337_v11, %v21952_v44  ;;  %v18490_v44 = vpack.c.bf16 %v5909_v10, %v5906_v14 }
 0x785   :  { %13753 = vmatprep.subr.bf16.mxu0 %v18301_v17  ;;  %v5954_v6 = vand.u32 4294901760, %v18307_v30 }
 0x786   :  { %13787 = vmatpush3.bf16.msra.mxu1 %v13786_v54  ;;  %v6107_v42 = vand.u32 4294901760, %v6106_v63  ;;  %v21982_v63 = vand.u32 4294901760, %v18396_v22 }
 0x787   :  { %12420 = vmatmul.mubr.msk.f32.gmra.mrb[30].mxu0 %vm379_vm7, %v5402_v53  ;;  %12453 = vmatmul.mubr.msk.f32.gmra.mrb[58].mxu1 %vm379_vm7, %v11307_v2  ;;  %v13788_v53 = vpack.c.bf16 %v6212_v26, %v6205_v38  ;;  %v6100_v2 = vand.u32 4294901760, %v6099_v55  ;;  %v18353_v18 = vsub.f32 %v18307_v30, %v5954_v6  ;;  %v21947_v26 = vand.u32 4294901760, %v18376_v39  ;;  %v18474_v30 = vld [vmem:[%s21551_s10 + $0x50] sm:$0xff] }
 0x788   :  { %12422 = vmatprep.mubr.msk.f32.mxu0 %vm379_vm7, %v5403_v36  ;;  %12455 = vmatprep.mubr.msk.f32.mxu1 %vm379_vm7, %v11308_v57  ;;  %v5951_v36 = vand.u32 4294901760, %v18286_v12  ;;  %v18313_v57 = vld [vmem:[%s21551_s10 + $0xb8] sm:$0xff]  ;;  %v18391_v55 = vsub.f32 %v18346_v46, %v5909_v10  ;;  %v21968_v10 = vand.u32 4294901760, %v18474_v30 }
 0x789   :  { %v13790_v20 = vpack.c.bf16 %v6100_v2, %v6093_v13  ;;  %13789 = vmatprep.subr.bf16.mxu1 %v13788_v53  ;;  %v5957_v49 = vand.u32 4294901760, %v18313_v57  ;;  %22806 = vst [vmem:[#allocation98_spill] sm:$0xff] %v18353_v18  ;;  %v21950_v56 = vand.u32 4294901760, %v18353_v18  ;;  %v18411_v2 = vld [vmem:[%s21551_s10 + $0x40] sm:$0xff]  ;;  %v6120_v46 = vsub.f32 %v18376_v39, %v21947_v26 }
 0x78a   :  { %v18329_v31 = vsub.f32 %v18286_v12, %v5951_v36  ;;  %22809 = vst [vmem:[#allocation11_spill] sm:$0xff] %v18391_v55  ;;  %v18406_v53 = vpack.c.bf16 %v5951_v36, %v5948_v25  ;;  %v18433_v26 = vpack.c.bf16 %v5903_v0, %v5900_v45  ;;  %v18521_v34 = vsub.f32 %v18474_v30, %v21968_v10 }
 0x78b   :  { %12423 = vmatmul.mubr.msk.f32.gmra.mrb[32].mxu0 %vm379_vm7, %v5404_v29  ;;  %12456 = vmatmul.mubr.msk.f32.gmra.mrb[60].mxu1 %vm379_vm7, %v11309_v62  ;;  %v18317_v29 = vsub.f32 %v18278_v15, %v5948_v25  ;;  %v18319_v62 = vpack.c.bf16 %v5891_v35, %v5888_v24  ;;  %v18340_v35 = vsub.f32 %v18299_v50, %v5903_v0  ;;  %v18401_v50 = vld [vmem:[%s21551_s10 + $0xc8] sm:$0xff]  ;;  %vm14994_vm7 = vmmov 0  }
 0x78c   :  { %v21953_v16 = vand.u32 4294901760, %v18329_v31  ;;  %v18366_v15 = vsub.f32 %v18313_v57, %v5957_v49  ;;  %13791 = vmatpush3.bf16.msra.mxu1 %v13790_v20  ;;  %v6232_v38 = vsub.f32 %v18353_v18, %v21950_v56  ;;  %22816 = vst [vmem:[#allocation57_spill] sm:$0xff] %v18521_v34  ;;  %v21971_v3 = vand.u32 4294901760, %v18521_v34 }
 0x78d   :  { %v21954_v24 = vand.u32 4294901760, %v18317_v29  ;;  %13755 = vmatpush3.bf16.msra.mxu0 %v18319_v62  ;;  %v21951_v28 = vand.u32 4294901760, %v18340_v35 }
 0x78e   :  { %13757 = vmatprep.subr.bf16.mxu0 %v18331_v48  ;;  %22807 = vst [vmem:[#allocation109_spill] sm:$0xff] %v18366_v15  ;;  %v6225_v5 = vsub.f32 %v18329_v31, %v21953_v16  ;;  %v21949_v12 = vand.u32 4294901760, %v18366_v15  ;;  %v6233_v20 = vand.u32 4294901760, %v6232_v38  ;;  %v6148_v10 = vsub.f32 %v18521_v34, %v21971_v3 }
 0x78f   :  { %v6218_v43 = vsub.f32 %v18317_v29, %v21954_v24  ;;  %v6113_v1 = vsub.f32 %v18340_v35, %v21951_v28 }
 0x790   :  { %v6226_v51 = vand.u32 4294901760, %v6225_v5  ;;  %v6239_v54 = vsub.f32 %v18366_v15, %v21949_v12  ;;  %v18420_v5 = vld [vmem:[%s21551_s10 + $0x48] sm:$0xff] }
 0x791   :  { %v6219_v58 = vand.u32 4294901760, %v6218_v43  ;;  %13759 = vmatpush3.bf16.msra.mxu0 %v18357_v60  ;;  %v6114_v13 = vand.u32 4294901760, %v6113_v1  ;;  %v21948_v43 = vand.u32 4294901760, %v18391_v55  ;;  %v18428_v1 = vld [vmem:[%s21551_s10 + $0xd0] sm:$0xff]  ;;  %v21979_v45 = vand.u32 4294901760, %v18420_v5 }
 0x792   :  { %v6240_v36 = vand.u32 4294901760, %v6239_v54  ;;  %13761 = vmatprep.subr.bf16.mxu0 %v18406_v53 }
 0x793   :  { %v13792_v57 = vpack.c.bf16 %v6226_v51, %v6219_v58  ;;  %v13794_v25 = vpack.c.bf16 %v6114_v13, %v6107_v42  ;;  %v21981_v58 = vand.u32 4294901760, %v18401_v50  ;;  %v6121_v51 = vand.u32 4294901760, %v6120_v46  ;;  %v18439_v13 = vld [vmem:[%s21551_s10 + $0xd8] sm:$0xff] }
 0x794   :  { %v6127_v38 = vsub.f32 %v18391_v55, %v21948_v43  ;;  %v21980_v42 = vand.u32 4294901760, %v18411_v2  ;;  %v13796_v54 = vpack.c.bf16 %v6240_v36, %v6233_v20  ;;  %v18460_v20 = vpack.c.bf16 %v5957_v49, %v5954_v6  ;;  %v18479_v6 = vld [vmem:[%s21551_s10 + $0x58] sm:$0xff] }
 0x795   :  { %13793 = vmatprep.subr.bf16.mxu1 %v13792_v57  ;;  %v18444_v57 = vsub.f32 %v18396_v22, %v21982_v63  ;;  %v18449_v46 = vsub.f32 %v18401_v50, %v21981_v58  ;;  %13763 = vmatpush3.bf16.msra.mxu0 %v18433_v26  ;;  %v21978_v36 = vand.u32 4294901760, %v18428_v1  ;;  %v21977_v56 = vand.u32 4294901760, %v18439_v13 }
 0x796   :  { %13795 = vmatpush3.bf16.msra.mxu1 %v13794_v25  ;;  %v6128_v0 = vand.u32 4294901760, %v6127_v38  ;;  %v18456_v25 = vsub.f32 %v18411_v2, %v21980_v42  ;;  %v18468_v38 = vsub.f32 %v18420_v5, %v21979_v45  ;;  %13765 = vmatprep.subr.bf16.mxu0 %v18460_v20 }
 0x797   :  { %22810 = vst [vmem:[#allocation12_spill] sm:$0xff] %v18444_v57  ;;  %22811 = vst [vmem:[#allocation89_spill] sm:$0xff] %v18449_v46  ;;  %13797 = vmatprep.subr.bf16.mxu1 %v13796_v54  ;;  %v21956_v43 = vand.u32 4294901760, %v18444_v57  ;;  %v21955_v12 = vand.u32 4294901760, %v18449_v46  ;;  %v18486_v28 = vsub.f32 %v18428_v1, %v21978_v36  ;;  %v18502_v24 = vsub.f32 %v18439_v13, %v21977_v56 }
 0x798   :  { %22812 = vst [vmem:[#allocation53_spill] sm:$0xff] %v18456_v25  ;;  %22813 = vst [vmem:[#allocation54_spill] sm:$0xff] %v18468_v38  ;;  %v13798_v49 = vpack.c.bf16 %v6128_v0, %v6121_v51  ;;  %v21960_v54 = vand.u32 4294901760, %v18456_v25  ;;  %v21963_v0 = vand.u32 4294901760, %v18468_v38 }
 0x799   :  { %22814 = vst [vmem:[#allocation110_spill] sm:$0xff] %v18486_v28  ;;  %v6246_v16 = vsub.f32 %v18444_v57, %v21956_v43  ;;  %v6253_v51 = vsub.f32 %v18449_v46, %v21955_v12  ;;  %22815 = vst [vmem:[#allocation113_spill] sm:$0xff] %v18502_v24  ;;  %v21965_v14 = vand.u32 4294901760, %v18486_v28  ;;  %13767 = vmatpush3.bf16.msra.mxu0 %v18490_v44  ;;  %v21976_v12 = vand.u32 4294901760, %v18479_v6 }
 0x79a   :  { %13799 = vmatpush3.bf16.msra.mxu1 %v13798_v49  ;;  %v6134_v9 = vsub.f32 %v18456_v25, %v21960_v54  ;;  %v6141_v61 = vsub.f32 %v18468_v38, %v21963_v0  ;;  %v21969_v49 = vand.u32 4294901760, %v18502_v24  ;;  %v22821_v25 = vand.u32 4294901760, %v18396_v22 }
 0x79b   :  { %v6247_v43 = vand.u32 4294901760, %v6246_v16  ;;  %v6254_v52 = vand.u32 4294901760, %v6253_v51  ;;  %v6260_v54 = vsub.f32 %v18486_v28, %v21965_v14  ;;  %v18526_v16 = vsub.f32 %v18479_v6, %v21976_v12  ;;  %v18605_v12 = vld [vmem:[%s21551_s10 + $0x78] sm:$0xff] }
 0x79c   :  { %v6135_v37 = vand.u32 4294901760, %v6134_v9  ;;  %v6142_v47 = vand.u32 4294901760, %v6141_v61  ;;  %v6267_v9 = vsub.f32 %v18502_v24, %v21969_v49 }
 0x79d   :  { %22817 = vst [vmem:[#allocation58_spill] sm:$0xff] %v18526_v16  ;;  %v13800_v51 = vpack.c.bf16 %v6254_v52, %v6247_v43  ;;  %v6261_v0 = vand.u32 4294901760, %v6260_v54  ;;  %v21970_v14 = vand.u32 4294901760, %v18526_v16  ;;  %v6149_v43 = vand.u32 4294901760, %v6148_v10 }
 0x79e   :  { %v13802_v23 = vpack.c.bf16 %v6142_v47, %v6135_v37  ;;  %v6268_v7 = vand.u32 4294901760, %v6267_v9  ;;  %v18542_v47 = vld [vmem:[%s21551_s10 + $0xe0] sm:$0xff]  ;;  %v18547_v37 = vld [vmem:[%s21551_s10 + $0xe8] sm:$0xff] }
 0x79f   :  { %13801 = vmatprep.subr.bf16.mxu1 %v13800_v51  ;;  %v6155_v61 = vsub.f32 %v18526_v16, %v21970_v14  ;;  %v21974_v51 = vand.u32 4294901760, %v18542_v47  ;;  %v18591_v14 = vld [vmem:[%s21551_s10 + $0xf8] sm:$0xff] }
 0x7a0   :  { %13803 = vmatpush3.bf16.msra.mxu1 %v13802_v23  ;;  %v13804_v52 = vpack.c.bf16 %v6268_v7, %v6261_v0  ;;  %v21973_v23 = vand.u32 4294901760, %v18547_v37  ;;  %v18554_v7 = vld [vmem:[%s21551_s10 + $0x60] sm:$0xff]  ;;  %v18559_v0 = vld [vmem:[%s21551_s10 + $0x68] sm:$0xff] }
 0x7a1   :  { %v6156_v49 = vand.u32 4294901760, %v6155_v61  ;;  %v21972_v10 = vand.u32 4294901760, %v18554_v7  ;;  %v18566_v9 = vsub.f32 %v18542_v47, %v21974_v51  ;;  %v21992_v51 = vand.u32 4294901760, %v18591_v14 }
 0x7a2   :  { %13805 = vmatprep.subr.bf16.mxu1 %v13804_v52  ;;  %v18571_v61 = vsub.f32 %v18547_v37, %v21973_v23 }
 0x7a3   :  { %v13806_v54 = vpack.c.bf16 %v6156_v49, %v6149_v43  ;;  %v21975_v49 = vand.u32 4294901760, %v18559_v0  ;;  %v18576_v52 = vsub.f32 %v18554_v7, %v21972_v10  ;;  %v21983_v3 = vand.u32 4294901760, %v18566_v9 }
 0x7a4   :  { %v21985_v10 = vand.u32 4294901760, %v18571_v61  ;;  %v18624_v56 = vsub.f32 %v18591_v14, %v21992_v51 }
 0x7a5   :  { %13807 = vmatpush3.bf16.msra.mxu1 %v13806_v54  ;;  %v18581_v43 = vsub.f32 %v18559_v0, %v21975_v49  ;;  %v18586_v54 = vld [vmem:[%s21551_s10 + $0xf0] sm:$0xff]  ;;  %v6274_v42 = vsub.f32 %v18566_v9, %v21983_v3  ;;  %v22818_v45 = vand.u32 4294901760, %v18576_v52 }
 0x7a6   :  { %v21987_v23 = vand.u32 4294901760, %v18586_v54  ;;  %v18600_v49 = vld [vmem:[%s21551_s10 + $0x70] sm:$0xff]  ;;  %v6281_v58 = vsub.f32 %v18571_v61, %v21985_v10  ;;  %v22003_v10 = vand.u32 4294901760, %v18605_v12  ;;  %v22005_v24 = vand.u32 4294901760, %v18624_v56 }
 0x7a7   :  { %v6162_v36 = vsub.f32 %v18576_v52, %v22818_v45  ;;  %v22819_v3 = vand.u32 4294901760, %v18581_v43  ;;  %v22820_v32 = vand.u32 4294901760, %v18600_v49  ;;  %v6275_v16 = vand.u32 4294901760, %v6274_v42 }
 0x7a8   :  { %v18619_v63 = vsub.f32 %v18586_v54, %v21987_v23  ;;  %v6282_v34 = vand.u32 4294901760, %v6281_v58 }
 0x7a9   :  { %v6169_v8 = vsub.f32 %v18581_v43, %v22819_v3  ;;  %v18636_v23 = vsub.f32 %v18600_v49, %v22820_v32  ;;  %v6163_v28 = vand.u32 4294901760, %v6162_v36  ;;  %v18644_v3 = vsub.f32 %v18605_v12, %v22003_v10 }
 0x7aa   :  { %v22004_v51 = vand.u32 4294901760, %v18619_v63  ;;  %v22822_v32 = vand.u32 4294901760, %v18401_v50  ;;  %v13808_v58 = vpack.c.bf16 %v6282_v34, %v6275_v16  ;;  %v22824_v36 = vand.u32 4294901760, %v18411_v2 }
 0x7ab   :  { %v6170_v38 = vand.u32 4294901760, %v6169_v8  ;;  %v6295_v8 = vsub.f32 %v18624_v56, %v22005_v24  ;;  %v22825_v10 = vand.u32 4294901760, %v18420_v5  ;;  %v22010_v50 = vand.u32 4294901760, %v18644_v3 }
 0x7ac   :  { %v18650_v46 = vpack.c.bf16 %v22822_v32, %v22821_v25  ;;  %v6288_v42 = vsub.f32 %v18619_v63, %v22004_v51  ;;  %13809 = vmatprep.subr.bf16.mxu1 %v13808_v58  ;;  %v22827_v51 = vand.u32 4294901760, %v18636_v23  ;;  %v22829_v58 = vand.u32 4294901760, %v18439_v13 }
 0x7ad   :  { %v18662_v45 = vpack.c.bf16 %v22825_v10, %v22824_v36  ;;  %v13810_v22 = vpack.c.bf16 %v6170_v38, %v6163_v28  ;;  %v6296_v16 = vand.u32 4294901760, %v6295_v8  ;;  %v6183_v28 = vsub.f32 %v18644_v3, %v22010_v50 }
 0x7ae   :  { %22823 = vst [vmem:[#allocation60_spill] sm:$0xff] %v18650_v46  ;;  %13769 = vmatprep.subr.bf16.mxu0 %v18650_v46  ;;  %v6289_v34 = vand.u32 4294901760, %v6288_v42  ;;  %v6176_v24 = vsub.f32 %v18636_v23, %v22827_v51  ;;  %v22828_v10 = vand.u32 4294901760, %v18428_v1 }
 0x7af   :  { %22826 = vst [vmem:[#allocation61_spill] sm:$0xff] %v18662_v45  ;;  %13771 = vmatpush3.bf16.msra.mxu0 %v18662_v45  ;;  %13811 = vmatpush3.bf16.msra.mxu1 %v13810_v22  ;;  %v6184_v22 = vand.u32 4294901760, %v6183_v28 }
 0x7b0   :  { %v18681_v42 = vpack.c.bf16 %v22829_v58, %v22828_v10  ;;  %v13812_v51 = vpack.c.bf16 %v6296_v16, %v6289_v34  ;;  %v6177_v1 = vand.u32 4294901760, %v6176_v24  ;;  %v22831_v10 = vand.u32 4294901760, %v18474_v30 }
 0x7b1   :  { %v22832_v58 = vand.u32 4294901760, %v18479_v6 }
 0x7b2   :  { %22830 = vst [vmem:[#allocation114_spill] sm:$0xff] %v18681_v42  ;;  %13773 = vmatprep.subr.bf16.mxu0 %v18681_v42  ;;  %13813 = vmatprep.subr.bf16.mxu1 %v13812_v51 }
 0x7b3   :  { %v18696_v50 = vpack.c.bf16 %v22832_v58, %v22831_v10  ;;  %v13814_v10 = vpack.c.bf16 %v6184_v22, %v6177_v1  ;;  %v22837_v58 = vand.u32 4294901760, %v18542_v47  ;;  %v22840_v1 = vand.u32 4294901760, %v18554_v7 }
 0x7b5   :  { %22833 = vst [vmem:[#allocation117_spill] sm:$0xff] %v18696_v50  ;;  %13775 = vmatpush3.bf16.msra.mxu0 %v18696_v50  ;;  %13815 = vmatpush3.bf16.msra.mxu1 %v13814_v10 }
 0x7b6   :  { %13849 = vmatprep.subr.bf16.mxu1 %v18301_v17 }
 0x856   :  { %v12418_v25 = vpop.f32.mrb[28].mxu0  ;;  %v12451_v32 = vpop.f32.mrb[56].mxu1 }
 0x857   :  { %v18669_v57 = vmax.f32 %v12418_v25, %v12451_v32  ;;  %v5489_v2 = vpop.f32.mrb[29].mxu0  ;;  %v5609_v5 = vpop.f32.mrb[57].mxu1 }
 0x858   :  { %v18675_v38 = vmax.f32 %v5489_v2, %v5609_v5 }
 0x859   :  { %v5657_v8 = vrot.slane %v18669_v57, 2  ;;  %v5645_v36 = vrot.slane %v18669_v57, 1  ;;  %v5669_v2 = vrot.slane %v18669_v57, 3 }
 0x85a   :  { %v12421_v25 = vpop.f32.mrb[30].mxu0  ;;  %v12454_v32 = vpop.f32.mrb[58].mxu1  ;;  %v5668_v16 = vrot.slane %v18675_v38, 3  ;;  %v22834_v39 = vrot.slane %v18675_v38, 2  ;;  %v22836_v51 = vrot.slane %v18675_v38, 1 }
 0x85b   :  { %v18689_v13 = vmax.f32 %v12421_v25, %v12454_v32  ;;  %v5499_v5 = vpop.f32.mrb[31].mxu0  ;;  %v5619_v34 = vpop.f32.mrb[59].mxu1 }
 0x85c   :  { %v18698_v55 = vmax.f32 %v5499_v5, %v5619_v34  ;;  %v5666_v24 = vsel %vm111_vm1, %v22834_v39, %v5657_v8  ;;  %v5654_v25 = vsel %vm86_vm3, %v22836_v51, %v5645_v36  ;;  %v5678_v34 = vsel %vm136_vm2, %v5668_v16, %v5669_v2 }
 0x85d   :  { %5722 = vrot.lane.b32.xlu0 %v5666_v24, %s14989_s1  ;;  %5698 = vrot.lane.b32.xlu1 %v5654_v25, %s14990_s2  ;;  %v22838_v24 = vand.u32 4294901760, %v18547_v37  ;;  %v5647_v22 = vrot.slane %v18689_v13, 1 }
 0x85e   :  { %v12424_v30 = vpop.f32.mrb[32].mxu0  ;;  %v12457_v6 = vpop.f32.mrb[60].mxu1  ;;  %v5646_v28 = vrot.slane %v18698_v55, 1  ;;  %v5670_v50 = vrot.slane %v18698_v55, 3 }
 0x85f   :  { %v18712_v32 = vmax.f32 %v12424_v30, %v12457_v6  ;;  %v5509_v39 = vpop.f32.mrb[33].mxu0  ;;  %v5629_v5 = vpop.f32.mrb[61].mxu1  ;;  %v18722_v51 = vpack.c.bf16 %v22838_v24, %v22837_v58  ;;  %v5658_v6 = vrot.slane %v18698_v55, 2 }
 0x860   :  { %v18724_v25 = vmax.f32 %v5509_v39, %v5629_v5  ;;  %v5653_v30 = vsel %vm86_vm3, %v5645_v36, %v5646_v28  ;;  %v5677_v37 = vsel %vm136_vm2, %v5669_v2, %v5670_v50  ;;  %v5659_v36 = vrot.slane %v18689_v13, 2 }
 0x861   :  { %22839 = vst [vmem:[#allocation62_spill] sm:$0xff] %v18722_v51  ;;  %5746 = vrot.lane.b32.xlu1 %v5678_v34, %s14991_s25  ;;  %5700 = vrot.lane.b32.xlu0 %v5653_v30, %s14990_s2  ;;  %v5665_v47 = vsel %vm111_vm1, %v5657_v8, %v5658_v6  ;;  %v22841_v39 = vand.u32 4294901760, %v18559_v0  ;;  %v5671_v34 = vrot.slane %v18689_v13, 3  ;;  %v22843_v8 = vand.u32 4294901760, %v18586_v54 }
 0x862   :  { %13777 = vmatprep.subr.bf16.mxu0 %v18722_v51  ;;  %v22844_v2 = vand.u32 4294901760, %v18591_v14  ;;  %v5664_v58 = vsel %vm111_vm1, %v5658_v6, %v5659_v36  ;;  %v5652_v24 = vsel %vm86_vm3, %v5646_v28, %v5647_v22  ;;  %v5648_v7 = vrot.slane %v18724_v25, 1 }
 0x863   :  { %v18746_v5 = vpack.c.bf16 %v22841_v39, %v22840_v1  ;;  %v22846_v0 = vand.u32 4294901760, %v18600_v49  ;;  %v22847_v30 = vand.u32 4294901760, %v18605_v12  ;;  %v13816_v14 = vpack.c.bf16 %v18227_v40, %v18225_v59 }
 0x864   :  { %v18753_v10 = vpack.c.bf16 %v22844_v2, %v22843_v8  ;;  %v5676_v54 = vsel %vm136_vm2, %v5670_v50, %v5671_v34  ;;  %v5651_v28 = vsel %vm86_vm3, %v5647_v22, %v5648_v7  ;;  %v5660_v49 = vrot.slane %v18724_v25, 2 }
 0x865   :  { %5724 = vrot.lane.b32.xlu1 %v5665_v47, %s14989_s1  ;;  %5748 = vrot.lane.b32.xlu0 %v5677_v37, %s14991_s25  ;;  %22842 = vst [vmem:[#allocation64_spill] sm:$0xff] %v18746_v5  ;;  %v18765_v47 = vpack.c.bf16 %v22847_v30, %v22846_v0  ;;  %v5672_v12 = vrot.slane %v18724_v25, 3  ;;  %v5661_v37 = vrot.slane %v18712_v32, 2  ;;  %v5649_v22 = vrot.slane %v18712_v32, 1 }
 0x866   :  { %22845 = vst [vmem:[#allocation65_spill] sm:$0xff] %v18753_v10  ;;  %13779 = vmatpush3.bf16.msra.mxu0 %v18746_v5  ;;  %v5663_v6 = vsel %vm111_vm1, %v5659_v36, %v5660_v49  ;;  %v5673_v36 = vrot.slane %v18712_v32, 3  ;;  %v22849_v0 = vrot.slane %v18675_v38, 2 }
 0x867   :  { %13781 = vmatprep.subr.bf16.mxu0 %v18753_v10  ;;  %v5675_v50 = vsel %vm136_vm2, %v5671_v34, %v5672_v12  ;;  %v5662_v1 = vsel %vm111_vm1, %v5660_v49, %v5661_v37  ;;  %v5650_v39 = vsel %vm86_vm3, %v5648_v7, %v5649_v22  ;;  %v22848_v34 = vrot.slane %v18675_v38, 1 }
 0x868   :  { %v5674_v2 = vsel %vm136_vm2, %v5672_v12, %v5673_v36  ;;  %v5679_v7 = vsel %vm136_vm2, %v5673_v36, %v5668_v16  ;;  %v5667_v30 = vsel %vm111_vm1, %v5661_v37, %v22849_v0  ;;  %v5683_v12 = vrot.slane %v18689_v13, 4 }
 0x869   :  { %5726 = vrot.lane.b32.xlu0 %v5664_v58, %s14989_s1  ;;  %5702 = vrot.lane.b32.xlu1 %v5652_v24, %s14990_s2  ;;  %v5655_v8 = vsel %vm86_vm3, %v5649_v22, %v22848_v34  ;;  %v5681_v58 = vrot.slane %v18669_v57, 4  ;;  %v5680_v24 = vrot.slane %v18675_v38, 4  ;;  %vm5864_vm1 = vcmask 605184  }
 0x86a   :  { %13783 = vmatpush3.bf16.msra.mxu0 %v18765_v47  ;;  %vm7848_vm2 = vcmask 1045504   ;;  %vm14993_vm3 = vmmov 1  }
 0x86b   :  { %13817 = vmatprep.subr.bf16.mxu0 %v13816_v14  ;;  %v5682_v14 = vrot.slane %v18698_v55, 4  ;;  %v5690_v16 = vsel %vm161_vm0, %v5680_v24, %v5681_v58  ;;  %vm19611_vm4 = vmpackc.low %vm7848_vm2, %vm14993_vm3 }
 0x86d   :  { %5750 = vrot.lane.b32.xlu1 %v5676_v54, %s14991_s25  ;;  %5704 = vrot.lane.b32.xlu0 %v5651_v28, %s14990_s2  ;;  %v5689_v49 = vsel %vm161_vm0, %v5681_v58, %v5682_v14 }
 0x871   :  { %5728 = vrot.lane.b32.xlu1 %v5663_v6, %s14989_s1  ;;  %5752 = vrot.lane.b32.xlu0 %v5675_v50, %s14991_s25  ;;  %v5684_v6 = vrot.slane %v18724_v25, 4  ;;  %v13818_v50 = vpack.c.bf16 %v18232_v27, %v18229_v4 }
 0x873   :  { %v5687_v22 = vsel %vm161_vm0, %v5683_v12, %v5684_v6 }
 0x875   :  { %5730 = vrot.lane.b32.xlu0 %v5662_v1, %s14989_s1  ;;  %5706 = vrot.lane.b32.xlu1 %v5650_v39, %s14990_s2  ;;  %v5688_v1 = vsel %vm161_vm0, %v5682_v14, %v5683_v12  ;;  %v5685_v39 = vrot.slane %v18712_v32, 4 }
 0x877   :  { %v5691_v36 = vsel %vm161_vm0, %v5685_v39, %v5680_v24  ;;  %v5686_v34 = vsel %vm161_vm0, %v5684_v6, %v5685_v39  ;;  %vm5808_vm0 = vcmask 64512  }
 0x879   :  { %5708 = vrot.lane.b32.xlu0 %v5655_v8, %s14990_s2  ;;  %5754 = vrot.lane.b32.xlu1 %v5674_v2, %s14991_s25  ;;  %s15002_s2 = smov 120  }
 0x87d   :  { %5756 = vrot.lane.b32.xlu0 %v5679_v7, %s14991_s25  ;;  %5732 = vrot.lane.b32.xlu1 %v5667_v30, %s14989_s1  ;;  %s15001_s1 = smov 59  }
 0x881   :  { %5772 = vrot.lane.b32.xlu0 %v5689_v49, %s14992_s26  ;;  %5770 = vrot.lane.b32.xlu1 %v5690_v16, %s14992_s26 }
 0x885   :  { %5776 = vrot.lane.b32.xlu0 %v5687_v22, %s14992_s26  ;;  %5774 = vrot.lane.b32.xlu1 %v5688_v1, %s14992_s26 }
 0x889   :  { %5780 = vrot.lane.b32.xlu0 %v5691_v36, %s14992_s26  ;;  %5778 = vrot.lane.b32.xlu1 %v5686_v34, %s14992_s26 }
 0x8cf   :  { %v5723_v8 = vpop.permute.xlu0 %5722  ;;  %v5699_v2 = vpop.permute.xlu1 %5698 }
 0x8d0   :  { %v5789_v58 = vsel %vm5788_vm13, %v18675_v38, %v5699_v2  ;;  %v5795_v0 = vsel %vm2578_vm10, %v5699_v2, %v5723_v8 }
 0x8d1   :  { %v18842_v7 = vand.u32 4294901760, %v5789_v58 }
 0x8d3   :  { %22850 = vst [vmem:[#allocation68_spill] sm:$0xff] %v18842_v7  ;;  %v18846_v30 = vsub.f32 %v5789_v58, %v18842_v7  ;;  %v18848_v24 = vpop.permute.xlu1 %5746  ;;  %v5701_v42 = vpop.permute.xlu0 %5700 }
 0x8d4   :  { %22851 = vst [vmem:[#allocation118_spill] sm:$0xff] %v18848_v24  ;;  %v5802_v14 = vsel %vm5801_vm14, %v5795_v0, %v18848_v24  ;;  %v5790_v16 = vsel %vm5788_vm13, %v18669_v57, %v5701_v42 }
 0x8d5   :  { %v18854_v49 = vand.u32 4294901760, %v5802_v14  ;;  %v18856_v38 = vand.u32 4294901760, %v5790_v16  ;;  %v22017_v12 = vand.u32 4294901760, %v18846_v30 }
 0x8d7   :  { %22852 = vst [vmem:[#allocation121_spill] sm:$0xff] %v18854_v49  ;;  %22853 = vst [vmem:[#allocation71_spill] sm:$0xff] %v18856_v38  ;;  %v18860_v6 = vsub.f32 %v5802_v14, %v18854_v49  ;;  %v18863_v22 = vsub.f32 %v5790_v16, %v18856_v38  ;;  %6299 = vmatprep.mubr.f32.mxu1 %v18854_v49  ;;  %v5725_v1 = vpop.permute.xlu1 %5724  ;;  %v18866_v39 = vpop.permute.xlu0 %5748  ;;  %v5992_v8 = vsub.f32 %v18846_v30, %v22017_v12  ;;  %v22868_v49 = vld [vmem:[#allocation89_spill] sm:$0xff] }
 0x8d8   :  { %22854 = vst [vmem:[#allocation73_spill] sm:$0xff] %v18866_v39  ;;  %v5796_v36 = vsel %vm2578_vm10, %v5701_v42, %v5725_v1  ;;  %6301 = vmatmul.mubr.f32.vlgmr.msra.gmra.mrb[62].mxu1 %v18842_v7  ;;  %v22867_v7 = vld [vmem:[#allocation12_spill] sm:$0xff] }
 0x8d9   :  { %v5803_v57 = vsel %vm5801_vm14, %v5796_v36, %v18866_v39  ;;  %13851 = vmatpush3.bf16.msra.mxu1 %v18319_v62  ;;  %v22018_v34 = vand.u32 4294901760, %v18860_v6  ;;  %v22021_v14 = vand.u32 4294901760, %v18863_v22  ;;  %v5993_v12 = vand.u32 4294901760, %v5992_v8 }
 0x8da   :  { %v18877_v2 = vand.u32 4294901760, %v5803_v57  ;;  %13853 = vmatprep.subr.bf16.mxu1 %v18331_v48 }
 0x8db   :  { %v5727_v58 = vpop.permute.xlu0 %5726  ;;  %v5703_v0 = vpop.permute.xlu1 %5702  ;;  %v5986_v42 = vsub.f32 %v18860_v6, %v22018_v34  ;;  %v6007_v8 = vsub.f32 %v18863_v22, %v22021_v14 }
 0x8dc   :  { %22855 = vst [vmem:[#allocation74_spill] sm:$0xff] %v18877_v2  ;;  %v18885_v16 = vsub.f32 %v5803_v57, %v18877_v2  ;;  %v5791_v1 = vsel %vm5788_vm13, %v18698_v55, %v5703_v0  ;;  %6306 = vmatprep.mubr.f32.mxu1 %v18877_v2  ;;  %v13820_v57 = vpack.c.bf16 %v18238_v41, %v18235_v21  ;;  %v22866_v2 = vld [vmem:[#allocation11_spill] sm:$0xff] }
 0x8dd   :  { %v18890_v36 = vand.u32 4294901760, %v5791_v1  ;;  %6308 = vmatmul.mubr.f32.gmra.mrb[64].mxu1 %v18856_v38  ;;  %v5987_v37 = vand.u32 4294901760, %v5986_v42  ;;  %v5797_v55 = vsel %vm2578_vm10, %v5703_v0, %v5727_v58  ;;  %v22865_v38 = vld [vmem:[#allocation72_spill] sm:$0xff] }
 0x8de   :  { %13855 = vmatpush3.bf16.msra.mxu1 %v18357_v60  ;;  %v22858_v58 = vand.u32 4294901760, %v18885_v16 }
 0x8df   :  { %22856 = vst [vmem:[#allocation76_spill] sm:$0xff] %v18890_v36  ;;  %v18901_v54 = vsub.f32 %v5791_v1, %v18890_v36  ;;  %5988 = vmatprep.mubr.f32.mxu0 %v5987_v37  ;;  %v18903_v34 = vpop.permute.xlu1 %5750  ;;  %v5705_v42 = vpop.permute.xlu0 %5704  ;;  %13857 = vmatprep.subr.bf16.mxu1 %v18406_v53 }
 0x8e0   :  { %22857 = vst [vmem:[#allocation122_spill] sm:$0xff] %v18903_v34  ;;  %v5804_v28 = vsel %vm5801_vm14, %v5797_v55, %v18903_v34  ;;  %v5792_v39 = vsel %vm5788_vm13, %v18689_v13, %v5705_v42  ;;  %5994 = vmatmul.mubr.f32.vlgmr.msra.gmra.mrb[34].mxu0 %v5993_v12  ;;  %v6001_v37 = vsub.f32 %v18885_v16, %v22858_v58 }
 0x8e1   :  { %v18916_v0 = vand.u32 4294901760, %v5804_v28  ;;  %v18918_v1 = vand.u32 4294901760, %v5792_v39  ;;  %13819 = vmatpush3.bf16.msra.mxu0 %v13818_v50  ;;  %v13822_v55 = vpack.c.bf16 %v18253_v33, %v18247_v19  ;;  %v6008_v50 = vand.u32 4294901760, %v6007_v8 }
 0x8e2   :  { %13859 = vmatpush3.bf16.msra.mxu1 %v18433_v26  ;;  %v6002_v24 = vand.u32 4294901760, %v6001_v37  ;;  %13821 = vmatprep.subr.bf16.mxu0 %v13820_v57  ;;  %v13824_v57 = vpack.c.bf16 %v18329_v31, %v18317_v29  ;;  %v13826_v8 = vpack.c.bf16 %v18340_v35, %v18337_v11 }
 0x8e3   :  { %22859 = vst [vmem:[#allocation101_spill] sm:$0xff] %v18916_v0  ;;  %22860 = vst [vmem:[#allocation77_spill] sm:$0xff] %v18918_v1  ;;  %v18925_v13 = vsub.f32 %v5804_v28, %v18916_v0  ;;  %v18928_v12 = vsub.f32 %v5792_v39, %v18918_v1  ;;  %6313 = vmatprep.mubr.f32.mxu1 %v18916_v0  ;;  %v5729_v58 = vpop.permute.xlu1 %5728  ;;  %v18931_v34 = vpop.permute.xlu0 %5752  ;;  %13861 = vmatprep.subr.bf16.mxu1 %v18460_v20  ;;  %v22863_v0 = vand.u32 4294901760, %v18901_v54 }
 0x8e4   :  { %22861 = vst [vmem:[#allocation79_spill] sm:$0xff] %v18931_v34  ;;  %v5798_v37 = vsel %vm2578_vm10, %v5705_v42, %v5729_v58  ;;  %6003 = vmatprep.mubr.f32.mxu0 %v6002_v24  ;;  %6315 = vmatmul.mubr.f32.gmra.mrb[66].mxu1 %v18890_v36 }
 0x8e5   :  { %v5805_v28 = vsel %vm5801_vm14, %v5798_v37, %v18931_v34  ;;  %6009 = vmatmul.mubr.f32.gmra.mrb[36].mxu0 %v6008_v50  ;;  %v22028_v39 = vand.u32 4294901760, %v18925_v13  ;;  %v6022_v24 = vsub.f32 %v18901_v54, %v22863_v0  ;;  %v13830_v37 = vpack.c.bf16 %v22866_v2, %v22865_v38  ;;  %v22877_v38 = vld [vmem:[#allocation117_spill] sm:$0xff]  ;;  %v22881_v2 = vld [vmem:[#allocation110_spill] sm:$0xff] }
 0x8e6   :  { %v18941_v14 = vand.u32 4294901760, %v5805_v28  ;;  %13823 = vmatpush3.bf16.msra.mxu0 %v13822_v55  ;;  %13863 = vmatpush3.bf16.msra.mxu1 %v18490_v44  ;;  %v13828_v55 = vpack.c.bf16 %v18366_v15, %v18353_v18  ;;  %v13832_v15 = vpack.c.bf16 %v22868_v49, %v22867_v7  ;;  %v18988_v49 = vld [vmem:[%s21551_s10 + $0x108] sm:$0xff] }
 0x8e7   :  { %v5731_v42 = vpop.permute.xlu0 %5730  ;;  %v5707_v58 = vpop.permute.xlu1 %5706  ;;  %13825 = vmatprep.subr.bf16.mxu0 %v13824_v57  ;;  %13865 = vmatprep.subr.bf16.mxu1 %v18650_v46  ;;  %v6016_v50 = vsub.f32 %v18925_v13, %v22028_v39  ;;  %v6023_v39 = vand.u32 4294901760, %v6022_v24  ;;  %22872 = vst [vmem:[#allocation86_spill] sm:$0xff] %v18988_v49  ;;  %v22879_v18 = vld [vmem:[#allocation54_spill] sm:$0xff] }
 0x8e8   :  { %22862 = vst [vmem:[#allocation81_spill] sm:$0xff] %v18941_v14  ;;  %v18957_v34 = vsub.f32 %v5805_v28, %v18941_v14  ;;  %v5793_v0 = vsel %vm5788_vm13, %v18724_v25, %v5707_v58  ;;  %6320 = vmatprep.mubr.f32.mxu1 %v18941_v14  ;;  %v18974_v25 = vld [vmem:[%s21551_s10 + $0x100] sm:$0xff]  ;;  %v22871_v28 = vand.u32 4294901760, %v18928_v12 }
 0x8e9   :  { %v18962_v57 = vand.u32 4294901760, %v5793_v0  ;;  %6322 = vmatmul.mubr.f32.gmra.mrb[68].mxu1 %v18918_v1  ;;  %v6017_v36 = vand.u32 4294901760, %v6016_v50  ;;  %22869 = vst [vmem:[#allocation83_spill] sm:$0xff] %v18974_v25  ;;  %v5799_v1 = vsel %vm2578_vm10, %v5707_v58, %v5731_v42 }
 0x8ea   :  { %13827 = vmatpush3.bf16.msra.mxu0 %v13826_v8  ;;  %13867 = vmatpush3.bf16.msra.mxu1 %v18662_v45  ;;  %v6037_v14 = vsub.f32 %v18928_v12, %v22871_v28  ;;  %v22878_v45 = vld [vmem:[#allocation53_spill] sm:$0xff] }
 0x8eb   :  { %22864 = vst [vmem:[#allocation82_spill] sm:$0xff] %v18962_v57  ;;  %v18978_v8 = vsub.f32 %v5793_v0, %v18962_v57  ;;  %6018 = vmatprep.mubr.f32.mxu0 %v6017_v36  ;;  %v5709_v24 = vpop.permute.xlu0 %5708  ;;  %v18980_v50 = vpop.permute.xlu1 %5754  ;;  %13829 = vmatprep.subr.bf16.mxu0 %v13828_v55  ;;  %v22873_v36 = vld [vmem:[#allocation114_spill] sm:$0xff]  ;;  %v22874_v55 = vand.u32 4294901760, %v18957_v34 }
 0x8ec   :  { %22870 = vst [vmem:[#allocation85_spill] sm:$0xff] %v18980_v50  ;;  %v5794_v42 = vsel %vm5788_vm13, %v18712_v32, %v5709_v24  ;;  %v5806_v58 = vsel %vm5801_vm14, %v5799_v1, %v18980_v50  ;;  %6024 = vmatmul.mubr.f32.gmra.mrb[38].mxu0 %v6023_v39  ;;  %13869 = vmatprep.subr.bf16.mxu1 %v22873_v36  ;;  %v22884_v39 = vand.u32 4294901760, %v18974_v25  ;;  %vm8296_vm13 = vcmask 482304  }
 0x8ed   :  { %v6031_v0 = vsub.f32 %v18957_v34, %v22874_v55  ;;  %v18998_v7 = vand.u32 4294901760, %v5794_v42  ;;  %v19000_v28 = vand.u32 4294901760, %v5806_v58  ;;  %v13834_v1 = vpack.c.bf16 %v22879_v18, %v22878_v45  ;;  %v19019_v18 = vld [vmem:[%s21551_s10 + $0x110] sm:$0xff] }
 0x8ee   :  { %13831 = vmatpush3.bf16.msra.mxu0 %v13830_v37  ;;  %13871 = vmatpush3.bf16.msra.mxu1 %v22877_v38  ;;  %v6038_v37 = vand.u32 4294901760, %v6037_v14  ;;  %v22882_v38 = vld [vmem:[#allocation113_spill] sm:$0xff]  ;;  %22883 = vst [vmem:[#allocation7_spill] sm:$0xff] %v19019_v18  ;;  %v22886_v14 = vand.u32 4294901760, %v18988_v49 }
 0x8ef   :  { %22875 = vst [vmem:[#allocation88_spill] sm:$0xff] %v18998_v7  ;;  %22876 = vst [vmem:[#allocation90_spill] sm:$0xff] %v19000_v28  ;;  %v6032_v32 = vand.u32 4294901760, %v6031_v0  ;;  %v19009_v36 = vsub.f32 %v5806_v58, %v19000_v28  ;;  %v19011_v55 = vpop.permute.xlu0 %5756  ;;  %6327 = vmatprep.mubr.f32.mxu1 %v19000_v28  ;;  %v5733_v46 = vpop.permute.xlu1 %5732  ;;  %13833 = vmatprep.subr.bf16.mxu0 %v13832_v15  ;;  %v13836_v0 = vpack.c.bf16 %v22882_v38, %v22881_v2  ;;  %v19034_v15 = vld [vmem:[%s21551_s10 + $0x118] sm:$0xff] }
 0x8f0   :  { %22880 = vst [vmem:[#allocation91_spill] sm:$0xff] %v19011_v55  ;;  %v19024_v58 = vsub.f32 %v18974_v25, %v22884_v39  ;;  %v19027_v50 = vsub.f32 %v5794_v42, %v18998_v7  ;;  %v5800_v28 = vsel %vm2578_vm10, %v5709_v24, %v5733_v46  ;;  %6329 = vmatmul.mubr.f32.gmra.mrb[70].mxu1 %v18962_v57  ;;  %v22889_v42 = vld [vmem:[#allocation57_spill] sm:$0xff]  ;;  %v22891_v25 = vand.u32 4294901760, %v18978_v8 }
 0x8f1   :  { %6033 = vmatprep.mubr.f32.mxu0 %v6032_v32  ;;  %v19039_v38 = vsub.f32 %v18988_v49, %v22886_v14  ;;  %v5807_v39 = vsel %vm5801_vm14, %v5800_v28, %v19011_v55  ;;  %13873 = vmatprep.subr.bf16.mxu1 %v18722_v51  ;;  %v22053_v46 = vand.u32 4294901760, %v19009_v36  ;;  %v22890_v32 = vld [vmem:[#allocation58_spill] sm:$0xff]  ;;  %v22057_v49 = vand.u32 4294901760, %v19019_v18 }
 0x8f2   :  { %22885 = vst [vmem:[#allocation40_spill] sm:$0xff] %v19024_v58  ;;  %6039 = vmatmul.mubr.f32.gmra.mrb[40].mxu0 %v6038_v37  ;;  %v19045_v24 = vand.u32 4294901760, %v5807_v39  ;;  %13875 = vmatpush3.bf16.msra.mxu1 %v18746_v5  ;;  %v13838_v57 = vpack.c.bf16 %v22890_v32, %v22889_v42  ;;  %v6052_v14 = vsub.f32 %v18978_v8, %v22891_v25  ;;  %v19078_v37 = vld [vmem:[%s21551_s10 + $0x130] sm:$0xff]  ;;  %v22898_v5 = vand.u32 4294901760, %v18860_v6 }
 0x8f3   :  { %22887 = vst [vmem:[#allocation104_spill] sm:$0xff] %v19039_v38  ;;  %13835 = vmatpush3.bf16.msra.mxu0 %v13834_v1  ;;  %13877 = vmatprep.subr.bf16.mxu1 %v18753_v10  ;;  %v6046_v28 = vsub.f32 %v19009_v36, %v22053_v46  ;;  %v19073_v46 = vld [vmem:[%s21551_s10 + $0x128] sm:$0xff]  ;;  %22892 = vst [vmem:[#allocation10_spill] sm:$0xff] %v19078_v37  ;;  %v19084_v25 = vsub.f32 %v19019_v18, %v22057_v49  ;;  %v22896_v18 = vand.u32 4294901760, %v19039_v38  ;;  %vm8294_vm10 = vcmask 1014784  }
 0x8f4   :  { %22888 = vst [vmem:[#allocation8_spill] sm:$0xff] %v19045_v24  ;;  %13837 = vmatprep.subr.bf16.mxu0 %v13836_v0  ;;  %v19061_v55 = vsub.f32 %v5807_v39, %v19045_v24  ;;  %6334 = vmatprep.mubr.f32.mxu1 %v19045_v24  ;;  %v19068_v0 = vld [vmem:[%s21551_s10 + $0x120] sm:$0xff]  ;;  %v19090_v24 = vld [vmem:[%s21551_s10 + $0x138] sm:$0xff]  ;;  %v5856_v10 = vld [vmem:[%s21551_s10 + $0x148] sm:$0x3]  ;;  %v22894_v39 = vand.u32 4294901760, %v19034_v15 }
 0x8f5   :  { %6336 = vmatmul.mubr.f32.gmra.mrb[72].mxu1 %v18998_v7  ;;  %v6047_v1 = vand.u32 4294901760, %v6046_v28  ;;  %22893 = vst [vmem:[#allocation105_spill] sm:$0xff] %v19090_v24  ;;  %v6053_v49 = vand.u32 4294901760, %v6052_v14  ;;  %v22895_v7 = vand.u32 4294901760, %v19024_v58  ;;  %v22065_v51 = vand.u32 4294901760, %v19068_v0 }
 0x8f6   :  { %v19098_v32 = vsub.f32 %v19034_v15, %v22894_v39  ;;  %13879 = vmatpush3.bf16.msra.mxu1 %v18765_v47  ;;  %6623 = vmatprep.mubr.f32.mxu1 %v22898_v5  ;;  %v22066_v39 = vand.u32 4294901760, %v19073_v46  ;;  %v22899_v14 = vand.u32 4294901760, %v19027_v50  ;;  %v19123_v5 = vsel %vm5883_vm15, %v5856_v10, 0 }
 0x8f7   :  { %13839 = vmatpush3.bf16.msra.mxu0 %v13838_v57  ;;  %v19106_v42 = vpack.c.bf16 %v22896_v18, %v22895_v7  ;;  %6048 = vmatprep.mubr.f32.mxu0 %v6047_v1  ;;  %v19120_v18 = vld [vmem:[%s21551_s10 + $0x140] sm:$0xff]  ;;  %v22900_v1 = vpack.c.bf16 %v18571_v61, %v18566_v9  ;;  %v19137_v57 = vsub.f32 %v19068_v0, %v22065_v51  ;;  %v22905_v51 = vand.u32 4294901760, %v19090_v24 }
 0x8f8   :  { %6054 = vmatmul.mubr.f32.gmra.mrb[42].mxu0 %v6053_v49  ;;  %v6067_v28 = vsub.f32 %v19027_v50, %v22899_v14  ;;  %13913 = vmatprep.subr.bf16.mxu1 %v18301_v17  ;;  %v22901_v49 = vand.u32 4294901760, %v19061_v55  ;;  %v19142_v10 = vsub.f32 %v19073_v46, %v22066_v39  ;;  %v22903_v17 = vand.u32 4294901760, %v18846_v30 }
 0x8f9   :  { %22897 = vst [vmem:[#allocation92_spill] sm:$0xff] %v19106_v42  ;;  %13841 = vmatprep.subr.bf16.mxu0 %v22900_v1  ;;  %v22902_v1 = vpack.c.bf16 %v18581_v43, %v18576_v52  ;;  %v19157_v7 = vsub.f32 %v19090_v24, %v22905_v51  ;;  %v22906_v39 = vand.u32 4294901760, %v18885_v16  ;;  %v22907_v38 = vand.u32 4294901760, %v19084_v25 }
 0x8fa   :  { %v6061_v14 = vsub.f32 %v19061_v55, %v22901_v49  ;;  %6627 = vmatmul.mubr.f32.vlgmr.msra.gmra.mrb[74].mxu1 %v22903_v17  ;;  %v22904_v49 = vand.u32 4294901760, %v19078_v37  ;;  %v22909_v51 = vpack.c.bf16 %v18624_v56, %v18619_v63  ;;  %v6068_v24 = vand.u32 4294901760, %v6067_v28 }
 0x8fb   :  { %13843 = vmatpush3.bf16.msra.mxu0 %v22902_v1  ;;  %13915 = vmatpush3.bf16.msra.mxu1 %v18319_v62  ;;  %v22910_v62 = vand.u32 4294901760, %v18225_v59  ;;  %v7195_v17 = vand.u32 4294901760, %v19137_v57  ;;  %v7202_v1 = vand.u32 4294901760, %v19142_v10  ;;  %v22914_v59 = vand.u32 4294901760, %v18863_v22 }
 0x8fc   :  { %v19152_v58 = vsub.f32 %v19078_v37, %v22904_v49  ;;  %6634 = vmatprep.mubr.f32.mxu1 %v22906_v39  ;;  %v6062_v42 = vand.u32 4294901760, %v6061_v14  ;;  %v22908_v49 = vand.u32 4294901760, %v19098_v32  ;;  %13845 = vmatprep.subr.bf16.mxu0 %v22909_v51  ;;  %v22911_v39 = vand.u32 4294901760, %v18227_v40 }
 0x8fd   :  { %13917 = vmatprep.subr.bf16.mxu1 %v18331_v48  ;;  %v22913_v51 = vand.u32 4294901760, %v19123_v5  ;;  %v7216_v48 = vand.u32 4294901760, %v19157_v7  ;;  %vm8298_vm14 = vcmask 998400   ;;  %vm8382_vm15 = vcmask 449536  }
 0x8fe   :  { %v19168_v37 = vpack.c.bf16 %v22908_v49, %v22907_v38  ;;  %v13880_v14 = vpack.c.bf16 %v22911_v39, %v22910_v62  ;;  %6063 = vmatprep.mubr.f32.mxu0 %v6062_v42  ;;  %v22912_v38 = vand.u32 4294901760, %v19120_v18  ;;  %6638 = vmatmul.mubr.f32.gmra.mrb[76].mxu1 %v22914_v59  ;;  %v7209_v40 = vand.u32 4294901760, %v19152_v58 }
 0x8ff   :  { %v19188_v28 = vsub.f32 %v19123_v5, %v22913_v51  ;;  %6069 = vmatmul.mubr.f32.gmra.mrb[44].mxu0 %v6068_v24  ;;  %v22915_v42 = vpack.c.bf16 %v18644_v3, %v18636_v23  ;;  %13919 = vmatpush3.bf16.msra.mxu1 %v18357_v60  ;;  %v22916_v62 = vand.u32 4294901760, %v18229_v4  ;;  %v22917_v39 = vand.u32 4294901760, %v18232_v27 }
 0x900   :  { %v19183_v49 = vsub.f32 %v19120_v18, %v22912_v38  ;;  %v19206_v24 = vpack.c.bf16 %v7202_v1, %v7195_v17  ;;  %6471 = vmatprep.mubr.f32.mxu0 %v18860_v6  ;;  %v22918_v51 = vand.u32 4294901760, %v18925_v13  ;;  %v19215_v60 = vpack.c.bf16 %v7216_v48, %v7209_v40  ;;  %13921 = vmatprep.subr.bf16.mxu1 %v18406_v53 }
 0x901   :  { %13847 = vmatpush3.bf16.msra.mxu0 %v22915_v42  ;;  %v13882_v38 = vpack.c.bf16 %v22917_v39, %v22916_v62  ;;  %v22919_v4 = vand.u32 4294901760, %v18235_v21  ;;  %v22920_v27 = vand.u32 4294901760, %v18238_v41  ;;  %v7230_v6 = vand.u32 4294901760, %v19188_v28 }
 0x902   :  { %6645 = vmatprep.mubr.f32.mxu1 %v22918_v51  ;;  %13881 = vmatprep.subr.bf16.mxu0 %v13880_v14  ;;  %v7223_v42 = vand.u32 4294901760, %v19183_v49  ;;  %v22921_v62 = vand.u32 4294901760, %v18901_v54  ;;  %v22922_v14 = vand.u32 4294901760, %v18247_v19  ;;  %v22923_v53 = vand.u32 4294901760, %v18253_v33 }
 0x903   :  { %v13884_v59 = vpack.c.bf16 %v22920_v27, %v22919_v4  ;;  %13923 = vmatpush3.bf16.msra.mxu1 %v18433_v26  ;;  %v22925_v26 = vand.u32 4294901760, %v18317_v29  ;;  %v22926_v19 = vand.u32 4294901760, %v18329_v31  ;;  %v22927_v39 = vand.u32 4294901760, %v18928_v12  ;;  %v22931_v31 = vld [vmem:[#allocation60_spill] sm:$0xff]  ;;  %v22934_v4 = vld [vmem:[#allocation109_spill] sm:$0xff] }
 0x904   :  { %6474 = vmatmul.mubr.f32.vlgmr.msra.gmra.mrb[46].mxu0 %v18846_v30  ;;  %6649 = vmatmul.mubr.f32.gmra.mrb[78].mxu1 %v22921_v62  ;;  %v13886_v21 = vpack.c.bf16 %v22923_v53, %v22922_v14  ;;  %v19236_v41 = vpack.c.bf16 %v7230_v6, %v7223_v42  ;;  %v22924_v30 = vand.u32 4294901760, %v18957_v34  ;;  %v22930_v29 = vand.u32 4294901760, %v19009_v36  ;;  %v22940_v62 = vld [vmem:[#allocation11_spill] sm:$0xff] }
 0x905   :  { %13883 = vmatpush3.bf16.msra.mxu0 %v13882_v38  ;;  %6480 = vmatprep.mubr.f32.mxu0 %v18885_v16  ;;  %v13888_v33 = vpack.c.bf16 %v22926_v19, %v22925_v26  ;;  %v22928_v16 = vand.u32 4294901760, %v18337_v11  ;;  %v22929_v38 = vand.u32 4294901760, %v18340_v35  ;;  %v22935_v27 = vand.u32 4294901760, %v22934_v4  ;;  %v22937_v35 = vld [vmem:[#allocation61_spill] sm:$0xff] }
 0x906   :  { %6656 = vmatprep.mubr.f32.mxu1 %v22924_v30  ;;  %13885 = vmatprep.subr.bf16.mxu0 %v13884_v59  ;;  %v22936_v11 = vand.u32 4294901760, %v18978_v8  ;;  %v22941_v14 = vand.u32 4294901760, %v22940_v62  ;;  %v22943_v30 = vld [vmem:[#allocation114_spill] sm:$0xff]  ;;  %v22946_v19 = vld [vmem:[#allocation89_spill] sm:$0xff]  ;;  %v22964_v62 = vand.u32 4294901760, %v18571_v61  ;;  %v22969_v61 = vand.u32 4294901760, %v18624_v56 }
 0x907   :  { %13925 = vmatprep.subr.bf16.mxu1 %v18460_v20  ;;  %v13890_v51 = vpack.c.bf16 %v22929_v38, %v22928_v16  ;;  %v22932_v20 = vld [vmem:[#allocation98_spill] sm:$0xff]  ;;  %v22948_v16 = vand.u32 4294901760, %v19027_v50  ;;  %v22949_v38 = vld [vmem:[#allocation117_spill] sm:$0xff] }
 0x908   :  { %6483 = vmatmul.mubr.f32.gmra.mrb[48].mxu0 %v18863_v22  ;;  %6660 = vmatmul.mubr.f32.gmra.mrb[80].mxu1 %v22927_v39  ;;  %v22933_v22 = vand.u32 4294901760, %v22932_v20  ;;  %v22953_v20 = vld [vmem:[#allocation121_spill] sm:$0xff] }
 0x909   :  { %13887 = vmatpush3.bf16.msra.mxu0 %v13886_v21  ;;  %13927 = vmatpush3.bf16.msra.mxu1 %v18490_v44  ;;  %v22938_v44 = vld [vmem:[#allocation72_spill] sm:$0xff]  ;;  %v22942_v21 = vand.u32 4294901760, %v19061_v55  ;;  %v22955_v4 = vld [vmem:[#allocation113_spill] sm:$0xff] }
 0x90a   :  { %6489 = vmatprep.mubr.f32.mxu0 %v18925_v13  ;;  %6667 = vmatprep.mubr.f32.mxu1 %v22930_v29  ;;  %v13892_v59 = vpack.c.bf16 %v22935_v27, %v22933_v22  ;;  %v22939_v13 = vand.u32 4294901760, %v22938_v44  ;;  %v22954_v22 = vand.u32 4294901760, %v22881_v2  ;;  %v22956_v27 = vand.u32 4294901760, %v22955_v4  ;;  %v22961_v44 = vld [vmem:[#allocation58_spill] sm:$0xff] }
 0x90b   :  { %13889 = vmatprep.subr.bf16.mxu0 %v13888_v33  ;;  %13929 = vmatprep.subr.bf16.mxu1 %v22931_v31  ;;  %v22947_v33 = vand.u32 4294901760, %v22946_v19  ;;  %v22963_v2 = vand.u32 4294901760, %v18566_v9  ;;  %v22968_v9 = vand.u32 4294901760, %v18619_v63  ;;  %v22971_v19 = vld [vmem:[#allocation74_spill] sm:$0xff] }
 0x90c   :  { %6492 = vmatmul.mubr.f32.gmra.mrb[50].mxu0 %v18901_v54  ;;  %6671 = vmatmul.mubr.f32.gmra.mrb[82].mxu1 %v22936_v11  ;;  %v13894_v53 = vpack.c.bf16 %v22941_v14, %v22939_v13  ;;  %v22944_v54 = vld [vmem:[#allocation12_spill] sm:$0xff]  ;;  %v22962_v13 = vand.u32 4294901760, %v22961_v44  ;;  %v22987_v44 = vld [vmem:[#allocation81_spill] sm:$0xff] }
 0x90d   :  { %13891 = vmatpush3.bf16.msra.mxu0 %v13890_v51  ;;  %13931 = vmatpush3.bf16.msra.mxu1 %v22937_v35  ;;  %v22945_v26 = vand.u32 4294901760, %v22944_v54  ;;  %v22951_v51 = vld [vmem:[#allocation54_spill] sm:$0xff]  ;;  %v22958_v11 = vld [vmem:[#allocation64_spill] sm:$0xff]  ;;  %v13904_v14 = vpack.c.bf16 %v22964_v62, %v22963_v2  ;;  %v5771_v54 = vpop.permute.xlu1 %5770  ;;  %v22988_v2 = vand.u32 4294901760, %v19068_v0  ;;  %v22989_v62 = vand.u32 4294901760, %v19073_v46 }
 0x90e   :  { %6498 = vmatprep.mubr.f32.mxu0 %v18957_v34  ;;  %6678 = vmatprep.mubr.f32.mxu1 %v22942_v21  ;;  %v22950_v34 = vand.u32 4294901760, %v22878_v45  ;;  %v22952_v29 = vand.u32 4294901760, %v22951_v51  ;;  %v22959_v45 = vld [vmem:[#allocation57_spill] sm:$0xff]  ;;  %v22967_v21 = vand.u32 4294901760, %v18581_v43  ;;  %v22973_v43 = vand.u32 4294901760, %v18644_v3  ;;  %v22979_v51 = vld [vmem:[#allocation118_spill] sm:$0xff] }
 0x90f   :  { %13893 = vmatprep.subr.bf16.mxu0 %v13892_v59  ;;  %13933 = vmatprep.subr.bf16.mxu1 %v22943_v30  ;;  %v13896_v39 = vpack.c.bf16 %v22947_v33, %v22945_v26  ;;  %v22957_v59 = vld [vmem:[#allocation62_spill] sm:$0xff]  ;;  %v22960_v35 = vand.u32 4294901760, %v22959_v45  ;;  %v22970_v26 = vld [vmem:[#allocation68_spill] sm:$0xff]  ;;  %v22974_v33 = vld [vmem:[#allocation83_spill] sm:$0xff] }
 0x910   :  { %6501 = vmatmul.mubr.f32.gmra.mrb[52].mxu0 %v18928_v12  ;;  %6682 = vmatmul.mubr.f32.gmra.mrb[84].mxu1 %v22948_v16  ;;  %v13898_v31 = vpack.c.bf16 %v22952_v29, %v22950_v34  ;;  %v13900_v12 = vpack.c.bf16 %v22956_v27, %v22954_v22  ;;  %v22976_v16 = vld [vmem:[#allocation86_spill] sm:$0xff]  ;;  %v22978_v34 = vld [vmem:[#allocation71_spill] sm:$0xff]  ;;  %v5809_v29 = vsel %vm5808_vm0, %v22979_v51, %v5771_v54  ;;  %v22983_v22 = vand.u32 4294901760, %v19034_v15  ;;  %v22984_v27 = vld [vmem:[#allocation73_spill] sm:$0xff] }
 0x911   :  { %13895 = vmatpush3.bf16.msra.mxu0 %v13894_v53  ;;  %13935 = vmatpush3.bf16.msra.mxu1 %v22949_v38  ;;  %v22965_v53 = vld [vmem:[#allocation65_spill] sm:$0xff]  ;;  %v22977_v63 = vand.u32 4294901760, %v22976_v16  ;;  %v5775_v56 = vpop.permute.xlu1 %5774  ;;  %v22986_v45 = vld [vmem:[#allocation122_spill] sm:$0xff] }
 0x912   :  { %6507 = vmatprep.mubr.f32.mxu0 %v19009_v36  ;;  %6987 = vmatprep.mubr.f32.mxu1 %v22953_v20  ;;  %v13902_v36 = vpack.c.bf16 %v22962_v13, %v22960_v35  ;;  %v5811_v35 = vsel %vm5808_vm0, %v22986_v45, %v5775_v56  ;;  %v22993_v0 = vld [vmem:[#allocation90_spill] sm:$0xff]  ;;  %v23000_v56 = vld [vmem:[#allocation105_spill] sm:$0xff] }
 0x913   :  { %13897 = vmatprep.subr.bf16.mxu0 %v13896_v39  ;;  %13937 = vmatprep.subr.bf16.mxu1 %v22957_v59  ;;  %v22975_v39 = vand.u32 4294901760, %v22974_v33  ;;  %v5866_v59 = vsel %vm5864_vm1, %v5809_v29, 0  ;;  %v22998_v16 = vld [vmem:[#allocation10_spill] sm:$0xff]  ;;  %v23002_v29 = vld [vmem:[#allocation91_spill] sm:$0xff] }
 0x914   :  { %6510 = vmatmul.mubr.f32.gmra.mrb[54].mxu0 %v18978_v8  ;;  %v22966_v8 = vand.u32 4294901760, %v18576_v52  ;;  %v22972_v52 = vand.u32 4294901760, %v18636_v23  ;;  %v22980_v23 = vld [vmem:[#allocation101_spill] sm:$0xff] }
 0x915   :  { %13899 = vmatpush3.bf16.msra.mxu0 %v13898_v31  ;;  %13939 = vmatpush3.bf16.msra.mxu1 %v22958_v11  ;;  %v19326_v38 = vpack.c.bf16 %v22977_v63, %v22975_v39  ;;  %v22981_v31 = vld [vmem:[#allocation7_spill] sm:$0xff]  ;;  %v22985_v11 = vld [vmem:[#allocation76_spill] sm:$0xff]  ;;  %v5779_v13 = vpop.permute.xlu1 %5778  ;;  %v22999_v63 = vand.u32 4294901760, %v22998_v16 }
 0x916   :  { %6516 = vmatprep.mubr.f32.mxu0 %v19061_v55  ;;  %13901 = vmatprep.subr.bf16.mxu0 %v13900_v12  ;;  %v13906_v30 = vpack.c.bf16 %v22967_v21, %v22966_v8  ;;  %v13908_v55 = vpack.c.bf16 %v22969_v61, %v22968_v9  ;;  %v5872_v21 = vsel %vm5864_vm1, %v5811_v35, 0  ;;  %v22992_v9 = vld [vmem:[#allocation85_spill] sm:$0xff] }
 0x917   :  { %13941 = vmatprep.subr.bf16.mxu1 %v22965_v53  ;;  %v22990_v53 = vld [vmem:[#allocation79_spill] sm:$0xff]  ;;  %v5813_v61 = vsel %vm5808_vm0, %v22992_v9, %v5779_v13  ;;  %v19381_v39 = vand.u32 4294901760, %v5872_v21 }
 0x918   :  { %6519 = vmatmul.mubr.f32.gmra.mrb[56].mxu0 %v19027_v50  ;;  %v5773_v50 = vpop.permute.xlu0 %5772 }
 0x919   :  { %13903 = vmatpush3.bf16.msra.mxu0 %v13902_v36  ;;  %13943 = vmatpush3.bf16.msra.mxu1 %v18765_v47  ;;  %v13910_v47 = vpack.c.bf16 %v22973_v43, %v22972_v52  ;;  %v5810_v12 = vsel %vm5808_vm0, %v22984_v27, %v5773_v50  ;;  %v19350_v36 = vand.u32 4294901760, %v5866_v59  ;;  %v23006_v27 = vand.u32 4294901760, %v19123_v5  ;;  %v23007_v5 = vld [vmem:[#allocation88_spill] sm:$0xff] }
 0x91a   :  { %6848 = vmatprep.mubr.f32.mxu0 %v22953_v20  ;;  %13905 = vmatprep.subr.bf16.mxu0 %v13904_v14  ;;  %v22982_v20 = vand.u32 4294901760, %v22981_v31  ;;  %v5869_v15 = vsel %vm5864_vm1, %v5810_v12, 0  ;;  %v19357_v14 = vpack.c.bf16 %v22989_v62, %v22988_v2  ;;  %v23003_v31 = vld [vmem:[#allocation82_spill] sm:$0xff]  ;;  %v19410_v13 = vsub.f32 %v5872_v21, %v19381_v39 }
 0x91b   :  { %v19368_v46 = vand.u32 4294901760, %v5869_v15 }
 0x91c   :  { %6989 = vmatmul.mubr.f32.vlgmr.msra.gmra.mrb[86].mxu1 %v22970_v26  ;;  %v5777_v3 = vpop.permute.xlu0 %5776  ;;  %v19337_v4 = vpack.c.bf16 %v22983_v22, %v22982_v20  ;;  %v23004_v20 = vld [vmem:[#allocation8_spill] sm:$0xff]  ;;  %v23005_v22 = vand.u32 4294901760, %v19120_v18 }
 0x91d   :  { %13907 = vmatpush3.bf16.msra.mxu0 %v13906_v30  ;;  %6994 = vmatprep.mubr.f32.mxu1 %v22971_v19  ;;  %v5812_v8 = vsel %vm5808_vm0, %v22990_v53, %v5777_v3  ;;  %v22991_v30 = vld [vmem:[#allocation77_spill] sm:$0xff]  ;;  %v5878_v3 = vsel %vm5864_vm1, %v5813_v61, 0 }
 0x91e   :  { %13909 = vmatprep.subr.bf16.mxu0 %v13908_v55  ;;  %v22994_v55 = vld [vmem:[#allocation40_spill] sm:$0xff]  ;;  %v5875_v33 = vsel %vm5864_vm1, %v5812_v8, 0  ;;  %v19401_v12 = vpack.c.bf16 %v23006_v27, %v23005_v22  ;;  %v19413_v2 = vand.u32 4294901760, %v5878_v3 }
 0x91f   :  { %v19406_v45 = vand.u32 4294901760, %v5875_v33 }
 0x920   :  { %6996 = vmatmul.mubr.f32.gmra.mrb[88].mxu1 %v22978_v34  ;;  %v5781_v54 = vpop.permute.xlu0 %5780  ;;  %v19434_v9 = vsub.f32 %v5878_v3, %v19413_v2  ;;  %v7210_v3 = vsub.f32 %v19152_v58, %v7209_v40 }
 0x921   :  { %13911 = vmatpush3.bf16.msra.mxu0 %v13910_v47  ;;  %7001 = vmatprep.mubr.f32.mxu1 %v22980_v23  ;;  %v19378_v47 = vsub.f32 %v5866_v59, %v19350_v36  ;;  %v19404_v59 = vsub.f32 %v5869_v15, %v19368_v46  ;;  %v23008_v15 = vand.u32 4294901760, %v19084_v25  ;;  %v19425_v8 = vsub.f32 %v5875_v33, %v19406_v45 }
 0x922   :  { %13945 = vmatprep.subr.bf16.mxu0 %v19326_v38 }
 0x923   :  { %v7106_v18 = vand.u32 4294901760, %v19378_v47  ;;  %v7182_v62 = vsub.f32 %v19084_v25, %v23008_v15  ;;  %v7116_v53 = vand.u32 4294901760, %v19404_v59 }
 0x924   :  { %6850 = vmatmul.mubr.f32.vlgmr.msra.gmra.mrb[58].mxu0 %v22970_v26  ;;  %7003 = vmatmul.mubr.f32.gmra.mrb[90].mxu1 %v22985_v11  ;;  %v22995_v26 = vand.u32 4294901760, %v22994_v55 }
 0x925   :  { %6855 = vmatprep.mubr.f32.mxu0 %v22971_v19  ;;  %7008 = vmatprep.mubr.f32.mxu1 %v22987_v44  ;;  %v22996_v19 = vld [vmem:[#allocation104_spill] sm:$0xff]  ;;  %v7107_v61 = vsub.f32 %v19378_v47, %v7106_v18  ;;  %v7117_v33 = vsub.f32 %v19404_v59, %v7116_v53 }
 0x926   :  { %13947 = vmatpush3.bf16.msra.mxu0 %v19326_v38  ;;  %v7168_v50 = vsub.f32 %v22994_v55, %v22995_v26  ;;  %v22997_v52 = vand.u32 4294901760, %v22996_v19  ;;  %v7126_v26 = vand.u32 4294901760, %v19410_v13 }
 0x927   :  { %13949 = vmatprep.subr.bf16.mxu0 %v19337_v4 }
 0x928   :  { %6857 = vmatmul.mubr.f32.gmra.mrb[60].mxu0 %v22978_v34  ;;  %7010 = vmatmul.mubr.f32.gmra.mrb[92].mxu1 %v22991_v30  ;;  %v7175_v43 = vsub.f32 %v22996_v19, %v22997_v52  ;;  %v23001_v34 = vand.u32 4294901760, %v23000_v56  ;;  %v7196_v52 = vsub.f32 %v19137_v57, %v7195_v17  ;;  %v7136_v56 = vand.u32 4294901760, %v19425_v8 }
 0x929   :  { %6862 = vmatprep.mubr.f32.mxu0 %v22980_v23  ;;  %7015 = vmatprep.mubr.f32.mxu1 %v22993_v0  ;;  %v5814_v23 = vsel %vm5808_vm0, %v23002_v29, %v5781_v54  ;;  %v23009_v54 = vand.u32 4294901760, %v19098_v32  ;;  %v7127_v17 = vsub.f32 %v19410_v13, %v7126_v26  ;;  %vm8385_vm0 = vcmask 1046528  }
 0x92a   :  { %13951 = vmatpush3.bf16.msra.mxu0 %v19337_v4  ;;  %v19388_v51 = vpack.c.bf16 %v23001_v34, %v22999_v63  ;;  %v7176_v35 = vand.u32 4294901760, %v7175_v43  ;;  %v7203_v43 = vsub.f32 %v19142_v10, %v7202_v1  ;;  %v7108_v34 = vand.u32 4294901760, %v7107_v61 }
 0x92b   :  { %13953 = vmatprep.subr.bf16.mxu0 %v19357_v14  ;;  %v7146_v1 = vand.u32 4294901760, %v19434_v9  ;;  %v7197_v29 = vand.u32 4294901760, %v7196_v52  ;;  %v7137_v27 = vsub.f32 %v19425_v8, %v7136_v56 }
 0x92c   :  { %6864 = vmatmul.mubr.f32.gmra.mrb[62].mxu0 %v22985_v11  ;;  %7017 = vmatmul.mubr.f32.gmra.mrb[94].mxu1 %v23003_v31  ;;  %v7169_v11 = vand.u32 4294901760, %v7168_v50  ;;  %v7183_v50 = vand.u32 4294901760, %v7182_v62 }
 0x92d   :  { %6869 = vmatprep.mubr.f32.mxu0 %v22987_v44  ;;  %7022 = vmatprep.mubr.f32.mxu1 %v23004_v20  ;;  %v5881_v44 = vsel %vm5864_vm1, %v5814_v23, 0  ;;  %v7204_v23 = vand.u32 4294901760, %v7203_v43  ;;  %vm11239_vm1 = vcmask 17408  }
 0x92e   :  { %13955 = vmatpush3.bf16.msra.mxu0 %v19357_v14  ;;  %v19427_v21 = vand.u32 4294901760, %v5881_v44 }
 0x92f   :  { %13957 = vmatprep.subr.bf16.mxu0 %v19388_v51  ;;  %v13972_v40 = vpack.c.bf16 %v7204_v23, %v7197_v29 }
 0x930   :  { %6871 = vmatmul.mubr.f32.gmra.mrb[64].mxu0 %v22991_v30  ;;  %7024 = vmatmul.mubr.f32.gmra.mrb[96].mxu1 %v23007_v5  ;;  %v7189_v30 = vsub.f32 %v19098_v32, %v23009_v54  ;;  %v19453_v16 = vsub.f32 %v5881_v44, %v19427_v21  ;;  %v7147_v44 = vsub.f32 %v19434_v9, %v7146_v1 }
 0x931   :  { %6876 = vmatprep.mubr.f32.mxu0 %v22993_v0  ;;  %v13964_v0 = vpack.c.bf16 %v7176_v35, %v7169_v11  ;;  %v7128_v35 = vand.u32 4294901760, %v7127_v17  ;;  %v7224_v54 = vsub.f32 %v19183_v49, %v7223_v42  ;;  %v13984_v42 = vpack.c.bf16 %v22996_v19, %v22994_v55 }
 0x932   :  { %13959 = vmatpush3.bf16.msra.mxu0 %v19388_v51  ;;  %v7190_v63 = vand.u32 4294901760, %v7189_v30  ;;  %v7156_v11 = vand.u32 4294901760, %v19453_v16  ;;  %v7231_v30 = vsub.f32 %v19188_v28, %v7230_v6  ;;  %v7148_v61 = vand.u32 4294901760, %v7147_v44 }
 0x933   :  { %13961 = vmatprep.subr.bf16.mxu0 %v19401_v12  ;;  %v7225_v52 = vand.u32 4294901760, %v7224_v54  ;;  %v13988_v6 = vpack.c.bf16 %v19098_v32, %v19084_v25  ;;  %v13996_v55 = vpack.c.bf16 %v19157_v7, %v19152_v58  ;;  %v14000_v32 = vpack.c.bf16 %v19188_v28, %v19183_v49  ;;  %v23010_v58 = vld [vmem:[#allocation92_spill] sm:$0xff]  ;;  %v7814_v25 = vld [vmem:[%s21553_s12 + $0x8] sm:$0xff] }
 0x934   :  { %6878 = vmatmul.mubr.f32.gmra.mrb[66].mxu0 %v23003_v31  ;;  %v7217_v31 = vsub.f32 %v19157_v7, %v7216_v48  ;;  %v13968_v22 = vpack.c.bf16 %v7190_v63, %v7183_v50  ;;  %v7138_v48 = vand.u32 4294901760, %v7137_v27  ;;  %v7157_v62 = vsub.f32 %v19453_v16, %v7156_v11  ;;  %v7817_v28 = vld [vmem:[%s21553_s12 + $0x20] sm:$0xff] }
 0x935   :  { %6883 = vmatprep.mubr.f32.mxu0 %v23004_v20  ;;  %v7118_v20 = vand.u32 4294901760, %v7117_v33  ;;  %v7232_v43 = vand.u32 4294901760, %v7231_v30  ;;  %v13992_v63 = vpack.c.bf16 %v19142_v10, %v19137_v57  ;;  %v7815_v57 = vld [vmem:[%s21553_s12 + $0x10] sm:$0xff]  ;;  %v7816_v10 = vld [vmem:[%s21553_s12 + $0x18] sm:$0xff] }
 0x936   :  { %13963 = vmatpush3.bf16.msra.mxu0 %v19401_v12  ;;  %v7218_v15 = vand.u32 4294901760, %v7217_v31  ;;  %v14068_v49 = vpack.c.bf16 %v7816_v10, %v7815_v57 }
 0x937   :  { %13965 = vmatprep.subr.bf16.mxu0 %v13964_v0  ;;  %v13980_v33 = vpack.c.bf16 %v7232_v43, %v7225_v52 }
 0x938   :  { %6885 = vmatmul.mubr.f32.gmra.mrb[68].mxu0 %v23007_v5  ;;  %v7211_v5 = vand.u32 4294901760, %v7210_v3 }
 0x939   :  { %12478 = vmatprep.mubr.f32.mxu0 %v7108_v34 }
 0x93a   :  { %v13976_v50 = vpack.c.bf16 %v7218_v15, %v7211_v5 }
 0x93c   :  { %12479 = vmatmul.mubr.f32.vlgmr.msra.gmra.mrb[70].mxu0 %v7118_v20 }
 0x93d   :  { %13967 = vmatpush3.bf16.msra.mxu0 %v13964_v0  ;;  %12481 = vmatprep.mubr.f32.mxu0 %v7128_v35  ;;  %v7158_v0 = vand.u32 4294901760, %v7157_v62 }
 0x93e   :  { %13969 = vmatprep.subr.bf16.mxu0 %v13968_v22 }
 0x940   :  { %12482 = vmatmul.mubr.f32.gmra.mrb[72].mxu0 %v7138_v48 }
 0x941   :  { %13971 = vmatpush3.bf16.msra.mxu0 %v13968_v22  ;;  %12484 = vmatprep.mubr.f32.mxu0 %v7148_v61 }
 0x942   :  { %13973 = vmatprep.subr.bf16.mxu0 %v13972_v40 }
 0x944   :  { %12485 = vmatmul.mubr.f32.gmra.mrb[74].mxu0 %v7158_v0 }
 0x945   :  { %13975 = vmatpush3.bf16.msra.mxu0 %v13972_v40  ;;  %12507 = vmatprep.mubr.f32.mxu0 %v19350_v36 }
 0x946   :  { %13977 = vmatprep.subr.bf16.mxu0 %v13976_v50 }
 0x949   :  { %13979 = vmatpush3.bf16.msra.mxu0 %v13976_v50 }
 0x94a   :  { %13981 = vmatprep.subr.bf16.mxu0 %v13980_v33 }
 0x94d   :  { %13983 = vmatpush3.bf16.msra.mxu0 %v13980_v33 }
 0x94e   :  { %13985 = vmatprep.subr.bf16.mxu0 %v13984_v42 }
 0x950   :  { %12508 = vmatmul.mubr.f32.vlgmr.msra.gmra.mrb[70].mxu0 %v19368_v46 }
 0x951   :  { %12510 = vmatprep.mubr.f32.mxu0 %v19381_v39  ;;  %13987 = vmatpush3.bf16.msra.mxu0 %v13984_v42 }
 0x952   :  { %13989 = vmatprep.subr.bf16.mxu0 %v13988_v6 }
 0x954   :  { %12511 = vmatmul.mubr.f32.gmra.mrb[72].mxu0 %v19406_v45 }
 0x955   :  { %12513 = vmatprep.mubr.f32.mxu0 %v19413_v2  ;;  %13991 = vmatpush3.bf16.msra.mxu0 %v13988_v6 }
 0x956   :  { %13993 = vmatprep.subr.bf16.mxu0 %v13992_v63 }
 0x958   :  { %12514 = vmatmul.mubr.f32.gmra.mrb[74].mxu0 %v19427_v21 }
 0x959   :  { %13995 = vmatpush3.bf16.msra.mxu0 %v13992_v63  ;;  %12536 = vmatprep.mubr.f32.mxu0 %v19378_v47  ;;  %v7823_v47 = vld [vmem:[%s21553_s12 + $0x50] sm:$0xff] }
 0x95a   :  { %13997 = vmatprep.subr.bf16.mxu0 %v13996_v55 }
 0x95d   :  { %13999 = vmatpush3.bf16.msra.mxu0 %v13996_v55 }
 0x95e   :  { %14001 = vmatprep.subr.bf16.mxu0 %v14000_v32 }
 0x961   :  { %14003 = vmatpush3.bf16.msra.mxu0 %v14000_v32 }
 0x962   :  { %14005 = vmatprep.subr.bf16.mxu0 %v19326_v38 }
 0x964   :  { %12537 = vmatmul.mubr.f32.vlgmr.msra.gmra.mrb[70].mxu0 %v19404_v59 }
 0x965   :  { %12539 = vmatprep.mubr.f32.mxu0 %v19410_v13  ;;  %14007 = vmatpush3.bf16.msra.mxu0 %v19326_v38  ;;  %v7825_v13 = vld [vmem:[%s21553_s12 + $0x60] sm:$0xff] }
 0x966   :  { %14009 = vmatprep.subr.bf16.mxu0 %v19337_v4 }
 0x968   :  { %12540 = vmatmul.mubr.f32.gmra.mrb[72].mxu0 %v19425_v8 }
 0x969   :  { %12542 = vmatprep.mubr.f32.mxu0 %v19434_v9  ;;  %14011 = vmatpush3.bf16.msra.mxu0 %v19337_v4 }
 0x96a   :  { %14013 = vmatprep.subr.bf16.mxu0 %v19357_v14 }
 0x96c   :  { %12543 = vmatmul.mubr.f32.gmra.mrb[74].mxu0 %v19453_v16 }
 0x96d   :  { %14015 = vmatpush3.bf16.msra.mxu0 %v19357_v14  ;;  %12565 = vmatprep.mubr.f32.mxu0 %v7106_v18 }
 0x96e   :  { %14017 = vmatprep.subr.bf16.mxu0 %v19388_v51 }
 0x971   :  { %14019 = vmatpush3.bf16.msra.mxu0 %v19388_v51 }
 0x972   :  { %14021 = vmatprep.subr.bf16.mxu0 %v19401_v12 }
 0x975   :  { %14023 = vmatpush3.bf16.msra.mxu0 %v19401_v12 }
 0x976   :  { %14025 = vmatprep.subr.bf16.mxu0 %v23010_v58 }
 0x978   :  { %12566 = vmatmul.mubr.f32.vlgmr.msra.gmra.mrb[70].mxu0 %v7116_v53 }
 0x979   :  { %12568 = vmatprep.mubr.f32.mxu0 %v7126_v26  ;;  %14027 = vmatpush3.bf16.msra.mxu0 %v23010_v58 }
 0x97a   :  { %14029 = vmatprep.subr.bf16.mxu0 %v19168_v37 }
 0x97c   :  { %12569 = vmatmul.mubr.f32.gmra.mrb[72].mxu0 %v7136_v56 }
 0x97d   :  { %12571 = vmatprep.mubr.f32.mxu0 %v7146_v1  ;;  %14031 = vmatpush3.bf16.msra.mxu0 %v19168_v37  ;;  %v7813_v37 = vld [vmem:[%s21553_s12] sm:$0xff] }
 0x97e   :  { %14033 = vmatprep.subr.bf16.mxu0 %v19206_v24  ;;  %v14064_v7 = vpack.c.bf16 %v7814_v25, %v7813_v37 }
 0x980   :  { %12572 = vmatmul.mubr.f32.gmra.mrb[74].mxu0 %v7156_v11  ;;  %14065 = vmatprep.subr.bf16.mxu1 %v14064_v7 }
 0x981   :  { %14035 = vmatpush3.bf16.msra.mxu0 %v19206_v24  ;;  %12594 = vmatprep.mubr.f32.mxu0 %v19350_v36  ;;  %v7818_v24 = vld [vmem:[%s21553_s12 + $0x28] sm:$0xff] }
 0x982   :  { %14037 = vmatprep.subr.bf16.mxu0 %v19215_v60  ;;  %14067 = vmatpush3.bf16.msra.mxu1 %v14064_v7 }
 0x983   :  { %14069 = vmatprep.subr.bf16.mxu1 %v14068_v49 }
 0x985   :  { %14039 = vmatpush3.bf16.msra.mxu0 %v19215_v60  ;;  %v14072_v60 = vpack.c.bf16 %v7818_v24, %v7817_v28 }
 0x986   :  { %14041 = vmatprep.subr.bf16.mxu0 %v19236_v41  ;;  %14071 = vmatpush3.bf16.msra.mxu1 %v14068_v49 }
 0x987   :  { %14073 = vmatprep.subr.bf16.mxu1 %v14072_v60 }
 0x989   :  { %14043 = vmatpush3.bf16.msra.mxu0 %v19236_v41  ;;  %v7819_v41 = vld [vmem:[%s21553_s12 + $0x30] sm:$0xff] }
 0x98a   :  { %14045 = vmatprep.subr.bf16.mxu0 %v19326_v38  ;;  %14075 = vmatpush3.bf16.msra.mxu1 %v14072_v60 }
 0x98c   :  { %12595 = vmatmul.mubr.f32.vlgmr.msra.gmra.mrb[70].mxu0 %v19368_v46 }
 0x98d   :  { %12597 = vmatprep.mubr.f32.mxu0 %v19381_v39  ;;  %14047 = vmatpush3.bf16.msra.mxu0 %v19326_v38  ;;  %v7820_v38 = vld [vmem:[%s21553_s12 + $0x38] sm:$0xff] }
 0x98e   :  { %14049 = vmatprep.subr.bf16.mxu0 %v19337_v4 }
 0x990   :  { %12598 = vmatmul.mubr.f32.gmra.mrb[72].mxu0 %v19406_v45 }
 0x991   :  { %12600 = vmatprep.mubr.f32.mxu0 %v19413_v2  ;;  %14051 = vmatpush3.bf16.msra.mxu0 %v19337_v4  ;;  %v14076_v4 = vpack.c.bf16 %v7820_v38, %v7819_v41 }
 0x992   :  { %14053 = vmatprep.subr.bf16.mxu0 %v19357_v14 }
 0x993   :  { %14077 = vmatprep.subr.bf16.mxu1 %v14076_v4 }
 0x994   :  { %12601 = vmatmul.mubr.f32.gmra.mrb[74].mxu0 %v19427_v21  ;;  %14079 = vmatpush3.bf16.msra.mxu1 %v14076_v4 }
 0x995   :  { %14055 = vmatpush3.bf16.msra.mxu0 %v19357_v14  ;;  %12623 = vmatprep.mubr.f32.mxu0 %v19350_v36  ;;  %v7821_v14 = vld [vmem:[%s21553_s12 + $0x40] sm:$0xff]  ;;  %v7822_v36 = vld [vmem:[%s21553_s12 + $0x48] sm:$0xff] }
 0x996   :  { %14057 = vmatprep.subr.bf16.mxu0 %v19388_v51  ;;  %v14080_v19 = vpack.c.bf16 %v7822_v36, %v7821_v14 }
 0x998   :  { %14081 = vmatprep.subr.bf16.mxu1 %v14080_v19 }
 0x999   :  { %14059 = vmatpush3.bf16.msra.mxu0 %v19388_v51  ;;  %v7824_v51 = vld [vmem:[%s21553_s12 + $0x58] sm:$0xff]  ;;  %14083 = vmatpush3.bf16.msra.mxu1 %v14080_v19 }
 0x99a   :  { %14061 = vmatprep.subr.bf16.mxu0 %v19401_v12  ;;  %v14084_v59 = vpack.c.bf16 %v7824_v51, %v7823_v47 }
 0x99c   :  { %14085 = vmatprep.subr.bf16.mxu1 %v14084_v59 }
 0x99d   :  { %14063 = vmatpush3.bf16.msra.mxu0 %v19401_v12  ;;  %v7826_v12 = vld [vmem:[%s21553_s12 + $0x68] sm:$0xff]  ;;  %14087 = vmatpush3.bf16.msra.mxu1 %v14084_v59 }
 0x99e   :  { %v14088_v18 = vpack.c.bf16 %v7826_v12, %v7825_v13 }
 0x9a0   :  { %12624 = vmatmul.mubr.f32.vlgmr.msra.gmra.mrb[70].mxu0 %v19368_v46  ;;  %14089 = vmatprep.subr.bf16.mxu1 %v14088_v18 }
 0x9a1   :  { %12626 = vmatprep.mubr.f32.mxu0 %v19381_v39  ;;  %14091 = vmatpush3.bf16.msra.mxu1 %v14088_v18 }
 0x9a4   :  { %12627 = vmatmul.mubr.f32.gmra.mrb[72].mxu0 %v19406_v45  ;;  %v11316_v45 = vld [vmem:[%s21552_s11] ss:$0 sm:$0xff] }
 0x9a5   :  { %12629 = vmatprep.mubr.f32.mxu0 %v19413_v2 }
 0x9a8   :  { %12630 = vmatmul.mubr.f32.gmra.mrb[74].mxu0 %v19427_v21 }
 0x9ab   :  { %v11476_v46 = vpop.f32.mrb[62].mxu1 }
 0x9ac   :  { %v11477_v39 = vpop.f32.mrb[63].mxu1 }
 0x9ad   :  { %v11478_v53 = vadd.f32 %v11477_v39, %v11476_v46 }
 0x9b0   :  { %v11479_v8 = vpop.f32.mrb[64].mxu1 }
 0x9b1   :  { %v11480_v9 = vpop.f32.mrb[65].mxu1 }
 0x9b2   :  { %v11481_v26 = vadd.f32 %v11480_v9, %v11479_v8 }
 0x9b3   :  { %v11426_v16 = vpop.f32.mrb[34].mxu0 }
 0x9b4   :  { %v11427_v56 = vpop.f32.mrb[35].mxu0 }
 0x9b5   :  { %v11428_v34 = vadd.f32 %v11427_v56, %v11426_v16 }
 0x9b7   :  { %v5996_v17 = vadd.f32 %v11428_v34, %v11316_v45  ;;  %v11482_v2 = vpop.f32.mrb[66].mxu1 }
 0x9b8   :  { %v11429_v1 = vpop.f32.mrb[36].mxu0  ;;  %v11483_v29 = vpop.f32.mrb[67].mxu1 }
 0x9b9   :  { %v11484_v21 = vadd.f32 %v11483_v29, %v11482_v2  ;;  %v11430_v23 = vpop.f32.mrb[37].mxu0  ;;  %v6303_v3 = vadd.f32 %v11478_v53, %v5996_v17 }
 0x9ba   :  { %v11431_v31 = vadd.f32 %v11430_v23, %v11429_v1 }
 0x9bc   :  { %v6011_v20 = vadd.f32 %v11431_v31, %v11316_v45  ;;  %v11485_v22 = vpop.f32.mrb[68].mxu1 }
 0x9bd   :  { %v11486_v27 = vpop.f32.mrb[69].mxu1 }
 0x9be   :  { %v11487_v11 = vadd.f32 %v11486_v27, %v11485_v22  ;;  %v6310_v35 = vadd.f32 %v11481_v26, %v6011_v20 }
 0x9bf   :  { %v11432_v44 = vpop.f32.mrb[38].mxu0 }
 0x9c0   :  { %v11433_v40 = vpop.f32.mrb[39].mxu0 }
 0x9c1   :  { %v11434_v5 = vadd.f32 %v11433_v40, %v11432_v44 }
 0x9c3   :  { %v6026_v15 = vadd.f32 %v11434_v5, %v11316_v45  ;;  %v11488_v48 = vpop.f32.mrb[70].mxu1 }
 0x9c4   :  { %v11489_v54 = vpop.f32.mrb[71].mxu1 }
 0x9c5   :  { %v11435_v62 = vpop.f32.mrb[40].mxu0  ;;  %v11490_v30 = vadd.f32 %v11489_v54, %v11488_v48  ;;  %v6317_v0 = vadd.f32 %v11484_v21, %v6026_v15 }
 0x9c6   :  { %v11436_v61 = vpop.f32.mrb[41].mxu0 }
 0x9c7   :  { %v11437_v50 = vadd.f32 %v11436_v61, %v11435_v62 }
 0x9c8   :  { %v11491_v43 = vpop.f32.mrb[72].mxu1 }
 0x9c9   :  { %v6041_v52 = vadd.f32 %v11437_v50, %v11316_v45  ;;  %v11492_v33 = vpop.f32.mrb[73].mxu1 }
 0x9ca   :  { %v11493_v42 = vadd.f32 %v11492_v33, %v11491_v43 }
 0x9cb   :  { %v6324_v6 = vadd.f32 %v11487_v11, %v6041_v52  ;;  %v11438_v63 = vpop.f32.mrb[42].mxu0 }
 0x9cc   :  { %v11439_v55 = vpop.f32.mrb[43].mxu0 }
 0x9cd   :  { %v11440_v32 = vadd.f32 %v11439_v55, %v11438_v63  ;;  %v11576_v58 = vpop.f32.mrb[74].mxu1  ;;  %v7828_v55 = vld [vmem:[%s21553_s12 + $0x78] sm:$0x3f] }
 0x9ce   :  { %v11577_v37 = vpop.f32.mrb[75].mxu1 }
 0x9cf   :  { %v6056_v25 = vadd.f32 %v11440_v32, %v11316_v45  ;;  %v11578_v57 = vadd.f32 %v11577_v37, %v11576_v58 }
 0x9d1   :  { %v11579_v10 = vpop.f32.mrb[76].mxu1  ;;  %v6331_v49 = vadd.f32 %v11490_v30, %v6056_v25 }
 0x9d2   :  { %v11441_v7 = vpop.f32.mrb[44].mxu0  ;;  %v11580_v24 = vpop.f32.mrb[77].mxu1 }
 0x9d3   :  { %v11442_v28 = vpop.f32.mrb[45].mxu0  ;;  %v11581_v41 = vadd.f32 %v11580_v24, %v11579_v10  ;;  %v11325_v24 = vld [vmem:[%s21553_s12 + $0x88] sm:$0xff] }
 0x9d4   :  { %v11443_v60 = vadd.f32 %v11442_v28, %v11441_v7  ;;  %v11324_v28 = vld [vmem:[%s21553_s12 + $0x80] sm:$0xff] }
 0x9d6   :  { %v6071_v38 = vadd.f32 %v11443_v60, %v11316_v45  ;;  %v14098_v60 = vpack.c.bf16 %v11325_v24, %v11324_v28 }
 0x9d7   :  { %v11526_v4 = vpop.f32.mrb[46].mxu0  ;;  %v11582_v14 = vpop.f32.mrb[78].mxu1 }
 0x9d8   :  { %v11527_v36 = vpop.f32.mrb[47].mxu0  ;;  %v11583_v19 = vpop.f32.mrb[79].mxu1  ;;  %v6338_v59 = vadd.f32 %v11493_v42, %v6071_v38 }
 0x9d9   :  { %v11528_v47 = vadd.f32 %v11527_v36, %v11526_v4  ;;  %v11584_v51 = vadd.f32 %v11583_v19, %v11582_v14 }
 0x9db   :  { %v6476_v13 = vadd.f32 %v11528_v47, %v6303_v3  ;;  %v11529_v12 = vpop.f32.mrb[48].mxu0  ;;  %v11585_v18 = vpop.f32.mrb[80].mxu1 }
 0x9dc   :  { %v11530_v46 = vpop.f32.mrb[49].mxu0  ;;  %v11586_v39 = vpop.f32.mrb[81].mxu1 }
 0x9dd   :  { %v11531_v53 = vadd.f32 %v11530_v46, %v11529_v12  ;;  %v11587_v8 = vadd.f32 %v11586_v39, %v11585_v18  ;;  %v6629_v9 = vadd.f32 %v11578_v57, %v6476_v13 }
 0x9df   :  { %v6485_v26 = vadd.f32 %v11531_v53, %v6310_v35  ;;  %v11532_v16 = vpop.f32.mrb[50].mxu0  ;;  %v11588_v56 = vpop.f32.mrb[82].mxu1 }
 0x9e0   :  { %v11533_v34 = vpop.f32.mrb[51].mxu0  ;;  %v11589_v45 = vpop.f32.mrb[83].mxu1 }
 0x9e1   :  { %v11534_v17 = vadd.f32 %v11533_v34, %v11532_v16  ;;  %v11590_v2 = vadd.f32 %v11589_v45, %v11588_v56  ;;  %v6640_v1 = vadd.f32 %v11581_v41, %v6485_v26 }
 0x9e3   :  { %v6494_v29 = vadd.f32 %v11534_v17, %v6317_v0  ;;  %v11535_v21 = vpop.f32.mrb[52].mxu0  ;;  %v11591_v23 = vpop.f32.mrb[84].mxu1 }
 0x9e4   :  { %v11536_v31 = vpop.f32.mrb[53].mxu0  ;;  %v11592_v3 = vpop.f32.mrb[85].mxu1 }
 0x9e5   :  { %v11537_v20 = vadd.f32 %v11536_v31, %v11535_v21  ;;  %v11593_v22 = vadd.f32 %v11592_v3, %v11591_v23  ;;  %v6651_v27 = vadd.f32 %v11584_v51, %v6494_v29 }
 0x9e7   :  { %v6503_v11 = vadd.f32 %v11537_v20, %v6324_v6  ;;  %v11538_v44 = vpop.f32.mrb[54].mxu0  ;;  %v7827_v6 = vld [vmem:[%s21553_s12 + $0x70] sm:$0xff] }
 0x9e8   :  { %v11539_v40 = vpop.f32.mrb[55].mxu0  ;;  %v14092_v32 = vpack.c.bf16 %v7828_v55, %v7827_v6 }
 0x9e9   :  { %v11540_v5 = vadd.f32 %v11539_v40, %v11538_v44  ;;  %v6662_v35 = vadd.f32 %v11587_v8, %v6503_v11 }
 0x9ea   :  { %14094 = vmatprep.subr.msk.bf16.mxu1 %vm19611_vm4, %v14092_v32 }
 0x9eb   :  { %v6512_v15 = vadd.f32 %v11540_v5, %v6331_v49  ;;  %v11541_v48 = vpop.f32.mrb[56].mxu0  ;;  %14097 = vmatpush3.bf16.msk.msra.mxu1 %vm19611_vm4, %v14092_v32 }
 0x9ec   :  { %v11542_v62 = vpop.f32.mrb[57].mxu0  ;;  %14099 = vmatprep.subr.bf16.mxu1 %v14098_v60 }
 0x9ed   :  { %v11543_v54 = vadd.f32 %v11542_v62, %v11541_v48  ;;  %v6673_v30 = vadd.f32 %v11590_v2, %v6512_v15 }
 0x9ef   :  { %v6521_v61 = vadd.f32 %v11543_v54, %v6338_v59  ;;  %v11676_v50 = vpop.f32.mrb[86].mxu1  ;;  %v11327_v54 = vld [vmem:[%s21553_s12 + $0x98] sm:$0xff] }
 0x9f0   :  { %v11677_v0 = vpop.f32.mrb[87].mxu1 }
 0x9f1   :  { %v11678_v52 = vadd.f32 %v11677_v0, %v11676_v50  ;;  %v6684_v43 = vadd.f32 %v11593_v22, %v6521_v61 }
 0x9f3   :  { %v11679_v33 = vpop.f32.mrb[88].mxu1 }
 0x9f4   :  { %v11680_v42 = vpop.f32.mrb[89].mxu1 }
 0x9f5   :  { %v11681_v63 = vadd.f32 %v11680_v42, %v11679_v33  ;;  %v11328_v42 = vld [vmem:[%s21553_s12 + $0xa0] sm:$0xff] }
 0x9f7   :  { %v11626_v58 = vpop.f32.mrb[58].mxu0  ;;  %v11682_v37 = vpop.f32.mrb[90].mxu1 }
 0x9f8   :  { %v11627_v57 = vpop.f32.mrb[59].mxu0  ;;  %v11683_v7 = vpop.f32.mrb[91].mxu1 }
 0x9f9   :  { %v11628_v10 = vadd.f32 %v11627_v57, %v11626_v58  ;;  %v11684_v49 = vadd.f32 %v11683_v7, %v11682_v37 }
 0x9fb   :  { %v6852_v41 = vadd.f32 %v11628_v10, %v6629_v9  ;;  %v11629_v38 = vpop.f32.mrb[60].mxu0  ;;  %v11685_v4 = vpop.f32.mrb[92].mxu1  ;;  %v11330_v10 = vld [vmem:[%s21553_s12 + $0xb0] sm:$0xff] }
 0x9fc   :  { %v11630_v14 = vpop.f32.mrb[61].mxu0  ;;  %v11686_v36 = vpop.f32.mrb[93].mxu1 }
 0x9fd   :  { %v11631_v19 = vadd.f32 %v11630_v14, %v11629_v38  ;;  %v11687_v47 = vadd.f32 %v11686_v36, %v11685_v4  ;;  %v6991_v51 = vadd.f32 %v11678_v52, %v6852_v41  ;;  %v11332_v41 = vld [vmem:[%s21553_s12 + $0xc0] sm:$0xff]  ;;  %v11333_v38 = vld [vmem:[%s21553_s12 + $0xc8] sm:$0xff]  ;;  %v11334_v14 = vld [vmem:[%s21553_s12 + $0xd0] sm:$0xff] }
 0x9fe   :  { %v14114_v4 = vpack.c.bf16 %v11333_v38, %v11332_v41  ;;  %v11335_v36 = vld [vmem:[%s21553_s12 + $0xd8] sm:$0xff] }
 0x9ff   :  { %v6859_v59 = vadd.f32 %v11631_v19, %v6640_v1  ;;  %v11632_v13 = vpop.f32.mrb[62].mxu0  ;;  %v11688_v12 = vpop.f32.mrb[94].mxu1  ;;  %v14118_v19 = vpack.c.bf16 %v11335_v36, %v11334_v14 }
 0xa00   :  { %v11633_v18 = vpop.f32.mrb[63].mxu0  ;;  %v11689_v46 = vpop.f32.mrb[95].mxu1 }
 0xa01   :  { %v11634_v39 = vadd.f32 %v11633_v18, %v11632_v13  ;;  %v11690_v53 = vadd.f32 %v11689_v46, %v11688_v12  ;;  %v6998_v8 = vadd.f32 %v11681_v63, %v6859_v59  ;;  %v11329_v63 = vld [vmem:[%s21553_s12 + $0xa8] sm:$0xff]  ;;  %v11338_v13 = vld [vmem:[%s21553_s12 + $0xf0] sm:$0xff]  ;;  %v11339_v12 = vld [vmem:[%s21553_s12 + $0xf8] sm:$0x3f]  ;;  %v23013_v46 = vmov 0.0|0.0  }
 0xa02   :  { %v14106_v57 = vpack.c.bf16 %v11329_v63, %v11328_v42  ;;  %v14126_v18 = vpack.c.bf16 %v11339_v12, %v11338_v13 }
 0xa03   :  { %v6866_v26 = vadd.f32 %v11634_v39, %v6651_v27  ;;  %v11635_v16 = vpop.f32.mrb[64].mxu0  ;;  %v11691_v56 = vpop.f32.mrb[96].mxu1  ;;  %v23014_v39 = vmov 0.0  }
 0xa04   :  { %v11636_v9 = vpop.f32.mrb[65].mxu0  ;;  %v11692_v34 = vpop.f32.mrb[97].mxu1 }
 0xa05   :  { %v11637_v45 = vadd.f32 %v11636_v9, %v11635_v16  ;;  %v11693_v17 = vadd.f32 %v11692_v34, %v11691_v56  ;;  %v7005_v2 = vadd.f32 %v11684_v49, %v6866_v26  ;;  %v11331_v49 = vld [vmem:[%s21553_s12 + $0xb8] sm:$0xff] }
 0xa07   :  { %v6873_v29 = vadd.f32 %v11637_v45, %v6662_v35  ;;  %v11638_v21 = vpop.f32.mrb[66].mxu0  ;;  %v11326_v35 = vld [vmem:[%s21553_s12 + $0x90] sm:$0xff] }
 0xa08   :  { %v11639_v23 = vpop.f32.mrb[67].mxu0 }
 0xa09   :  { %v11640_v31 = vadd.f32 %v11639_v23, %v11638_v21  ;;  %v7012_v1 = vadd.f32 %v11687_v47, %v6873_v29  ;;  %v11336_v47 = vld [vmem:[%s21553_s12 + $0xe0] sm:$0xff] }
 0xa0b   :  { %v6880_v3 = vadd.f32 %v11640_v31, %v6673_v30  ;;  %v11641_v20 = vpop.f32.mrb[68].mxu0 }
 0xa0c   :  { %v11642_v22 = vpop.f32.mrb[69].mxu0 }
 0xa0d   :  { %v11643_v11 = vadd.f32 %v11642_v22, %v11641_v20  ;;  %v7019_v44 = vadd.f32 %v11690_v53, %v6880_v3 }
 0xa0f   :  { %v6887_v40 = vadd.f32 %v11643_v11, %v6684_v43  ;;  %v14102_v43 = vpack.c.bf16 %v11327_v54, %v11326_v35  ;;  %v8320_v35 = vld [vmem:[%s21555_s14 + $0x80] sm:$0xff]  ;;  %v8321_v54 = vld [vmem:[%s21555_s14 + $0x88] sm:$0xff] }
 0xa11   :  { %v7026_v5 = vadd.f32 %v11693_v17, %v6887_v40  ;;  %v8068_v40 = vld [vmem:[%s21554_s13] sm:$0xff] }
 0xa73   :  { %v12625_v27 = vpop.f32.mrb[70].mxu0 }
 0xa74   :  { %v19625_v15 = vadd.f32 %v12625_v27, %v6998_v8  ;;  %v7773_v48 = vpop.f32.mrb[71].mxu0  ;;  %v8070_v27 = vld [vmem:[%s21554_s13 + $0x10] sm:$0x3] }
 0xa75   :  { %v14706_v62 = vadd.f32 %v7773_v48, %v6991_v51  ;;  %v11337_v51 = vld [vmem:[%s21553_s12 + $0xe8] sm:$0xff]  ;;  %v11351_v48 = vld [vmem:[%s21554_s13 + $0x20] sm:$0xff]  ;;  %s14997_s12 = smov 63  }
 0xa76   :  { %v7808_v50 = vmax.f32 %v19625_v15, 0.0  ;;  %v14122_v59 = vpack.c.bf16 %v11337_v51, %v11336_v47  ;;  %v11350_v15 = vld [vmem:[%s21554_s13 + $0x18] sm:$0xff] }
 0xa77   :  { %v7807_v30 = vmax.f32 %v14706_v62, 0.0  ;;  %v12628_v61 = vpop.f32.mrb[72].mxu0  ;;  %v11352_v62 = vld [vmem:[%s21554_s13 + $0x28] sm:$0x3] }
 0xa78   :  { %v14707_v0 = vadd.f32 %v12628_v61, %v7012_v1  ;;  %v7785_v52 = vpop.f32.mrb[73].mxu0  ;;  %v8438_v61 = vand.u32 4294901760, %v8320_v35 }
 0xa79   :  { %v14708_v33 = vadd.f32 %v7785_v52, %v7005_v2  ;;  %12664 = vmatprep.mubr.msk.f32.mxu1 %vm7829_vm6, %v7807_v30 }
 0xa7a   :  { %12665 = vmatmul.mubr.msk.f32.vlgmr.msra.gmra.mrb[98].mxu1 %vm7829_vm6, %v7808_v50  ;;  %v7810_v32 = vmax.f32 %v14707_v0, 0.0  ;;  %v8305_v0 = vld [vmem:[%s21555_s14 + $0x8] sm:$0xff] }
 0xa7b   :  { %v7809_v6 = vmax.f32 %v14708_v33, 0.0  ;;  %14101 = vmatpush3.bf16.msra.mxu1 %v14098_v60  ;;  %v12631_v55 = vpop.f32.mrb[74].mxu0  ;;  %v14110_v60 = vpack.c.bf16 %v11331_v49, %v11330_v10  ;;  %v19748_v33 = vld [vmem:[%s21555_s14 + $0x98] sm:$0xff]  ;;  %v8393_v42 = vand.u32 4294901760, %v8305_v0 }
 0xa7c   :  { %v14709_v58 = vadd.f32 %v12631_v55, %v7026_v5  ;;  %v7797_v37 = vpop.f32.mrb[75].mxu0  ;;  %14103 = vmatprep.subr.bf16.mxu1 %v14102_v43  ;;  %v8069_v5 = vld [vmem:[%s21554_s13 + $0x8] sm:$0xff]  ;;  %v19755_v55 = vld [vmem:[%s21555_s14 + $0x10] sm:$0xff] }
 0xa7d   :  { %v14710_v7 = vadd.f32 %v7797_v37, %v7019_v44  ;;  %12667 = vmatprep.mubr.msk.f32.mxu1 %vm7829_vm6, %v7809_v6  ;;  %v19769_v10 = vsub.f32 %v8305_v0, %v8393_v42 }
 0xa7e   :  { %12668 = vmatmul.mubr.msk.f32.gmra.mrb[100].mxu1 %vm7829_vm6, %v7810_v32  ;;  %v7812_v24 = vmax.f32 %v14709_v58, 0.0  ;;  %v19762_v58 = vsub.f32 %v8320_v35, %v8438_v61 }
 0xa7f   :  { %v7811_v28 = vmax.f32 %v14710_v7, 0.0  ;;  %14105 = vmatpush3.bf16.msra.mxu1 %v14102_v43  ;;  %v19743_v43 = vld [vmem:[%s21555_s14 + $0x90] sm:$0xff]  ;;  %v8396_v7 = vand.u32 4294901760, %v19755_v55  ;;  %v22089_v14 = vand.u32 4294901760, %v19769_v10 }
 0xa80   :  { %14107 = vmatprep.subr.bf16.mxu1 %v14106_v57  ;;  %v8444_v63 = vand.u32 4294901760, %v19743_v43 }
 0xa81   :  { %12670 = vmatprep.mubr.msk.f32.mxu1 %vm7829_vm6, %v7811_v28 }
 0xa82   :  { %12671 = vmatmul.mubr.msk.f32.gmra.mrb[102].mxu1 %vm7829_vm6, %v7812_v24  ;;  %v19772_v49 = vsub.f32 %v19743_v43, %v8444_v63 }
 0xa83   :  { %14109 = vmatpush3.bf16.msra.mxu1 %v14106_v57  ;;  %12705 = vmatprep.mubr.msk.f32.mxu1 %vm7829_vm6, %v7807_v30  ;;  %v8304_v30 = vld [vmem:[%s21555_s14] sm:$0xff] }
 0xa84   :  { %14111 = vmatprep.subr.bf16.mxu1 %v14110_v60  ;;  %v8390_v52 = vand.u32 4294901760, %v8304_v30  ;;  %v22088_v36 = vand.u32 4294901760, %v19772_v49 }
 0xa86   :  { %v19766_v57 = vsub.f32 %v8304_v30, %v8390_v52  ;;  %v19863_v30 = vld [vmem:[%s21555_s14 + $0x30] sm:$0xff] }
 0xa87   :  { %14113 = vmatpush3.bf16.msra.mxu1 %v14110_v60  ;;  %v22092_v60 = vand.u32 4294901760, %v19762_v58 }
 0xa88   :  { %14115 = vmatprep.subr.bf16.mxu1 %v14114_v4  ;;  %v22090_v38 = vand.u32 4294901760, %v19766_v57 }
 0xa89   :  { %v8617_v51 = vsub.f32 %v19762_v58, %v22092_v60 }
 0xa8a   :  { %v8505_v13 = vsub.f32 %v19766_v57, %v22090_v38 }
 0xa8b   :  { %14117 = vmatpush3.bf16.msra.mxu1 %v14114_v4  ;;  %v19784_v4 = vsub.f32 %v19755_v55, %v8396_v7 }
 0xa8c   :  { %14119 = vmatprep.subr.bf16.mxu1 %v14118_v19 }
 0xa8d   :  { %v22084_v12 = vand.u32 4294901760, %v19784_v4 }
 0xa8f   :  { %14121 = vmatpush3.bf16.msra.mxu1 %v14118_v19 }
 0xa90   :  { %14123 = vmatprep.subr.bf16.mxu1 %v14122_v59 }
 0xa93   :  { %14125 = vmatpush3.bf16.msra.mxu1 %v14122_v59 }
 0xa94   :  { %14128 = vmatprep.subr.msk.bf16.mxu1 %vm19611_vm4, %v14126_v18 }
 0xa97   :  { %14131 = vmatpush3.bf16.msk.msra.mxu1 %vm19611_vm4, %v14126_v18  ;;  %v8512_v18 = vsub.f32 %v19769_v10, %v22089_v14 }
 0xa98   :  { %14132 = vmatprep.subr.bf16.mxu1 %v23013_v46 }
 0xa9a   :  { %12706 = vmatmul.mubr.msk.f32.vlgmr.msra.gmra.mrb[104].mxu1 %vm7829_vm6, %v7808_v50  ;;  %v8441_v50 = vand.u32 4294901760, %v8321_v54 }
 0xa9b   :  { %12708 = vmatprep.mubr.msk.f32.mxu1 %vm7829_vm6, %v7809_v6  ;;  %v8447_v6 = vand.u32 4294901760, %v19748_v33 }
 0xa9c   :  { %v19764_v37 = vsub.f32 %v8321_v54, %v8441_v50 }
 0xa9d   :  { %v19868_v0 = vpack.c.bf16 %v8447_v6, %v8444_v63  ;;  %v19883_v63 = vld [vmem:[%s21555_s14 + $0x38] sm:$0xff] }
 0xa9e   :  { %12709 = vmatmul.mubr.msk.f32.gmra.mrb[106].mxu1 %vm7829_vm6, %v7810_v32  ;;  %v19760_v32 = vld [vmem:[%s21555_s14 + $0x18] sm:$0xff]  ;;  %v22091_v41 = vand.u32 4294901760, %v19764_v37 }
 0xa9f   :  { %12711 = vmatprep.mubr.msk.f32.mxu1 %vm7829_vm6, %v7811_v28  ;;  %v19775_v28 = vsub.f32 %v19748_v33, %v8447_v6 }
 0xaa0   :  { %v8624_v59 = vsub.f32 %v19764_v37, %v22091_v41 }
 0xaa1   :  { %v22086_v19 = vand.u32 4294901760, %v19775_v28 }
 0xaa2   :  { %12712 = vmatmul.mubr.msk.f32.gmra.mrb[108].mxu1 %vm7829_vm6, %v7812_v24  ;;  %v8399_v24 = vand.u32 4294901760, %v19760_v32 }
 0xaa3   :  { %12726 = vmatprep.mubr.msk.f32.mxu1 %vm14994_vm7, %v23014_v39 }
 0xaa4   :  { %v19790_v47 = vsub.f32 %v19760_v32, %v8399_v24 }
 0xb4d   :  { %v12666_v53 = vpop.f32.mrb[98].mxu1 }
 0xb4e   :  { %v7918_v8 = vpop.f32.mrb[99].mxu1 }
 0xb51   :  { %v12669_v25 = vpop.f32.mrb[100].mxu1 }
 0xb52   :  { %v7928_v26 = vpop.f32.mrb[101].mxu1 }
 0xb55   :  { %v12672_v16 = vpop.f32.mrb[102].mxu1 }
 0xb56   :  { %v7938_v56 = vpop.f32.mrb[103].mxu1 }
 0xb6d   :  { %v12707_v9 = vpop.f32.mrb[104].mxu1 }
 0xb6e   :  { %v8063_v34 = vmax.f32 %v12666_v53, %v12707_v9  ;;  %v8033_v45 = vpop.f32.mrb[105].mxu1  ;;  %v8631_v53 = vsub.f32 %v19772_v49, %v22088_v36  ;;  %v8506_v9 = vand.u32 4294901760, %v8505_v13  ;;  %v8408_v13 = vand.u32 4294901760, %v19863_v30 }
 0xb6f   :  { %v8062_v17 = vmax.f32 %v7918_v8, %v8033_v45  ;;  %v8638_v8 = vsub.f32 %v19775_v28, %v22086_v19  ;;  %v19823_v45 = vld [vmem:[%s21555_s14 + $0xa8] sm:$0xff] }
 0xb71   :  { %v14133_v2 = vpack.c.bf16 %v8063_v34, %v8062_v17  ;;  %v12710_v29 = vpop.f32.mrb[106].mxu1  ;;  %v8519_v34 = vsub.f32 %v19784_v4, %v22084_v12  ;;  %v8513_v17 = vand.u32 4294901760, %v8512_v18 }
 0xb72   :  { %v8065_v21 = vmax.f32 %v12669_v25, %v12710_v29  ;;  %v8043_v23 = vpop.f32.mrb[107].mxu1  ;;  %v22083_v25 = vand.u32 4294901760, %v19790_v47  ;;  %v8639_v29 = vand.u32 4294901760, %v8638_v8 }
 0xb73   :  { %v8064_v31 = vmax.f32 %v7928_v26, %v8043_v23  ;;  %14134 = vmatpush3.bf16.msra.mxu1 %v14133_v2  ;;  %v19815_v26 = vld [vmem:[%s21555_s14 + $0xa0] sm:$0xff] }
 0xb74   :  { %14135 = vmatprep.subr.bf16.mxu1 %v23013_v46  ;;  %v19831_v23 = vld [vmem:[%s21555_s14 + $0x20] sm:$0xff] }
 0xb75   :  { %v14136_v1 = vpack.c.bf16 %v8065_v21, %v8064_v31  ;;  %v12713_v3 = vpop.f32.mrb[108].mxu1  ;;  %v8526_v21 = vsub.f32 %v19790_v47, %v22083_v25  ;;  %v19836_v31 = vld [vmem:[%s21555_s14 + $0x28] sm:$0xff]  ;;  %v8402_v35 = vand.u32 4294901760, %v19831_v23 }
 0xb76   :  { %v8067_v20 = vmax.f32 %v12672_v16, %v12713_v3  ;;  %v8053_v22 = vpop.f32.mrb[109].mxu1  ;;  %v8618_v16 = vand.u32 4294901760, %v8617_v51  ;;  %v8520_v3 = vand.u32 4294901760, %v8519_v34  ;;  %v8405_v54 = vand.u32 4294901760, %v19836_v31 }
 0xb77   :  { %v8066_v11 = vmax.f32 %v7938_v56, %v8053_v22  ;;  %14137 = vmatpush3.bf16.msra.mxu1 %v14136_v1  ;;  %v8625_v56 = vand.u32 4294901760, %v8624_v59  ;;  %v8450_v22 = vand.u32 4294901760, %v19815_v26  ;;  %v19874_v33 = vsub.f32 %v19831_v23, %v8402_v35  ;;  %v19933_v23 = vld [vmem:[%s21555_s14 + $0xc0] sm:$0xff] }
 0xb78   :  { %14138 = vmatprep.subr.bf16.mxu1 %v23013_v46  ;;  %v19894_v59 = vpack.c.bf16 %v8399_v24, %v8396_v7  ;;  %v8411_v24 = vand.u32 4294901760, %v19883_v63 }
 0xb79   :  { %v14139_v44 = vpack.c.bf16 %v8067_v20, %v8066_v11  ;;  %v19838_v20 = vpack.c.bf16 %v8441_v50, %v8438_v61  ;;  %v19844_v11 = vld [vmem:[%s21555_s14 + $0xb0] sm:$0xff] }
 0xb7a   :  { %v8456_v43 = vand.u32 4294901760, %v19844_v11 }
 0xb7b   :  { %14140 = vmatpush3.bf16.msra.mxu1 %v14139_v44 }
 0xb7c   :  { %14141 = vmatprep.subr.bf16.mxu1 %v23013_v46  ;;  %v19890_v51 = vsub.f32 %v19844_v11, %v8456_v43  ;;  %v20007_v11 = vld [vmem:[%s21555_s14 + $0x50] sm:$0xff] }
 0xb7e   :  { %12727 = vmatmul.mubr.msk.f32.vlgmr.msra.gmra.mrb[110].mxu1 %vm366_vm5, %v8068_v40  ;;  %v22075_v7 = vand.u32 4294901760, %v19890_v51 }
 0xb7f   :  { %14143 = vmatpush3.bf16.msra.mxu1 %v14133_v2  ;;  %12729 = vmatprep.mubr.msk.f32.mxu1 %vm14994_vm7, %v23014_v39  ;;  %v8632_v2 = vand.u32 4294901760, %v8631_v53  ;;  %v22077_v53 = vand.u32 4294901760, %v19874_v33 }
 0xb80   :  { %14144 = vmatprep.subr.bf16.mxu1 %v23013_v46 }
 0xb81   :  { %v14186_v40 = vpack.c.bf16 %v8639_v29, %v8632_v2  ;;  %v8659_v2 = vsub.f32 %v19890_v51, %v22075_v7  ;;  %v20023_v7 = vpack.c.bf16 %v8411_v24, %v8408_v13 }
 0xb82   :  { %12730 = vmatmul.mubr.msk.f32.gmra.mrb[112].mxu1 %vm366_vm5, %v8069_v5  ;;  %v8527_v5 = vand.u32 4294901760, %v8526_v21  ;;  %v19928_v21 = vsub.f32 %v19883_v63, %v8411_v24  ;;  %v22094_v24 = vand.u32 4294901760, %v20007_v11 }
 0xb83   :  { %14146 = vmatpush3.bf16.msra.mxu1 %v14136_v1  ;;  %12732 = vmatprep.mubr.msk.f32.mxu1 %vm14994_vm7, %v23014_v39  ;;  %v14182_v1 = vpack.c.bf16 %v8625_v56, %v8618_v16  ;;  %v19913_v16 = vsub.f32 %v19863_v30, %v8408_v13 }
 0xb84   :  { %14147 = vmatprep.subr.bf16.mxu1 %v23013_v46  ;;  %v14188_v61 = vpack.c.bf16 %v8527_v5, %v8520_v3  ;;  %v19948_v5 = vld [vmem:[%s21555_s14 + $0x40] sm:$0xff] }
 0xb85   :  { %14183 = vmatprep.subr.bf16.mxu0 %v14182_v1  ;;  %v22072_v29 = vand.u32 4294901760, %v19913_v16 }
 0xb86   :  { %12733 = vmatmul.mubr.msk.f32.gmra.mrb[114].mxu1 %vm366_vm5, %v8070_v27  ;;  %v8453_v27 = vand.u32 4294901760, %v19823_v45 }
 0xb87   :  { %14149 = vmatpush3.bf16.msra.mxu1 %v14139_v44  ;;  %12747 = vmatprep.mubr.msk.f32.mxu1 %vm14994_vm7, %v23014_v39  ;;  %v14184_v44 = vpack.c.bf16 %v8513_v17, %v8506_v9  ;;  %v8533_v9 = vsub.f32 %v19874_v33, %v22077_v53  ;;  %v8547_v63 = vsub.f32 %v19913_v16, %v22072_v29 }
 0xb88   :  { %14151 = vmatprep.subr.bf16.mxu1 %v19838_v20  ;;  %v19866_v50 = vsub.f32 %v19823_v45, %v8453_v27  ;;  %v19970_v29 = vpack.c.bf16 %v8405_v54, %v8402_v35 }
 0xb89   :  { %14185 = vmatpush3.bf16.msra.mxu0 %v14184_v44  ;;  %v8534_v1 = vand.u32 4294901760, %v8533_v9  ;;  %v8462_v9 = vand.u32 4294901760, %v19933_v23 }
 0xb8a   :  { %12748 = vmatmul.mubr.msk.f32.vlgmr.msra.gmra.mrb[116].mxu1 %vm366_vm5, %v11350_v15  ;;  %v19850_v15 = vld [vmem:[%s21555_s14 + $0xb8] sm:$0xff]  ;;  %14187 = vmatprep.subr.bf16.mxu0 %v14186_v40  ;;  %v22080_v6 = vand.u32 4294901760, %v19866_v50  ;;  %v19943_v40 = vpack.c.bf16 %v8453_v27, %v8450_v22 }
 0xb8b   :  { %12750 = vmatprep.mubr.msk.f32.mxu1 %vm14994_vm7, %v23014_v39  ;;  %v8459_v32 = vand.u32 4294901760, %v19850_v15 }
 0xb8c   :  { %v8652_v55 = vsub.f32 %v19866_v50, %v22080_v6 }
 0xb8d   :  { %14189 = vmatpush3.bf16.msra.mxu0 %v14188_v61  ;;  %v8660_v61 = vand.u32 4294901760, %v8659_v2 }
 0xb8e   :  { %12751 = vmatmul.mubr.msk.f32.gmra.mrb[118].mxu1 %vm366_vm5, %v11351_v48  ;;  %v19854_v48 = vsub.f32 %v19815_v26, %v8450_v22  ;;  %v19903_v26 = vsub.f32 %v19850_v15, %v8459_v32  ;;  %v8653_v17 = vand.u32 4294901760, %v8652_v55  ;;  %v19957_v55 = vld [vmem:[%s21555_s14 + $0x48] sm:$0xff] }
 0xb8f   :  { %12753 = vmatprep.mubr.msk.f32.mxu1 %vm14994_vm7, %v23014_v39 }
 0xb90   :  { %v22073_v45 = vand.u32 4294901760, %v19903_v26 }
 0xb92   :  { %12754 = vmatmul.mubr.msk.f32.gmra.mrb[120].mxu1 %vm366_vm5, %v11352_v62  ;;  %v19856_v62 = vpack.c.bf16 %v8393_v42, %v8390_v52  ;;  %v22081_v52 = vand.u32 4294901760, %v19854_v48  ;;  %v19877_v42 = vsub.f32 %v19836_v31, %v8405_v54  ;;  %v19938_v31 = vld [vmem:[%s21555_s14 + $0xc8] sm:$0xff]  ;;  %v8666_v44 = vsub.f32 %v19903_v26, %v22073_v45 }
 0xb93   :  { %v19979_v45 = vsub.f32 %v19933_v23, %v8462_v9  ;;  %v19993_v54 = vpack.c.bf16 %v8459_v32, %v8456_v43  ;;  %v20012_v43 = vld [vmem:[%s21555_s14 + $0x58] sm:$0xff]  ;;  %vm8292_vm5 = vcmask 498688  }
 0xb94   :  { %14153 = vmatpush3.bf16.msra.mxu1 %v19856_v62  ;;  %v8645_v18 = vsub.f32 %v19854_v48, %v22081_v52  ;;  %v22076_v8 = vand.u32 4294901760, %v19877_v42  ;;  %v8667_v27 = vand.u32 4294901760, %v8666_v44 }
 0xb95   :  { %14155 = vmatprep.subr.bf16.mxu1 %v19868_v0 }
 0xb96   :  { %v8646_v56 = vand.u32 4294901760, %v8645_v18  ;;  %v8540_v34 = vsub.f32 %v19877_v42, %v22076_v8  ;;  %v22074_v18 = vand.u32 4294901760, %v19928_v21  ;;  %v14194_v44 = vpack.c.bf16 %v8667_v27, %v8660_v61 }
 0xb98   :  { %14157 = vmatpush3.bf16.msra.mxu1 %v19894_v59  ;;  %v8541_v3 = vand.u32 4294901760, %v8540_v34  ;;  %v14190_v15 = vpack.c.bf16 %v8653_v17, %v8646_v56  ;;  %v8465_v56 = vand.u32 4294901760, %v19938_v31  ;;  %v19965_v34 = vld [vmem:[%s21555_s14 + $0xd0] sm:$0xff]  ;;  %v8548_v17 = vand.u32 4294901760, %v8547_v63 }
 0xb99   :  { %14159 = vmatprep.subr.bf16.mxu1 %v19943_v40  ;;  %v8554_v2 = vsub.f32 %v19928_v21, %v22074_v18  ;;  %v22104_v63 = vand.u32 4294901760, %v19957_v55  ;;  %v22103_v23 = vand.u32 4294901760, %v19965_v34 }
 0xb9a   :  { %v14192_v22 = vpack.c.bf16 %v8541_v3, %v8534_v1  ;;  %14191 = vmatprep.subr.bf16.mxu0 %v14190_v15  ;;  %v22105_v1 = vand.u32 4294901760, %v19948_v5  ;;  %v19976_v3 = vld [vmem:[%s21555_s14 + $0xd8] sm:$0xff]  ;;  %v19982_v15 = vsub.f32 %v19938_v31, %v8465_v56  ;;  %v22079_v31 = vand.u32 4294901760, %v19979_v45 }
 0xb9b   :  { %v8555_v18 = vand.u32 4294901760, %v8554_v2  ;;  %v22102_v27 = vand.u32 4294901760, %v19976_v3  ;;  %v20074_v36 = vpack.c.bf16 %v8465_v56, %v8462_v9 }
 0xb9c   :  { %14193 = vmatpush3.bf16.msra.mxu0 %v14192_v22  ;;  %23015 = vst [vmem:[#allocation15_spill] sm:$0xff] %v19982_v15  ;;  %14161 = vmatpush3.bf16.msra.mxu1 %v19970_v29  ;;  %v19989_v35 = vsub.f32 %v19948_v5, %v22105_v1  ;;  %v22078_v61 = vand.u32 4294901760, %v19982_v15  ;;  %v20001_v22 = vsub.f32 %v19957_v55, %v22104_v63 }
 0xb9d   :  { %14195 = vmatprep.subr.bf16.mxu0 %v14194_v44  ;;  %v14196_v32 = vpack.c.bf16 %v8555_v18, %v8548_v17  ;;  %14163 = vmatprep.subr.bf16.mxu1 %v19993_v54  ;;  %v20019_v44 = vsub.f32 %v19965_v34, %v22103_v23  ;;  %v8673_v8 = vsub.f32 %v19979_v45, %v22079_v31 }
 0xb9e   :  { %23016 = vst [vmem:[#allocation16_spill] sm:$0xff] %v19989_v35  ;;  %23017 = vst [vmem:[#allocation93_spill] sm:$0xff] %v20001_v22  ;;  %v22082_v2 = vand.u32 4294901760, %v19989_v35  ;;  %v8680_v18 = vsub.f32 %v19982_v15, %v22078_v61  ;;  %v22085_v17 = vand.u32 4294901760, %v20001_v22  ;;  %v20035_v53 = vsub.f32 %v19976_v3, %v22102_v27 }
 0xb9f   :  { %23018 = vst [vmem:[#allocation22_spill] sm:$0xff] %v20019_v44  ;;  %v22087_v13 = vand.u32 4294901760, %v20019_v44  ;;  %v22093_v61 = vand.u32 4294901760, %v20012_v43  ;;  %v8674_v31 = vand.u32 4294901760, %v8673_v8  ;;  %v20059_v8 = vsub.f32 %v20007_v11, %v22094_v24 }
 0xba0   :  { %23019 = vst [vmem:[#allocation17_spill] sm:$0xff] %v20035_v53  ;;  %14197 = vmatpush3.bf16.msra.mxu0 %v14196_v32  ;;  %v8561_v30 = vsub.f32 %v19989_v35, %v22082_v2  ;;  %14165 = vmatpush3.bf16.msra.mxu1 %v20023_v7  ;;  %v8681_v6 = vand.u32 4294901760, %v8680_v18  ;;  %v8568_v52 = vsub.f32 %v20001_v22, %v22085_v17  ;;  %v22097_v32 = vand.u32 4294901760, %v20035_v53  ;;  %v20051_v2 = vld [vmem:[%s21555_s14 + $0xe0] sm:$0xff]  ;;  %v20069_v17 = vld [vmem:[%s21555_s14 + $0xe8] sm:$0xff] }
 0xba1   :  { %v8687_v12 = vsub.f32 %v20019_v44, %v22087_v13  ;;  %23020 = vst [vmem:[#allocation18_spill] sm:$0xff] %v20059_v8  ;;  %v20064_v18 = vsub.f32 %v20012_v43, %v22093_v61  ;;  %v22096_v38 = vand.u32 4294901760, %v20059_v8  ;;  %v22101_v60 = vand.u32 4294901760, %v20051_v2  ;;  %14167 = vmatprep.subr.bf16.mxu1 %v20074_v36 }
 0xba2   :  { %v8562_v25 = vand.u32 4294901760, %v8561_v30  ;;  %v14198_v30 = vpack.c.bf16 %v8681_v6, %v8674_v31  ;;  %v8569_v19 = vand.u32 4294901760, %v8568_v52  ;;  %v8694_v13 = vsub.f32 %v20035_v53, %v22097_v32 }
 0xba3   :  { %23021 = vst [vmem:[#allocation6_spill] sm:$0xff] %v20064_v18  ;;  %v8688_v14 = vand.u32 4294901760, %v8687_v12  ;;  %v22095_v41 = vand.u32 4294901760, %v20064_v18  ;;  %v22100_v52 = vand.u32 4294901760, %v20069_v17  ;;  %v8575_v6 = vsub.f32 %v20059_v8, %v22096_v38 }
 0xba4   :  { %14199 = vmatprep.subr.bf16.mxu0 %v14198_v30  ;;  %v14200_v61 = vpack.c.bf16 %v8569_v19, %v8562_v25  ;;  %v8695_v24 = vand.u32 4294901760, %v8694_v13  ;;  %v20090_v9 = vsub.f32 %v20051_v2, %v22101_v60  ;;  %v23028_v53 = vand.u32 4294901760, %v19976_v3 }
 0xba5   :  { %v8582_v12 = vsub.f32 %v20064_v18, %v22095_v41  ;;  %v20095_v25 = vsub.f32 %v20069_v17, %v22100_v52  ;;  %v8576_v56 = vand.u32 4294901760, %v8575_v6  ;;  %v8316_v6 = vld [vmem:[%s21555_s14 + $0x60] sm:$0xff] }
 0xba6   :  { %23022 = vst [vmem:[#allocation13_spill] sm:$0xff] %v20090_v9  ;;  %14201 = vmatpush3.bf16.msra.mxu0 %v14200_v61  ;;  %v14202_v19 = vpack.c.bf16 %v8695_v24, %v8688_v14  ;;  %v22098_v13 = vand.u32 4294901760, %v20090_v9 }
 0xba7   :  { %23023 = vst [vmem:[#allocation21_spill] sm:$0xff] %v20095_v25  ;;  %v8583_v31 = vand.u32 4294901760, %v8582_v12  ;;  %v22099_v30 = vand.u32 4294901760, %v20095_v25  ;;  %v8317_v12 = vld [vmem:[%s21555_s14 + $0x68] sm:$0xff] }
 0xba8   :  { %14203 = vmatprep.subr.bf16.mxu0 %v14202_v19  ;;  %v8701_v38 = vsub.f32 %v20090_v9, %v22098_v13  ;;  %v8426_v19 = vand.u32 4294901760, %v8316_v6 }
 0xba9   :  { %v14204_v41 = vpack.c.bf16 %v8583_v31, %v8576_v56  ;;  %v8708_v14 = vsub.f32 %v20095_v25, %v22099_v30  ;;  %v8429_v56 = vand.u32 4294901760, %v8317_v12 }
 0xbaa   :  { %v8702_v61 = vand.u32 4294901760, %v8701_v38  ;;  %v20111_v31 = vsub.f32 %v8316_v6, %v8426_v19  ;;  %v8335_v38 = vld [vmem:[%s21555_s14 + $0xf8] sm:$0xff] }
 0xbab   :  { %14205 = vmatpush3.bf16.msra.mxu0 %v14204_v41  ;;  %v8709_v24 = vand.u32 4294901760, %v8708_v14  ;;  %v20113_v13 = vsub.f32 %v8317_v12, %v8429_v56  ;;  %v8334_v41 = vld [vmem:[%s21555_s14 + $0xf0] sm:$0xff]  ;;  %v8483_v14 = vand.u32 4294901760, %v8335_v38 }
 0xbac   :  { %v22118_v6 = vand.u32 4294901760, %v20111_v31 }
 0xbad   :  { %v14206_v32 = vpack.c.bf16 %v8709_v24, %v8702_v61  ;;  %v8318_v61 = vld [vmem:[%s21555_s14 + $0x70] sm:$0xff]  ;;  %v8319_v24 = vld [vmem:[%s21555_s14 + $0x78] sm:$0xff]  ;;  %v22119_v12 = vand.u32 4294901760, %v20113_v13  ;;  %v20131_v27 = vsub.f32 %v8335_v38, %v8483_v14 }
 0xbae   :  { %v8432_v30 = vand.u32 4294901760, %v8318_v61  ;;  %v8435_v52 = vand.u32 4294901760, %v8319_v24  ;;  %v8589_v63 = vsub.f32 %v20111_v31, %v22118_v6 }
 0xbaf   :  { %14207 = vmatprep.subr.bf16.mxu0 %v14206_v32  ;;  %v8480_v32 = vand.u32 4294901760, %v8334_v41  ;;  %v8596_v1 = vsub.f32 %v20113_v13, %v22119_v12  ;;  %v23025_v12 = vand.u32 4294901760, %v19957_v55 }
 0xbb0   :  { %v20139_v39 = vsub.f32 %v8318_v61, %v8432_v30  ;;  %v20141_v46 = vsub.f32 %v8319_v24, %v8435_v52  ;;  %v8590_v38 = vand.u32 4294901760, %v8589_v63  ;;  %v23027_v63 = vand.u32 4294901760, %v19965_v34 }
 0xbb1   :  { %v20129_v60 = vsub.f32 %v8334_v41, %v8480_v32  ;;  %v22129_v41 = vand.u32 4294901760, %v20131_v27  ;;  %v8597_v18 = vand.u32 4294901760, %v8596_v1 }
 0xbb2   :  { %v20163_v8 = vpack.c.bf16 %v23028_v53, %v23027_v63  ;;  %v23030_v15 = vand.u32 4294901760, %v20139_v39 }
 0xbb3   :  { %v22124_v9 = vand.u32 4294901760, %v20129_v60  ;;  %v8722_v61 = vsub.f32 %v20131_v27, %v22129_v41  ;;  %v14208_v1 = vpack.c.bf16 %v8597_v18, %v8590_v38 }
 0xbb4   :  { %23029 = vst [vmem:[#allocation14_spill] sm:$0xff] %v20163_v8  ;;  %v8603_v41 = vsub.f32 %v20139_v39, %v23030_v15 }
 0xbb5   :  { %v8715_v6 = vsub.f32 %v20129_v60, %v22124_v9  ;;  %v8723_v35 = vand.u32 4294901760, %v8722_v61  ;;  %14209 = vmatpush3.bf16.msra.mxu0 %v14208_v1  ;;  %v23035_v61 = vand.u32 4294901760, %v20051_v2 }
 0xbb6   :  { %v8604_v3 = vand.u32 4294901760, %v8603_v41 }
 0xbb7   :  { %v8716_v9 = vand.u32 4294901760, %v8715_v6  ;;  %v23033_v6 = vand.u32 4294901760, %v20012_v43 }
 0xbb9   :  { %v14210_v34 = vpack.c.bf16 %v8723_v35, %v8716_v9 }
 0xbbb   :  { %14211 = vmatprep.subr.bf16.mxu0 %v14210_v34 }
 0xc51   :  { %v8146_v23 = vpop.f32.mrb[110].mxu1 }
 0xc52   :  { %v12728_v25 = vpop.f32.mrb[111].mxu1 }
 0xc53   :  { %v23024_v25 = vand.u32 4294901760, %v19948_v5  ;;  %v23031_v5 = vand.u32 4294901760, %v20141_v46 }
 0xc55   :  { %v8151_v24 = vpop.f32.mrb[112].mxu1  ;;  %v20157_v44 = vpack.c.bf16 %v23025_v12, %v23024_v25  ;;  %v8610_v55 = vsub.f32 %v20141_v46, %v23031_v5  ;;  %v23036_v25 = vand.u32 4294901760, %v20069_v17  ;;  %v20191_v5 = vpack.c.bf16 %v8483_v14, %v8480_v32 }
 0xc56   :  { %v12731_v22 = vpop.f32.mrb[113].mxu1 }
 0xc57   :  { %23026 = vst [vmem:[#allocation26_spill] sm:$0xff] %v20157_v44  ;;  %14169 = vmatpush3.bf16.msra.mxu1 %v20157_v44  ;;  %v8611_v53 = vand.u32 4294901760, %v8610_v55  ;;  %v23032_v22 = vand.u32 4294901760, %v20007_v11  ;;  %v20184_v35 = vpack.c.bf16 %v23036_v25, %v23035_v61  ;;  %v20187_v11 = vpack.c.bf16 %v8429_v56, %v8426_v19  ;;  %23039 = vst [vmem:[#allocation24_spill] sm:$0xff] %v20191_v5 }
 0xc58   :  { %14171 = vmatprep.subr.bf16.mxu1 %v20163_v8  ;;  %v20193_v55 = vpack.c.bf16 %v8435_v52, %v8432_v30  ;;  %v14214_v56 = vpack.c.bf16 %v19764_v37, %v19762_v58 }
 0xc59   :  { %v8156_v18 = vpop.f32.mrb[114].mxu1  ;;  %v20177_v12 = vpack.c.bf16 %v23033_v6, %v23032_v22  ;;  %v14212_v38 = vpack.c.bf16 %v8611_v53, %v8604_v3  ;;  %23037 = vst [vmem:[#allocation27_spill] sm:$0xff] %v20184_v35  ;;  %23038 = vst [vmem:[#allocation32_spill] sm:$0xff] %v20187_v11 }
 0xc5a   :  { %v12734_v15 = vpop.f32.mrb[115].mxu1 }
 0xc5b   :  { %23034 = vst [vmem:[#allocation23_spill] sm:$0xff] %v20177_v12  ;;  %14173 = vmatpush3.bf16.msra.mxu1 %v20177_v12  ;;  %14213 = vmatpush3.bf16.msra.mxu0 %v14212_v38 }
 0xc5c   :  { %14247 = vmatprep.subr.bf16.mxu0 %v19838_v20  ;;  %14175 = vmatprep.subr.bf16.mxu1 %v20184_v35 }
 0xc5d   :  { %v8239_v9 = vpop.f32.mrb[116].mxu1 }
 0xc5e   :  { %v8253_v43 = vmax.f32 %v8146_v23, %v8239_v9  ;;  %v12749_v41 = vpop.f32.mrb[117].mxu1 }
 0xc5f   :  { %14177 = vmatpush3.bf16.msra.mxu1 %v20187_v11 }
 0xc60   :  { %v8265_v1 = vrot.slane %v8253_v43, 6  ;;  %v8261_v63 = vrot.slane %v8253_v43, 4  ;;  %14179 = vmatprep.subr.bf16.mxu1 %v20191_v5  ;;  %v8257_v23 = vrot.slane %v8253_v43, 2 }
 0xc61   :  { %v8244_v2 = vpop.f32.mrb[118].mxu1 }
 0xc62   :  { %v8254_v17 = vmax.f32 %v8151_v24, %v8244_v2  ;;  %8266 = vrot.lane.b32.xlu0 %v8265_v1, %s14995_s30  ;;  %8262 = vrot.lane.b32.xlu1 %v8261_v63, %s14996_s0  ;;  %v12752_v19 = vpop.f32.mrb[119].mxu1 }
 0xc63   :  { %14181 = vmatpush3.bf16.msra.mxu1 %v20193_v55 }
 0xc64   :  { %14215 = vmatprep.subr.bf16.mxu1 %v14214_v56  ;;  %v8281_v30 = vrot.slane %v8254_v17, 6  ;;  %v8277_v14 = vrot.slane %v8254_v17, 4  ;;  %v8273_v24 = vrot.slane %v8254_v17, 2 }
 0xc65   :  { %v8249_v34 = vpop.f32.mrb[120].mxu1 }
 0xc66   :  { %v8255_v32 = vmax.f32 %v8156_v18, %v8249_v34  ;;  %8258 = vrot.lane.b32.xlu1 %v8257_v23, %s14997_s12  ;;  %8270 = vrot.lane.b32.xlu0 %v8254_v17, %s14998_s19  ;;  %v12755_v52 = vpop.f32.mrb[121].mxu1 }
 0xc6a   :  { %8282 = vrot.lane.b32.xlu0 %v8281_v30, %s14999_s22  ;;  %8278 = vrot.lane.b32.xlu1 %v8277_v14, %s15000_s8  ;;  %v14218_v30 = vpack.c.bf16 %v19775_v28, %v19772_v49  ;;  %v14220_v14 = vpack.c.bf16 %v19790_v47, %v19784_v4  ;;  %s15003_s8 = smov [#allocation2]  }
 0xc6e   :  { %8274 = vrot.lane.b32.xlu1 %v8273_v24, %s15001_s1  ;;  %8286 = vrot.lane.b32.xlu0 %v8255_v32, %s15002_s2  ;;  %v14216_v32 = vpack.c.bf16 %v19769_v10, %v19766_v57  ;;  %v14222_v24 = vpack.c.bf16 %v19866_v50, %v19854_v48  ;;  %s11247_s1 = sshll.u32 %s15003_s8, 4  ;;  %s11248_s1 = int_to_ptr.vmem [resolvable:$true] %s11247_s1 }
 0xc6f   :  { %s14958_s2 = scalar_lea.vmem %s11248_s1, 32  ;;  %p14963_p1 = scmp.lt.s32.totalorder %s11248_s1, %s11248_s1 }
 0xc70   :  { %p14959_p0 = scmp.ne.s32.totalorder %s11248_s1, %s14958_s2  ;;  %p14964_p2 = scmp.lt.s32.totalorder %s14958_s2, %s14958_s2 }
 0xc72   :  { %p14965_p3 = por %p14964_p2, %p14963_p1 }
 0xc74   :  { %p14966_p4 = pnand %p14965_p3, %p14959_p0 }
 0xcd4   :  { %v8267_v22 = vpop.permute.xlu0 %8266  ;;  %v8263_v6 = vpop.permute.xlu1 %8262 }
 0xcd5   :  { %v8293_v15 = vsel %vm8292_vm5, %v8263_v6, %v8267_v22  ;;  %v14224_v22 = vpack.c.bf16 %v19877_v42, %v19874_v33 }
 0xcd8   :  { %v8259_v38 = vpop.permute.xlu1 %8258  ;;  %v20205_v61 = vpop.permute.xlu0 %8270 }
 0xcd9   :  { %23040 = vst [vmem:[#allocation35_spill] sm:$0xff] %v20205_v61  ;;  %v8290_v25 = vsel %vm8289_vm8, %v8253_v43, %v8259_v38  ;;  %v8295_v9 = vsel %vm8294_vm10, %v8293_v15, %v20205_v61  ;;  %v20246_v15 = vld [vmem:[%s21555_s14 + $0x150] sm:$0xff]  ;;  %v20251_v38 = vld [vmem:[%s21555_s14 + $0x158] sm:$0xff] }
 0xcda   :  { %v8291_v41 = vsel %vm7829_vm6, %v8290_v25, %v8263_v6  ;;  %v20209_v1 = vand.u32 4294901760, %v8295_v9  ;;  %v14226_v6 = vpack.c.bf16 %v19903_v26, %v19890_v51  ;;  %23042 = vst [vmem:[#allocation44_spill] sm:$0xff] %v20246_v15  ;;  %23043 = vst [vmem:[#allocation36_spill] sm:$0xff] %v20251_v38  ;;  %v14228_v25 = vpack.c.bf16 %v19928_v21, %v19913_v16 }
 0xcdb   :  { %v20211_v63 = vand.u32 4294901760, %v8291_v41 }
 0xcdc   :  { %v8486_v2 = vsub.f32 %v8295_v9, %v20209_v1  ;;  %8726 = vmatprep.mubr.f32.mxu0 %v20209_v1  ;;  %v22131_v9 = vand.u32 4294901760, %v20246_v15 }
 0xcdd   :  { %23041 = vst [vmem:[#allocation39_spill] sm:$0xff] %v20211_v63  ;;  %v20216_v17 = vsub.f32 %v8291_v41, %v20211_v63  ;;  %8728 = vmatmul.mubr.f32.vlgmr.msra.gmra.mrb[76].mxu0 %v20211_v63  ;;  %v22133_v41 = vand.u32 4294901760, %v20251_v38 }
 0xcde   :  { %14249 = vmatpush3.bf16.msra.mxu0 %v19856_v62  ;;  %v8487_v43 = vand.u32 4294901760, %v8486_v2  ;;  %v20299_v53 = vsub.f32 %v20246_v15, %v22131_v9  ;;  %v23055_v9 = vld [vmem:[#allocation22_spill] sm:$0xff]  ;;  %v20346_v15 = vld [vmem:[%s21555_s14 + $0x180] sm:$0xff] }
 0xcdf   :  { %v22130_v19 = vand.u32 4294901760, %v20216_v17  ;;  %14251 = vmatprep.subr.bf16.mxu0 %v19868_v0  ;;  %v20304_v3 = vsub.f32 %v20251_v38, %v22133_v41  ;;  %v23059_v38 = vld [vmem:[#allocation18_spill] sm:$0xff] }
 0xce0   :  { %8970 = vmatprep.mubr.f32.mxu0 %v8487_v43  ;;  %v8488_v23 = vsub.f32 %v8486_v2, %v8487_v43  ;;  %v20266_v43 = vld [vmem:[%s21555_s14 + $0x1e8] sm:$0xff] }
 0xce1   :  { %v8494_v56 = vsub.f32 %v20216_v17, %v22130_v19  ;;  %23045 = vst [vmem:[#allocation47_spill] sm:$0xff] %v20266_v43  ;;  %v20309_v19 = vld [vmem:[%s21555_s14 + $0x170] sm:$0xff] }
 0xce2   :  { %14253 = vmatpush3.bf16.msra.mxu0 %v19894_v59  ;;  %v8489_v34 = vand.u32 4294901760, %v8488_v23  ;;  %v23046_v23 = vld [vmem:[#allocation15_spill] sm:$0xff]  ;;  %23053 = vst [vmem:[#allocation56_spill] sm:$0xff] %v20309_v19  ;;  %v23060_v41 = vld [vmem:[#allocation6_spill] sm:$0xff] }
 0xce3   :  { %v8495_v52 = vand.u32 4294901760, %v8494_v56  ;;  %14255 = vmatprep.subr.bf16.mxu0 %v19943_v40  ;;  %v14230_v56 = vpack.c.bf16 %v23046_v23, %v19979_v45  ;;  %v14236_v61 = vpack.c.bf16 %v23060_v41, %v23059_v38 }
 0xce4   :  { %8490 = vmatprep.mubr.f32.mxu1 %v8489_v34  ;;  %v20274_v34 = vld [vmem:[%s21555_s14 + $0x160] sm:$0xff] }
 0xce5   :  { %8496 = vmatmul.mubr.f32.vlgmr.msra.gmra.mrb[122].mxu1 %v8495_v52  ;;  %23047 = vst [vmem:[#allocation51_spill] sm:$0xff] %v20274_v34 }
 0xce6   :  { %14217 = vmatpush3.bf16.msra.mxu1 %v14216_v32  ;;  %14257 = vmatpush3.bf16.msra.mxu0 %v19970_v29  ;;  %v20279_v32 = vld [vmem:[%s21555_s14 + $0x168] sm:$0xff] }
 0xce7   :  { %8863 = vmatprep.mubr.f32.mxu1 %v8486_v2  ;;  %14219 = vmatprep.subr.bf16.mxu1 %v14218_v30  ;;  %v20261_v2 = vld [vmem:[%s21555_s14 + $0x1e0] sm:$0xff]  ;;  %23048 = vst [vmem:[#allocation96_spill] sm:$0xff] %v20279_v32 }
 0xce8   :  { %14259 = vmatprep.subr.bf16.mxu0 %v19993_v54  ;;  %23044 = vst [vmem:[#allocation43_spill] sm:$0xff] %v20261_v2  ;;  %v23056_v30 = vld [vmem:[#allocation17_spill] sm:$0xff]  ;;  %v23057_v63 = vand.u32 4294901760, %v20261_v2 }
 0xce9   :  { %v14234_v52 = vpack.c.bf16 %v23056_v30, %v23055_v9  ;;  %v23070_v9 = vand.u32 4294901760, %v20309_v19 }
 0xcea   :  { %14221 = vmatpush3.bf16.msra.mxu1 %v14220_v14  ;;  %14261 = vmatpush3.bf16.msra.mxu0 %v20023_v7  ;;  %v20286_v14 = vld [vmem:[%s21555_s14 + $0x1f0] sm:$0xff] }
 0xceb   :  { %14223 = vmatprep.subr.bf16.mxu1 %v14222_v24  ;;  %14263 = vmatprep.subr.bf16.mxu0 %v20074_v36  ;;  %23049 = vst [vmem:[#allocation99_spill] sm:$0xff] %v20286_v14  ;;  %v20291_v24 = vld [vmem:[%s21555_s14 + $0x1f8] sm:$0xff] }
 0xcec   :  { %23050 = vst [vmem:[#allocation55_spill] sm:$0xff] %v20291_v24  ;;  %v23066_v41 = vand.u32 4294901760, %v20291_v24 }
 0xcee   :  { %14225 = vmatpush3.bf16.msra.mxu1 %v14224_v22  ;;  %14265 = vmatpush3.bf16.msra.mxu0 %v20157_v44  ;;  %v23051_v22 = vld [vmem:[#allocation16_spill] sm:$0xff]  ;;  %v23064_v44 = vand.u32 4294901760, %v20279_v32 }
 0xcef   :  { %14227 = vmatprep.subr.bf16.mxu1 %v14226_v6  ;;  %14267 = vmatprep.subr.bf16.mxu0 %v20163_v8  ;;  %v23052_v6 = vld [vmem:[#allocation93_spill] sm:$0xff] }
 0xcf0   :  { %v14232_v18 = vpack.c.bf16 %v23052_v6, %v23051_v22  ;;  %v20356_v8 = vld [vmem:[%s21555_s14 + $0x100] sm:$0xff] }
 0xcf2   :  { %14229 = vmatpush3.bf16.msra.mxu1 %v14228_v25  ;;  %14269 = vmatpush3.bf16.msra.mxu0 %v20177_v12  ;;  %v20314_v25 = vld [vmem:[%s21555_s14 + $0x178] sm:$0xff]  ;;  %v20326_v12 = vsub.f32 %v20261_v2, %v23057_v63  ;;  %v23061_v2 = vld [vmem:[#allocation13_spill] sm:$0xff] }
 0xcf3   :  { %23054 = vst [vmem:[#allocation100_spill] sm:$0xff] %v20314_v25  ;;  %14231 = vmatprep.subr.bf16.mxu1 %v14230_v56  ;;  %14271 = vmatprep.subr.bf16.mxu0 %v20184_v35  ;;  %v23058_v56 = vand.u32 4294901760, %v20266_v43 }
 0xcf5   :  { %v20331_v35 = vsub.f32 %v20266_v43, %v23058_v56  ;;  %v23062_v56 = vld [vmem:[#allocation21_spill] sm:$0xff] }
 0xcf6   :  { %14233 = vmatpush3.bf16.msra.mxu1 %v14232_v18  ;;  %14273 = vmatpush3.bf16.msra.mxu0 %v20187_v11  ;;  %v14238_v43 = vpack.c.bf16 %v23062_v56, %v23061_v2  ;;  %v20351_v18 = vld [vmem:[%s21555_s14 + $0x188] sm:$0xff]  ;;  %v23065_v56 = vand.u32 4294901760, %v20286_v14 }
 0xcf7   :  { %14235 = vmatprep.subr.bf16.mxu1 %v14234_v52  ;;  %14275 = vmatprep.subr.bf16.mxu0 %v20191_v5  ;;  %v23063_v52 = vand.u32 4294901760, %v20274_v34  ;;  %v20366_v5 = vsub.f32 %v20279_v32, %v23064_v44  ;;  %v20371_v11 = vld [vmem:[%s21555_s14 + $0x108] sm:$0xff]  ;;  %v23068_v44 = vand.u32 4294901760, %v20304_v3 }
 0xcf8   :  { %v20376_v2 = vsub.f32 %v20286_v14, %v23065_v56  ;;  %v20394_v56 = vsub.f32 %v20309_v19, %v23070_v9  ;;  %v23071_v14 = vand.u32 4294901760, %v20314_v25  ;;  %v23078_v9 = vand.u32 4294901760, %v19764_v37 }
 0xcf9   :  { %v20361_v63 = vsub.f32 %v20274_v34, %v23063_v52  ;;  %v20381_v52 = vsub.f32 %v20291_v24, %v23066_v41  ;;  %v23067_v34 = vand.u32 4294901760, %v20299_v53  ;;  %v23100_v19 = vand.u32 4294901760, %v19775_v28 }
 0xcfa   :  { %v20399_v41 = vsub.f32 %v20314_v25, %v23071_v14  ;;  %14237 = vmatpush3.bf16.msra.mxu1 %v14236_v61  ;;  %14277 = vmatpush3.bf16.msra.mxu0 %v20193_v55  ;;  %v23073_v14 = vand.u32 4294901760, %v20326_v12  ;;  %v23074_v61 = vand.u32 4294901760, %v20331_v35  ;;  %v23105_v28 = vand.u32 4294901760, %v19784_v4  ;;  %v20541_v4 = vld [vmem:[%s21555_s14 + $0x1a0] sm:$0xff] }
 0xcfb   :  { %v20387_v32 = vpack.c.bf16 %v23068_v44, %v23067_v34  ;;  %14239 = vmatprep.subr.bf16.mxu1 %v14238_v43  ;;  %14311 = vmatprep.subr.bf16.mxu0 %v19838_v20  ;;  %v22150_v30 = vand.u32 4294901760, %v20361_v63  ;;  %v22151_v34 = vand.u32 4294901760, %v20376_v2  ;;  %v23076_v43 = vand.u32 4294901760, %v20216_v17 }
 0xcfc   :  { %23072 = vst [vmem:[#allocation59_spill] sm:$0xff] %v20399_v41  ;;  %v20413_v25 = vpack.c.bf16 %v23074_v61, %v23073_v14  ;;  %v23077_v20 = vand.u32 4294901760, %v19762_v58  ;;  %v20431_v14 = vld [vmem:[%s21555_s14 + $0x198] sm:$0xff]  ;;  %v23079_v58 = vand.u32 4294901760, %v20366_v5  ;;  %v23084_v61 = vand.u32 4294901760, %v20351_v18 }
 0xcfd   :  { %23069 = vst [vmem:[#allocation111_spill] sm:$0xff] %v20387_v32  ;;  %8974 = vmatmul.mubr.f32.vlgmr.msra.gmra.mrb[78].mxu0 %v23076_v43  ;;  %v20426_v32 = vld [vmem:[%s21555_s14 + $0x190] sm:$0xff]  ;;  %v23082_v43 = vand.u32 4294901760, %v20346_v15 }
 0xcfe   :  { %23075 = vst [vmem:[#allocation63_spill] sm:$0xff] %v20413_v25  ;;  %v14278_v38 = vpack.c.bf16 %v23078_v9, %v23077_v20  ;;  %v20439_v37 = vpack.c.bf16 %v23079_v58, %v22150_v30  ;;  %v23081_v9 = vpack.c.bf16 %v20113_v13, %v20111_v31  ;;  %14313 = vmatpush3.bf16.msra.mxu0 %v19856_v62  ;;  %v23086_v58 = vand.u32 4294901760, %v20381_v52 }
 0xcff   :  { %v20448_v20 = vsub.f32 %v20346_v15, %v23082_v43  ;;  %v20453_v44 = vsub.f32 %v20351_v18, %v23084_v61  ;;  %9244 = vmatprep.mubr.f32.mxu0 %v20209_v1  ;;  %v23088_v62 = vpack.c.bf16 %v20131_v27, %v20129_v60  ;;  %v23091_v61 = vand.u32 4294901760, %v20371_v11  ;;  %14315 = vmatprep.subr.bf16.mxu0 %v19868_v0 }
 0xd00   :  { %23080 = vst [vmem:[#allocation112_spill] sm:$0xff] %v20439_v37  ;;  %14241 = vmatpush3.bf16.msra.mxu1 %v23081_v9  ;;  %v20459_v30 = vpack.c.bf16 %v23086_v58, %v22151_v34  ;;  %v23089_v9 = vand.u32 4294901760, %v20356_v8  ;;  %v23093_v25 = vand.u32 4294901760, %v20394_v56  ;;  %v23094_v58 = vand.u32 4294901760, %v20399_v41 }
 0xd01   :  { %23083 = vst [vmem:[#allocation115_spill] sm:$0xff] %v20448_v20  ;;  %23085 = vst [vmem:[#allocation66_spill] sm:$0xff] %v20453_v44  ;;  %14243 = vmatprep.subr.bf16.mxu1 %v23088_v62  ;;  %v20473_v37 = vsub.f32 %v20371_v11, %v23091_v61  ;;  %v23096_v61 = vpack.c.bf16 %v20141_v46, %v20139_v39  ;;  %v22157_v62 = vand.u32 4294901760, %v20448_v20 }
 0xd02   :  { %23087 = vst [vmem:[#allocation67_spill] sm:$0xff] %v20459_v30  ;;  %v20468_v43 = vsub.f32 %v20356_v8, %v23089_v9  ;;  %v20479_v34 = vpack.c.bf16 %v23094_v58, %v23093_v25  ;;  %v20487_v9 = vld [vmem:[%s21555_s14 + $0x110] sm:$0xff]  ;;  %14317 = vmatpush3.bf16.msra.mxu0 %v19894_v59  ;;  %v23097_v25 = vand.u32 4294901760, %v19766_v57  ;;  %v23098_v58 = vand.u32 4294901760, %v19769_v10 }
 0xd03   :  { %23092 = vst [vmem:[#allocation119_spill] sm:$0xff] %v20473_v37  ;;  %v22156_v30 = vand.u32 4294901760, %v20453_v44  ;;  %14319 = vmatprep.subr.bf16.mxu0 %v19943_v40  ;;  %v22154_v59 = vand.u32 4294901760, %v20473_v37  ;;  %v23101_v10 = vand.u32 4294901760, %v20426_v32  ;;  %v9479_v57 = vsub.f32 %v20448_v20, %v22157_v62 }
 0xd04   :  { %23090 = vst [vmem:[#allocation116_spill] sm:$0xff] %v20468_v43  ;;  %23095 = vst [vmem:[#allocation69_spill] sm:$0xff] %v20479_v34  ;;  %14245 = vmatpush3.bf16.msra.mxu1 %v23096_v61  ;;  %v14280_v0 = vpack.c.bf16 %v23098_v58, %v23097_v25  ;;  %v23099_v34 = vand.u32 4294901760, %v19772_v49  ;;  %v22155_v61 = vand.u32 4294901760, %v20468_v43  ;;  %v20520_v49 = vld [vmem:[%s21555_s14 + $0x118] sm:$0xff]  ;;  %v23107_v58 = vand.u32 4294901760, %v19854_v48 }
 0xd05   :  { %14279 = vmatprep.subr.bf16.mxu1 %v14278_v38  ;;  %v20510_v25 = vsub.f32 %v20426_v32, %v23101_v10  ;;  %v23103_v38 = vand.u32 4294901760, %v20431_v14  ;;  %v23108_v10 = vand.u32 4294901760, %v19866_v50  ;;  %v9374_v50 = vsub.f32 %v20473_v37, %v22154_v59 }
 0xd06   :  { %v14282_v24 = vpack.c.bf16 %v23100_v19, %v23099_v34  ;;  %v23106_v19 = vand.u32 4294901760, %v19790_v47  ;;  %v20546_v47 = vld [vmem:[%s21555_s14 + $0x1a8] sm:$0xff]  ;;  %14321 = vmatpush3.bf16.msra.mxu0 %v19970_v29  ;;  %v9367_v48 = vsub.f32 %v20468_v43, %v22155_v61  ;;  %v23113_v61 = vand.u32 4294901760, %v19890_v51 }
 0xd07   :  { %23102 = vst [vmem:[#allocation70_spill] sm:$0xff] %v20510_v25  ;;  %v20515_v40 = vsub.f32 %v20431_v14, %v23103_v38  ;;  %8866 = vmatmul.mubr.f32.vlgmr.msra.gmra.mrb[124].mxu1 %v20216_v17  ;;  %v14286_v38 = vpack.c.bf16 %v23108_v10, %v23107_v58  ;;  %v9486_v17 = vsub.f32 %v20453_v44, %v22156_v30  ;;  %v23111_v58 = vand.u32 4294901760, %v19874_v33 }
 0xd08   :  { %v14284_v34 = vpack.c.bf16 %v23106_v19, %v23105_v28  ;;  %14281 = vmatpush3.bf16.msra.mxu1 %v14280_v0  ;;  %9140 = vmatprep.mubr.f32.mxu1 %v20209_v1  ;;  %v23109_v0 = vand.u32 4294901760, %v20487_v9  ;;  %v8283_v19 = vpop.permute.xlu0 %8282  ;;  %v23112_v10 = vand.u32 4294901760, %v19877_v42  ;;  %v23114_v30 = vand.u32 4294901760, %v19903_v26  ;;  %v20585_v26 = vld [vmem:[%s21555_s14 + $0x120] sm:$0xff] }
 0xd09   :  { %23104 = vst [vmem:[#allocation120_spill] sm:$0xff] %v20515_v40  ;;  %14283 = vmatprep.subr.bf16.mxu1 %v14282_v24  ;;  %14323 = vmatprep.subr.bf16.mxu0 %v19993_v54  ;;  %v22158_v62 = vand.u32 4294901760, %v20541_v4  ;;  %v23115_v54 = vand.u32 4294901760, %v19913_v16  ;;  %v23116_v29 = vand.u32 4294901760, %v19928_v21  ;;  %v23117_v33 = vand.u32 4294901760, %v19979_v45 }
 0xd0a   :  { %v20559_v28 = vsub.f32 %v20487_v9, %v23109_v0  ;;  %v14288_v59 = vpack.c.bf16 %v23112_v10, %v23111_v58  ;;  %v14290_v0 = vpack.c.bf16 %v23114_v30, %v23113_v61  ;;  %v23118_v42 = vand.u32 4294901760, %v23046_v23  ;;  %14325 = vmatpush3.bf16.msra.mxu0 %v20023_v7  ;;  %v20597_v23 = vld [vmem:[%s21555_s14 + $0x128] sm:$0xff] }
 0xd0b   :  { %v14292_v24 = vpack.c.bf16 %v23116_v29, %v23115_v54  ;;  %v9480_v10 = vand.u32 4294901760, %v9479_v57  ;;  %v9487_v51 = vand.u32 4294901760, %v9486_v17  ;;  %v9368_v30 = vand.u32 4294901760, %v9367_v48  ;;  %v20602_v57 = vld [vmem:[%s21555_s14 + $0x1b0] sm:$0xff]  ;;  %14327 = vmatprep.subr.bf16.mxu0 %v20074_v36  ;;  %v20621_v36 = vpop.permute.xlu1 %8278 }
 0xd0c   :  { %23110 = vst [vmem:[#allocation75_spill] sm:$0xff] %v20559_v28  ;;  %14285 = vmatpush3.bf16.msra.mxu1 %v14284_v34  ;;  %v14294_v58 = vpack.c.bf16 %v23118_v42, %v23117_v33  ;;  %v9375_v16 = vand.u32 4294901760, %v9374_v50  ;;  %v23119_v61 = vand.u32 4294901760, %v20520_v49  ;;  %v23121_v7 = vand.u32 4294901760, %v23051_v22  ;;  %v23123_v17 = vld [vmem:[#allocation22_spill] sm:$0xff]  ;;  %v23125_v50 = vld [vmem:[#allocation17_spill] sm:$0xff] }
 0xd0d   :  { %14287 = vmatprep.subr.bf16.mxu1 %v14286_v38  ;;  %v23122_v34 = vand.u32 4294901760, %v23052_v6  ;;  %v23124_v48 = vand.u32 4294901760, %v23123_v17  ;;  %v23126_v29 = vand.u32 4294901760, %v23125_v50  ;;  %v23127_v33 = vand.u32 4294901760, %v20510_v25  ;;  %23129 = vst [vmem:[#allocation80_spill] sm:$0xff] %v20621_v36  ;;  %v23130_v22 = vld [vmem:[#allocation18_spill] sm:$0xff] }
 0xd0e   :  { %v20592_v45 = vsub.f32 %v20520_v49, %v23119_v61  ;;  %v23128_v61 = vand.u32 4294901760, %v20515_v40  ;;  %v23131_v1 = vand.u32 4294901760, %v23130_v22  ;;  %v23132_v6 = vld [vmem:[#allocation6_spill] sm:$0xff]  ;;  %v20632_v17 = vsub.f32 %v20541_v4, %v22158_v62 }
 0xd0f   :  { %v14296_v38 = vpack.c.bf16 %v23122_v34, %v23121_v7  ;;  %v20613_v54 = vpack.c.bf16 %v23126_v29, %v23124_v48  ;;  %v9493_v42 = vsub.f32 %v20510_v25, %v23127_v33  ;;  %v23133_v7 = vand.u32 4294901760, %v23132_v6  ;;  %v20643_v33 = vld [vmem:[%s21555_s14 + $0x1b8] sm:$0xff]  ;;  %v23140_v6 = vld [vmem:[#allocation21_spill] sm:$0xff]  ;;  %v23142_v25 = vld [vmem:[#allocation26_spill] sm:$0xff] }
 0xd10   :  { %23120 = vst [vmem:[#allocation78_spill] sm:$0xff] %v20592_v45  ;;  %v9500_v21 = vsub.f32 %v20515_v40, %v23128_v61  ;;  %23134 = vst [vmem:[#allocation84_spill] sm:$0xff] %v20632_v17  ;;  %v23135_v48 = vand.u32 4294901760, %v20546_v47  ;;  %v20645_v61 = vpop.permute.xlu0 %8286  ;;  %14289 = vmatpush3.bf16.msra.mxu1 %v14288_v59  ;;  %v20653_v40 = vpack.c.bf16 %v9487_v51, %v9480_v10  ;;  %v22167_v29 = vand.u32 4294901760, %v20602_v57 }
 0xd11   :  { %v20627_v34 = vpack.c.bf16 %v23133_v7, %v23131_v1  ;;  %23137 = vst [vmem:[#allocation37_spill] sm:$0xff] %v20645_v61  ;;  %v23138_v1 = vld [vmem:[#allocation13_spill] sm:$0xff]  ;;  %v23141_v7 = vand.u32 4294901760, %v23140_v6  ;;  %14329 = vmatpush3.bf16.msra.mxu0 %v23142_v25  ;;  %14291 = vmatprep.subr.bf16.mxu1 %v14290_v0  ;;  %v23143_v37 = vand.u32 4294901760, %v20111_v31  ;;  %v23144_v43 = vand.u32 4294901760, %v20113_v13  ;;  %v23146_v25 = vld [vmem:[#allocation14_spill] sm:$0xff] }
 0xd12   :  { %v20637_v50 = vsub.f32 %v20546_v47, %v23135_v48  ;;  %v23139_v22 = vand.u32 4294901760, %v23138_v1  ;;  %v22168_v48 = vand.u32 4294901760, %v20597_v23  ;;  %v20664_v1 = vpack.c.bf16 %v9375_v16, %v9368_v30  ;;  %14331 = vmatprep.subr.bf16.mxu0 %v23146_v25 }
 0xd13   :  { %v20662_v59 = vpack.c.bf16 %v23144_v43, %v23143_v37  ;;  %v8301_v6 = vsel %vm8300_vm11, %v20621_v36, %v8283_v19  ;;  %v9494_v0 = vand.u32 4294901760, %v9493_v42  ;;  %v9501_v31 = vand.u32 4294901760, %v9500_v21  ;;  %v20679_v37 = vld [vmem:[%s21555_s14 + $0x130] sm:$0xff]  ;;  %v20684_v43 = vld [vmem:[%s21555_s14 + $0x138] sm:$0xff] }
 0xd14   :  { %23136 = vst [vmem:[#allocation87_spill] sm:$0xff] %v20637_v50  ;;  %v20651_v62 = vpack.c.bf16 %v23141_v7, %v23139_v22  ;;  %v23145_v22 = vand.u32 4294901760, %v20559_v28  ;;  %v8303_v30 = vsel %vm8302_vm12, %v8301_v6, %v20645_v61  ;;  %v23147_v21 = vand.u32 4294901760, %v20585_v26  ;;  %v20698_v7 = vld [vmem:[%s21555_s14 + $0x1c0] sm:$0xff]  ;;  %14293 = vmatpush3.bf16.msra.mxu1 %v14292_v24 }
 0xd15   :  { %v23149_v6 = vand.u32 4294901760, %v20129_v60  ;;  %v23150_v25 = vand.u32 4294901760, %v20131_v27  ;;  %v23152_v19 = vand.u32 4294901760, %v20141_v46  ;;  %v20720_v51 = vsub.f32 %v20597_v23, %v22168_v48  ;;  %v23155_v60 = vld [vmem:[#allocation23_spill] sm:$0xff]  ;;  %14295 = vmatprep.subr.bf16.mxu1 %v14294_v58 }
 0xd16   :  { %v20669_v10 = vsub.f32 %v20559_v28, %v23145_v22  ;;  %v20693_v42 = vsub.f32 %v20585_v26, %v23147_v21  ;;  %v20703_v22 = vld [vmem:[%s21555_s14 + $0x1c8] sm:$0xff]  ;;  %v23151_v21 = vand.u32 4294901760, %v20139_v39  ;;  %v20725_v24 = vsub.f32 %v20602_v57, %v22167_v29  ;;  %14333 = vmatpush3.bf16.msra.mxu0 %v23155_v60 }
 0xd17   :  { %v20709_v16 = vpack.c.bf16 %v23150_v25, %v23149_v6  ;;  %23153 = vst [vmem:[#allocation42_spill] sm:$0xff] %v20720_v51  ;;  %v23156_v39 = vand.u32 4294901760, %v20592_v45  ;;  %v20737_v25 = vld [vmem:[%s21555_s14 + $0x140] sm:$0xff]  ;;  %v20744_v58 = vand.u32 4294901760, %v8303_v30  ;;  %v23159_v60 = vand.u32 4294901760, %v20643_v33  ;;  %v20757_v6 = vld [vmem:[%s21555_s14 + $0x1d0] sm:$0xff] }
 0xd18   :  { %23148 = vst [vmem:[#allocation34_spill] sm:$0xff] %v20693_v42  ;;  %v20715_v13 = vpack.c.bf16 %v23152_v19, %v23151_v21  ;;  %23154 = vst [vmem:[#allocation41_spill] sm:$0xff] %v20725_v24  ;;  %v9382_v27 = vand.u32 4294901760, %v20669_v10  ;;  %v20742_v21 = vld [vmem:[%s21555_s14 + $0x148] sm:$0xff]  ;;  %v23158_v10 = vld [vmem:[#allocation27_spill] sm:$0xff]  ;;  %v23162_v61 = vand.u32 4294901760, %v20632_v17  ;;  %14297 = vmatpush3.bf16.msra.mxu1 %v14296_v38 }
 0xd19   :  { %v9388_v46 = vsub.f32 %v20592_v45, %v23156_v39  ;;  %23157 = vst [vmem:[#allocation46_spill] sm:$0xff] %v20742_v21  ;;  %14335 = vmatprep.subr.bf16.mxu0 %v23158_v10  ;;  %v20750_v39 = vsub.f32 %v20643_v33, %v23159_v60  ;;  %23160 = vst [vmem:[#allocation49_spill] sm:$0xff] %v20757_v6  ;;  %v20762_v19 = vld [vmem:[%s21555_s14 + $0x1d8] sm:$0xff]  ;;  %v14378_v10 = vpack.c.bf16 %v9501_v31, %v9494_v0 }
 0xd1a   :  { %23161 = vst [vmem:[#allocation106_spill] sm:$0xff] %v20762_v19  ;;  %v9507_v60 = vsub.f32 %v20632_v17, %v23162_v61  ;;  %v23163_v45 = vand.u32 4294901760, %v20637_v50  ;;  %v23164_v0 = vld [vmem:[#allocation32_spill] sm:$0xff]  ;;  %14299 = vmatprep.subr.bf16.mxu1 %v20613_v54  ;;  %v23165_v61 = vand.u32 4294901760, %v20679_v37  ;;  %v20790_v36 = vsub.f32 %v8303_v30, %v20744_v58 }
 0xd1b   :  { %14337 = vmatpush3.bf16.msra.mxu0 %v23164_v0  ;;  %v23167_v0 = vld [vmem:[#allocation24_spill] sm:$0xff]  ;;  %v23168_v28 = vand.u32 4294901760, %v20698_v7  ;;  %v23169_v48 = vand.u32 4294901760, %v20703_v22  ;;  %v9389_v44 = vand.u32 4294901760, %v9388_v46  ;;  %v23170_v30 = vand.u32 4294901760, %v20693_v42 }
 0xd1c   :  { %v9514_v29 = vsub.f32 %v20637_v50, %v23163_v45  ;;  %v20780_v31 = vsub.f32 %v20679_v37, %v23165_v61  ;;  %v23166_v45 = vand.u32 4294901760, %v20684_v43  ;;  %14339 = vmatprep.subr.bf16.mxu0 %v23167_v0  ;;  %v9508_v50 = vand.u32 4294901760, %v9507_v60  ;;  %14301 = vmatpush3.bf16.msra.mxu1 %v20627_v34 }
 0xd1d   :  { %v20797_v61 = vsub.f32 %v20698_v7, %v23168_v28  ;;  %v9395_v17 = vsub.f32 %v20693_v42, %v23170_v30  ;;  %v23171_v0 = vand.u32 4294901760, %v20720_v51  ;;  %v23172_v28 = vand.u32 4294901760, %v20725_v24  ;;  %14303 = vmatprep.subr.bf16.mxu1 %v20651_v62 }
 0xd1e   :  { %v20785_v38 = vsub.f32 %v20684_v43, %v23166_v45  ;;  %v20802_v45 = vsub.f32 %v20703_v22, %v23169_v48  ;;  %v9515_v20 = vand.u32 4294901760, %v9514_v29  ;;  %v23173_v48 = vand.u32 4294901760, %v20737_v25 }
 0xd1f   :  { %v9402_v54 = vsub.f32 %v20720_v51, %v23171_v0  ;;  %v9521_v41 = vsub.f32 %v20725_v24, %v23172_v28  ;;  %v23174_v29 = vand.u32 4294901760, %v20742_v21  ;;  %14341 = vmatpush3.bf16.msra.mxu0 %v20193_v55  ;;  %v23175_v0 = vand.u32 4294901760, %v20757_v6 }
 0xd20   :  { %v20817_v46 = vsub.f32 %v20737_v25, %v23173_v48  ;;  %v23176_v48 = vand.u32 4294901760, %v20762_v19  ;;  %14375 = vmatprep.subr.bf16.mxu0 %v20653_v40  ;;  %v23177_v62 = vand.u32 4294901760, %v20750_v39  ;;  %v9541_v34 = vand.u32 4294901760, %v20802_v45  ;;  %v23180_v40 = vld [vmem:[#allocation39_spill] sm:$0xff]  ;;  %14305 = vmatpush3.bf16.msra.mxu1 %v20662_v59 }
 0xd21   :  { %v20822_v60 = vsub.f32 %v20742_v21, %v23174_v29  ;;  %v20831_v28 = vsub.f32 %v20757_v6, %v23175_v0  ;;  %v14380_v51 = vpack.c.bf16 %v9389_v44, %v9382_v27  ;;  %v23178_v0 = vand.u32 4294901760, %v20346_v15  ;;  %14307 = vmatprep.subr.bf16.mxu1 %v20709_v16 }
 0xd22   :  { %v20836_v24 = vsub.f32 %v20762_v19, %v23176_v48  ;;  %v9528_v29 = vsub.f32 %v20750_v39, %v23177_v62  ;;  %v23179_v42 = vand.u32 4294901760, %v20351_v18  ;;  %v14382_v48 = vpack.c.bf16 %v9515_v20, %v9508_v50  ;;  %9246 = vmatmul.mubr.f32.vlgmr.msra.gmra.mrb[80].mxu0 %v23180_v40 }
 0xd23   :  { %v9396_v19 = vand.u32 4294901760, %v9395_v17  ;;  %v9403_v55 = vand.u32 4294901760, %v9402_v54  ;;  %v9522_v21 = vand.u32 4294901760, %v9521_v41  ;;  %v9422_v62 = vand.u32 4294901760, %v20817_v46  ;;  %14377 = vmatpush3.bf16.msra.mxu0 %v20664_v1  ;;  %9588 = vmatprep.mubr.f32.mxu0 %v20744_v58 }
 0xd24   :  { %v20849_v6 = vpack.c.bf16 %v23179_v42, %v23178_v0  ;;  %v9429_v30 = vand.u32 4294901760, %v20822_v60  ;;  %v23181_v15 = vand.u32 4294901760, %v20780_v31  ;;  %v23182_v44 = vand.u32 4294901760, %v20785_v38  ;;  %14379 = vmatprep.subr.bf16.mxu0 %v14378_v10  ;;  %14309 = vmatpush3.bf16.msra.mxu1 %v20715_v13 }
 0xd25   :  { %v9548_v17 = vand.u32 4294901760, %v20831_v28  ;;  %v22194_v41 = vand.u32 4294901760, %v20836_v24  ;;  %v23183_v50 = vand.u32 4294901760, %v20790_v36  ;;  %v9529_v1 = vand.u32 4294901760, %v9528_v29 }
 0xd26   :  { %v9409_v18 = vsub.f32 %v20780_v31, %v23181_v15  ;;  %v9416_v20 = vsub.f32 %v20785_v38, %v23182_v44  ;;  %v23184_v42 = vand.u32 4294901760, %v20797_v61  ;;  %v9542_v54 = vsub.f32 %v20802_v45, %v9541_v34  ;;  %14343 = vmatprep.subr.bf16.mxu1 %v20849_v6 }
 0xd27   :  { %v9350_v59 = vsub.f32 %v20790_v36, %v23183_v50  ;;  %v23185_v0 = vand.u32 4294901760, %v20356_v8  ;;  %v23186_v15 = vand.u32 4294901760, %v20371_v11  ;;  %v14384_v16 = vpack.c.bf16 %v9403_v55, %v9396_v19  ;;  %14381 = vmatpush3.bf16.msra.mxu0 %v14380_v51  ;;  %9142 = vmatmul.mubr.f32.vlgmr.msra.gmra.mrb[126].mxu1 %v23180_v40 }
 0xd28   :  { %v9535_v27 = vsub.f32 %v20797_v61, %v23184_v42  ;;  %v23187_v10 = vand.u32 4294901760, %v20426_v32  ;;  %v23188_v29 = vand.u32 4294901760, %v20431_v14  ;;  %v9423_v42 = vsub.f32 %v20817_v46, %v9422_v62  ;;  %14383 = vmatprep.subr.bf16.mxu0 %v14382_v48 }
 0xd29   :  { %v20879_v44 = vpack.c.bf16 %v23186_v15, %v23185_v0  ;;  %v9430_v8 = vsub.f32 %v20822_v60, %v9429_v30  ;;  %v9410_v11 = vand.u32 4294901760, %v9409_v18  ;;  %v9417_v13 = vand.u32 4294901760, %v9416_v20 }
 0xd2a   :  { %v20886_v50 = vpack.c.bf16 %v23188_v29, %v23187_v10  ;;  %v9549_v32 = vsub.f32 %v20831_v28, %v9548_v17  ;;  %v9556_v14 = vsub.f32 %v20836_v24, %v22194_v41  ;;  %v9351_v19 = vand.u32 4294901760, %v9350_v59 }
 0xd2b   :  { %v14386_v55 = vpack.c.bf16 %v9529_v1, %v9522_v21  ;;  %v9536_v0 = vand.u32 4294901760, %v9535_v27  ;;  %v9543_v15 = vand.u32 4294901760, %v9542_v54  ;;  %v23189_v51 = vand.u32 4294901760, %v20487_v9  ;;  %14345 = vmatpush3.bf16.msra.mxu1 %v20879_v44  ;;  %14385 = vmatpush3.bf16.msra.mxu0 %v14384_v16 }
 0xd2c   :  { %v23190_v18 = vand.u32 4294901760, %v20520_v49  ;;  %9352 = vmatprep.mubr.f32.mxu1 %v9351_v19  ;;  %v9424_v10 = vand.u32 4294901760, %v9423_v42  ;;  %v9431_v29 = vand.u32 4294901760, %v9430_v8  ;;  %v23191_v41 = vand.u32 4294901760, %v20299_v53  ;;  %14347 = vmatprep.subr.bf16.mxu1 %v20886_v50 }
 0xd2d   :  { %v23192_v21 = vand.u32 4294901760, %v20304_v3  ;;  %v14388_v9 = vpack.c.bf16 %v9417_v13, %v9410_v11  ;;  %v23193_v49 = vand.u32 4294901760, %v20541_v4  ;;  %v23194_v40 = vand.u32 4294901760, %v20546_v47  ;;  %14387 = vmatprep.subr.bf16.mxu0 %v14386_v55  ;;  %v8275_v13 = vpop.permute.xlu1 %8274 }
 0xd2e   :  { %v20906_v20 = vpack.c.bf16 %v23190_v18, %v23189_v51  ;;  %v9437_v48 = vsub.f32 %v20299_v53, %v23191_v41  ;;  %v9550_v27 = vand.u32 4294901760, %v9549_v32  ;;  %v9557_v54 = vand.u32 4294901760, %v9556_v14 }
 0xd2f   :  { %v9444_v59 = vsub.f32 %v20304_v3, %v23192_v21  ;;  %v20920_v1 = vpack.c.bf16 %v23194_v40, %v23193_v49  ;;  %v14390_v42 = vpack.c.bf16 %v9543_v15, %v9536_v0  ;;  %v23195_v41 = vand.u32 4294901760, %v20326_v12  ;;  %14389 = vmatpush3.bf16.msra.mxu0 %v14388_v9  ;;  %v23205_v49 = vld [vmem:[#allocation35_spill] sm:$0xff] }
 0xd30   :  { %v23196_v19 = vand.u32 4294901760, %v20331_v35  ;;  %v23197_v11 = vand.u32 4294901760, %v20585_v26  ;;  %v23198_v4 = vand.u32 4294901760, %v20597_v23  ;;  %14349 = vmatpush3.bf16.msra.mxu1 %v20906_v20  ;;  %v14392_v32 = vpack.c.bf16 %v9431_v29, %v9424_v10 }
 0xd31   :  { %v9563_v8 = vsub.f32 %v20326_v12, %v23195_v41  ;;  %v23199_v14 = vand.u32 4294901760, %v20602_v57  ;;  %v23200_v55 = vand.u32 4294901760, %v20643_v33  ;;  %v9438_v15 = vand.u32 4294901760, %v9437_v48  ;;  %14351 = vmatprep.subr.bf16.mxu1 %v20920_v1  ;;  %14391 = vmatprep.subr.bf16.mxu0 %v14390_v42 }
 0xd32   :  { %v9570_v16 = vsub.f32 %v20331_v35, %v23196_v19  ;;  %v20932_v47 = vpack.c.bf16 %v23198_v4, %v23197_v11  ;;  %v9445_v51 = vand.u32 4294901760, %v9444_v59  ;;  %v14394_v26 = vpack.c.bf16 %v9557_v54, %v9550_v27 }
 0xd33   :  { %v20939_v0 = vpack.c.bf16 %v23200_v55, %v23199_v14  ;;  %v23201_v23 = vand.u32 4294901760, %v20361_v63  ;;  %v23202_v21 = vand.u32 4294901760, %v20366_v5  ;;  %v9564_v57 = vand.u32 4294901760, %v9563_v8  ;;  %14393 = vmatpush3.bf16.msra.mxu0 %v14392_v32  ;;  %v23211_v14 = vld [vmem:[#allocation59_spill] sm:$0xff] }
 0xd34   :  { %v9571_v29 = vand.u32 4294901760, %v9570_v16  ;;  %v23203_v33 = vand.u32 4294901760, %v20376_v2  ;;  %v23204_v59 = vand.u32 4294901760, %v20381_v52  ;;  %v8297_v40 = vsel %vm8296_vm13, %v23205_v49, %v8275_v13  ;;  %14353 = vmatpush3.bf16.msra.mxu1 %v20932_v47  ;;  %14395 = vmatprep.subr.bf16.mxu0 %v14394_v26  ;;  %v23219_v49 = vld [vmem:[#allocation106_spill] sm:$0xff] }
 0xd35   :  { %v9451_v18 = vsub.f32 %v20361_v63, %v23201_v23  ;;  %v9458_v10 = vsub.f32 %v20366_v5, %v23202_v21  ;;  %v23206_v27 = vand.u32 4294901760, %v20679_v37  ;;  %v23207_v54 = vand.u32 4294901760, %v20684_v43  ;;  %14355 = vmatprep.subr.bf16.mxu1 %v20939_v0 }
 0xd36   :  { %v9577_v48 = vsub.f32 %v20376_v2, %v23203_v33  ;;  %v9584_v9 = vsub.f32 %v20381_v52, %v23204_v59  ;;  %v14396_v41 = vpack.c.bf16 %v9445_v51, %v9438_v15  ;;  %v23208_v8 = vand.u32 4294901760, %v20698_v7  ;;  %v23213_v15 = vld [vmem:[#allocation80_spill] sm:$0xff]  ;;  %v23217_v33 = vld [vmem:[#allocation49_spill] sm:$0xff] }
 0xd37   :  { %v20961_v42 = vpack.c.bf16 %v23207_v54, %v23206_v27  ;;  %v23209_v19 = vand.u32 4294901760, %v20703_v22  ;;  %v9452_v11 = vand.u32 4294901760, %v9451_v18  ;;  %v9459_v4 = vand.u32 4294901760, %v9458_v10  ;;  %v23215_v18 = vld [vmem:[#allocation46_spill] sm:$0xff] }
 0xd38   :  { %v23210_v13 = vand.u32 4294901760, %v20394_v56  ;;  %v23212_v43 = vand.u32 4294901760, %v23211_v14  ;;  %v8299_v51 = vsel %vm8298_vm14, %v8297_v40, %v23213_v15  ;;  %v14398_v7 = vpack.c.bf16 %v9571_v29, %v9564_v57  ;;  %14397 = vmatpush3.bf16.msra.mxu0 %v14396_v41  ;;  %v23223_v40 = vld [vmem:[#allocation36_spill] sm:$0xff] }
 0xd39   :  { %v20967_v16 = vpack.c.bf16 %v23209_v19, %v23208_v8  ;;  %v9578_v22 = vand.u32 4294901760, %v9577_v48  ;;  %v9585_v23 = vand.u32 4294901760, %v9584_v9  ;;  %14357 = vmatpush3.bf16.msra.mxu1 %v20961_v42  ;;  %v23214_v32 = vand.u32 4294901760, %v20737_v25  ;;  %v23221_v48 = vld [vmem:[#allocation44_spill] sm:$0xff] }
 0xd3a   :  { %v9465_v37 = vsub.f32 %v20394_v56, %v23210_v13  ;;  %v9472_v55 = vsub.f32 %v23211_v14, %v23212_v43  ;;  %v23216_v21 = vand.u32 4294901760, %v23215_v18  ;;  %v23218_v59 = vand.u32 4294901760, %v23217_v33  ;;  %14399 = vmatprep.subr.bf16.mxu0 %v14398_v7  ;;  %v23229_v7 = vld [vmem:[#allocation51_spill] sm:$0xff] }
 0xd3b   :  { %v23220_v27 = vand.u32 4294901760, %v23219_v49  ;;  %v20990_v8 = vand.u32 4294901760, %v8299_v51  ;;  %14359 = vmatprep.subr.bf16.mxu1 %v20967_v16  ;;  %v14400_v26 = vpack.c.bf16 %v9459_v4, %v9452_v11  ;;  %v14402_v25 = vpack.c.bf16 %v9585_v23, %v9578_v22  ;;  %v23225_v11 = vld [vmem:[#allocation43_spill] sm:$0xff]  ;;  %v23231_v23 = vld [vmem:[#allocation96_spill] sm:$0xff] }
 0xd3c   :  { %v20982_v10 = vpack.c.bf16 %v23216_v21, %v23214_v32  ;;  %v9466_v57 = vand.u32 4294901760, %v9465_v37  ;;  %v9473_v29 = vand.u32 4294901760, %v9472_v55  ;;  %v23222_v9 = vand.u32 4294901760, %v23221_v48  ;;  %v23227_v37 = vld [vmem:[#allocation47_spill] sm:$0xff] }
 0xd3d   :  { %v20988_v54 = vpack.c.bf16 %v23220_v27, %v23218_v59  ;;  %v23224_v19 = vand.u32 4294901760, %v23223_v40  ;;  %v21001_v43 = vsub.f32 %v8299_v51, %v20990_v8  ;;  %14401 = vmatpush3.bf16.msra.mxu0 %v14400_v26  ;;  %v23226_v4 = vand.u32 4294901760, %v23225_v11  ;;  %v23233_v21 = vld [vmem:[#allocation99_spill] sm:$0xff]  ;;  %v23237_v26 = vld [vmem:[#allocation56_spill] sm:$0xff] }
 0xd3e   :  { %14361 = vmatpush3.bf16.msra.mxu1 %v20982_v10  ;;  %v14404_v41 = vpack.c.bf16 %v9473_v29, %v9466_v57  ;;  %v23228_v55 = vand.u32 4294901760, %v23227_v37  ;;  %14403 = vmatprep.subr.bf16.mxu0 %v14402_v25  ;;  %v23230_v22 = vand.u32 4294901760, %v23229_v7  ;;  %v23232_v32 = vand.u32 4294901760, %v23231_v23  ;;  %v23235_v59 = vld [vmem:[#allocation55_spill] sm:$0xff]  ;;  %v23239_v29 = vld [vmem:[#allocation100_spill] sm:$0xff] }
 0xd3f   :  { %v20998_v13 = vpack.c.bf16 %v23224_v19, %v23222_v9  ;;  %14363 = vmatprep.subr.bf16.mxu1 %v20988_v54  ;;  %v9355_v51 = vand.u32 4294901760, %v21001_v43  ;;  %v23234_v33 = vand.u32 4294901760, %v23233_v21  ;;  %v23236_v49 = vand.u32 4294901760, %v23235_v59  ;;  %v23242_v19 = vld [vmem:[#allocation115_spill] sm:$0xff]  ;;  %v23247_v23 = vld [vmem:[#allocation120_spill] sm:$0xff] }
 0xd40   :  { %v21008_v15 = vpack.c.bf16 %v23228_v55, %v23226_v4  ;;  %v21015_v18 = vpack.c.bf16 %v23232_v32, %v23230_v22  ;;  %v23238_v57 = vand.u32 4294901760, %v23237_v26  ;;  %v23240_v25 = vand.u32 4294901760, %v23239_v29  ;;  %v23244_v4 = vld [vmem:[#allocation116_spill] sm:$0xff]  ;;  %v23245_v37 = vld [vmem:[#allocation119_spill] sm:$0xff]  ;;  %v23246_v22 = vld [vmem:[#allocation70_spill] sm:$0xff] }
 0xd41   :  { %14405 = vmatpush3.bf16.msra.mxu0 %v14404_v41  ;;  %v21024_v27 = vpack.c.bf16 %v23236_v49, %v23234_v33  ;;  %v23241_v9 = vand.u32 4294901760, %v20790_v36  ;;  %v9356_v40 = vsub.f32 %v21001_v43, %v9355_v51  ;;  %v23243_v41 = vld [vmem:[#allocation66_spill] sm:$0xff]  ;;  %v14408_v55 = vpack.c.bf16 %v23245_v37, %v23244_v4  ;;  %v23248_v21 = vld [vmem:[#allocation75_spill] sm:$0xff]  ;;  %v23250_v49 = vld [vmem:[#allocation84_spill] sm:$0xff] }
 0xd42   :  { %14365 = vmatpush3.bf16.msra.mxu1 %v20998_v13  ;;  %14439 = vmatprep.subr.bf16.mxu0 %v20849_v6  ;;  %v21032_v48 = vpack.c.bf16 %v23240_v25, %v23238_v57  ;;  %v14406_v11 = vpack.c.bf16 %v23243_v41, %v23242_v19  ;;  %v14410_v32 = vpack.c.bf16 %v23247_v23, %v23246_v22  ;;  %v23249_v33 = vld [vmem:[#allocation78_spill] sm:$0xff]  ;;  %v23251_v26 = vld [vmem:[#allocation87_spill] sm:$0xff] }
 0xd43   :  { %14367 = vmatprep.subr.bf16.mxu1 %v21008_v15  ;;  %v9357_v7 = vand.u32 4294901760, %v9356_v40  ;;  %v14412_v59 = vpack.c.bf16 %v23249_v33, %v23248_v21  ;;  %v14414_v57 = vpack.c.bf16 %v23251_v26, %v23250_v49  ;;  %v23252_v29 = vld [vmem:[#allocation34_spill] sm:$0xff]  ;;  %v23254_v40 = vld [vmem:[#allocation41_spill] sm:$0xff] }
 0xd44   :  { %9590 = vmatmul.mubr.f32.vlgmr.msra.gmra.mrb[82].mxu0 %v20990_v8  ;;  %v23253_v25 = vld [vmem:[#allocation42_spill] sm:$0xff] }
 0xd45   :  { %14441 = vmatpush3.bf16.msra.mxu0 %v20879_v44  ;;  %9832 = vmatprep.mubr.f32.mxu0 %v23241_v9  ;;  %v14416_v9 = vpack.c.bf16 %v23253_v25, %v23252_v29 }
 0xd46   :  { %14369 = vmatpush3.bf16.msra.mxu1 %v21015_v18  ;;  %14443 = vmatprep.subr.bf16.mxu0 %v20886_v50 }
 0xd47   :  { %14371 = vmatprep.subr.bf16.mxu1 %v21024_v27 }
 0xd49   :  { %14445 = vmatpush3.bf16.msra.mxu0 %v20906_v20 }
 0xd4a   :  { %14373 = vmatpush3.bf16.msra.mxu1 %v21032_v48  ;;  %14447 = vmatprep.subr.bf16.mxu0 %v20920_v1 }
 0xd4b   :  { %14407 = vmatprep.subr.bf16.mxu1 %v14406_v11  ;;  %v14420_v11 = vpack.c.bf16 %v20785_v38, %v20780_v31 }
 0xd4d   :  { %9358 = vmatmul.mubr.f32.vlgmr.msra.gmra.mrb[128].mxu1 %v9357_v7  ;;  %14449 = vmatpush3.bf16.msra.mxu0 %v20932_v47  ;;  %v14424_v7 = vpack.c.bf16 %v20822_v60, %v20817_v46  ;;  %v8369_v46 = vld [vmem:[%s21555_s14 + $0x208] sm:$0xff]  ;;  %v23275_v60 = vmov 0.0|0.0  }
 0xd4e   :  { %14409 = vmatpush3.bf16.msra.mxu1 %v14408_v55  ;;  %9725 = vmatprep.mubr.f32.mxu1 %v20790_v36  ;;  %v14418_v36 = vpack.c.bf16 %v20750_v39, %v23254_v40  ;;  %v14422_v55 = vpack.c.bf16 %v20802_v45, %v20797_v61  ;;  %v8368_v45 = vld [vmem:[%s21555_s14 + $0x200] sm:$0xff] }
 0xd4f   :  { %14411 = vmatprep.subr.bf16.mxu1 %v14410_v32  ;;  %14451 = vmatprep.subr.bf16.mxu0 %v20939_v0  ;;  %v14426_v32 = vpack.c.bf16 %v20836_v24, %v20831_v28  ;;  %v23276_v28 = vld [vmem:[#allocation37_spill] sm:$0xff] }
 0xd51   :  { %14453 = vmatpush3.bf16.msra.mxu0 %v20961_v42 }
 0xd52   :  { %14413 = vmatpush3.bf16.msra.mxu1 %v14412_v59  ;;  %14455 = vmatprep.subr.bf16.mxu0 %v20967_v16  ;;  %v14428_v59 = vpack.c.bf16 %v20304_v3, %v20299_v53  ;;  %v14434_v3 = vpack.c.bf16 %v20381_v52, %v20376_v2  ;;  %v14436_v53 = vpack.c.bf16 %v23211_v14, %v20394_v56  ;;  %v23257_v2 = vand.u32 4294901760, %v23244_v4 }
 0xd53   :  { %14415 = vmatprep.subr.bf16.mxu1 %v14414_v57  ;;  %v14430_v57 = vpack.c.bf16 %v20331_v35, %v20326_v12  ;;  %v23255_v12 = vand.u32 4294901760, %v23242_v19  ;;  %v23256_v35 = vand.u32 4294901760, %v23243_v41  ;;  %v23259_v56 = vand.u32 4294901760, %v23246_v22 }
 0xd54   :  { %v23262_v14 = vand.u32 4294901760, %v23249_v33  ;;  %v23264_v19 = vand.u32 4294901760, %v23251_v26  ;;  %v23267_v4 = vand.u32 4294901760, %v23254_v40  ;;  %v23269_v22 = vand.u32 4294901760, %v20780_v31 }
 0xd55   :  { %14457 = vmatpush3.bf16.msra.mxu0 %v20982_v10  ;;  %v23272_v31 = vand.u32 4294901760, %v20836_v24  ;;  %v23274_v24 = vld [vmem:[#allocation63_spill] sm:$0xff] }
 0xd56   :  { %14417 = vmatpush3.bf16.msra.mxu1 %v14416_v9  ;;  %14459 = vmatprep.subr.bf16.mxu0 %v20988_v54  ;;  %v14432_v9 = vpack.c.bf16 %v20366_v5, %v20361_v63  ;;  %v14470_v5 = vpack.c.bf16 %v23256_v35, %v23255_v12  ;;  %v23258_v63 = vand.u32 4294901760, %v23245_v37 }
 0xd57   :  { %14419 = vmatprep.subr.bf16.mxu1 %v14418_v36 }
 0xd58   :  { %v14472_v52 = vpack.c.bf16 %v23258_v63, %v23257_v2 }
 0xd59   :  { %14461 = vmatpush3.bf16.msra.mxu0 %v20998_v13 }
 0xd5a   :  { %14421 = vmatpush3.bf16.msra.mxu1 %v14420_v11  ;;  %14463 = vmatprep.subr.bf16.mxu0 %v21008_v15 }
 0xd5b   :  { %14423 = vmatprep.subr.bf16.mxu1 %v14422_v55 }
 0xd5d   :  { %14465 = vmatpush3.bf16.msra.mxu0 %v21015_v18 }
 0xd5e   :  { %14425 = vmatpush3.bf16.msra.mxu1 %v14424_v7  ;;  %14467 = vmatprep.subr.bf16.mxu0 %v21024_v27 }
 0xd5f   :  { %14427 = vmatprep.subr.bf16.mxu1 %v14426_v32 }
 0xd61   :  { %14469 = vmatpush3.bf16.msra.mxu0 %v21032_v48 }
 0xd62   :  { %14429 = vmatpush3.bf16.msra.mxu1 %v14428_v59  ;;  %14503 = vmatprep.subr.bf16.mxu0 %v20849_v6  ;;  %v23260_v6 = vand.u32 4294901760, %v23247_v23 }
 0xd63   :  { %14431 = vmatprep.subr.bf16.mxu1 %v14430_v57 }
 0xd64   :  { %9836 = vmatmul.mubr.f32.vlgmr.msra.gmra.mrb[84].mxu0 %v9355_v51 }
 0xd65   :  { %14505 = vmatpush3.bf16.msra.mxu0 %v20879_v44  ;;  %10106 = vmatprep.mubr.f32.mxu0 %v20744_v58  ;;  %v14474_v44 = vpack.c.bf16 %v23260_v6, %v23259_v56 }
 0xd66   :  { %14433 = vmatpush3.bf16.msra.mxu1 %v14432_v9  ;;  %14507 = vmatprep.subr.bf16.mxu0 %v20886_v50  ;;  %v23261_v50 = vand.u32 4294901760, %v23248_v21  ;;  %v23271_v21 = vand.u32 4294901760, %v20797_v61  ;;  %v23273_v61 = vld [vmem:[#allocation111_spill] sm:$0xff] }
 0xd67   :  { %14435 = vmatprep.subr.bf16.mxu1 %v14434_v3  ;;  %v8374_v9 = vld [vmem:[%s21555_s14 + $0x230] sm:$0x7f] }
 0xd68   :  { %v14476_v51 = vpack.c.bf16 %v23262_v14, %v23261_v50 }
 0xd69   :  { %14509 = vmatpush3.bf16.msra.mxu0 %v20906_v20  ;;  %v23263_v20 = vand.u32 4294901760, %v23250_v49 }
 0xd6a   :  { %14437 = vmatpush3.bf16.msra.mxu1 %v14436_v53  ;;  %14511 = vmatprep.subr.bf16.mxu0 %v20920_v1  ;;  %v23265_v1 = vand.u32 4294901760, %v23252_v29  ;;  %v8372_v29 = vld [vmem:[%s21555_s14 + $0x220] sm:$0xff] }
 0xd6b   :  { %14471 = vmatprep.subr.bf16.mxu1 %v14470_v5  ;;  %v14478_v41 = vpack.c.bf16 %v23264_v19, %v23263_v20  ;;  %v10126_v59 = vand.u32 4294901760, %v8372_v29 }
 0xd6d   :  { %9728 = vmatmul.mubr.f32.vlgmr.msra.gmra.mrb[130].mxu1 %v21001_v43  ;;  %14513 = vmatpush3.bf16.msra.mxu0 %v20932_v47  ;;  %v23268_v47 = vand.u32 4294901760, %v20750_v39  ;;  %v14488_v39 = vpack.c.bf16 %v9429_v30, %v9422_v62  ;;  %v10117_v30 = vand.u32 4294901760, %v8369_v46  ;;  %v8383_v62 = vsel %vm8382_vm15, %v23276_v28, 0  ;;  %v11356_v28 = vld [vmem:[%s21556_s15] ss:$0 sm:$0xff] }
 0xd6e   :  { %14473 = vmatpush3.bf16.msra.mxu1 %v14472_v52  ;;  %10002 = vmatprep.mubr.f32.mxu1 %v20744_v58  ;;  %v23266_v58 = vand.u32 4294901760, %v23253_v25  ;;  %v8373_v25 = vld [vmem:[%s21555_s14 + $0x228] sm:$0xff]  ;;  %v21212_v53 = vsub.f32 %v8372_v29, %v10126_v59  ;;  %v8387_v52 = vsel %vm8385_vm0, %v8374_v9, 0 }
 0xd6f   :  { %14475 = vmatprep.subr.bf16.mxu1 %v14474_v44  ;;  %14515 = vmatprep.subr.bf16.mxu0 %v20939_v0  ;;  %v14482_v37 = vpack.c.bf16 %v23268_v47, %v23267_v4  ;;  %v23270_v0 = vand.u32 4294901760, %v20785_v38  ;;  %v14490_v38 = vpack.c.bf16 %v23272_v31, %v9548_v17  ;;  %v23277_v17 = vld [vmem:[#allocation112_spill] sm:$0xff]  ;;  %v10129_v57 = vand.u32 4294901760, %v8373_v25 }
 0xd70   :  { %v14480_v43 = vpack.c.bf16 %v23266_v58, %v23265_v1  ;;  %v10226_v14 = vand.u32 4294901760, %v21212_v53  ;;  %v21234_v19 = vand.u32 4294901760, %v8387_v52 }
 0xd71   :  { %14517 = vmatpush3.bf16.msra.mxu0 %v20961_v42  ;;  %v14484_v23 = vpack.c.bf16 %v23270_v0, %v23269_v22  ;;  %v14486_v42 = vpack.c.bf16 %v9541_v34, %v23271_v21  ;;  %v10114_v34 = vand.u32 4294901760, %v8368_v45  ;;  %v21214_v12 = vsub.f32 %v8373_v25, %v10129_v57 }
 0xd72   :  { %14477 = vmatpush3.bf16.msra.mxu1 %v14476_v51  ;;  %14519 = vmatprep.subr.bf16.mxu0 %v20967_v16  ;;  %v23278_v16 = vld [vmem:[#allocation67_spill] sm:$0xff]  ;;  %v21220_v63 = vpack.c.bf16 %v10129_v57, %v10126_v59  ;;  %v10227_v4 = vsub.f32 %v21212_v53, %v10226_v14 }
 0xd73   :  { %14479 = vmatprep.subr.bf16.mxu1 %v14478_v41  ;;  %v21178_v33 = vpack.c.bf16 %v10117_v30, %v10114_v34  ;;  %v10233_v51 = vand.u32 4294901760, %v21214_v12  ;;  %v21239_v41 = vsub.f32 %v8387_v52, %v21234_v19 }
 0xd74   :  { %v10228_v0 = vand.u32 4294901760, %v10227_v4 }
 0xd75   :  { %14521 = vmatpush3.bf16.msra.mxu0 %v20982_v10  ;;  %v21163_v10 = vsub.f32 %v8368_v45, %v10114_v34  ;;  %v10234_v47 = vsub.f32 %v21214_v12, %v10233_v51  ;;  %v10240_v21 = vand.u32 4294901760, %v21239_v41  ;;  %v14559_v45 = vpack.c.bf16 %v21214_v12, %v21212_v53 }
 0xd76   :  { %14481 = vmatpush3.bf16.msra.mxu1 %v14480_v43  ;;  %14523 = vmatprep.subr.bf16.mxu0 %v20988_v54  ;;  %v21165_v54 = vsub.f32 %v8369_v46, %v10117_v30 }
 0xd77   :  { %14483 = vmatprep.subr.bf16.mxu1 %v14482_v37  ;;  %v10198_v40 = vand.u32 4294901760, %v21163_v10 }
 0xd78   :  { %v10205_v36 = vand.u32 4294901760, %v21165_v54 }
 0xd79   :  { %14525 = vmatpush3.bf16.msra.mxu0 %v20998_v13  ;;  %v8370_v13 = vld [vmem:[%s21555_s14 + $0x210] sm:$0xff] }
 0xd7a   :  { %14485 = vmatpush3.bf16.msra.mxu1 %v14484_v23  ;;  %14527 = vmatprep.subr.bf16.mxu0 %v21008_v15  ;;  %v8371_v15 = vld [vmem:[%s21555_s14 + $0x218] sm:$0xff]  ;;  %v10120_v49 = vand.u32 4294901760, %v8370_v13  ;;  %v10206_v3 = vsub.f32 %v21165_v54, %v10205_v36  ;;  %v10235_v23 = vand.u32 4294901760, %v10234_v47  ;;  %v10642_v47 = vld [vmem:[%s21557_s16 + $0x20] sm:$0xff] }
 0xd7b   :  { %14487 = vmatprep.subr.bf16.mxu1 %v14486_v42  ;;  %v10123_v26 = vand.u32 4294901760, %v8371_v15 }
 0xd7c   :  { %v21189_v11 = vsub.f32 %v8370_v13, %v10120_v49  ;;  %v10207_v6 = vand.u32 4294901760, %v10206_v3  ;;  %v14550_v42 = vpack.c.bf16 %v10235_v23, %v10228_v0 }
 0xd7d   :  { %14529 = vmatpush3.bf16.msra.mxu0 %v21015_v18  ;;  %v23279_v18 = vmov 0.0   ;;  %v21191_v55 = vsub.f32 %v8371_v15, %v10123_v26  ;;  %v21198_v32 = vpack.c.bf16 %v10123_v26, %v10120_v49 }
 0xd7e   :  { %14489 = vmatpush3.bf16.msra.mxu1 %v14488_v39  ;;  %14531 = vmatprep.subr.bf16.mxu0 %v21024_v27  ;;  %v21175_v27 = vand.u32 4294901760, %v8383_v62  ;;  %v10212_v35 = vand.u32 4294901760, %v21189_v11  ;;  %v10241_v39 = vsub.f32 %v21239_v41, %v10240_v21 }
 0xd7f   :  { %14491 = vmatprep.subr.bf16.mxu1 %v14490_v38  ;;  %v10219_v5 = vand.u32 4294901760, %v21191_v55  ;;  %v14553_v38 = vpack.c.bf16 %v21165_v54, %v21163_v10  ;;  %v14577_v54 = vpack.c.bf16 %v10233_v51, %v10226_v14 }
 0xd80   :  { %v21194_v7 = vsub.f32 %v8383_v62, %v21175_v27  ;;  %v10213_v44 = vsub.f32 %v21189_v11, %v10212_v35  ;;  %v10242_v31 = vand.u32 4294901760, %v10241_v39 }
 0xd81   :  { %14533 = vmatpush3.bf16.msra.mxu0 %v21032_v48  ;;  %v23280_v48 = vld [vmem:[#allocation69_spill] sm:$0xff]  ;;  %v10220_v50 = vsub.f32 %v21191_v55, %v10219_v5  ;;  %v14574_v15 = vpack.c.bf16 %v10219_v5, %v10212_v35 }
 0xd82   :  { %14493 = vmatpush3.bf16.msra.mxu1 %v23273_v61  ;;  %14588 = vmatprep.subr.bf16.mxu0 %v23275_v60  ;;  %v10187_v2 = vand.u32 4294901760, %v21194_v7  ;;  %v10214_v58 = vand.u32 4294901760, %v10213_v44  ;;  %v14556_v61 = vpack.c.bf16 %v21191_v55, %v21189_v11  ;;  %v10639_v11 = vld [vmem:[%s21557_s16 + $0x8] sm:$0xff]  ;;  %v10640_v55 = vld [vmem:[%s21557_s16 + $0x10] sm:$0xff] }
 0xd83   :  { %14495 = vmatprep.subr.bf16.mxu1 %v23274_v24  ;;  %v10221_v43 = vand.u32 4294901760, %v10220_v50  ;;  %v10670_v59 = vand.u32 4294901760, %v10640_v55 }
 0xd84   :  { %10108 = vmatmul.mubr.f32.vlgmr.msra.gmra.mrb[86].mxu0 %v20990_v8  ;;  %v10188_v20 = vsub.f32 %v21194_v7, %v10187_v2 }
 0xd85   :  { %12880 = vmatprep.mubr.msk.f32.mxu0 %vm14994_vm7, %v23279_v18  ;;  %v14547_v22 = vpack.c.bf16 %v10221_v43, %v10214_v58  ;;  %v21334_v12 = vsub.f32 %v10640_v55, %v10670_v59 }
 0xd86   :  { %14497 = vmatpush3.bf16.msra.mxu1 %v23277_v17  ;;  %v10189_v37 = vand.u32 4294901760, %v10188_v20 }
 0xd87   :  { %14499 = vmatprep.subr.bf16.mxu1 %v23278_v16  ;;  %v14571_v16 = vpack.c.bf16 %v10205_v36, %v10198_v40  ;;  %v10638_v36 = vld [vmem:[%s21557_s16] sm:$0xff] }
 0xd8a   :  { %14501 = vmatpush3.bf16.msra.mxu1 %v23280_v48 }
 0xd8b   :  { %14534 = vmatprep.subr.bf16.mxu1 %v23275_v60 }
 0xd8d   :  { %10004 = vmatmul.mubr.f32.vlgmr.msra.gmra.mrb[132].mxu1 %v20990_v8  ;;  %v10199_v8 = vsub.f32 %v21163_v10, %v10198_v40 }
 0xd8e   :  { %14536 = vmatpush3.bf16.msra.mxu1 %v21178_v33  ;;  %12770 = vmatprep.mubr.msk.f32.mxu1 %vm14994_vm7, %v23279_v18 }
 0xd8f   :  { %14537 = vmatprep.subr.bf16.mxu1 %v23275_v60  ;;  %v10200_v56 = vand.u32 4294901760, %v10199_v8 }
 0xd91   :  { %v14544_v1 = vpack.c.bf16 %v10207_v6, %v10200_v56 }
 0xd92   :  { %14539 = vmatpush3.bf16.msra.mxu1 %v21198_v32 }
 0xd93   :  { %14540 = vmatprep.subr.bf16.mxu1 %v23275_v60 }
 0xd96   :  { %14542 = vmatpush3.bf16.msra.mxu1 %v21220_v63 }
 0xd97   :  { %12768 = vmatprep.subr.mxu1 %v23279_v18 }
 0xd9a   :  { %12769 = vmatpush3.msra.mxu1 %v21234_v19 }
 0xd9b   :  { %12771 = vmatmul.mubr.f32.vlgmr.msra.gmra.mrb[134].mxu1 %v10189_v37  ;;  %14543 = vmatprep.subr.bf16.mxu1 %v23275_v60  ;;  %v10643_v37 = vld [vmem:[%s21557_s16 + $0x28] sm:$0xff] }
 0xd9c   :  { %14545 = vmatpush3.bf16.msra.mxu1 %v14544_v1  ;;  %12787 = vmatprep.mubr.msk.f32.mxu1 %vm14994_vm7, %v23279_v18  ;;  %v10679_v0 = vand.u32 4294901760, %v10643_v37 }
 0xd9d   :  { %14546 = vmatprep.subr.bf16.mxu1 %v23275_v60 }
 0xda0   :  { %14548 = vmatpush3.bf16.msra.mxu1 %v14547_v22  ;;  %v10676_v22 = vand.u32 4294901760, %v10642_v47 }
 0xda1   :  { %14549 = vmatprep.subr.bf16.mxu1 %v23275_v60 }
 0xda2   :  { %v21350_v23 = vpack.c.bf16 %v10679_v0, %v10676_v22 }
 0xda4   :  { %14551 = vmatpush3.bf16.msra.mxu1 %v14550_v42  ;;  %v10645_v42 = vld [vmem:[%s21557_s16 + $0x38] sm:$0xff] }
 0xda5   :  { %12785 = vmatprep.subr.mxu1 %v23279_v18 }
 0xda8   :  { %12786 = vmatpush3.msra.mxu1 %v10242_v31  ;;  %v10685_v31 = vand.u32 4294901760, %v10645_v42 }
 0xda9   :  { %12788 = vmatmul.mubr.f32.vlgmr.msra.gmra.mrb[134].mxu1 %v21175_v27  ;;  %14552 = vmatprep.subr.bf16.mxu1 %v23275_v60 }
 0xdaa   :  { %14554 = vmatpush3.bf16.msra.mxu1 %v14553_v38  ;;  %12804 = vmatprep.mubr.msk.f32.mxu1 %vm14994_vm7, %v23279_v18 }
 0xdab   :  { %14555 = vmatprep.subr.bf16.mxu1 %v23275_v60 }
 0xdae   :  { %14557 = vmatpush3.bf16.msra.mxu1 %v14556_v61 }
 0xdaf   :  { %14558 = vmatprep.subr.bf16.mxu1 %v23275_v60 }
 0xdb0   :  { %v11919_v46 = vpop.f32.mrb[76].mxu0 }
 0xdb1   :  { %v11920_v24 = vpop.f32.mrb[77].mxu0 }
 0xdb2   :  { %14560 = vmatpush3.bf16.msra.mxu1 %v14559_v45  ;;  %v11921_v34 = vadd.f32 %v11920_v24, %v11919_v46  ;;  %v10646_v46 = vld [vmem:[%s21557_s16 + $0x40] sm:$0xff]  ;;  %v10647_v24 = vld [vmem:[%s21557_s16 + $0x48] sm:$0xff] }
 0xdb3   :  { %12802 = vmatprep.subr.mxu1 %v23279_v18 }
 0xdb6   :  { %12803 = vmatpush3.msra.mxu1 %v21239_v41 }
 0xdb7   :  { %12805 = vmatmul.mubr.f32.vlgmr.msra.gmra.mrb[134].mxu1 %v21194_v7  ;;  %14561 = vmatprep.subr.bf16.mxu1 %v23275_v60  ;;  %v10664_v7 = vand.u32 4294901760, %v10638_v36 }
 0xdb8   :  { %14563 = vmatpush3.bf16.msra.mxu1 %v21178_v33  ;;  %12821 = vmatprep.mubr.msk.f32.mxu1 %vm14994_vm7, %v23279_v18  ;;  %v11884_v30 = vpop.f32.mrb[122].mxu1 }
 0xdb9   :  { %14564 = vmatprep.subr.bf16.mxu1 %v23275_v60  ;;  %v11885_v62 = vpop.f32.mrb[123].mxu1  ;;  %v21330_v3 = vsub.f32 %v10638_v36, %v10664_v7 }
 0xdba   :  { %v11886_v17 = vadd.f32 %v11885_v62, %v11884_v30  ;;  %v10688_v30 = vand.u32 4294901760, %v10646_v46 }
 0xdbc   :  { %14566 = vmatpush3.bf16.msra.mxu1 %v21198_v32  ;;  %v8498_v13 = vadd.f32 %v11886_v17, %v11356_v28  ;;  %v10691_v28 = vand.u32 4294901760, %v10647_v24  ;;  %v10752_v17 = vand.u32 4294901760, %v21330_v3 }
 0xdbd   :  { %14567 = vmatprep.subr.bf16.mxu1 %v23275_v60 }
 0xdbe   :  { %v8730_v10 = vadd.f32 %v11921_v34, %v8498_v13  ;;  %v21370_v62 = vpack.c.bf16 %v10691_v28, %v10688_v30  ;;  %v21374_v13 = vsub.f32 %v10642_v47, %v10676_v22 }
 0xdc0   :  { %14569 = vmatpush3.bf16.msra.mxu1 %v21220_v63 }
 0xdc1   :  { %12819 = vmatprep.subr.mxu1 %v23279_v18 }
 0xdc4   :  { %12820 = vmatpush3.msra.mxu1 %v21234_v19 }
 0xdc5   :  { %12822 = vmatmul.mubr.f32.vlgmr.msra.gmra.mrb[134].mxu1 %v10187_v2  ;;  %14570 = vmatprep.subr.bf16.mxu1 %v23275_v60 }
 0xdc6   :  { %14572 = vmatpush3.bf16.msra.mxu1 %v14571_v16  ;;  %12838 = vmatprep.mubr.msk.f32.mxu1 %vm14994_vm7, %v23279_v18 }
 0xdc7   :  { %14573 = vmatprep.subr.bf16.mxu1 %v23275_v60 }
 0xdca   :  { %14575 = vmatpush3.bf16.msra.mxu1 %v14574_v15  ;;  %v21376_v15 = vsub.f32 %v10643_v37, %v10679_v0 }
 0xdcb   :  { %14576 = vmatprep.subr.bf16.mxu1 %v23275_v60 }
 0xdce   :  { %14578 = vmatpush3.bf16.msra.mxu1 %v14577_v54  ;;  %v21380_v54 = vsub.f32 %v10645_v42, %v10685_v31 }
 0xdcf   :  { %12836 = vmatprep.subr.mxu1 %v23279_v18 }
 0xdd0   :  { %v11989_v48 = vpop.f32.mrb[78].mxu0 }
 0xdd1   :  { %v11990_v49 = vpop.f32.mrb[79].mxu0 }
 0xdd2   :  { %12837 = vmatpush3.msra.mxu1 %v10240_v21  ;;  %v11991_v26 = vadd.f32 %v11990_v49, %v11989_v48  ;;  %v10644_v21 = vld [vmem:[%s21557_s16 + $0x30] sm:$0xff]  ;;  %v21386_v49 = vsub.f32 %v10646_v46, %v10688_v30 }
 0xdd3   :  { %12839 = vmatmul.mubr.f32.vlgmr.msra.gmra.mrb[134].mxu1 %v21175_v27  ;;  %14579 = vmatprep.subr.bf16.mxu1 %v23275_v60  ;;  %v10682_v39 = vand.u32 4294901760, %v10644_v21  ;;  %v10648_v48 = vld [vmem:[%s21557_s16 + $0x50] sm:$0xf] }
 0xdd4   :  { %14581 = vmatpush3.bf16.msra.mxu1 %v21178_v33  ;;  %12855 = vmatprep.mubr.msk.f32.mxu1 %vm14994_vm7, %v23279_v18  ;;  %v10808_v0 = vand.u32 4294901760, %v21386_v49 }
 0xdd5   :  { %14582 = vmatprep.subr.bf16.mxu1 %v23275_v60  ;;  %v21360_v61 = vpack.c.bf16 %v10685_v31, %v10682_v39 }
 0xdd8   :  { %14584 = vmatpush3.bf16.msra.mxu1 %v21198_v32  ;;  %v10667_v32 = vand.u32 4294901760, %v10639_v11 }
 0xdd9   :  { %14585 = vmatprep.subr.bf16.mxu1 %v23275_v60 }
 0xdda   :  { %v11954_v29 = vpop.f32.mrb[124].mxu1  ;;  %v21328_v8 = vpack.c.bf16 %v10667_v32, %v10664_v7  ;;  %v21332_v53 = vsub.f32 %v10639_v11, %v10667_v32  ;;  %v10766_v7 = vand.u32 4294901760, %v21334_v12 }
 0xddb   :  { %v11955_v33 = vpop.f32.mrb[125].mxu1 }
 0xddc   :  { %14587 = vmatpush3.bf16.msra.mxu1 %v21220_v63  ;;  %v11956_v25 = vadd.f32 %v11955_v33, %v11954_v29  ;;  %14590 = vmatpush3.bf16.msra.mxu0 %v21328_v8  ;;  %v10759_v16 = vand.u32 4294901760, %v21332_v53  ;;  %v21391_v29 = vsel %vm2698_vm9, %v10648_v48, 0  ;;  %v10753_v33 = vsub.f32 %v21330_v3, %v10752_v17 }
 0xddd   :  { %12853 = vmatprep.subr.mxu1 %v23279_v18  ;;  %14591 = vmatprep.subr.bf16.mxu0 %v23275_v60  ;;  %vm10656_vm9 = vcmask 687104  }
 0xdde   :  { %v8868_v40 = vadd.f32 %v11956_v25, %v8730_v10  ;;  %v21378_v10 = vsub.f32 %v10644_v21, %v10682_v39  ;;  %v10760_v36 = vsub.f32 %v21332_v53, %v10759_v16  ;;  %v10754_v55 = vand.u32 4294901760, %v10753_v33 }
 0xddf   :  { %v10809_v39 = vsub.f32 %v21386_v49, %v10808_v0 }
 0xde0   :  { %12854 = vmatpush3.msra.mxu1 %v21234_v19  ;;  %v8976_v57 = vadd.f32 %v11991_v26, %v8868_v40  ;;  %v21388_v26 = vsub.f32 %v10647_v24, %v10691_v28  ;;  %v21398_v40 = vand.u32 4294901760, %v21391_v29 }
 0xde1   :  { %12856 = vmatmul.mubr.f32.vlgmr.msra.gmra.mrb[134].mxu1 %v21175_v27  ;;  %v10641_v27 = vld [vmem:[%s21557_s16 + $0x18] sm:$0xff] }
 0xde2   :  { %v10673_v9 = vand.u32 4294901760, %v10641_v27  ;;  %v10815_v21 = vand.u32 4294901760, %v21388_v26 }
 0xde4   :  { %v21336_v35 = vsub.f32 %v10641_v27, %v10673_v9  ;;  %v21339_v5 = vpack.c.bf16 %v10673_v9, %v10670_v59  ;;  %v10761_v59 = vand.u32 4294901760, %v10760_v36  ;;  %v10816_v31 = vsub.f32 %v21388_v26, %v10815_v21 }
 0xde6   :  { %14593 = vmatpush3.bf16.msra.mxu0 %v21339_v5  ;;  %v10773_v32 = vand.u32 4294901760, %v21336_v35  ;;  %v14622_v48 = vpack.c.bf16 %v21336_v35, %v21334_v12 }
 0xde7   :  { %14594 = vmatprep.subr.bf16.mxu0 %v23275_v60 }
 0xde8   :  { %v10774_v9 = vsub.f32 %v21336_v35, %v10773_v32 }
 0xdea   :  { %14596 = vmatpush3.bf16.msra.mxu0 %v21350_v23 }
 0xdeb   :  { %14597 = vmatprep.subr.bf16.mxu0 %v23275_v60 }
 0xdee   :  { %14599 = vmatpush3.bf16.msra.mxu0 %v21360_v61 }
 0xdef   :  { %14600 = vmatprep.subr.bf16.mxu0 %v23275_v60 }
 0xdf2   :  { %14602 = vmatpush3.bf16.msra.mxu0 %v21370_v62 }
 0xdf3   :  { %12878 = vmatprep.subr.mxu0 %v23279_v18 }
 0xdf5   :  { %v12059_v2 = vpop.f32.mrb[80].mxu0 }
 0xdf6   :  { %v12060_v63 = vpop.f32.mrb[81].mxu0  ;;  %12879 = vmatpush3.msra.mxu0 %v21398_v40 }
 0xdf7   :  { %v12061_v52 = vadd.f32 %v12060_v63, %v12059_v2  ;;  %14603 = vmatprep.subr.bf16.mxu0 %v23275_v60  ;;  %v14604_v63 = vpack.c.bf16 %v10761_v59, %v10754_v55 }
 0xdfa   :  { %v12024_v56 = vpop.f32.mrb[126].mxu1 }
 0xdfb   :  { %v12025_v6 = vpop.f32.mrb[127].mxu1 }
 0xdfc   :  { %v12026_v44 = vadd.f32 %v12025_v6, %v12024_v56  ;;  %v10775_v56 = vand.u32 4294901760, %v10774_v9  ;;  %v10780_v6 = vand.u32 4294901760, %v21374_v13 }
 0xdfe   :  { %v9144_v50 = vadd.f32 %v12026_v44, %v8976_v57  ;;  %v10767_v57 = vsub.f32 %v21334_v12, %v10766_v7  ;;  %v10787_v44 = vand.u32 4294901760, %v21376_v15  ;;  %v14661_v12 = vpack.c.bf16 %v10815_v21, %v10808_v0 }
 0xe00   :  { %v9248_v14 = vadd.f32 %v12061_v52, %v9144_v50  ;;  %v10768_v52 = vand.u32 4294901760, %v10767_v57  ;;  %v14631_v57 = vpack.c.bf16 %v21388_v26, %v21386_v49 }
 0xe17   :  { %v12129_v51 = vpop.f32.mrb[82].mxu0 }
 0xe18   :  { %v12130_v20 = vpop.f32.mrb[83].mxu0 }
 0xe19   :  { %v12131_v19 = vadd.f32 %v12130_v20, %v12129_v51  ;;  %v10781_v51 = vsub.f32 %v21374_v13, %v10780_v6  ;;  %v10788_v20 = vsub.f32 %v21376_v15, %v10787_v44 }
 0xe20   :  { %v12094_v41 = vpop.f32.mrb[128].mxu1 }
 0xe21   :  { %v12095_v1 = vpop.f32.mrb[129].mxu1 }
 0xe22   :  { %v12096_v58 = vadd.f32 %v12095_v1, %v12094_v41  ;;  %v10789_v41 = vand.u32 4294901760, %v10788_v20  ;;  %v10794_v1 = vand.u32 4294901760, %v21378_v10 }
 0xe24   :  { %v9360_v43 = vadd.f32 %v12096_v58, %v9248_v14  ;;  %v14607_v14 = vpack.c.bf16 %v10775_v56, %v10768_v52  ;;  %v10801_v58 = vand.u32 4294901760, %v21380_v54 }
 0xe26   :  { %v9592_v4 = vadd.f32 %v12131_v19, %v9360_v43  ;;  %v10782_v19 = vand.u32 4294901760, %v10781_v51  ;;  %v10802_v47 = vsub.f32 %v21380_v54, %v10801_v58 }
 0xe28   :  { %v14610_v43 = vpack.c.bf16 %v10789_v41, %v10782_v19  ;;  %v10803_v22 = vand.u32 4294901760, %v10802_v47  ;;  %v10821_v47 = vsub.f32 %v21391_v29, %v21398_v40  ;;  %v14649_v29 = vpack.c.bf16 %v10759_v16, %v10752_v17 }
 0xe37   :  { %v12199_v38 = vpop.f32.mrb[84].mxu0 }
 0xe38   :  { %v12200_v45 = vpop.f32.mrb[85].mxu0 }
 0xe39   :  { %v12201_v34 = vadd.f32 %v12200_v45, %v12199_v38  ;;  %v10810_v38 = vand.u32 4294901760, %v10809_v39  ;;  %v10817_v45 = vand.u32 4294901760, %v10816_v31 }
 0xe3b   :  { %v14616_v46 = vpack.c.bf16 %v10817_v45, %v10810_v38 }
 0xe40   :  { %v12164_v25 = vpop.f32.mrb[130].mxu1 }
 0xe41   :  { %v12165_v11 = vpop.f32.mrb[131].mxu1 }
 0xe42   :  { %v12166_v27 = vadd.f32 %v12165_v11, %v12164_v25  ;;  %v14625_v25 = vpack.c.bf16 %v21376_v15, %v21374_v13 }
 0xe44   :  { %v9730_v2 = vadd.f32 %v12166_v27, %v9592_v4  ;;  %v10795_v4 = vsub.f32 %v21378_v10, %v10794_v1  ;;  %v14628_v27 = vpack.c.bf16 %v21380_v54, %v21378_v10 }
 0xe46   :  { %v9838_v50 = vadd.f32 %v12201_v34, %v9730_v2  ;;  %v10796_v37 = vand.u32 4294901760, %v10795_v4  ;;  %v14619_v34 = vpack.c.bf16 %v21332_v53, %v21330_v3  ;;  %v14655_v3 = vpack.c.bf16 %v10787_v44, %v10780_v6 }
 0xe47   :  { %v14658_v53 = vpack.c.bf16 %v10801_v58, %v10794_v1 }
 0xe48   :  { %v14613_v42 = vpack.c.bf16 %v10803_v22, %v10796_v37  ;;  %v10822_v37 = vand.u32 4294901760, %v10821_v47 }
 0xe4a   :  { %v10823_v22 = vsub.f32 %v10821_v47, %v10822_v37 }
 0xe57   :  { %v12269_v24 = vpop.f32.mrb[86].mxu0 }
 0xe58   :  { %v12270_v30 = vpop.f32.mrb[87].mxu0 }
 0xe59   :  { %v12271_v28 = vadd.f32 %v12270_v30, %v12269_v24 }
 0xe60   :  { %v12234_v33 = vpop.f32.mrb[132].mxu1 }
 0xe61   :  { %v12235_v36 = vpop.f32.mrb[133].mxu1 }
 0xe62   :  { %v12236_v11 = vadd.f32 %v12235_v36, %v12234_v33 }
 0xe64   :  { %v10006_v55 = vadd.f32 %v12236_v11, %v9838_v50 }
 0xe66   :  { %v10110_v59 = vadd.f32 %v12271_v28, %v10006_v55 }
 0xeb4   :  { %v10633_v9 = vpop.f32.mrb[134].mxu1 }
 0xeb5   :  { %v14711_v2 = vadd.f32 %v10633_v9, %v10110_v59  ;;  %v12857_v52 = vpop.f32.mrb[135].mxu1 }
 0xeb7   :  { %v10637_v56 = vmax.f32 %v14711_v2, 0.0 }
 0xeb9   :  { %v10658_v51 = vsel %vm10656_vm9, %v10637_v56, 0 }
 0xeba   :  { %v21447_v20 = vand.u32 4294901760, %v10658_v51 }
 0xebc   :  { %v10740_v19 = vsub.f32 %v10658_v51, %v21447_v20 }
 0xebe   :  { %v10741_v41 = vand.u32 4294901760, %v10740_v19 }
 0xec0   :  { %v10742_v4 = vsub.f32 %v10740_v19, %v10741_v41 }
 0xec2   :  { %v10743_v50 = vand.u32 4294901760, %v10742_v4 }
 0xec4   :  { %12881 = vmatmul.mubr.f32.vlgmr.msra.gmra.mrb[88].mxu0 %v10743_v50 }
 0xec5   :  { %14605 = vmatpush3.bf16.msra.mxu0 %v14604_v63  ;;  %12905 = vmatprep.mubr.msk.f32.mxu0 %vm14994_vm7, %v23279_v18  ;;  %v10824_v63 = vand.u32 4294901760, %v10823_v22 }
 0xec6   :  { %14606 = vmatprep.subr.bf16.mxu0 %v23275_v60 }
 0xec9   :  { %14608 = vmatpush3.bf16.msra.mxu0 %v14607_v14  ;;  %v14652_v14 = vpack.c.bf16 %v10773_v32, %v10766_v7 }
 0xeca   :  { %14609 = vmatprep.subr.bf16.mxu0 %v23275_v60 }
 0xecd   :  { %14611 = vmatpush3.bf16.msra.mxu0 %v14610_v43 }
 0xece   :  { %14612 = vmatprep.subr.bf16.mxu0 %v23275_v60 }
 0xed1   :  { %14614 = vmatpush3.bf16.msra.mxu0 %v14613_v42 }
 0xed2   :  { %14615 = vmatprep.subr.bf16.mxu0 %v23275_v60 }
 0xed5   :  { %14617 = vmatpush3.bf16.msra.mxu0 %v14616_v46 }
 0xed6   :  { %12903 = vmatprep.subr.mxu0 %v23279_v18 }
 0xed9   :  { %12904 = vmatpush3.msra.mxu0 %v10824_v63 }
 0xeda   :  { %12906 = vmatmul.mubr.f32.vlgmr.msra.gmra.mrb[88].mxu0 %v21447_v20  ;;  %14618 = vmatprep.subr.bf16.mxu0 %v23275_v60 }
 0xedb   :  { %14620 = vmatpush3.bf16.msra.mxu0 %v14619_v34  ;;  %12930 = vmatprep.mubr.msk.f32.mxu0 %vm14994_vm7, %v23279_v18 }
 0xedc   :  { %14621 = vmatprep.subr.bf16.mxu0 %v23275_v60 }
 0xedf   :  { %14623 = vmatpush3.bf16.msra.mxu0 %v14622_v48 }
 0xee0   :  { %14624 = vmatprep.subr.bf16.mxu0 %v23275_v60 }
 0xee3   :  { %14626 = vmatpush3.bf16.msra.mxu0 %v14625_v25 }
 0xee4   :  { %14627 = vmatprep.subr.bf16.mxu0 %v23275_v60 }
 0xee7   :  { %14629 = vmatpush3.bf16.msra.mxu0 %v14628_v27 }
 0xee8   :  { %14630 = vmatprep.subr.bf16.mxu0 %v23275_v60 }
 0xeeb   :  { %14632 = vmatpush3.bf16.msra.mxu0 %v14631_v57 }
 0xeec   :  { %12928 = vmatprep.subr.mxu0 %v23279_v18 }
 0xeef   :  { %12929 = vmatpush3.msra.mxu0 %v10821_v47 }
 0xef0   :  { %12931 = vmatmul.mubr.f32.vlgmr.msra.gmra.mrb[88].mxu0 %v10740_v19  ;;  %14633 = vmatprep.subr.bf16.mxu0 %v23275_v60 }
 0xef1   :  { %14635 = vmatpush3.bf16.msra.mxu0 %v21328_v8  ;;  %12955 = vmatprep.mubr.msk.f32.mxu0 %vm14994_vm7, %v23279_v18 }
 0xef2   :  { %14636 = vmatprep.subr.bf16.mxu0 %v23275_v60 }
 0xef5   :  { %14638 = vmatpush3.bf16.msra.mxu0 %v21339_v5 }
 0xef6   :  { %14639 = vmatprep.subr.bf16.mxu0 %v23275_v60 }
 0xef9   :  { %14641 = vmatpush3.bf16.msra.mxu0 %v21350_v23 }
 0xefa   :  { %14642 = vmatprep.subr.bf16.mxu0 %v23275_v60 }
 0xefd   :  { %14644 = vmatpush3.bf16.msra.mxu0 %v21360_v61 }
 0xefe   :  { %14645 = vmatprep.subr.bf16.mxu0 %v23275_v60 }
 0xf01   :  { %14647 = vmatpush3.bf16.msra.mxu0 %v21370_v62 }
 0xf02   :  { %12953 = vmatprep.subr.mxu0 %v23279_v18 }
 0xf05   :  { %12954 = vmatpush3.msra.mxu0 %v21398_v40 }
 0xf06   :  { %12956 = vmatmul.mubr.f32.vlgmr.msra.gmra.mrb[88].mxu0 %v10741_v41  ;;  %14648 = vmatprep.subr.bf16.mxu0 %v23275_v60 }
 0xf07   :  { %14650 = vmatpush3.bf16.msra.mxu0 %v14649_v29  ;;  %12980 = vmatprep.mubr.msk.f32.mxu0 %vm14994_vm7, %v23279_v18 }
 0xf08   :  { %14651 = vmatprep.subr.bf16.mxu0 %v23275_v60 }
 0xf0b   :  { %14653 = vmatpush3.bf16.msra.mxu0 %v14652_v14 }
 0xf0c   :  { %14654 = vmatprep.subr.bf16.mxu0 %v23275_v60 }
 0xf0f   :  { %14656 = vmatpush3.bf16.msra.mxu0 %v14655_v3 }
 0xf10   :  { %14657 = vmatprep.subr.bf16.mxu0 %v23275_v60 }
 0xf13   :  { %14659 = vmatpush3.bf16.msra.mxu0 %v14658_v53 }
 0xf14   :  { %14660 = vmatprep.subr.bf16.mxu0 %v23275_v60 }
 0xf17   :  { %14662 = vmatpush3.bf16.msra.mxu0 %v14661_v12 }
 0xf18   :  { %12978 = vmatprep.subr.mxu0 %v23279_v18 }
 0xf1b   :  { %12979 = vmatpush3.msra.mxu0 %v10822_v37 }
 0xf1c   :  { %12981 = vmatmul.mubr.f32.vlgmr.msra.gmra.mrb[88].mxu0 %v21447_v20  ;;  %14663 = vmatprep.subr.bf16.mxu0 %v23275_v60 }
 0xf1d   :  { %14665 = vmatpush3.bf16.msra.mxu0 %v21328_v8  ;;  %13005 = vmatprep.mubr.msk.f32.mxu0 %vm14994_vm7, %v23279_v18  ;;  %v11357_v8 = vld [vmem:[%s21558_s17] ss:$0 sm:$0xff] }
 0xf1e   :  { %14666 = vmatprep.subr.bf16.mxu0 %v23275_v60 }
 0xf21   :  { %14668 = vmatpush3.bf16.msra.mxu0 %v21339_v5 }
 0xf22   :  { %14669 = vmatprep.subr.bf16.mxu0 %v23275_v60 }
 0xf25   :  { %14671 = vmatpush3.bf16.msra.mxu0 %v21350_v23 }
 0xf26   :  { %14672 = vmatprep.subr.bf16.mxu0 %v23275_v60 }
 0xf29   :  { %14674 = vmatpush3.bf16.msra.mxu0 %v21360_v61 }
 0xf2a   :  { %14675 = vmatprep.subr.bf16.mxu0 %v23275_v60 }
 0xf2d   :  { %14677 = vmatpush3.bf16.msra.mxu0 %v21370_v62 }
 0xf2e   :  { %13003 = vmatprep.subr.mxu0 %v23279_v18 }
 0xf31   :  { %13004 = vmatpush3.msra.mxu0 %v21398_v40 }
 0xf32   :  { %13006 = vmatmul.mubr.f32.vlgmr.msra.gmra.mrb[88].mxu0 %v21447_v20 }
0x1005   :  { %v11235_v35 = vpop.f32.mrb[88].mxu0 }
0x1006   :  { %v14712_v5 = vadd.f32 %v11357_v8, %v11235_v35  ;;  %v13007_v23 = vpop.f32.mrb[89].mxu0 }
0x1008   :  { %11240 = vst.msk [vmem:[#allocation2] sm:$0x3] %vm11239_vm1, %v14712_v5 }
0x1009   :  { %14969 = shalt.err (!%p14966_p4)
}
0x100a   :  { %s14970_s15 = scalar_lea.hbm %s21559_s18, 32 }
0x100b   :  { %p14971_p5 = scmp.ne.s32.totalorder %s21559_s18, %s14970_s15  ;;  %p14974_p6 = scmp.lt.u32.totalorder %s14970_s15, %s21559_s18 }
0x100d   :  { %p14976_p7 = pnand %p14974_p6, %p14971_p5 }
0x100f   :  { %14979 = shalt.err (!%p14976_p7)
}
0x1010   :  { %11250 = dma.vmem_to_hbm [thread:$0]  %s11248_s1, 32, %s21559_s18, [#allocation3]  }
0x1011   :  { %14980 = dma.done.wait [#allocation3], 32  }
0x1012   :  { %14981 = vsyncadd [#allocation3], 4294967264 }
0x1013   :  { %11254 = vsyncpa [#allocation3], 1 }

</bundles_post_ra>
